<compile_context>
chip_gen: v5e
topology: v5e:2x2
jax: 0.10.0
libtpu: 0.0.40
codegen_flags: <defaults>
</compile_context>

<pallas_src>
import jax
import jax.numpy as jnp
from jax.experimental import pallas as pl
from jax.experimental.pallas import tpu as pltpu


def _gru_classifier_kernel(x_ref, len_ref, wih_ref, bih_ref, whh_ref, bhn_ref,
                           wlin_ref, blin_ref, out_ref):
    SBP, _ = x_ref.shape
    BP = len_ref.shape[0]
    S = SBP // BP
    HP2 = whh_ref.shape[0]          # 2 * HP  ([h_fwd | h_bwd], lane aligned)
    HP = HP2 // 2

    # ---- Hoisted input projection: ONE MXU matmul for both directions, all gates
    # and all timesteps.  x_comb rows hold [x(t) | x(S-1-t)]; wih is the (2E, 6HP)
    # block-diagonal of the two directions' input weights; bih already contains the
    # folded r/z recurrent biases.
    xp = jnp.dot(x_ref[...], wih_ref[...],
                 preferred_element_type=jnp.float32) + bih_ref[...]        # (S*BP, 6HP)

    lens = len_ref[...]                                                    # (BP, 1) int32
    whh = whh_ref[...]                                                     # (2HP, 6HP) bf16
    bhn = bhn_ref[...]                                                     # (1, 2HP) f32

    # ---- Hoisted keep masks (pack_padded_sequence): fwd half of the state keeps
    # updating while i < len, bwd half while (S-1-i) < len.  Precomputed here, off
    # the serial recurrence chain, instead of per-step broadcast-compares.
    col_is_fwd = jax.lax.broadcasted_iota(jnp.int32, (1, HP2), 1) < HP     # (1, 2HP)
    keep = []
    for i in range(S):
        thr = jnp.where(col_is_fwd, jnp.int32(i), jnp.int32(S - 1 - i))    # (1, 2HP)
        keep.append(lens > thr)                                            # (BP, 2HP)

    # ---- Recurrence: gate-major columns [r_f|r_b|z_f|z_b|n_f|n_b], every slice is
    # 128-lane aligned, ONE block-diagonal dot per step covers both directions.
    h = jnp.zeros((BP, HP2), jnp.float32)                                  # [h_fwd | h_bwd]
    for i in range(S):  # S small & static -> full unroll (cross-step LLO visibility)
        xp_t = xp[i * BP:(i + 1) * BP, :]                                  # (BP, 6HP)
        hp = jnp.dot(h.astype(jnp.bfloat16), whh,
                     preferred_element_type=jnp.float32)                   # (BP, 6HP)
        rz = jax.nn.sigmoid(xp_t[:, :2 * HP2] + hp[:, :2 * HP2])           # r|z, both dirs
        r = rz[:, :HP2]
        z = rz[:, HP2:]
        # b_hn must stay inside r * (W_hn h + b_hn) (PyTorch GRU definition).
        n = jnp.tanh(xp_t[:, 2 * HP2:] + r * (hp[:, 2 * HP2:] + bhn))
        h_new = (1.0 - z) * n + z * h
        h = jnp.where(keep[i], h_new, h)                                   # frozen past len

    # ---- Classifier + log_softmax (state is already [h_fwd | h_bwd]). ----
    logits = jnp.dot(h.astype(jnp.bfloat16), wlin_ref[...],
                     preferred_element_type=jnp.float32) + blin_ref[...]   # (BP, CP)
    # Stable log_softmax; padded classes carry a -1e30 bias so exp() underflows to 0.
    mx = jnp.max(logits, axis=-1, keepdims=True)
    lse = mx + jnp.log(jnp.sum(jnp.exp(logits - mx), axis=-1, keepdims=True))
    out_ref[...] = logits - lse


def _full_spec(shape):
    nd = len(shape)
    return pl.BlockSpec(shape, lambda i, _nd=nd: (0,) * _nd)


def _round_up(x, m):
    return ((x + m - 1) // m) * m


def rnn_classification_forward(inputs, length, params):
    """inputs: (B, S) int32 token ids; length: (B,) int32 valid lengths."""
    emb = params["embedding"]                                # (V, E)
    B, S = inputs.shape
    E = emb.shape[1]
    H = params["w_hh_f"].shape[1]
    C = params["w_lin"].shape[0]

    HP = _round_up(H, 128)                                   # lane-aligned gate blocks
    BP = _round_up(max(B, 8), 16)                            # bf16 sublane-packed rows
    CP = _round_up(max(C, 128), 128)                         # lane-dense output store

    bf16, f32 = jnp.bfloat16, jnp.float32

    # ---- Glue (plain JAX): bf16 time-major gather + fold time-reversal into x. ----
    # TODO(synk): for large S*B fuse the embedding gather into the kernel
    # (PrefetchScalarGridSpec with token ids as scalar prefetch + pl.Element rows).
    x_tm = emb.astype(bf16)[inputs.T]                        # (S, B, E) bf16 gather
    x_tm = jnp.pad(x_tm, ((0, 0), (0, BP - B), (0, 0)))      # (S, BP, E)
    x_comb = jnp.concatenate([x_tm, x_tm[::-1]], axis=-1)    # [x(t) | x(S-1-t)]
    x_comb = x_comb.reshape(S * BP, 2 * E)
    lens = jnp.pad(length.astype(jnp.int32), (0, BP - B))[:, None]        # (BP, 1)

    # ---- Weight packing: gate-major, 128-lane aligned column blocks ------------
    #   columns: [ r_f | r_b | z_f | z_b | n_f | n_b ], each block HP wide
    #   state  : [ h_f | h_b ], each block HP wide
    def g3(a):  # split PyTorch (3H, ...) stacked gates -> (r, z, n)
        return a[:H], a[H:2 * H], a[2 * H:]

    wir_f, wiz_f, win_f = g3(params["w_ih_f"])
    wir_b, wiz_b, win_b = g3(params["w_ih_b"])
    whr_f, whz_f, whn_f = g3(params["w_hh_f"])
    whr_b, whz_b, whn_b = g3(params["w_hh_b"])
    bir_f, biz_f, bin_f = g3(params["b_ih_f"])
    bir_b, biz_b, bin_b = g3(params["b_ih_b"])
    bhr_f, bhz_f, bhn_f = g3(params["b_hh_f"])
    bhr_b, bhz_b, bhn_b = g3(params["b_hh_b"])

    # Input weights: block-diagonal over [x(t) | x(S-1-t)].
    wih = jnp.zeros((2 * E, 6 * HP), f32)
    wih = wih.at[:E, 0 * HP:0 * HP + H].set(wir_f.T)
    wih = wih.at[E:, 1 * HP:1 * HP + H].set(wir_b.T)
    wih = wih.at[:E, 2 * HP:2 * HP + H].set(wiz_f.T)
    wih = wih.at[E:, 3 * HP:3 * HP + H].set(wiz_b.T)
    wih = wih.at[:E, 4 * HP:4 * HP + H].set(win_f.T)
    wih = wih.at[E:, 5 * HP:5 * HP + H].set(win_b.T)
    wih = wih.astype(bf16)

    # Recurrence weights: block-diagonal over [h_f | h_b].
    whh = jnp.zeros((2 * HP, 6 * HP), f32)
    whh = whh.at[:H,        0 * HP:0 * HP + H].set(whr_f.T)
    whh = whh.at[HP:HP + H, 1 * HP:1 * HP + H].set(whr_b.T)
    whh = whh.at[:H,        2 * HP:2 * HP + H].set(whz_f.T)
    whh = whh.at[HP:HP + H, 3 * HP:3 * HP + H].set(whz_b.T)
    whh = whh.at[:H,        4 * HP:4 * HP + H].set(whn_f.T)
    whh = whh.at[HP:HP + H, 5 * HP:5 * HP + H].set(whn_b.T)
    whh = whh.astype(bf16)

    # r/z recurrent biases folded into the input-projection bias (safe: they only
    # appear inside the r/z sigmoids).  b_hn is kept separate (added per step).
    bih = jnp.zeros((1, 6 * HP), f32)
    bih = bih.at[0, 0 * HP:0 * HP + H].set(bir_f + bhr_f)
    bih = bih.at[0, 1 * HP:1 * HP + H].set(bir_b + bhr_b)
    bih = bih.at[0, 2 * HP:2 * HP + H].set(biz_f + bhz_f)
    bih = bih.at[0, 3 * HP:3 * HP + H].set(biz_b + bhz_b)
    bih = bih.at[0, 4 * HP:4 * HP + H].set(bin_f)
    bih = bih.at[0, 5 * HP:5 * HP + H].set(bin_b)

    bhn = jnp.zeros((1, 2 * HP), f32)
    bhn = bhn.at[0, :H].set(bhn_f)
    bhn = bhn.at[0, HP:HP + H].set(bhn_b)

    # Classifier: rows follow the [h_f | h_b] state layout; padded classes get a
    # -1e30 bias so their exp() underflows to exactly 0 inside the log_softmax.
    wlin = jnp.zeros((2 * HP, CP), f32)
    wlin = wlin.at[:H, :C].set(params["w_lin"][:, :H].T)
    wlin = wlin.at[HP:HP + H, :C].set(params["w_lin"][:, H:].T)
    wlin = wlin.astype(bf16)
    blin = jnp.full((1, CP), -1e30, f32).at[0, :C].set(params["b_lin"].astype(f32))

    args = (x_comb, lens, wih, bih, whh, bhn, wlin, blin)

    # Single grid point: the recurrence is sequential and all state stays VMEM-resident.
    # TODO(synk): for large B add a leading "parallel" batch-tile grid axis (>=16 rows
    # per tile) so v7x's second TensorCore is used; for large S*B, tile the time axis
    # (fori_loop / emit_pipeline) instead of keeping the hoisted xp fully resident.
    grid_spec = pl.GridSpec(
        grid=(1,),
        in_specs=[_full_spec(a.shape) for a in args],
        out_specs=_full_spec((BP, CP)),
    )
    out = pl.pallas_call(
        _gru_classifier_kernel,
        out_shape=jax.ShapeDtypeStruct((BP, CP), jnp.float32),
        grid_spec=grid_spec,
        compiler_params=pltpu.CompilerParams(
            dimension_semantics=("arbitrary",),
            vmem_limit_bytes=32 * 1024 * 1024,   # explicit budget, safe on v5e/v6e/v7x
        ),
    )(*args)
    return out[:B, :C]


def _reference_forward(inputs, length, params):
    """Pure-JAX f32 reference of the PyTorch module's forward (packed bi-GRU)."""
    B, S = inputs.shape
    H = params["w_hh_f"].shape[1]
    x = params["embedding"][inputs]                      # (B, S, E) f32

    def gru_dir(w_ih, w_hh, b_ih, b_hh, reverse):
        h = jnp.zeros((B, H), jnp.float32)
        steps = range(S - 1, -1, -1) if reverse else range(S)
        for t in steps:
            gi = x[:, t] @ w_ih.T + b_ih                 # (B, 3H)
            gh = h @ w_hh.T + b_hh
            r = jax.nn.sigmoid(gi[:, :H] + gh[:, :H])
            z = jax.nn.sigmoid(gi[:, H:2 * H] + gh[:, H:2 * H])
            n = jnp.tanh(gi[:, 2 * H:] + r * gh[:, 2 * H:])
            h_new = (1.0 - z) * n + z * h
            h = jnp.where((length > t)[:, None], h_new, h)   # packed-sequence semantics
        return h

    h_f = gru_dir(params["w_ih_f"], params["w_hh_f"], params["b_ih_f"], params["b_hh_f"], False)
    h_b = gru_dir(params["w_ih_b"], params["w_hh_b"], params["b_ih_b"], params["b_hh_b"], True)
    hidden = jnp.concatenate([h_f, h_b], axis=-1)
    logits = hidden @ params["w_lin"].T + params["b_lin"]
    return jax.nn.log_softmax(logits, axis=-1)


def init_params(key, vocab_size, embedding_size, hidden_size, num_classes):
    """Synthetic parameters in PyTorch layout (gates r, z, n stacked along dim 0)."""
    ks = jax.random.split(key, 11)
    s_gru = 1.0 / (hidden_size ** 0.5)
    s_lin = 1.0 / ((2 * hidden_size) ** 0.5)

    def u(k, shape, scale):
        return jax.random.uniform(k, shape, jnp.float32, -scale, scale)

    H, E = hidden_size, embedding_size
    return {
        "embedding": jax.random.normal(ks[0], (vocab_size, E), jnp.float32),
        # forward direction
        "w_ih_f": u(ks[1], (3 * H, E), s_gru),
        "w_hh_f": u(ks[2], (3 * H, H), s_gru),
        "b_ih_f": u(ks[3], (3 * H,), s_gru),
        "b_hh_f": u(ks[4], (3 * H,), s_gru),
        # backward direction
        "w_ih_b": u(ks[5], (3 * H, E), s_gru),
        "w_hh_b": u(ks[6], (3 * H, H), s_gru),
        "b_ih_b": u(ks[7], (3 * H,), s_gru),
        "b_hh_b": u(ks[8], (3 * H,), s_gru),
        # classifier
        "w_lin": u(ks[9], (num_classes, 2 * H), s_lin),
        "b_lin": u(ks[10], (num_classes,), s_lin),
    }


if __name__ == "__main__":
    vocab_size, embedding_size, hidden_size = 50, 16, 32
    num_layers, bidirectional, num_classes = 1, True, 5
    p, pad_idx = 0.5, 0              # GRU dropout inactive with num_layers=1
    B, S = 2, 8

    key = jax.random.PRNGKey(0)
    kp, ki = jax.random.split(key, 2)
    params = init_params(kp, vocab_size, embedding_size, hidden_size, num_classes)

    length = jnp.array([8, 5], dtype=jnp.int32)
    tokens = jax.random.randint(ki, (B, S), 1, vocab_size, dtype=jnp.int32)
    pos = jnp.arange(S, dtype=jnp.int32)[None, :]
    tokens = jnp.where(pos < length[:, None], tokens, pad_idx)   # pad with pad_idx

    out = rnn_classification_forward(tokens, length, params)
    out = jax.block_until_ready(out)

    assert out.shape == (B, num_classes), out.shape
    probs_sum = jnp.sum(jnp.exp(out), axis=-1)                   # log_softmax sanity
    assert bool(jnp.all(jnp.abs(probs_sum - 1.0) < 1e-3)), probs_sum

    ref = _reference_forward(tokens, length, params)             # pure-f32 reference
    max_err = float(jnp.max(jnp.abs(out - ref)))                 # loose tol: bf16 matmul operands
    assert max_err < 0.25, (max_err, out, ref)

    print("KERNEL_OK")
</pallas_src>

<mosaic_0001>
module attributes {stable_mosaic.version = 11 : i64} {
  func.func @_gru_classifier_kernel(%arg0: i32, %arg1: memref<128x32xbf16, #tpu.memory_space<vmem>>, %arg2: memref<16x1xi32, #tpu.memory_space<vmem>>, %arg3: memref<32x768xbf16, #tpu.memory_space<vmem>>, %arg4: memref<1x768xf32, #tpu.memory_space<vmem>>, %arg5: memref<256x768xbf16, #tpu.memory_space<vmem>>, %arg6: memref<1x256xf32, #tpu.memory_space<vmem>>, %arg7: memref<256x128xbf16, #tpu.memory_space<vmem>>, %arg8: memref<1x128xf32, #tpu.memory_space<vmem>>, %arg9: memref<16x128xf32, #tpu.memory_space<vmem>>) attributes {dimension_semantics = [#tpu.dimension_semantics<arbitrary>], iteration_bounds = array<i64: 1>, scalar_prefetch = 0 : i64, scratch_operands = 0 : i64, tpu.core_type = #tpu.core_type<tc>, window_params = [{pipeline_mode = #tpu.pipeline_mode<synchronous>, transform_indices = @transform_0, window_bounds = array<i64: 128, 32>}, {pipeline_mode = #tpu.pipeline_mode<synchronous>, transform_indices = @transform_1, window_bounds = array<i64: 16, 1>}, {pipeline_mode = #tpu.pipeline_mode<synchronous>, transform_indices = @transform_2, window_bounds = array<i64: 32, 768>}, {pipeline_mode = #tpu.pipeline_mode<synchronous>, transform_indices = @transform_3, window_bounds = array<i64: 1, 768>}, {pipeline_mode = #tpu.pipeline_mode<synchronous>, transform_indices = @transform_4, window_bounds = array<i64: 256, 768>}, {pipeline_mode = #tpu.pipeline_mode<synchronous>, transform_indices = @transform_5, window_bounds = array<i64: 1, 256>}, {pipeline_mode = #tpu.pipeline_mode<synchronous>, transform_indices = @transform_6, window_bounds = array<i64: 256, 128>}, {pipeline_mode = #tpu.pipeline_mode<synchronous>, transform_indices = @transform_7, window_bounds = array<i64: 1, 128>}, {pipeline_mode = #tpu.pipeline_mode<synchronous>, transform_indices = @transform_8, window_bounds = array<i64: 16, 128>}]} {
    %c0 = arith.constant 0 : index
    %c0_0 = arith.constant 0 : index
    %0 = vector.load %arg1[%c0, %c0_0] : memref<128x32xbf16, #tpu.memory_space<vmem>>, vector<128x32xbf16>
    %c0_1 = arith.constant 0 : index
    %c0_2 = arith.constant 0 : index
    %1 = vector.load %arg3[%c0_1, %c0_2] : memref<32x768xbf16, #tpu.memory_space<vmem>>, vector<32x768xbf16>
    %cst = arith.constant dense<0.000000e+00> : vector<128x768xf32>
    %2 = tpu.matmul %0, %1, %cst {dimension_numbers = #tpu.dot_dimension_numbers<[1], [0], [0], [1], [0, 0, 1, 1], [], []>} : vector<128x32xbf16>, vector<32x768xbf16>, vector<128x768xf32> -> vector<128x768xf32>
    %c0_3 = arith.constant 0 : index
    %c0_4 = arith.constant 0 : index
    %3 = vector.load %arg4[%c0_3, %c0_4] : memref<1x768xf32, #tpu.memory_space<vmem>>, vector<1x768xf32>
    %4 = vector.broadcast %3 : vector<1x768xf32> to vector<128x768xf32>
    %5 = arith.addf %2, %4 : vector<128x768xf32>
    %c0_5 = arith.constant 0 : index
    %c0_6 = arith.constant 0 : index
    %6 = vector.load %arg2[%c0_5, %c0_6] : memref<16x1xi32, #tpu.memory_space<vmem>>, vector<16x1xi32>
    %c0_7 = arith.constant 0 : index
    %c0_8 = arith.constant 0 : index
    %7 = vector.load %arg5[%c0_7, %c0_8] : memref<256x768xbf16, #tpu.memory_space<vmem>>, vector<256x768xbf16>
    %c0_9 = arith.constant 0 : index
    %c0_10 = arith.constant 0 : index
    %8 = vector.load %arg6[%c0_9, %c0_10] : memref<1x256xf32, #tpu.memory_space<vmem>>, vector<1x256xf32>
    %9 = tpu.iota {dimensions = array<i32: 1>} : vector<1x256xi32>
    %c128_i32 = arith.constant 128 : i32
    %10 = vector.broadcast %c128_i32 : i32 to vector<1x256xi32>
    %11 = arith.cmpi slt, %9, %10 : vector<1x256xi32>
    %c0_i32 = arith.constant 0 : i32
    %c7_i32 = arith.constant 7 : i32
    %12 = vector.broadcast %c0_i32 : i32 to vector<1x256xi32>
    %13 = vector.broadcast %c7_i32 : i32 to vector<1x256xi32>
    %14 = arith.select %11, %12, %13 : vector<1x256xi1>, vector<1x256xi32>
    %15 = vector.broadcast %6 : vector<16x1xi32> to vector<16x256xi32>
    %16 = vector.broadcast %14 : vector<1x256xi32> to vector<16x256xi32>
    %17 = arith.cmpi sgt, %15, %16 : vector<16x256xi32>
    %c1_i32 = arith.constant 1 : i32
    %c6_i32 = arith.constant 6 : i32
    %18 = vector.broadcast %c1_i32 : i32 to vector<1x256xi32>
    %19 = vector.broadcast %c6_i32 : i32 to vector<1x256xi32>
    %20 = arith.select %11, %18, %19 : vector<1x256xi1>, vector<1x256xi32>
    %21 = vector.broadcast %6 : vector<16x1xi32> to vector<16x256xi32>
    %22 = vector.broadcast %20 : vector<1x256xi32> to vector<16x256xi32>
    %23 = arith.cmpi sgt, %21, %22 : vector<16x256xi32>
    %c2_i32 = arith.constant 2 : i32
    %c5_i32 = arith.constant 5 : i32
    %24 = vector.broadcast %c2_i32 : i32 to vector<1x256xi32>
    %25 = vector.broadcast %c5_i32 : i32 to vector<1x256xi32>
    %26 = arith.select %11, %24, %25 : vector<1x256xi1>, vector<1x256xi32>
    %27 = vector.broadcast %6 : vector<16x1xi32> to vector<16x256xi32>
    %28 = vector.broadcast %26 : vector<1x256xi32> to vector<16x256xi32>
    %29 = arith.cmpi sgt, %27, %28 : vector<16x256xi32>
    %c3_i32 = arith.constant 3 : i32
    %c4_i32 = arith.constant 4 : i32
    %30 = vector.broadcast %c3_i32 : i32 to vector<1x256xi32>
    %31 = vector.broadcast %c4_i32 : i32 to vector<1x256xi32>
    %32 = arith.select %11, %30, %31 : vector<1x256xi1>, vector<1x256xi32>
    %33 = vector.broadcast %6 : vector<16x1xi32> to vector<16x256xi32>
    %34 = vector.broadcast %32 : vector<1x256xi32> to vector<16x256xi32>
    %35 = arith.cmpi sgt, %33, %34 : vector<16x256xi32>
    %c4_i32_11 = arith.constant 4 : i32
    %c3_i32_12 = arith.constant 3 : i32
    %36 = vector.broadcast %c4_i32_11 : i32 to vector<1x256xi32>
    %37 = vector.broadcast %c3_i32_12 : i32 to vector<1x256xi32>
    %38 = arith.select %11, %36, %37 : vector<1x256xi1>, vector<1x256xi32>
    %39 = vector.broadcast %6 : vector<16x1xi32> to vector<16x256xi32>
    %40 = vector.broadcast %38 : vector<1x256xi32> to vector<16x256xi32>
    %41 = arith.cmpi sgt, %39, %40 : vector<16x256xi32>
    %c5_i32_13 = arith.constant 5 : i32
    %c2_i32_14 = arith.constant 2 : i32
    %42 = vector.broadcast %c5_i32_13 : i32 to vector<1x256xi32>
    %43 = vector.broadcast %c2_i32_14 : i32 to vector<1x256xi32>
    %44 = arith.select %11, %42, %43 : vector<1x256xi1>, vector<1x256xi32>
    %45 = vector.broadcast %6 : vector<16x1xi32> to vector<16x256xi32>
    %46 = vector.broadcast %44 : vector<1x256xi32> to vector<16x256xi32>
    %47 = arith.cmpi sgt, %45, %46 : vector<16x256xi32>
    %c6_i32_15 = arith.constant 6 : i32
    %c1_i32_16 = arith.constant 1 : i32
    %48 = vector.broadcast %c6_i32_15 : i32 to vector<1x256xi32>
    %49 = vector.broadcast %c1_i32_16 : i32 to vector<1x256xi32>
    %50 = arith.select %11, %48, %49 : vector<1x256xi1>, vector<1x256xi32>
    %51 = vector.broadcast %6 : vector<16x1xi32> to vector<16x256xi32>
    %52 = vector.broadcast %50 : vector<1x256xi32> to vector<16x256xi32>
    %53 = arith.cmpi sgt, %51, %52 : vector<16x256xi32>
    %c7_i32_17 = arith.constant 7 : i32
    %c0_i32_18 = arith.constant 0 : i32
    %54 = vector.broadcast %c7_i32_17 : i32 to vector<1x256xi32>
    %55 = vector.broadcast %c0_i32_18 : i32 to vector<1x256xi32>
    %56 = arith.select %11, %54, %55 : vector<1x256xi1>, vector<1x256xi32>
    %57 = vector.broadcast %6 : vector<16x1xi32> to vector<16x256xi32>
    %58 = vector.broadcast %56 : vector<1x256xi32> to vector<16x256xi32>
    %59 = arith.cmpi sgt, %57, %58 : vector<16x256xi32>
    %cst_19 = arith.constant 0.000000e+00 : f32
    %60 = vector.broadcast %cst_19 : f32 to vector<16x256xf32>
    %61 = vector.extract_strided_slice %5 {offsets = [0, 0], sizes = [16, 768], strides = [1, 1]} : vector<128x768xf32> to vector<16x768xf32>
    %62 = arith.truncf %60 : vector<16x256xf32> to vector<16x256xbf16>
    %cst_20 = arith.constant dense<0.000000e+00> : vector<16x768xf32>
    %63 = tpu.matmul %62, %7, %cst_20 {dimension_numbers = #tpu.dot_dimension_numbers<[1], [0], [0], [1], [0, 0, 1, 1], [], []>} : vector<16x256xbf16>, vector<256x768xbf16>, vector<16x768xf32> -> vector<16x768xf32>
    %64 = vector.extract_strided_slice %61 {offsets = [0, 0], sizes = [16, 512], strides = [1, 1]} : vector<16x768xf32> to vector<16x512xf32>
    %65 = vector.extract_strided_slice %63 {offsets = [0, 0], sizes = [16, 512], strides = [1, 1]} : vector<16x768xf32> to vector<16x512xf32>
    %66 = arith.addf %64, %65 : vector<16x512xf32>
    %67 = arith.negf %66 : vector<16x512xf32>
    %68 = math.exp %67 : vector<16x512xf32>
    %cst_21 = arith.constant 1.000000e+00 : f32
    %69 = vector.broadcast %cst_21 : f32 to vector<16x512xf32>
    %70 = arith.addf %69, %68 : vector<16x512xf32>
    %71 = arith.divf %69, %70 : vector<16x512xf32>
    %72 = vector.extract_strided_slice %71 {offsets = [0, 0], sizes = [16, 256], strides = [1, 1]} : vector<16x512xf32> to vector<16x256xf32>
    %73 = vector.extract_strided_slice %71 {offsets = [0, 256], sizes = [16, 256], strides = [1, 1]} : vector<16x512xf32> to vector<16x256xf32>
    %74 = vector.extract_strided_slice %61 {offsets = [0, 512], sizes = [16, 256], strides = [1, 1]} : vector<16x768xf32> to vector<16x256xf32>
    %75 = vector.extract_strided_slice %63 {offsets = [0, 512], sizes = [16, 256], strides = [1, 1]} : vector<16x768xf32> to vector<16x256xf32>
    %76 = vector.broadcast %8 : vector<1x256xf32> to vector<16x256xf32>
    %77 = arith.addf %75, %76 : vector<16x256xf32>
    %78 = arith.mulf %72, %77 : vector<16x256xf32>
    %79 = arith.addf %74, %78 : vector<16x256xf32>
    %80 = math.tanh %79 : vector<16x256xf32>
    %cst_22 = arith.constant 1.000000e+00 : f32
    %81 = vector.broadcast %cst_22 : f32 to vector<16x256xf32>
    %82 = arith.subf %81, %73 : vector<16x256xf32>
    %83 = arith.mulf %82, %80 : vector<16x256xf32>
    %84 = arith.mulf %73, %60 : vector<16x256xf32>
    %85 = arith.addf %83, %84 : vector<16x256xf32>
    %86 = arith.select %17, %85, %60 : vector<16x256xi1>, vector<16x256xf32>
    %87 = vector.extract_strided_slice %5 {offsets = [16, 0], sizes = [16, 768], strides = [1, 1]} : vector<128x768xf32> to vector<16x768xf32>
    %88 = arith.truncf %86 : vector<16x256xf32> to vector<16x256xbf16>
    %cst_23 = arith.constant dense<0.000000e+00> : vector<16x768xf32>
    %89 = tpu.matmul %88, %7, %cst_23 {dimension_numbers = #tpu.dot_dimension_numbers<[1], [0], [0], [1], [0, 0, 1, 1], [], []>} : vector<16x256xbf16>, vector<256x768xbf16>, vector<16x768xf32> -> vector<16x768xf32>
    %90 = vector.extract_strided_slice %87 {offsets = [0, 0], sizes = [16, 512], strides = [1, 1]} : vector<16x768xf32> to vector<16x512xf32>
    %91 = vector.extract_strided_slice %89 {offsets = [0, 0], sizes = [16, 512], strides = [1, 1]} : vector<16x768xf32> to vector<16x512xf32>
    %92 = arith.addf %90, %91 : vector<16x512xf32>
    %93 = arith.negf %92 : vector<16x512xf32>
    %94 = math.exp %93 : vector<16x512xf32>
    %cst_24 = arith.constant 1.000000e+00 : f32
    %95 = vector.broadcast %cst_24 : f32 to vector<16x512xf32>
    %96 = arith.addf %95, %94 : vector<16x512xf32>
    %97 = arith.divf %95, %96 : vector<16x512xf32>
    %98 = vector.extract_strided_slice %97 {offsets = [0, 0], sizes = [16, 256], strides = [1, 1]} : vector<16x512xf32> to vector<16x256xf32>
    %99 = vector.extract_strided_slice %97 {offsets = [0, 256], sizes = [16, 256], strides = [1, 1]} : vector<16x512xf32> to vector<16x256xf32>
    %100 = vector.extract_strided_slice %87 {offsets = [0, 512], sizes = [16, 256], strides = [1, 1]} : vector<16x768xf32> to vector<16x256xf32>
    %101 = vector.extract_strided_slice %89 {offsets = [0, 512], sizes = [16, 256], strides = [1, 1]} : vector<16x768xf32> to vector<16x256xf32>
    %102 = vector.broadcast %8 : vector<1x256xf32> to vector<16x256xf32>
    %103 = arith.addf %101, %102 : vector<16x256xf32>
    %104 = arith.mulf %98, %103 : vector<16x256xf32>
    %105 = arith.addf %100, %104 : vector<16x256xf32>
    %106 = math.tanh %105 : vector<16x256xf32>
    %cst_25 = arith.constant 1.000000e+00 : f32
    %107 = vector.broadcast %cst_25 : f32 to vector<16x256xf32>
    %108 = arith.subf %107, %99 : vector<16x256xf32>
    %109 = arith.mulf %108, %106 : vector<16x256xf32>
    %110 = arith.mulf %99, %86 : vector<16x256xf32>
    %111 = arith.addf %109, %110 : vector<16x256xf32>
    %112 = arith.select %23, %111, %86 : vector<16x256xi1>, vector<16x256xf32>
    %113 = vector.extract_strided_slice %5 {offsets = [32, 0], sizes = [16, 768], strides = [1, 1]} : vector<128x768xf32> to vector<16x768xf32>
    %114 = arith.truncf %112 : vector<16x256xf32> to vector<16x256xbf16>
    %cst_26 = arith.constant dense<0.000000e+00> : vector<16x768xf32>
    %115 = tpu.matmul %114, %7, %cst_26 {dimension_numbers = #tpu.dot_dimension_numbers<[1], [0], [0], [1], [0, 0, 1, 1], [], []>} : vector<16x256xbf16>, vector<256x768xbf16>, vector<16x768xf32> -> vector<16x768xf32>
    %116 = vector.extract_strided_slice %113 {offsets = [0, 0], sizes = [16, 512], strides = [1, 1]} : vector<16x768xf32> to vector<16x512xf32>
    %117 = vector.extract_strided_slice %115 {offsets = [0, 0], sizes = [16, 512], strides = [1, 1]} : vector<16x768xf32> to vector<16x512xf32>
    %118 = arith.addf %116, %117 : vector<16x512xf32>
    %119 = arith.negf %118 : vector<16x512xf32>
    %120 = math.exp %119 : vector<16x512xf32>
    %cst_27 = arith.constant 1.000000e+00 : f32
    %121 = vector.broadcast %cst_27 : f32 to vector<16x512xf32>
    %122 = arith.addf %121, %120 : vector<16x512xf32>
    %123 = arith.divf %121, %122 : vector<16x512xf32>
    %124 = vector.extract_strided_slice %123 {offsets = [0, 0], sizes = [16, 256], strides = [1, 1]} : vector<16x512xf32> to vector<16x256xf32>
    %125 = vector.extract_strided_slice %123 {offsets = [0, 256], sizes = [16, 256], strides = [1, 1]} : vector<16x512xf32> to vector<16x256xf32>
    %126 = vector.extract_strided_slice %113 {offsets = [0, 512], sizes = [16, 256], strides = [1, 1]} : vector<16x768xf32> to vector<16x256xf32>
    %127 = vector.extract_strided_slice %115 {offsets = [0, 512], sizes = [16, 256], strides = [1, 1]} : vector<16x768xf32> to vector<16x256xf32>
    %128 = vector.broadcast %8 : vector<1x256xf32> to vector<16x256xf32>
    %129 = arith.addf %127, %128 : vector<16x256xf32>
    %130 = arith.mulf %124, %129 : vector<16x256xf32>
    %131 = arith.addf %126, %130 : vector<16x256xf32>
    %132 = math.tanh %131 : vector<16x256xf32>
    %cst_28 = arith.constant 1.000000e+00 : f32
    %133 = vector.broadcast %cst_28 : f32 to vector<16x256xf32>
    %134 = arith.subf %133, %125 : vector<16x256xf32>
    %135 = arith.mulf %134, %132 : vector<16x256xf32>
    %136 = arith.mulf %125, %112 : vector<16x256xf32>
    %137 = arith.addf %135, %136 : vector<16x256xf32>
    %138 = arith.select %29, %137, %112 : vector<16x256xi1>, vector<16x256xf32>
    %139 = vector.extract_strided_slice %5 {offsets = [48, 0], sizes = [16, 768], strides = [1, 1]} : vector<128x768xf32> to vector<16x768xf32>
    %140 = arith.truncf %138 : vector<16x256xf32> to vector<16x256xbf16>
    %cst_29 = arith.constant dense<0.000000e+00> : vector<16x768xf32>
    %141 = tpu.matmul %140, %7, %cst_29 {dimension_numbers = #tpu.dot_dimension_numbers<[1], [0], [0], [1], [0, 0, 1, 1], [], []>} : vector<16x256xbf16>, vector<256x768xbf16>, vector<16x768xf32> -> vector<16x768xf32>
    %142 = vector.extract_strided_slice %139 {offsets = [0, 0], sizes = [16, 512], strides = [1, 1]} : vector<16x768xf32> to vector<16x512xf32>
    %143 = vector.extract_strided_slice %141 {offsets = [0, 0], sizes = [16, 512], strides = [1, 1]} : vector<16x768xf32> to vector<16x512xf32>
    %144 = arith.addf %142, %143 : vector<16x512xf32>
    %145 = arith.negf %144 : vector<16x512xf32>
    %146 = math.exp %145 : vector<16x512xf32>
    %cst_30 = arith.constant 1.000000e+00 : f32
    %147 = vector.broadcast %cst_30 : f32 to vector<16x512xf32>
    %148 = arith.addf %147, %146 : vector<16x512xf32>
    %149 = arith.divf %147, %148 : vector<16x512xf32>
    %150 = vector.extract_strided_slice %149 {offsets = [0, 0], sizes = [16, 256], strides = [1, 1]} : vector<16x512xf32> to vector<16x256xf32>
    %151 = vector.extract_strided_slice %149 {offsets = [0, 256], sizes = [16, 256], strides = [1, 1]} : vector<16x512xf32> to vector<16x256xf32>
    %152 = vector.extract_strided_slice %139 {offsets = [0, 512], sizes = [16, 256], strides = [1, 1]} : vector<16x768xf32> to vector<16x256xf32>
    %153 = vector.extract_strided_slice %141 {offsets = [0, 512], sizes = [16, 256], strides = [1, 1]} : vector<16x768xf32> to vector<16x256xf32>
    %154 = vector.broadcast %8 : vector<1x256xf32> to vector<16x256xf32>
    %155 = arith.addf %153, %154 : vector<16x256xf32>
    %156 = arith.mulf %150, %155 : vector<16x256xf32>
    %157 = arith.addf %152, %156 : vector<16x256xf32>
    %158 = math.tanh %157 : vector<16x256xf32>
    %cst_31 = arith.constant 1.000000e+00 : f32
    %159 = vector.broadcast %cst_31 : f32 to vector<16x256xf32>
    %160 = arith.subf %159, %151 : vector<16x256xf32>
    %161 = arith.mulf %160, %158 : vector<16x256xf32>
    %162 = arith.mulf %151, %138 : vector<16x256xf32>
    %163 = arith.addf %161, %162 : vector<16x256xf32>
    %164 = arith.select %35, %163, %138 : vector<16x256xi1>, vector<16x256xf32>
    %165 = vector.extract_strided_slice %5 {offsets = [64, 0], sizes = [16, 768], strides = [1, 1]} : vector<128x768xf32> to vector<16x768xf32>
    %166 = arith.truncf %164 : vector<16x256xf32> to vector<16x256xbf16>
    %cst_32 = arith.constant dense<0.000000e+00> : vector<16x768xf32>
    %167 = tpu.matmul %166, %7, %cst_32 {dimension_numbers = #tpu.dot_dimension_numbers<[1], [0], [0], [1], [0, 0, 1, 1], [], []>} : vector<16x256xbf16>, vector<256x768xbf16>, vector<16x768xf32> -> vector<16x768xf32>
    %168 = vector.extract_strided_slice %165 {offsets = [0, 0], sizes = [16, 512], strides = [1, 1]} : vector<16x768xf32> to vector<16x512xf32>
    %169 = vector.extract_strided_slice %167 {offsets = [0, 0], sizes = [16, 512], strides = [1, 1]} : vector<16x768xf32> to vector<16x512xf32>
    %170 = arith.addf %168, %169 : vector<16x512xf32>
    %171 = arith.negf %170 : vector<16x512xf32>
    %172 = math.exp %171 : vector<16x512xf32>
    %cst_33 = arith.constant 1.000000e+00 : f32
    %173 = vector.broadcast %cst_33 : f32 to vector<16x512xf32>
    %174 = arith.addf %173, %172 : vector<16x512xf32>
    %175 = arith.divf %173, %174 : vector<16x512xf32>
    %176 = vector.extract_strided_slice %175 {offsets = [0, 0], sizes = [16, 256], strides = [1, 1]} : vector<16x512xf32> to vector<16x256xf32>
    %177 = vector.extract_strided_slice %175 {offsets = [0, 256], sizes = [16, 256], strides = [1, 1]} : vector<16x512xf32> to vector<16x256xf32>
    %178 = vector.extract_strided_slice %165 {offsets = [0, 512], sizes = [16, 256], strides = [1, 1]} : vector<16x768xf32> to vector<16x256xf32>
    %179 = vector.extract_strided_slice %167 {offsets = [0, 512], sizes = [16, 256], strides = [1, 1]} : vector<16x768xf32> to vector<16x256xf32>
    %180 = vector.broadcast %8 : vector<1x256xf32> to vector<16x256xf32>
    %181 = arith.addf %179, %180 : vector<16x256xf32>
    %182 = arith.mulf %176, %181 : vector<16x256xf32>
    %183 = arith.addf %178, %182 : vector<16x256xf32>
    %184 = math.tanh %183 : vector<16x256xf32>
    %cst_34 = arith.constant 1.000000e+00 : f32
    %185 = vector.broadcast %cst_34 : f32 to vector<16x256xf32>
    %186 = arith.subf %185, %177 : vector<16x256xf32>
    %187 = arith.mulf %186, %184 : vector<16x256xf32>
    %188 = arith.mulf %177, %164 : vector<16x256xf32>
    %189 = arith.addf %187, %188 : vector<16x256xf32>
    %190 = arith.select %41, %189, %164 : vector<16x256xi1>, vector<16x256xf32>
    %191 = vector.extract_strided_slice %5 {offsets = [80, 0], sizes = [16, 768], strides = [1, 1]} : vector<128x768xf32> to vector<16x768xf32>
    %192 = arith.truncf %190 : vector<16x256xf32> to vector<16x256xbf16>
    %cst_35 = arith.constant dense<0.000000e+00> : vector<16x768xf32>
    %193 = tpu.matmul %192, %7, %cst_35 {dimension_numbers = #tpu.dot_dimension_numbers<[1], [0], [0], [1], [0, 0, 1, 1], [], []>} : vector<16x256xbf16>, vector<256x768xbf16>, vector<16x768xf32> -> vector<16x768xf32>
    %194 = vector.extract_strided_slice %191 {offsets = [0, 0], sizes = [16, 512], strides = [1, 1]} : vector<16x768xf32> to vector<16x512xf32>
    %195 = vector.extract_strided_slice %193 {offsets = [0, 0], sizes = [16, 512], strides = [1, 1]} : vector<16x768xf32> to vector<16x512xf32>
    %196 = arith.addf %194, %195 : vector<16x512xf32>
    %197 = arith.negf %196 : vector<16x512xf32>
    %198 = math.exp %197 : vector<16x512xf32>
    %cst_36 = arith.constant 1.000000e+00 : f32
    %199 = vector.broadcast %cst_36 : f32 to vector<16x512xf32>
    %200 = arith.addf %199, %198 : vector<16x512xf32>
    %201 = arith.divf %199, %200 : vector<16x512xf32>
    %202 = vector.extract_strided_slice %201 {offsets = [0, 0], sizes = [16, 256], strides = [1, 1]} : vector<16x512xf32> to vector<16x256xf32>
    %203 = vector.extract_strided_slice %201 {offsets = [0, 256], sizes = [16, 256], strides = [1, 1]} : vector<16x512xf32> to vector<16x256xf32>
    %204 = vector.extract_strided_slice %191 {offsets = [0, 512], sizes = [16, 256], strides = [1, 1]} : vector<16x768xf32> to vector<16x256xf32>
    %205 = vector.extract_strided_slice %193 {offsets = [0, 512], sizes = [16, 256], strides = [1, 1]} : vector<16x768xf32> to vector<16x256xf32>
    %206 = vector.broadcast %8 : vector<1x256xf32> to vector<16x256xf32>
    %207 = arith.addf %205, %206 : vector<16x256xf32>
    %208 = arith.mulf %202, %207 : vector<16x256xf32>
    %209 = arith.addf %204, %208 : vector<16x256xf32>
    %210 = math.tanh %209 : vector<16x256xf32>
    %cst_37 = arith.constant 1.000000e+00 : f32
    %211 = vector.broadcast %cst_37 : f32 to vector<16x256xf32>
    %212 = arith.subf %211, %203 : vector<16x256xf32>
    %213 = arith.mulf %212, %210 : vector<16x256xf32>
    %214 = arith.mulf %203, %190 : vector<16x256xf32>
    %215 = arith.addf %213, %214 : vector<16x256xf32>
    %216 = arith.select %47, %215, %190 : vector<16x256xi1>, vector<16x256xf32>
    %217 = vector.extract_strided_slice %5 {offsets = [96, 0], sizes = [16, 768], strides = [1, 1]} : vector<128x768xf32> to vector<16x768xf32>
    %218 = arith.truncf %216 : vector<16x256xf32> to vector<16x256xbf16>
    %cst_38 = arith.constant dense<0.000000e+00> : vector<16x768xf32>
    %219 = tpu.matmul %218, %7, %cst_38 {dimension_numbers = #tpu.dot_dimension_numbers<[1], [0], [0], [1], [0, 0, 1, 1], [], []>} : vector<16x256xbf16>, vector<256x768xbf16>, vector<16x768xf32> -> vector<16x768xf32>
    %220 = vector.extract_strided_slice %217 {offsets = [0, 0], sizes = [16, 512], strides = [1, 1]} : vector<16x768xf32> to vector<16x512xf32>
    %221 = vector.extract_strided_slice %219 {offsets = [0, 0], sizes = [16, 512], strides = [1, 1]} : vector<16x768xf32> to vector<16x512xf32>
    %222 = arith.addf %220, %221 : vector<16x512xf32>
    %223 = arith.negf %222 : vector<16x512xf32>
    %224 = math.exp %223 : vector<16x512xf32>
    %cst_39 = arith.constant 1.000000e+00 : f32
    %225 = vector.broadcast %cst_39 : f32 to vector<16x512xf32>
    %226 = arith.addf %225, %224 : vector<16x512xf32>
    %227 = arith.divf %225, %226 : vector<16x512xf32>
    %228 = vector.extract_strided_slice %227 {offsets = [0, 0], sizes = [16, 256], strides = [1, 1]} : vector<16x512xf32> to vector<16x256xf32>
    %229 = vector.extract_strided_slice %227 {offsets = [0, 256], sizes = [16, 256], strides = [1, 1]} : vector<16x512xf32> to vector<16x256xf32>
    %230 = vector.extract_strided_slice %217 {offsets = [0, 512], sizes = [16, 256], strides = [1, 1]} : vector<16x768xf32> to vector<16x256xf32>
    %231 = vector.extract_strided_slice %219 {offsets = [0, 512], sizes = [16, 256], strides = [1, 1]} : vector<16x768xf32> to vector<16x256xf32>
    %232 = vector.broadcast %8 : vector<1x256xf32> to vector<16x256xf32>
    %233 = arith.addf %231, %232 : vector<16x256xf32>
    %234 = arith.mulf %228, %233 : vector<16x256xf32>
    %235 = arith.addf %230, %234 : vector<16x256xf32>
    %236 = math.tanh %235 : vector<16x256xf32>
    %cst_40 = arith.constant 1.000000e+00 : f32
    %237 = vector.broadcast %cst_40 : f32 to vector<16x256xf32>
    %238 = arith.subf %237, %229 : vector<16x256xf32>
    %239 = arith.mulf %238, %236 : vector<16x256xf32>
    %240 = arith.mulf %229, %216 : vector<16x256xf32>
    %241 = arith.addf %239, %240 : vector<16x256xf32>
    %242 = arith.select %53, %241, %216 : vector<16x256xi1>, vector<16x256xf32>
    %243 = vector.extract_strided_slice %5 {offsets = [112, 0], sizes = [16, 768], strides = [1, 1]} : vector<128x768xf32> to vector<16x768xf32>
    %244 = arith.truncf %242 : vector<16x256xf32> to vector<16x256xbf16>
    %cst_41 = arith.constant dense<0.000000e+00> : vector<16x768xf32>
    %245 = tpu.matmul %244, %7, %cst_41 {dimension_numbers = #tpu.dot_dimension_numbers<[1], [0], [0], [1], [0, 0, 1, 1], [], []>} : vector<16x256xbf16>, vector<256x768xbf16>, vector<16x768xf32> -> vector<16x768xf32>
    %246 = vector.extract_strided_slice %243 {offsets = [0, 0], sizes = [16, 512], strides = [1, 1]} : vector<16x768xf32> to vector<16x512xf32>
    %247 = vector.extract_strided_slice %245 {offsets = [0, 0], sizes = [16, 512], strides = [1, 1]} : vector<16x768xf32> to vector<16x512xf32>
    %248 = arith.addf %246, %247 : vector<16x512xf32>
    %249 = arith.negf %248 : vector<16x512xf32>
    %250 = math.exp %249 : vector<16x512xf32>
    %cst_42 = arith.constant 1.000000e+00 : f32
    %251 = vector.broadcast %cst_42 : f32 to vector<16x512xf32>
    %252 = arith.addf %251, %250 : vector<16x512xf32>
    %253 = arith.divf %251, %252 : vector<16x512xf32>
    %254 = vector.extract_strided_slice %253 {offsets = [0, 0], sizes = [16, 256], strides = [1, 1]} : vector<16x512xf32> to vector<16x256xf32>
    %255 = vector.extract_strided_slice %253 {offsets = [0, 256], sizes = [16, 256], strides = [1, 1]} : vector<16x512xf32> to vector<16x256xf32>
    %256 = vector.extract_strided_slice %243 {offsets = [0, 512], sizes = [16, 256], strides = [1, 1]} : vector<16x768xf32> to vector<16x256xf32>
    %257 = vector.extract_strided_slice %245 {offsets = [0, 512], sizes = [16, 256], strides = [1, 1]} : vector<16x768xf32> to vector<16x256xf32>
    %258 = vector.broadcast %8 : vector<1x256xf32> to vector<16x256xf32>
    %259 = arith.addf %257, %258 : vector<16x256xf32>
    %260 = arith.mulf %254, %259 : vector<16x256xf32>
    %261 = arith.addf %256, %260 : vector<16x256xf32>
    %262 = math.tanh %261 : vector<16x256xf32>
    %cst_43 = arith.constant 1.000000e+00 : f32
    %263 = vector.broadcast %cst_43 : f32 to vector<16x256xf32>
    %264 = arith.subf %263, %255 : vector<16x256xf32>
    %265 = arith.mulf %264, %262 : vector<16x256xf32>
    %266 = arith.mulf %255, %242 : vector<16x256xf32>
    %267 = arith.addf %265, %266 : vector<16x256xf32>
    %268 = arith.select %59, %267, %242 : vector<16x256xi1>, vector<16x256xf32>
    %269 = arith.truncf %268 : vector<16x256xf32> to vector<16x256xbf16>
    %c0_44 = arith.constant 0 : index
    %c0_45 = arith.constant 0 : index
    %270 = vector.load %arg7[%c0_44, %c0_45] : memref<256x128xbf16, #tpu.memory_space<vmem>>, vector<256x128xbf16>
    %cst_46 = arith.constant dense<0.000000e+00> : vector<16x128xf32>
    %271 = tpu.matmul %269, %270, %cst_46 {dimension_numbers = #tpu.dot_dimension_numbers<[1], [0], [0], [1], [0, 0, 1, 1], [], []>} : vector<16x256xbf16>, vector<256x128xbf16>, vector<16x128xf32> -> vector<16x128xf32>
    %c0_47 = arith.constant 0 : index
    %c0_48 = arith.constant 0 : index
    %272 = vector.load %arg8[%c0_47, %c0_48] : memref<1x128xf32, #tpu.memory_space<vmem>>, vector<1x128xf32>
    %273 = vector.broadcast %272 : vector<1x128xf32> to vector<16x128xf32>
    %274 = arith.addf %271, %273 : vector<16x128xf32>
    %cst_49 = arith.constant dense<0xFF800000> : vector<16xf32>
    %275 = vector.multi_reduction <maximumf>, %274, %cst_49 [1] : vector<16x128xf32> to vector<16xf32>
    %276 = vector.shape_cast %275 : vector<16xf32> to vector<16x1xf32>
    %277 = vector.broadcast %276 : vector<16x1xf32> to vector<16x128xf32>
    %278 = arith.subf %274, %277 : vector<16x128xf32>
    %279 = math.exp %278 : vector<16x128xf32>
    %cst_50 = arith.constant dense<0.000000e+00> : vector<16xf32>
    %280 = vector.multi_reduction <add>, %279, %cst_50 [1] : vector<16x128xf32> to vector<16xf32>
    %281 = vector.shape_cast %280 : vector<16xf32> to vector<16x1xf32>
    %282 = math.log %281 : vector<16x1xf32>
    %283 = arith.addf %276, %282 : vector<16x1xf32>
    %284 = vector.broadcast %283 : vector<16x1xf32> to vector<16x128xf32>
    %285 = arith.subf %274, %284 : vector<16x128xf32>
    %c0_51 = arith.constant 0 : index
    %c0_52 = arith.constant 0 : index
    %286 = vector.load %arg9[%c0_51, %c0_52] : memref<16x128xf32, #tpu.memory_space<vmem>>, vector<16x128xf32>
    tpu.vector_store %arg9[%c0_51, %c0_52], %285 {strides = array<i32>} : memref<16x128xf32, #tpu.memory_space<vmem>>, vector<16x128xf32>,
    return
  }
  func.func @transform_0(%arg0: i32) -> (i32, i32) {
    %c0_i32 = arith.constant 0 : i32
    %c0_i32_0 = arith.constant 0 : i32
    %c0_i32_1 = arith.constant 0 : i32
    return %c0_i32, %c0_i32_0 : i32, i32
  }
  func.func @transform_1(%arg0: i32) -> (i32, i32) {
    %c0_i32 = arith.constant 0 : i32
    %c0_i32_0 = arith.constant 0 : i32
    %c0_i32_1 = arith.constant 0 : i32
    return %c0_i32, %c0_i32_0 : i32, i32
  }
  func.func @transform_2(%arg0: i32) -> (i32, i32) {
    %c0_i32 = arith.constant 0 : i32
    %c0_i32_0 = arith.constant 0 : i32
    %c0_i32_1 = arith.constant 0 : i32
    return %c0_i32, %c0_i32_0 : i32, i32
  }
  func.func @transform_3(%arg0: i32) -> (i32, i32) {
    %c0_i32 = arith.constant 0 : i32
    %c0_i32_0 = arith.constant 0 : i32
    %c0_i32_1 = arith.constant 0 : i32
    return %c0_i32, %c0_i32_0 : i32, i32
  }
  func.func @transform_4(%arg0: i32) -> (i32, i32) {
    %c0_i32 = arith.constant 0 : i32
    %c0_i32_0 = arith.constant 0 : i32
    %c0_i32_1 = arith.constant 0 : i32
    return %c0_i32, %c0_i32_0 : i32, i32
  }
  func.func @transform_5(%arg0: i32) -> (i32, i32) {
    %c0_i32 = arith.constant 0 : i32
    %c0_i32_0 = arith.constant 0 : i32
    %c0_i32_1 = arith.constant 0 : i32
    return %c0_i32, %c0_i32_0 : i32, i32
  }
  func.func @transform_6(%arg0: i32) -> (i32, i32) {
    %c0_i32 = arith.constant 0 : i32
    %c0_i32_0 = arith.constant 0 : i32
    %c0_i32_1 = arith.constant 0 : i32
    return %c0_i32, %c0_i32_0 : i32, i32
  }
  func.func @transform_7(%arg0: i32) -> (i32, i32) {
    %c0_i32 = arith.constant 0 : i32
    %c0_i32_0 = arith.constant 0 : i32
    %c0_i32_1 = arith.constant 0 : i32
    return %c0_i32, %c0_i32_0 : i32, i32
  }
  func.func @transform_8(%arg0: i32) -> (i32, i32) {
    %c0_i32 = arith.constant 0 : i32
    %c0_i32_0 = arith.constant 0 : i32
    %c0_i32_1 = arith.constant 0 : i32
    return %c0_i32, %c0_i32_0 : i32, i32
  }
}

</mosaic_0001>

<bundles_post_ra>
// kernel: tpu_custom_call.1
= control target key start
LH: loop header
LB: loop body
LE: loop exit
PB: predicated region body
PF: predicated region fallthrough
CT: control target
= control target key end

     0   :  { %13 = vsyncpa [#allocation3], 0  ;;  %s9113_s0 = inlined_call_operand.vmem [shape: bf16[128,32], index: 0, kind: input, shape index: {}]   ;;  %s9114_s1 = inlined_call_operand.vmem [shape: s32[16,1], index: 1, kind: input, shape index: {}]   ;;  %s9115_s2 = inlined_call_operand.hbm [shape: bf16[32,768], index: 2, kind: input, shape index: {}]   ;;  %s9116_s3 = inlined_call_operand.vmem [shape: f32[1,768], index: 3, kind: input, shape index: {}]   ;;  %s9117_s4 = inlined_call_operand.hbm [shape: bf16[256,768], index: 4, kind: input, shape index: {}]   ;;  %s9118_s5 = inlined_call_operand.vmem [shape: f32[1,256], index: 5, kind: input, shape index: {}]   ;;  %s9119_s6 = inlined_call_operand.hbm [shape: bf16[256,128], index: 6, kind: input, shape index: {}]   ;;  %s9120_s7 = inlined_call_operand.vmem [shape: f32[1,128], index: 7, kind: input, shape index: {}]   ;;  %s9121_s8 = inlined_call_operand.hbm [shape: f32[16,128], index: 8, kind: output, shape index: {}]  }
   0x1   :  { %14 = vsyncpa [#allocation6], 0 }
   0x2   :  { %15 = vsyncpa [#allocation4], 0  ;;  %s39_s29 = sshll.u32 %s9117_s4, 4  ;;  %s5570_s30 = smov [#allocation5]   ;;  %s40_s29 = int_to_ptr.hbm [resolvable:$true] %s39_s29 }
   0x3   :  { %s41_s9 = sshll.u32 %s5570_s30, 4  ;;  %s24_s12 = sshll.u32 %s9115_s2, 4  ;;  %s42_s9 = int_to_ptr.vmem [resolvable:$true] %s41_s9  ;;  %s25_s12 = int_to_ptr.hbm [resolvable:$true] %s24_s12 }
   0x4   :  { %s5571_s13 = smov 384   ;;  %s5572_s14 = smov 24  }
   0x5   :  { %47 = dma.hbm_to_vmem [thread:$0]  %s40_s29, 12288, %s42_s9, [#allocation6], %s5571_s13, %s5571_s13, %s5572_s14  }
   0x6   :  { %s5573_s15 = smov [#allocation2]   ;;  %s54_s19 = sshll.u32 %s9119_s6, 4  ;;  %s55_s19 = int_to_ptr.hbm [resolvable:$true] %s54_s19 }
   0x7   :  { %s26_s16 = sshll.u32 %s5573_s15, 4  ;;  %s5574_s4 = smov [#allocation7]   ;;  %s27_s16 = int_to_ptr.vmem [resolvable:$true] %s26_s16 }
   0x8   :  { %32 = dma.hbm_to_vmem [thread:$0]  %s25_s12, 1536, %s27_s16, [#allocation3], %s5571_s13, %s5571_s13, %s5572_s14  }
   0x9   :  { %s56_s20 = sshll.u32 %s5574_s4, 4  ;;  %s5575_s21 = smov 64   ;;  %s57_s20 = int_to_ptr.vmem [resolvable:$true] %s56_s20 }
   0xa   :  { %s5576_s22 = smov 4  }
   0xb   :  { %62 = dma.hbm_to_vmem [thread:$0]  %s55_s19, 2048, %s57_s20, [#allocation6], %s5575_s21, %s5575_s21, %s5576_s22  }
   0xc   :  { %5564 = dma.done.wait [#allocation3], 1536  }
   0xd   :  { %5565 = vsyncadd [#allocation3], 4294965760 }
   0xe   :  { %5566 = dma.done.wait [#allocation6], 14336  }
   0xf   :  { %5567 = vsyncadd [#allocation6], 4294952960  ;;  %v4372_v0 = vld [vmem:[#allocation2 + $0x30] sm:$0xf]  ;;  %v5007_v1 = vld [vmem:[#allocation2 + $0x44] sm:$0xf0] }
  0x10   :  { %v5004_v2 = vld [vmem:[#allocation2 + $0x34] sm:$0xf]  ;;  %v4373_v3 = vor.u32 %v5007_v1, %v4372_v0  ;;  %v4374_v4 = vld [vmem:[#allocation2 + $0x48] sm:$0xf0]  ;;  %v4348_v5 = vld [vmem:[#allocation2] sm:$0xf] }
  0x11   :  { %v5001_v6 = vld [vmem:[#allocation2 + $0x14] sm:$0xf0]  ;;  %v4377_v7 = vor.u32 %v5004_v2, %v4374_v4  ;;  %v4998_v8 = vld [vmem:[#allocation2 + $0x4] sm:$0xf]  ;;  %v4350_v9 = vld [vmem:[#allocation2 + $0x18] sm:$0xf0] }
  0x12   :  { %251 = vmatpush.bf16.msra.mxu0 %v4373_v3  ;;  %5122 = vmatpush.bf16.msra.mxu2 %v4373_v3  ;;  %v4349_v10 = vor.u32 %v5001_v6, %v4348_v5  ;;  %v4388_v11 = vld [vmem:[#allocation2 + $0x40] sm:$0xf]  ;;  %v5009_v12 = vld [vmem:[#allocation2 + $0x54] sm:$0xf0]  ;;  %v4353_v13 = vor.u32 %v4998_v8, %v4350_v9  ;;  %v5006_v14 = vld [vmem:[#allocation2 + $0x44] sm:$0xf] }
  0x13   :  { %300 = vmatpush.bf16.msra.mxu1 %v4377_v7  ;;  %5124 = vmatpush.bf16.msra.mxu3 %v4377_v7  ;;  %v4390_v15 = vld [vmem:[#allocation2 + $0x58] sm:$0xf0]  ;;  %v4380_v16 = vld [vmem:[#allocation2 + $0x38] sm:$0xf]  ;;  %v4389_v17 = vor.u32 %v5009_v12, %v4388_v11  ;;  %v5008_v19 = vld [vmem:[#allocation2 + $0x4c] sm:$0xf0] }
  0x14   :  { %v4393_v18 = vor.u32 %v5006_v14, %v4390_v15  ;;  %v5005_v20 = vld [vmem:[#allocation2 + $0x3c] sm:$0xf]  ;;  %v4382_v21 = vld [vmem:[#allocation2 + $0x50] sm:$0xf0]  ;;  %v5638_v22 = vld [vmem:[%s9113_s0] sm:$0xff]  ;;  %vm220_vm0 = vcmask 261120   ;;  %v4381_v24 = vor.u32 %v5008_v19, %v4380_v16 }
  0x15   :  { %v5643_v23 = vld [vmem:[%s9113_s0 + $0x38] sm:$0xff]  ;;  %v4385_v25 = vor.u32 %v5005_v20, %v4382_v21  ;;  %v4356_v26 = vld [vmem:[#allocation2 + $0x8] sm:$0xf]  ;;  %v5002_v27 = vld [vmem:[#allocation2 + $0x1c] sm:$0xf0]  ;;  %s4300_s23 = sshll.u32 %s9121_s8, 4  ;;  %s4301_s23 = int_to_ptr.hbm [resolvable:$true] %s4300_s23 }
  0x16   :  { %252 = vmatpush.bf16.msra.mxu0 %v4349_v10  ;;  %5123 = vmatpush.bf16.msra.mxu2 %v4349_v10  ;;  %v4999_v28 = vld [vmem:[#allocation2 + $0xc] sm:$0xf]  ;;  %v4358_v29 = vld [vmem:[#allocation2 + $0x20] sm:$0xf0]  ;;  %v4612_v30 = vld [vmem:[#allocation5 + $0x150] sm:$0xf]  ;;  %v4357_v33 = vor.u32 %v5002_v27, %v4356_v26 }
  0x17   :  { %301 = vmatpush.bf16.msra.mxu1 %v4353_v13  ;;  %5125 = vmatpush.bf16.msra.mxu3 %v4353_v13  ;;  %v5055_v31 = vld [vmem:[#allocation5 + $0x164] sm:$0xf0]  ;;  %v4804_v32 = vld [vmem:[#allocation5 + $0x2d0] sm:$0xf]  ;;  %v4361_v34 = vor.u32 %v4999_v28, %v4358_v29  ;;  %v4588_v39 = vld [vmem:[#allocation5 + $0x120] sm:$0xf] }
  0x18   :  { %v5103_v35 = vld [vmem:[#allocation5 + $0x2e4] sm:$0xf0]  ;;  %v5653_v36 = vor.u32 %v5055_v31, %v4612_v30  ;;  %v5049_v40 = vld [vmem:[#allocation5 + $0x134] sm:$0xf0]  ;;  %v4780_v41 = vld [vmem:[#allocation5 + $0x2a0] sm:$0xf] }
  0x19   :  { %4394 = vmatmul.msk.bf16.vlgmr.msra.gmra.mxu0 %vm220_vm0, %v5638_v22  ;;  %4401 = vmatmul.msk.bf16.vlgmr.msra.gmra.mxu2 %vm220_vm0, %v5643_v23  ;;  %v5655_v37 = vor.u32 %v5103_v35, %v4804_v32  ;;  %v5662_v38 = vld [vmem:[%s9113_s0 + $0x8] sm:$0xff]  ;;  %v5672_v42 = vor.u32 %v5049_v40, %v4588_v39  ;;  %v5097_v43 = vld [vmem:[#allocation5 + $0x2b4] sm:$0xf0]  ;;  %v4364_v44 = vld [vmem:[#allocation2 + $0x10] sm:$0xf]  ;;  %s5579_s24 = smov 128  }
  0x1a   :  { %447 = vmatpush.bf16.msrb.mxu0 %v4389_v17  ;;  %4402 = vmatmul.msk.bf16.vlgmr.msra.gmra.mxu1 %vm220_vm0, %v5638_v22  ;;  %9354 = vst [vmem:[#allocation12_spill] sm:$0xff] %v5653_v36  ;;  %v5003_v45 = vld [vmem:[#allocation2 + $0x24] sm:$0xf0]  ;;  %v5674_v46 = vor.u32 %v5097_v43, %v4780_v41  ;;  %v5000_v48 = vld [vmem:[#allocation2 + $0x14] sm:$0xf]  ;;  %v5700_v58 = vld [vmem:[%s9113_s0 + $0x18] sm:$0xff] }
  0x1b   :  { %496 = vmatpush.bf16.msrb.mxu1 %v4393_v18  ;;  %4409 = vmatmul.msk.bf16.vlgmr.msra.gmra.mxu3 %vm220_vm0, %v5643_v23  ;;  %9355 = vst [vmem:[#allocation13_spill] sm:$0xff] %v5655_v37  ;;  %v4365_v47 = vor.u32 %v5003_v45, %v4364_v44  ;;  %v4366_v49 = vld [vmem:[#allocation2 + $0x28] sm:$0xf0]  ;;  %v5681_v51 = vld [vmem:[%s9113_s0 + $0x10] sm:$0xff]  ;;  %v5043_v53 = vld [vmem:[#allocation5 + $0x104] sm:$0xf0] }
  0x1c   :  { %349 = vmatpush.bf16.msrb.mxu2 %v4381_v24  ;;  %398 = vmatpush.bf16.msrb.mxu3 %v4385_v25  ;;  %9356 = vst [vmem:[#allocation14_spill] sm:$0xff] %v5672_v42  ;;  %v4369_v50 = vor.u32 %v5000_v48, %v4366_v49  ;;  %v4564_v52 = vld [vmem:[#allocation5 + $0xf0] sm:$0xf]  ;;  %v5091_v56 = vld [vmem:[#allocation5 + $0x284] sm:$0xf0]  ;;  %v5719_v1 = vld [vmem:[%s9113_s0 + $0x20] sm:$0xff] }
  0x1d   :  { %9357 = vst [vmem:[#allocation15_spill] sm:$0xff] %v5674_v46  ;;  %v4756_v54 = vld [vmem:[#allocation5 + $0x270] sm:$0xf]  ;;  %v5691_v55 = vor.u32 %v5043_v53, %v4564_v52  ;;  %v4540_v59 = vld [vmem:[#allocation5 + $0xc0] sm:$0xf]  ;;  %v5748_v20 = vld [vmem:[%s9113_s0 + $0x28] sm:$0xff] }
  0x1e   :  { %448 = vmatpush.bf16.msrb.mxu0 %v4365_v47  ;;  %v5693_v57 = vor.u32 %v5091_v56, %v4756_v54  ;;  %v5037_v60 = vld [vmem:[#allocation5 + $0xd4] sm:$0xf0]  ;;  %v4732_v61 = vld [vmem:[#allocation5 + $0x240] sm:$0xf]  ;;  %v4516_v2 = vld [vmem:[#allocation5 + $0x90] sm:$0xf] }
  0x1f   :  { %497 = vmatpush.bf16.msrb.mxu1 %v4369_v50  ;;  %9358 = vst [vmem:[#allocation16_spill] sm:$0xff] %v5691_v55  ;;  %v5710_v62 = vor.u32 %v5037_v60, %v4540_v59  ;;  %v5085_v63 = vld [vmem:[#allocation5 + $0x254] sm:$0xf0]  ;;  %v5031_v3 = vld [vmem:[#allocation5 + $0xa4] sm:$0xf0]  ;;  %s5580_s25 = smov 8  }
  0x20   :  { %350 = vmatpush.bf16.msrb.mxu2 %v4357_v33  ;;  %399 = vmatpush.bf16.msrb.mxu3 %v4361_v34  ;;  %9359 = vst [vmem:[#allocation17_spill] sm:$0xff] %v5693_v57  ;;  %v5712_v0 = vor.u32 %v5085_v63, %v4732_v61  ;;  %v4708_v4 = vld [vmem:[#allocation5 + $0x210] sm:$0xf]  ;;  %v5729_v5 = vor.u32 %v5031_v3, %v4516_v2  ;;  %v5079_v6 = vld [vmem:[#allocation5 + $0x224] sm:$0xf0] }
  0x21   :  { %9360 = vst [vmem:[#allocation18_spill] sm:$0xff] %v5710_v62  ;;  %v4492_v7 = vld [vmem:[#allocation5 + $0x60] sm:$0xf]  ;;  %v5025_v8 = vld [vmem:[#allocation5 + $0x74] sm:$0xf0]  ;;  %v5731_v9 = vor.u32 %v5079_v6, %v4708_v4  ;;  %v5791_v63 = vld [vmem:[%s9113_s0 + $0x30] sm:$0xff] }
  0x22   :  { %9361 = vst [vmem:[#allocation19_spill] sm:$0xff] %v5712_v0  ;;  %v4684_v10 = vld [vmem:[#allocation5 + $0x1e0] sm:$0xf]  ;;  %v5073_v11 = vld [vmem:[#allocation5 + $0x1f4] sm:$0xf0]  ;;  %v5734_v12 = vor.u32 %v5025_v8, %v4492_v7 }
  0x23   :  { %9362 = vst [vmem:[#allocation20_spill] sm:$0xff] %v5729_v5  ;;  %v5737_v13 = vor.u32 %v5073_v11, %v4684_v10  ;;  %v4468_v14 = vld [vmem:[#allocation5 + $0x30] sm:$0xf]  ;;  %v5019_v15 = vld [vmem:[#allocation5 + $0x44] sm:$0xf0] }
  0x24   :  { %1177 = vmatpush.bf16.msra.mxu2 %v5653_v36  ;;  %1191 = vmatpush.bf16.msra.mxu3 %v5655_v37  ;;  %9363 = vst [vmem:[#allocation21_spill] sm:$0xff] %v5731_v9  ;;  %v4660_v16 = vld [vmem:[#allocation5 + $0x1b0] sm:$0xf]  ;;  %v5067_v17 = vld [vmem:[#allocation5 + $0x1c4] sm:$0xf0]  ;;  %v5740_v18 = vor.u32 %v5019_v15, %v4468_v14 }
  0x25   :  { %9364 = vst [vmem:[#allocation22_spill] sm:$0xff] %v5734_v12  ;;  %v5743_v19 = vor.u32 %v5067_v17, %v4660_v16  ;;  %v4444_v21 = vld [vmem:[#allocation5] sm:$0xf]  ;;  %v5013_v24 = vld [vmem:[#allocation5 + $0x14] sm:$0xf0] }
  0x26   :  { %9365 = vst [vmem:[#allocation23_spill] sm:$0xff] %v5737_v13  ;;  %v4636_v25 = vld [vmem:[#allocation5 + $0x180] sm:$0xf]  ;;  %v5057_v27 = vld [vmem:[#allocation5 + $0x174] sm:$0xf0]  ;;  %v5760_v29 = vor.u32 %v5013_v24, %v4444_v21 }
  0x27   :  { %9366 = vst [vmem:[#allocation24_spill] sm:$0xff] %v5740_v18  ;;  %v4628_v26 = vld [vmem:[#allocation5 + $0x160] sm:$0xf]  ;;  %v5105_v31 = vld [vmem:[#allocation5 + $0x2f4] sm:$0xf0] }
  0x28   :  { %1178 = vmatpush.bf16.msra.mxu2 %v5672_v42  ;;  %1192 = vmatpush.bf16.msra.mxu3 %v5674_v46  ;;  %9367 = vst [vmem:[#allocation25_spill] sm:$0xff] %v5743_v19  ;;  %v4820_v28 = vld [vmem:[#allocation5 + $0x2e0] sm:$0xf]  ;;  %v5762_v30 = vor.u32 %v5057_v27, %v4628_v26  ;;  %v5061_v32 = vld [vmem:[#allocation5 + $0x194] sm:$0xf0] }
  0x29   :  { %4395 = vmatmul.msk.bf16.gmra.mxu0 %vm220_vm0, %v5662_v38  ;;  %4410 = vmatmul.msk.bf16.vlgmr.msrb.gmra.mxu2 %vm220_vm0, %v5638_v22  ;;  %9368 = vst [vmem:[#allocation26_spill] sm:$0xff] %v5760_v29  ;;  %v5052_v33 = vld [vmem:[#allocation5 + $0x154] sm:$0xf]  ;;  %v5764_v34 = vor.u32 %v5105_v31, %v4820_v28  ;;  %v5767_v35 = vor.u32 %v5061_v32, %v4636_v25  ;;  %v4614_v39 = vld [vmem:[#allocation5 + $0x168] sm:$0xf0] }
  0x2a   :  { %4403 = vmatmul.msk.bf16.gmra.mxu1 %vm220_vm0, %v5662_v38  ;;  %9369 = vst [vmem:[#allocation27_spill] sm:$0xff] %v5762_v30  ;;  %v5100_v40 = vld [vmem:[#allocation5 + $0x2d4] sm:$0xf]  ;;  %v4806_v41 = vld [vmem:[#allocation5 + $0x2e8] sm:$0xf0]  ;;  %1289 = vmatpush.bf16.msra.mxu0 %v5762_v30  ;;  %v5770_v43 = vor.u32 %v5052_v33, %v4614_v39 }
  0x2b   :  { %4418 = vmatmul.msk.bf16.vlgmr.msrb.gmra.mxu3 %vm220_vm0, %v5638_v22  ;;  %9370 = vst [vmem:[#allocation28_spill] sm:$0xff] %v5764_v34  ;;  %v5772_v44 = vor.u32 %v5100_v40, %v4806_v41  ;;  %v5046_v45 = vld [vmem:[#allocation5 + $0x124] sm:$0xf]  ;;  %v4590_v47 = vld [vmem:[#allocation5 + $0x138] sm:$0xf0]  ;;  %1303 = vmatpush.bf16.msra.mxu1 %v5764_v34 }
  0x2c   :  { %1179 = vmatpush.bf16.msra.mxu2 %v5691_v55  ;;  %1193 = vmatpush.bf16.msra.mxu3 %v5693_v57  ;;  %9371 = vst [vmem:[#allocation29_spill] sm:$0xff] %v5767_v35  ;;  %v5094_v48 = vld [vmem:[#allocation5 + $0x2a4] sm:$0xf]  ;;  %v4782_v49 = vld [vmem:[#allocation5 + $0x2b8] sm:$0xf0]  ;;  %v5778_v50 = vor.u32 %v5046_v45, %v4590_v47 }
  0x2d   :  { %9372 = vst [vmem:[#allocation30_spill] sm:$0xff] %v5770_v43  ;;  %v5780_v52 = vor.u32 %v5094_v48, %v4782_v49  ;;  %v5040_v53 = vld [vmem:[#allocation5 + $0xf4] sm:$0xf]  ;;  %v4566_v54 = vld [vmem:[#allocation5 + $0x108] sm:$0xf0] }
  0x2e   :  { %9373 = vst [vmem:[#allocation31_spill] sm:$0xff] %v5772_v44  ;;  %v5088_v56 = vld [vmem:[#allocation5 + $0x274] sm:$0xf]  ;;  %v4758_v59 = vld [vmem:[#allocation5 + $0x288] sm:$0xf0]  ;;  %v5784_v60 = vor.u32 %v5040_v53, %v4566_v54 }
  0x2f   :  { %9374 = vst [vmem:[#allocation32_spill] sm:$0xff] %v5778_v50  ;;  %v5786_v61 = vor.u32 %v5088_v56, %v4758_v59  ;;  %v5034_v2 = vld [vmem:[#allocation5 + $0xc4] sm:$0xf]  ;;  %v4542_v3 = vld [vmem:[#allocation5 + $0xd8] sm:$0xf0] }
  0x30   :  { %1180 = vmatpush.bf16.msra.mxu2 %v5710_v62  ;;  %1194 = vmatpush.bf16.msra.mxu3 %v5712_v0  ;;  %9375 = vst [vmem:[#allocation33_spill] sm:$0xff] %v5780_v52  ;;  %v5795_v4 = vor.u32 %v5034_v2, %v4542_v3  ;;  %v5082_v6 = vld [vmem:[#allocation5 + $0x244] sm:$0xf]  ;;  %v4734_v7 = vld [vmem:[#allocation5 + $0x258] sm:$0xf0] }
  0x31   :  { %9376 = vst [vmem:[#allocation34_spill] sm:$0xff] %v5784_v60  ;;  %v5797_v8 = vor.u32 %v5082_v6, %v4734_v7  ;;  %v4604_v10 = vld [vmem:[#allocation5 + $0x130] sm:$0xf]  ;;  %v5051_v11 = vld [vmem:[#allocation5 + $0x144] sm:$0xf0] }
  0x32   :  { %9377 = vst [vmem:[#allocation35_spill] sm:$0xff] %v5786_v61  ;;  %v4796_v14 = vld [vmem:[#allocation5 + $0x2b0] sm:$0xf]  ;;  %v5809_v15 = vor.u32 %v5051_v11, %v4604_v10  ;;  %v5099_v16 = vld [vmem:[#allocation5 + $0x2c4] sm:$0xf0] }
  0x33   :  { %9378 = vst [vmem:[#allocation36_spill] sm:$0xff] %v5795_v4  ;;  %v5028_v17 = vld [vmem:[#allocation5 + $0x94] sm:$0xf]  ;;  %v4518_v21 = vld [vmem:[#allocation5 + $0xa8] sm:$0xf0]  ;;  %v5811_v24 = vor.u32 %v5099_v16, %v4796_v14 }
  0x34   :  { %1181 = vmatpush.bf16.msra.mxu2 %v5729_v5  ;;  %1195 = vmatpush.bf16.msra.mxu3 %v5731_v9  ;;  %9379 = vst [vmem:[#allocation37_spill] sm:$0xff] %v5797_v8  ;;  %v5813_v25 = vor.u32 %v5028_v17, %v4518_v21  ;;  %v5076_v26 = vld [vmem:[#allocation5 + $0x214] sm:$0xf]  ;;  %v4710_v27 = vld [vmem:[#allocation5 + $0x228] sm:$0xf0]  ;;  %v9122_v21 = vmov 0  }
  0x35   :  { %9380 = vst [vmem:[#allocation38_spill] sm:$0xff] %v5809_v15  ;;  %1290 = vmatpush.bf16.msra.mxu0 %v5809_v15  ;;  %v5816_v28 = vor.u32 %v5076_v26, %v4710_v27  ;;  %1304 = vmatpush.bf16.msra.mxu1 %v5811_v24  ;;  %v5022_v31 = vld [vmem:[#allocation5 + $0x64] sm:$0xf]  ;;  %v4494_v32 = vld [vmem:[#allocation5 + $0x78] sm:$0xf0] }
  0x36   :  { %9381 = vst [vmem:[#allocation39_spill] sm:$0xff] %v5811_v24  ;;  %v5070_v33 = vld [vmem:[#allocation5 + $0x1e4] sm:$0xf]  ;;  %v5821_v39 = vor.u32 %v5022_v31, %v4494_v32  ;;  %v4686_v40 = vld [vmem:[#allocation5 + $0x1f8] sm:$0xf0]  ;;  %5137 = vset.pattern.permute.xlu0 %v9122_v21 }
  0x37   :  { %9382 = vst [vmem:[#allocation40_spill] sm:$0xff] %v5813_v25  ;;  %v5823_v41 = vor.u32 %v5070_v33, %v4686_v40  ;;  %v5016_v45 = vld [vmem:[#allocation5 + $0x34] sm:$0xf]  ;;  %v4470_v47 = vld [vmem:[#allocation5 + $0x48] sm:$0xf0] }
  0x38   :  { %1182 = vmatpush.bf16.msra.mxu2 %v5734_v12  ;;  %1196 = vmatpush.bf16.msra.mxu3 %v5737_v13  ;;  %9383 = vst [vmem:[#allocation41_spill] sm:$0xff] %v5816_v28  ;;  %v5064_v48 = vld [vmem:[#allocation5 + $0x1b4] sm:$0xf]  ;;  %v5827_v49 = vor.u32 %v5016_v45, %v4470_v47  ;;  %v4662_v53 = vld [vmem:[#allocation5 + $0x1c8] sm:$0xf0] }
  0x39   :  { %4396 = vmatmul.msk.bf16.gmra.mxu0 %vm220_vm0, %v5681_v51  ;;  %4411 = vmatmul.msk.bf16.gmra.mxu2 %vm220_vm0, %v5662_v38  ;;  %9384 = vst [vmem:[#allocation42_spill] sm:$0xff] %v5821_v39  ;;  %v5829_v54 = vor.u32 %v5064_v48, %v4662_v53  ;;  %v5010_v56 = vld [vmem:[#allocation5 + $0x4] sm:$0xf]  ;;  %v4446_v59 = vld [vmem:[#allocation5 + $0x18] sm:$0xf0] }
  0x3a   :  { %4404 = vmatmul.msk.bf16.gmra.mxu1 %vm220_vm0, %v5681_v51  ;;  %9385 = vst [vmem:[#allocation43_spill] sm:$0xff] %v5823_v41  ;;  %v5058_v2 = vld [vmem:[#allocation5 + $0x184] sm:$0xf]  ;;  %v5833_v3 = vor.u32 %v5010_v56, %v4446_v59  ;;  %v4638_v6 = vld [vmem:[#allocation5 + $0x198] sm:$0xf0] }
  0x3b   :  { %4419 = vmatmul.msk.bf16.gmra.mxu3 %vm220_vm0, %v5662_v38  ;;  %9386 = vst [vmem:[#allocation44_spill] sm:$0xff] %v5827_v49  ;;  %v5835_v7 = vor.u32 %v5058_v2, %v4638_v6  ;;  %v4580_v10 = vld [vmem:[#allocation5 + $0x100] sm:$0xf]  ;;  %v5045_v11 = vld [vmem:[#allocation5 + $0x114] sm:$0xf0] }
  0x3c   :  { %1183 = vmatpush.bf16.msra.mxu2 %v5740_v18  ;;  %1197 = vmatpush.bf16.msra.mxu3 %v5743_v19  ;;  %9387 = vst [vmem:[#allocation45_spill] sm:$0xff] %v5829_v54  ;;  %v4772_v14 = vld [vmem:[#allocation5 + $0x280] sm:$0xf]  ;;  %v5847_v16 = vor.u32 %v5045_v11, %v4580_v10  ;;  %v5093_v17 = vld [vmem:[#allocation5 + $0x294] sm:$0xf0] }
  0x3d   :  { %9388 = vst [vmem:[#allocation46_spill] sm:$0xff] %v5833_v3  ;;  %v5850_v26 = vor.u32 %v5093_v17, %v4772_v14  ;;  %v4556_v31 = vld [vmem:[#allocation5 + $0xd0] sm:$0xf]  ;;  %v5039_v32 = vld [vmem:[#allocation5 + $0xe4] sm:$0xf0] }
  0x3e   :  { %9389 = vst [vmem:[#allocation47_spill] sm:$0xff] %v5835_v7  ;;  %1291 = vmatpush.bf16.msra.mxu0 %v5847_v16  ;;  %v4748_v33 = vld [vmem:[#allocation5 + $0x250] sm:$0xf]  ;;  %v5868_v45 = vor.u32 %v5039_v32, %v4556_v31  ;;  %v5087_v47 = vld [vmem:[#allocation5 + $0x264] sm:$0xf0] }
  0x3f   :  { %9390 = vst [vmem:[#allocation48_spill] sm:$0xff] %v5847_v16  ;;  %1305 = vmatpush.bf16.msra.mxu1 %v5850_v26  ;;  %v5872_v53 = vor.u32 %v5087_v47, %v4748_v33  ;;  %v5056_v2 = vld [vmem:[#allocation5 + $0x16c] sm:$0xf0]  ;;  %v4812_v6 = vld [vmem:[#allocation5 + $0x2d8] sm:$0xf] }
  0x40   :  { %1184 = vmatpush.bf16.msra.mxu2 %v5760_v29  ;;  %1198 = vmatpush.bf16.msra.mxu3 %v5767_v35  ;;  %9391 = vst [vmem:[#allocation49_spill] sm:$0xff] %v5850_v26  ;;  %v5104_v10 = vld [vmem:[#allocation5 + $0x2ec] sm:$0xf0]  ;;  %v4596_v33 = vld [vmem:[#allocation5 + $0x128] sm:$0xf] }
  0x41   :  { %9395 = vst [vmem:[#allocation53_spill] sm:$0xff] %v5868_v45  ;;  %v5890_v32 = vor.u32 %v5104_v10, %v4812_v6  ;;  %v5050_v47 = vld [vmem:[#allocation5 + $0x13c] sm:$0xf0]  ;;  %v4788_v21 = vld [vmem:[#allocation5 + $0x2a8] sm:$0xf] }
  0x42   :  { %9397 = vst [vmem:[#allocation55_spill] sm:$0xff] %v5872_v53  ;;  %1292 = vmatpush.bf16.msra.mxu0 %v5868_v45  ;;  %v4532_v6 = vld [vmem:[#allocation5 + $0xa0] sm:$0xf]  ;;  %v5033_v10 = vld [vmem:[#allocation5 + $0xb4] sm:$0xf0] }
  0x43   :  { %1306 = vmatpush.bf16.msra.mxu1 %v5872_v53  ;;  %9405 = vst [vmem:[#allocation63_spill] sm:$0xff] %v5890_v32  ;;  %v4764_v45 = vld [vmem:[#allocation5 + $0x278] sm:$0xf]  ;;  %v5092_v53 = vld [vmem:[#allocation5 + $0x28c] sm:$0xf0] }
  0x44   :  { %1205 = vmatpush.bf16.msrb.mxu2 %v5770_v43  ;;  %1219 = vmatpush.bf16.msrb.mxu3 %v5772_v44  ;;  %v5081_v16 = vld [vmem:[#allocation5 + $0x234] sm:$0xf0]  ;;  %v5086_v30 = vld [vmem:[#allocation5 + $0x25c] sm:$0xf0]  ;;  %v4692_v34 = vld [vmem:[#allocation5 + $0x1e8] sm:$0xf] }
  0x48   :  { %1206 = vmatpush.bf16.msrb.mxu2 %v5778_v50  ;;  %1220 = vmatpush.bf16.msrb.mxu3 %v5780_v52 }
  0x49   :  { %4397 = vmatmul.msk.bf16.gmra.mxu0 %vm220_vm0, %v5700_v58  ;;  %4412 = vmatmul.msk.bf16.gmra.mxu2 %vm220_vm0, %v5681_v51 }
  0x4a   :  { %4405 = vmatmul.msk.bf16.gmra.mxu1 %vm220_vm0, %v5700_v58 }
  0x4b   :  { %4420 = vmatmul.msk.bf16.gmra.mxu3 %vm220_vm0, %v5681_v51 }
  0x4c   :  { %1207 = vmatpush.bf16.msrb.mxu2 %v5784_v60  ;;  %1221 = vmatpush.bf16.msrb.mxu3 %v5786_v61 }
  0x50   :  { %1208 = vmatpush.bf16.msrb.mxu2 %v5795_v4  ;;  %1222 = vmatpush.bf16.msrb.mxu3 %v5797_v8 }
  0x54   :  { %1209 = vmatpush.bf16.msrb.mxu2 %v5813_v25  ;;  %1223 = vmatpush.bf16.msrb.mxu3 %v5816_v28 }
  0x58   :  { %1210 = vmatpush.bf16.msrb.mxu2 %v5821_v39  ;;  %1224 = vmatpush.bf16.msrb.mxu3 %v5823_v41 }
  0x59   :  { %4398 = vmatmul.msk.bf16.gmra.mxu0 %vm220_vm0, %v5719_v1  ;;  %4413 = vmatmul.msk.bf16.gmra.mxu2 %vm220_vm0, %v5700_v58 }
  0x5a   :  { %4406 = vmatmul.msk.bf16.gmra.mxu1 %vm220_vm0, %v5719_v1 }
  0x5b   :  { %4421 = vmatmul.msk.bf16.gmra.mxu3 %vm220_vm0, %v5700_v58 }
  0x5c   :  { %1211 = vmatpush.bf16.msrb.mxu2 %v5827_v49  ;;  %1225 = vmatpush.bf16.msrb.mxu3 %v5829_v54 }
  0x60   :  { %1212 = vmatpush.bf16.msrb.mxu2 %v5833_v3  ;;  %1226 = vmatpush.bf16.msrb.mxu3 %v5835_v7  ;;  %v4790_v7 = vld [vmem:[#allocation5 + $0x2c0] sm:$0xf0] }
  0x69   :  { %4399 = vmatmul.msk.bf16.gmra.mxu0 %vm220_vm0, %v5748_v20  ;;  %4414 = vmatmul.msk.bf16.gmra.mxu2 %vm220_vm0, %v5719_v1 }
  0x6a   :  { %4407 = vmatmul.msk.bf16.gmra.mxu1 %vm220_vm0, %v5748_v20 }
  0x6b   :  { %4422 = vmatmul.msk.bf16.gmra.mxu3 %vm220_vm0, %v5719_v1 }
  0x79   :  { %4400 = vmatmul.msk.bf16.gmra.mxu0 %vm220_vm0, %v5791_v63  ;;  %4415 = vmatmul.msk.bf16.gmra.mxu2 %vm220_vm0, %v5748_v20 }
  0x7a   :  { %4408 = vmatmul.msk.bf16.gmra.mxu1 %vm220_vm0, %v5791_v63 }
  0x7b   :  { %4423 = vmatmul.msk.bf16.gmra.mxu3 %vm220_vm0, %v5748_v20 }
  0x89   :  { %4416 = vmatmul.msk.bf16.gmra.mxu2 %vm220_vm0, %v5791_v63  ;;  %4426 = vmatmul.msk.bf16.vlgmr.msrb.gmra.mxu0 %vm220_vm0, %v5638_v22 }
  0x8a   :  { %4434 = vmatmul.msk.bf16.vlgmr.msrb.gmra.mxu1 %vm220_vm0, %v5638_v22 }
  0x8b   :  { %4424 = vmatmul.msk.bf16.gmra.mxu3 %vm220_vm0, %v5791_v63 }
  0x96   :  { %v5854_v22 = vpop.f32.mrf.mxu0 }
  0x97   :  { %9392 = vst [vmem:[#allocation50_spill] sm:$0xff] %v5854_v22  ;;  %v5856_v27 = vpop.f32.mrf.mxu1 }
  0x98   :  { %9393 = vst [vmem:[#allocation51_spill] sm:$0xff] %v5856_v27  ;;  %v5068_v27 = vld [vmem:[#allocation5 + $0x1cc] sm:$0xf0] }
  0x99   :  { %4417 = vmatmul.msk.bf16.gmra.mxu2 %vm220_vm0, %v5643_v23  ;;  %4427 = vmatmul.msk.bf16.gmra.mxu0 %vm220_vm0, %v5662_v38 }
  0x9a   :  { %4435 = vmatmul.msk.bf16.gmra.mxu1 %vm220_vm0, %v5662_v38  ;;  %v4620_v38 = vld [vmem:[#allocation5 + $0x158] sm:$0xf] }
  0x9b   :  { %4425 = vmatmul.msk.bf16.gmra.mxu3 %vm220_vm0, %v5643_v23  ;;  %v5888_v31 = vor.u32 %v5056_v2, %v4620_v38  ;;  %v5900_v38 = vor.u32 %v5050_v47, %v4596_v33  ;;  %v5921_v33 = vor.u32 %v5092_v53, %v4764_v45  ;;  %v4548_v47 = vld [vmem:[#allocation5 + $0xc8] sm:$0xf]  ;;  %v4716_v45 = vld [vmem:[#allocation5 + $0x218] sm:$0xf]  ;;  %v5080_v53 = vld [vmem:[#allocation5 + $0x22c] sm:$0xf0] }
  0x9c   :  { %v5866_v40 = vpop.f32.mrf.mxu2 }
  0x9d   :  { %9394 = vst [vmem:[#allocation52_spill] sm:$0xff] %v5866_v40  ;;  %v5044_v40 = vld [vmem:[#allocation5 + $0x10c] sm:$0xf0] }
  0x9e   :  { %v5870_v48 = vpop.f32.mrf.mxu3  ;;  %v5874_v56 = vpop.f32.mrf.mxu0  ;;  %9404 = vst [vmem:[#allocation62_spill] sm:$0xff] %v5888_v31 }
  0x9f   :  { %9396 = vst [vmem:[#allocation54_spill] sm:$0xff] %v5870_v48  ;;  %v5877_v23 = vpop.f32.mrf.mxu1  ;;  %v5098_v48 = vld [vmem:[#allocation5 + $0x2bc] sm:$0xf0] }
  0xa0   :  { %9398 = vst [vmem:[#allocation56_spill] sm:$0xff] %v5874_v56  ;;  %v5902_v2 = vor.u32 %v5098_v48, %v4788_v21 }
  0xa1   :  { %9399 = vst [vmem:[#allocation57_spill] sm:$0xff] %v5877_v23  ;;  %v4668_v23 = vld [vmem:[#allocation5 + $0x1b8] sm:$0xf] }
  0xa2   :  { %9407 = vst [vmem:[#allocation64_spill] sm:$0xff] %v5900_v38 }
  0xa3   :  { %9408 = vst [vmem:[#allocation65_spill] sm:$0xff] %v5902_v2 }
  0xa4   :  { %v5880_v59 = vpop.f32.mrf.mxu2  ;;  %9416 = vst [vmem:[#allocation73_spill] sm:$0xff] %v5921_v33 }
  0xa5   :  { %9400 = vst [vmem:[#allocation58_spill] sm:$0xff] %v5880_v59  ;;  %v9406_v59 = vmov 0  }
  0xa6   :  { %v5882_v11 = vpop.f32.mrf.mxu3  ;;  %v5884_v14 = vpop.f32.mrf.mxu0 }
  0xa7   :  { %9401 = vst [vmem:[#allocation59_spill] sm:$0xff] %v5882_v11  ;;  %v5886_v17 = vpop.f32.mrf.mxu1  ;;  %v4572_v11 = vld [vmem:[#allocation5 + $0xf8] sm:$0xf] }
  0xa8   :  { %9402 = vst [vmem:[#allocation60_spill] sm:$0xff] %v5884_v14  ;;  %v5919_v48 = vor.u32 %v5044_v40, %v4572_v11  ;;  %v5032_v40 = vld [vmem:[#allocation5 + $0xac] sm:$0xf0] }
  0xa9   :  { %9403 = vst [vmem:[#allocation61_spill] sm:$0xff] %v5886_v17  ;;  %4428 = vmatmul.msk.bf16.gmra.mxu0 %vm220_vm0, %v5681_v51  ;;  %1185 = vmatmul.bf16.vlgmr.msra.gmra.mxu2 %v9406_v59  ;;  %v4724_v17 = vld [vmem:[#allocation5 + $0x220] sm:$0xf] }
  0xaa   :  { %4436 = vmatmul.msk.bf16.gmra.mxu1 %vm220_vm0, %v5681_v51  ;;  %1233 = vmatpush.bf16.msra.mxu2 %v5888_v31  ;;  %v5906_v51 = vor.u32 %v5033_v10, %v4532_v6  ;;  %v5910_v15 = vor.u32 %v5081_v16, %v4724_v17  ;;  %9415 = vst [vmem:[#allocation72_spill] sm:$0xff] %v5919_v48  ;;  %v5038_v6 = vld [vmem:[#allocation5 + $0xdc] sm:$0xf0]  ;;  %v4740_v10 = vld [vmem:[#allocation5 + $0x248] sm:$0xf] }
  0xab   :  { %1199 = vmatmul.bf16.vlgmr.msra.gmra.mxu3 %v9406_v59  ;;  %v5926_v16 = vor.u32 %v5038_v6, %v4548_v47  ;;  %v5928_v17 = vor.u32 %v5086_v30, %v4740_v10  ;;  %v5942_v30 = vor.u32 %v5080_v53, %v4716_v45  ;;  %v4500_v6 = vld [vmem:[#allocation5 + $0x68] sm:$0xf]  ;;  %v5026_v10 = vld [vmem:[#allocation5 + $0x7c] sm:$0xf0]  ;;  %v4476_v53 = vld [vmem:[#allocation5 + $0x38] sm:$0xf] }
  0xac   :  { %1247 = vmatpush.bf16.msra.mxu3 %v5890_v32  ;;  %v5904_v14 = vpop.f32.mrf.mxu2  ;;  %9410 = vst [vmem:[#allocation67_spill] sm:$0xff] %v5906_v51  ;;  %1293 = vmatpush.bf16.msra.mxu0 %v5906_v51 }
  0xad   :  { %9409 = vst [vmem:[#allocation66_spill] sm:$0xff] %v5904_v14  ;;  %1307 = vmatpush.bf16.msra.mxu1 %v5910_v15 }
  0xae   :  { %v5908_v26 = vpop.f32.mrf.mxu3  ;;  %9412 = vst [vmem:[#allocation69_spill] sm:$0xff] %v5910_v15  ;;  %v5912_v24 = vpop.f32.mrf.mxu0  ;;  %1234 = vmatpush.bf16.msra.mxu2 %v5900_v38 }
  0xaf   :  { %9411 = vst [vmem:[#allocation68_spill] sm:$0xff] %v5908_v26  ;;  %v5917_v21 = vpop.f32.mrf.mxu1  ;;  %v5074_v26 = vld [vmem:[#allocation5 + $0x1fc] sm:$0xf0] }
  0xb0   :  { %9413 = vst [vmem:[#allocation70_spill] sm:$0xff] %v5912_v24  ;;  %1248 = vmatpush.bf16.msra.mxu3 %v5902_v2  ;;  %v4524_v24 = vld [vmem:[#allocation5 + $0x98] sm:$0xf]  ;;  %v5954_v45 = vor.u32 %v5074_v26, %v4692_v34  ;;  %v5974_v26 = vor.u32 %v5068_v27, %v4668_v23 }
  0xb1   :  { %9414 = vst [vmem:[#allocation71_spill] sm:$0xff] %v5917_v21  ;;  %v5940_v47 = vor.u32 %v5032_v40, %v4524_v24  ;;  %v4700_v24 = vld [vmem:[#allocation5 + $0x1f0] sm:$0xf]  ;;  %v5952_v40 = vor.u32 %v5026_v10, %v4500_v6  ;;  %v4644_v6 = vld [vmem:[#allocation5 + $0x188] sm:$0xf] }
  0xb2   :  { %1235 = vmatpush.bf16.msra.mxu2 %v5919_v48  ;;  %9417 = vst [vmem:[#allocation74_spill] sm:$0xff] %v5926_v16  ;;  %v5062_v10 = vld [vmem:[#allocation5 + $0x19c] sm:$0xf0] }
  0xb3   :  { %9418 = vst [vmem:[#allocation75_spill] sm:$0xff] %v5928_v17 }
  0xb4   :  { %1249 = vmatpush.bf16.msra.mxu3 %v5921_v33  ;;  %v5930_v21 = vpop.f32.mrf.mxu2  ;;  %9423 = vst [vmem:[#allocation80_spill] sm:$0xff] %v5940_v47 }
  0xb5   :  { %9419 = vst [vmem:[#allocation76_spill] sm:$0xff] %v5930_v21  ;;  %v5075_v21 = vld [vmem:[#allocation5 + $0x204] sm:$0xf0] }
  0xb6   :  { %v5932_v11 = vpop.f32.mrf.mxu3  ;;  %v5934_v51 = vpop.f32.mrf.mxu0  ;;  %1236 = vmatpush.bf16.msra.mxu2 %v5926_v16  ;;  %9424 = vst [vmem:[#allocation81_spill] sm:$0xff] %v5942_v30  ;;  %v5960_v56 = vor.u32 %v5075_v21, %v4700_v24  ;;  %v5014_v21 = vld [vmem:[#allocation5 + $0x1c] sm:$0xf0]  ;;  %v5053_v24 = vld [vmem:[#allocation5 + $0x15c] sm:$0xf] }
  0xb7   :  { %9420 = vst [vmem:[#allocation77_spill] sm:$0xff] %v5932_v11  ;;  %v5938_v15 = vpop.f32.mrf.mxu1 }
  0xb8   :  { %9421 = vst [vmem:[#allocation78_spill] sm:$0xff] %v5934_v51  ;;  %1250 = vmatpush.bf16.msra.mxu3 %v5928_v17  ;;  %v4508_v51 = vld [vmem:[#allocation5 + $0x70] sm:$0xf]  ;;  %1308 = vmatpush.bf16.msra.mxu1 %v5960_v56 }
  0xb9   :  { %9422 = vst [vmem:[#allocation79_spill] sm:$0xff] %v5938_v15  ;;  %4429 = vmatmul.msk.bf16.gmra.mxu0 %vm220_vm0, %v5700_v58  ;;  %1213 = vmatmul.bf16.vlgmr.msrb.gmra.mxu2 %v9406_v59  ;;  %v5027_v15 = vld [vmem:[#allocation5 + $0x84] sm:$0xf0] }
  0xba   :  { %4437 = vmatmul.msk.bf16.gmra.mxu1 %vm220_vm0, %v5700_v58  ;;  %1237 = vmatpush.bf16.msra.mxu2 %v5940_v47  ;;  %9425 = vst [vmem:[#allocation82_spill] sm:$0xff] %v5952_v40  ;;  %v5956_v11 = vor.u32 %v5027_v15, %v4508_v51  ;;  %v5020_v58 = vld [vmem:[#allocation5 + $0x4c] sm:$0xf0]  ;;  %v4452_v51 = vld [vmem:[#allocation5 + $0x8] sm:$0xf] }
  0xbb   :  { %1227 = vmatmul.bf16.vlgmr.msrb.gmra.mxu3 %v9406_v59  ;;  %9426 = vst [vmem:[#allocation83_spill] sm:$0xff] %v5954_v45  ;;  %v5972_v15 = vor.u32 %v5020_v58, %v4476_v53  ;;  %v5047_v58 = vld [vmem:[#allocation5 + $0x12c] sm:$0xf] }
  0xbc   :  { %1251 = vmatpush.bf16.msra.mxu3 %v5942_v30  ;;  %9427 = vst [vmem:[#allocation84_spill] sm:$0xff] %v5956_v11  ;;  %v5958_v14 = vpop.f32.mrf.mxu2  ;;  %1294 = vmatpush.bf16.msra.mxu0 %v5956_v11  ;;  %v5978_v11 = vor.u32 %v5014_v21, %v4452_v51  ;;  %v4574_v21 = vld [vmem:[#allocation5 + $0x110] sm:$0xf0] }
  0xbd   :  { %9428 = vst [vmem:[#allocation85_spill] sm:$0xff] %v5958_v14  ;;  %v5101_v14 = vld [vmem:[#allocation5 + $0x2dc] sm:$0xf] }
  0xbe   :  { %9429 = vst [vmem:[#allocation86_spill] sm:$0xff] %v5960_v56  ;;  %v5962_v22 = vpop.f32.mrf.mxu3  ;;  %v5965_v3 = vpop.f32.mrf.mxu0  ;;  %1238 = vmatpush.bf16.msra.mxu2 %v5952_v40  ;;  %v5980_v56 = vor.u32 %v5062_v10, %v4644_v6  ;;  %v4598_v40 = vld [vmem:[#allocation5 + $0x140] sm:$0xf0]  ;;  %v5089_v6 = vld [vmem:[#allocation5 + $0x27c] sm:$0xf] }
  0xbf   :  { %9430 = vst [vmem:[#allocation87_spill] sm:$0xff] %v5962_v22  ;;  %v5970_v34 = vpop.f32.mrf.mxu1  ;;  %v4622_v22 = vld [vmem:[#allocation5 + $0x170] sm:$0xf0] }
  0xc0   :  { %9431 = vst [vmem:[#allocation88_spill] sm:$0xff] %v5965_v3  ;;  %1252 = vmatpush.bf16.msra.mxu3 %v5954_v45  ;;  %v4814_v3 = vld [vmem:[#allocation5 + $0x2f0] sm:$0xf0]  ;;  %v5984_v27 = vor.u32 %v5053_v24, %v4622_v22  ;;  %v5095_v45 = vld [vmem:[#allocation5 + $0x2ac] sm:$0xf] }
  0xc1   :  { %9432 = vst [vmem:[#allocation89_spill] sm:$0xff] %v5970_v34  ;;  %v5986_v23 = vor.u32 %v5101_v14, %v4814_v3  ;;  %v5998_v3 = vor.u32 %v5047_v58, %v4598_v40  ;;  %v6000_v22 = vor.u32 %v5095_v45, %v4790_v7  ;;  %v5041_v14 = vld [vmem:[#allocation5 + $0xfc] sm:$0xf]  ;;  %v4766_v10 = vld [vmem:[#allocation5 + $0x290] sm:$0xf0] }
  0xc2   :  { %9433 = vst [vmem:[#allocation90_spill] sm:$0xff] %v5972_v15  ;;  %1239 = vmatpush.bf16.msra.mxu2 %v5972_v15  ;;  %v4484_v24 = vld [vmem:[#allocation5 + $0x40] sm:$0xf]  ;;  %v5069_v7 = vld [vmem:[#allocation5 + $0x1d4] sm:$0xf0]  ;;  %v6014_v58 = vor.u32 %v5041_v14, %v4574_v21 }
  0xc3   :  { %9434 = vst [vmem:[#allocation91_spill] sm:$0xff] %v5974_v26  ;;  %v5083_v15 = vld [vmem:[#allocation5 + $0x24c] sm:$0xf]  ;;  %v5029_v21 = vld [vmem:[#allocation5 + $0x9c] sm:$0xf] }
  0xc4   :  { %1253 = vmatpush.bf16.msra.mxu3 %v5974_v26  ;;  %9435 = vst [vmem:[#allocation92_spill] sm:$0xff] %v5978_v11  ;;  %v5982_v53 = vpop.f32.mrf.mxu2 }
  0xc5   :  { %9436 = vst [vmem:[#allocation93_spill] sm:$0xff] %v5980_v56 }
  0xc6   :  { %9437 = vst [vmem:[#allocation94_spill] sm:$0xff] %v5982_v53  ;;  %v5988_v34 = vpop.f32.mrf.mxu3  ;;  %v5990_v47 = vpop.f32.mrf.mxu0  ;;  %1240 = vmatpush.bf16.msra.mxu2 %v5978_v11 }
  0xc7   :  { %9438 = vst [vmem:[#allocation95_spill] sm:$0xff] %v5984_v27  ;;  %v5994_v51 = vpop.f32.mrf.mxu1 }
  0xc8   :  { %9439 = vst [vmem:[#allocation96_spill] sm:$0xff] %v5986_v23  ;;  %1254 = vmatpush.bf16.msra.mxu3 %v5980_v56  ;;  %v4550_v56 = vld [vmem:[#allocation5 + $0xe0] sm:$0xf0] }
  0xc9   :  { %9440 = vst [vmem:[#allocation97_spill] sm:$0xff] %v5988_v34  ;;  %4430 = vmatmul.msk.bf16.gmra.mxu0 %vm220_vm0, %v5719_v1  ;;  %1241 = vmatmul.bf16.vlgmr.msra.gmra.mxu2 %v9406_v59  ;;  %v6016_v34 = vor.u32 %v5089_v6, %v4766_v10  ;;  %v4526_v6 = vld [vmem:[#allocation5 + $0xb0] sm:$0xf0]  ;;  %v5077_v10 = vld [vmem:[#allocation5 + $0x21c] sm:$0xf] }
  0xca   :  { %9441 = vst [vmem:[#allocation98_spill] sm:$0xff] %v5990_v47  ;;  %1261 = vmatpush.bf16.msrb.mxu2 %v5984_v27  ;;  %4438 = vmatmul.msk.bf16.gmra.mxu1 %vm220_vm0, %v5719_v1  ;;  %v4676_v47 = vld [vmem:[#allocation5 + $0x1c0] sm:$0xf]  ;;  %v5035_v1 = vld [vmem:[#allocation5 + $0xcc] sm:$0xf] }
  0xcb   :  { %9442 = vst [vmem:[#allocation99_spill] sm:$0xff] %v5994_v51  ;;  %v5021_v51 = vld [vmem:[#allocation5 + $0x54] sm:$0xf0]  ;;  %1255 = vmatmul.bf16.vlgmr.msra.gmra.mxu3 %v9406_v59  ;;  %v6018_v53 = vor.u32 %v5069_v7, %v4676_v47  ;;  %v6030_v14 = vor.u32 %v5035_v1, %v4550_v56  ;;  %v4718_v7 = vld [vmem:[#allocation5 + $0x230] sm:$0xf0] }
  0xcc   :  { %1275 = vmatpush.bf16.msrb.mxu3 %v5986_v23  ;;  %9443 = vst [vmem:[#allocation100_spill] sm:$0xff] %v5998_v3  ;;  %v6008_v40 = vor.u32 %v5021_v51, %v4484_v24  ;;  %v6012_v45 = vpop.f32.mrf.mxu2  ;;  %v4742_v51 = vld [vmem:[#allocation5 + $0x260] sm:$0xf0] }
  0xcd   :  { %9444 = vst [vmem:[#allocation101_spill] sm:$0xff] %v6000_v22  ;;  %1309 = vmatpush.bf16.msra.mxu1 %v6018_v53  ;;  %v6032_v47 = vor.u32 %v5083_v15, %v4742_v51  ;;  %v4502_v56 = vld [vmem:[#allocation5 + $0x80] sm:$0xf0]  ;;  %v5071_v15 = vld [vmem:[#allocation5 + $0x1ec] sm:$0xf] }
  0xce   :  { %9445 = vst [vmem:[#allocation102_spill] sm:$0xff] %v6008_v40  ;;  %1262 = vmatpush.bf16.msrb.mxu2 %v5998_v3  ;;  %v6020_v11 = vpop.f32.mrf.mxu3  ;;  %1295 = vmatpush.bf16.msra.mxu0 %v6008_v40  ;;  %v6023_v24 = vpop.f32.mrf.mxu0  ;;  %v4694_v1 = vld [vmem:[#allocation5 + $0x200] sm:$0xf0] }
  0xcf   :  { %9446 = vst [vmem:[#allocation103_spill] sm:$0xff] %v6012_v45  ;;  %v6026_v26 = vpop.f32.mrf.mxu1  ;;  %v5023_v45 = vld [vmem:[#allocation5 + $0x6c] sm:$0xf]  ;;  %v5102_v3 = vld [vmem:[#allocation5 + $0x2e4] sm:$0xf] }
  0xd0   :  { %1276 = vmatpush.bf16.msrb.mxu3 %v6000_v22  ;;  %9447 = vst [vmem:[#allocation104_spill] sm:$0xff] %v6014_v58 }
  0xd1   :  { %9448 = vst [vmem:[#allocation105_spill] sm:$0xff] %v6016_v34 }
  0xd2   :  { %9449 = vst [vmem:[#allocation106_spill] sm:$0xff] %v6018_v53  ;;  %1263 = vmatpush.bf16.msrb.mxu2 %v6014_v58 }
  0xd3   :  { %9450 = vst [vmem:[#allocation107_spill] sm:$0xff] %v6020_v11  ;;  %v6038_v11 = vor.u32 %v5029_v21, %v4526_v6  ;;  %v6052_v21 = vor.u32 %v5071_v15, %v4694_v1  ;;  %v5017_v6 = vld [vmem:[#allocation5 + $0x3c] sm:$0xf]  ;;  %v5011_v1 = vld [vmem:[#allocation5 + $0xc] sm:$0xf] }
  0xd4   :  { %9451 = vst [vmem:[#allocation108_spill] sm:$0xff] %v6023_v24  ;;  %1277 = vmatpush.bf16.msrb.mxu3 %v6016_v34  ;;  %v6036_v24 = vpop.f32.mrf.mxu2  ;;  %v5059_v34 = vld [vmem:[#allocation5 + $0x18c] sm:$0xf] }
  0xd5   :  { %9452 = vst [vmem:[#allocation109_spill] sm:$0xff] %v6026_v26  ;;  %v6040_v26 = vor.u32 %v5077_v10, %v4718_v7  ;;  %v4478_v10 = vld [vmem:[#allocation5 + $0x50] sm:$0xf0]  ;;  %v5065_v7 = vld [vmem:[#allocation5 + $0x1bc] sm:$0xf] }
  0xd6   :  { %9453 = vst [vmem:[#allocation110_spill] sm:$0xff] %v6030_v14  ;;  %1264 = vmatpush.bf16.msrb.mxu2 %v6030_v14  ;;  %v6042_v40 = vpop.f32.mrf.mxu3  ;;  %v6044_v51 = vpop.f32.mrf.mxu0  ;;  %v6050_v14 = vor.u32 %v5023_v45, %v4502_v56  ;;  %v6064_v56 = vor.u32 %v5017_v6, %v4478_v10 }
  0xd7   :  { %9454 = vst [vmem:[#allocation111_spill] sm:$0xff] %v6032_v47  ;;  %v6046_v53 = vpop.f32.mrf.mxu1 }
  0xd8   :  { %1278 = vmatpush.bf16.msrb.mxu3 %v6032_v47  ;;  %9455 = vst [vmem:[#allocation112_spill] sm:$0xff] %v6036_v24  ;;  %v4652_v24 = vld [vmem:[#allocation5 + $0x190] sm:$0xf]  ;;  %v4454_v47 = vld [vmem:[#allocation5 + $0x20] sm:$0xf0] }
  0xd9   :  { %9456 = vst [vmem:[#allocation113_spill] sm:$0xff] %v6038_v11  ;;  %4431 = vmatmul.msk.bf16.gmra.mxu0 %vm220_vm0, %v5748_v20 }
  0xda   :  { %9457 = vst [vmem:[#allocation114_spill] sm:$0xff] %v6040_v26  ;;  %1265 = vmatpush.bf16.msrb.mxu2 %v6038_v11  ;;  %4439 = vmatmul.msk.bf16.gmra.mxu1 %vm220_vm0, %v5748_v20 }
  0xdb   :  { %9458 = vst [vmem:[#allocation115_spill] sm:$0xff] %v6042_v40  ;;  %v4670_v40 = vld [vmem:[#allocation5 + $0x1d0] sm:$0xf0] }
  0xdc   :  { %9459 = vst [vmem:[#allocation116_spill] sm:$0xff] %v6044_v51  ;;  %1279 = vmatpush.bf16.msrb.mxu3 %v6040_v26  ;;  %v4460_v51 = vld [vmem:[#allocation5 + $0x10] sm:$0xf]  ;;  %v5063_v26 = vld [vmem:[#allocation5 + $0x1a4] sm:$0xf0]  ;;  %v6062_v45 = vpop.f32.mrf.mxu2  ;;  %v6066_v15 = vor.u32 %v5065_v7, %v4670_v40 }
  0xdd   :  { %9460 = vst [vmem:[#allocation117_spill] sm:$0xff] %v6046_v53  ;;  %v5015_v53 = vld [vmem:[#allocation5 + $0x24] sm:$0xf0]  ;;  %v6068_v58 = vor.u32 %v5063_v26, %v4652_v24  ;;  %v6082_v26 = vor.u32 %v5011_v1, %v4454_v47  ;;  %v5048_v7 = vld [vmem:[#allocation5 + $0x134] sm:$0xf] }
  0xde   :  { %9461 = vst [vmem:[#allocation118_spill] sm:$0xff] %v6050_v14  ;;  %v6058_v11 = vor.u32 %v5015_v53, %v4460_v51  ;;  %1266 = vmatpush.bf16.msrb.mxu2 %v6050_v14  ;;  %v6070_v20 = vpop.f32.mrf.mxu3  ;;  %v4646_v53 = vld [vmem:[#allocation5 + $0x1a0] sm:$0xf0]  ;;  %v6073_v14 = vpop.f32.mrf.mxu0 }
  0xdf   :  { %9462 = vst [vmem:[#allocation119_spill] sm:$0xff] %v6052_v21  ;;  %v5054_v51 = vld [vmem:[#allocation5 + $0x164] sm:$0xf]  ;;  %1310 = vmatpush.bf16.msra.mxu1 %v6068_v58  ;;  %v6077_v40 = vpop.f32.mrf.mxu1  ;;  %v6084_v24 = vor.u32 %v5059_v34, %v4646_v53  ;;  %v4582_v53 = vld [vmem:[#allocation5 + $0x118] sm:$0xf0] }
  0xe0   :  { %9463 = vst [vmem:[#allocation120_spill] sm:$0xff] %v6058_v11  ;;  %1280 = vmatpush.bf16.msrb.mxu3 %v6052_v21  ;;  %1296 = vmatpush.bf16.msra.mxu0 %v6058_v11  ;;  %v4630_v21 = vld [vmem:[#allocation5 + $0x178] sm:$0xf0] }
  0xe1   :  { %9464 = vst [vmem:[#allocation121_spill] sm:$0xff] %v6062_v45  ;;  %v4822_v45 = vld [vmem:[#allocation5 + $0x2f8] sm:$0xf0]  ;;  %v6086_v6 = vor.u32 %v5054_v51, %v4630_v21  ;;  %v5090_v51 = vld [vmem:[#allocation5 + $0x284] sm:$0xf] }
  0xe2   :  { %9465 = vst [vmem:[#allocation122_spill] sm:$0xff] %v6064_v56  ;;  %1267 = vmatpush.bf16.msrb.mxu2 %v6064_v56  ;;  %v6088_v10 = vor.u32 %v5102_v3, %v4822_v45  ;;  %v5042_v45 = vld [vmem:[#allocation5 + $0x104] sm:$0xf] }
  0xe3   :  { %9466 = vst [vmem:[#allocation123_spill] sm:$0xff] %v6066_v15  ;;  %1562 = vmatpush.bf16.msrb.mxu1 %v5655_v37 }
  0xe4   :  { %9467 = vst [vmem:[#allocation124_spill] sm:$0xff] %v6068_v58  ;;  %1548 = vmatpush.bf16.msrb.mxu0 %v5653_v36  ;;  %1281 = vmatpush.bf16.msrb.mxu3 %v6066_v15  ;;  %v4798_v36 = vld [vmem:[#allocation5 + $0x2c8] sm:$0xf0]  ;;  %v6094_v47 = vpop.f32.mrf.mxu2 }
  0xe5   :  { %9468 = vst [vmem:[#allocation125_spill] sm:$0xff] %v6070_v20  ;;  %v5096_v20 = vld [vmem:[#allocation5 + $0x2b4] sm:$0xf] }
  0xe6   :  { %9469 = vst [vmem:[#allocation126_spill] sm:$0xff] %v6073_v14  ;;  %v4606_v14 = vld [vmem:[#allocation5 + $0x148] sm:$0xf0]  ;;  %1268 = vmatpush.bf16.msrb.mxu2 %v6082_v26  ;;  %v6098_v34 = vpop.f32.mrf.mxu3  ;;  %v6102_v21 = vor.u32 %v5096_v20, %v4798_v36  ;;  %v6104_v1 = vpop.f32.mrf.mxu0  ;;  %v6114_v36 = vor.u32 %v5042_v45, %v4582_v53  ;;  %v5036_v20 = vld [vmem:[#allocation5 + $0xd4] sm:$0xf] }
  0xe7   :  { %9470 = vst [vmem:[#allocation127_spill] sm:$0xff] %v6077_v40  ;;  %1563 = vmatpush.bf16.msrb.mxu1 %v5674_v46  ;;  %v6100_v3 = vor.u32 %v5048_v7, %v4606_v14  ;;  %v4774_v40 = vld [vmem:[#allocation5 + $0x298] sm:$0xf0]  ;;  %v4558_v7 = vld [vmem:[#allocation5 + $0xe8] sm:$0xf0] }
  0xe8   :  { %9471 = vst [vmem:[#allocation128_spill] sm:$0xff] %v6082_v26  ;;  %1549 = vmatpush.bf16.msrb.mxu0 %v5672_v42  ;;  %1282 = vmatpush.bf16.msrb.mxu3 %v6084_v24  ;;  %v6116_v14 = vor.u32 %v5090_v51, %v4774_v40  ;;  %v6130_v45 = vor.u32 %v5036_v20, %v4558_v7  ;;  %v4510_v7 = vld [vmem:[#allocation5 + $0x88] sm:$0xf0] }
  0xe9   :  { %9472 = vst [vmem:[#allocation129_spill] sm:$0xff] %v6084_v24  ;;  %1269 = vmatmul.bf16.vlgmr.msrb.gmra.mxu2 %v9406_v59  ;;  %4432 = vmatmul.msk.bf16.gmra.mxu0 %vm220_vm0, %v5791_v63 }
  0xea   :  { %9473 = vst [vmem:[#allocation130_spill] sm:$0xff] %v6094_v47  ;;  %1317 = vmatpush.bf16.msra.mxu2 %v6086_v6  ;;  %v6109_v47 = vpop.f32.mrf.mxu1  ;;  %4440 = vmatmul.msk.bf16.gmra.mxu1 %vm220_vm0, %v5791_v63  ;;  %v5030_v63 = vld [vmem:[#allocation5 + $0xa4] sm:$0xf] }
  0xeb   :  { %9474 = vst [vmem:[#allocation131_spill] sm:$0xff] %v6098_v34  ;;  %1283 = vmatmul.bf16.vlgmr.msrb.gmra.mxu3 %v9406_v59  ;;  %1564 = vmatpush.bf16.msrb.mxu1 %v5693_v57  ;;  %v4534_v57 = vld [vmem:[#allocation5 + $0xb8] sm:$0xf0] }
  0xec   :  { %1331 = vmatpush.bf16.msra.mxu3 %v6088_v10  ;;  %9475 = vst [vmem:[#allocation132_spill] sm:$0xff] %v6104_v1  ;;  %1550 = vmatpush.bf16.msrb.mxu0 %v5691_v55  ;;  %v5084_v1 = vld [vmem:[#allocation5 + $0x254] sm:$0xf]  ;;  %v6123_v34 = vpop.f32.mrf.mxu2  ;;  %v5078_v55 = vld [vmem:[#allocation5 + $0x224] sm:$0xf]  ;;  %v6142_v20 = vor.u32 %v5030_v63, %v4534_v57 }
  0xed   :  { %9476 = vst [vmem:[#allocation133_spill] sm:$0xff] %v6109_v47  ;;  %v4750_v47 = vld [vmem:[#allocation5 + $0x268] sm:$0xf0] }
  0xee   :  { %1318 = vmatpush.bf16.msra.mxu2 %v6100_v3  ;;  %9477 = vst [vmem:[#allocation134_spill] sm:$0xff] %v6123_v34  ;;  %v6128_v40 = vpop.f32.mrf.mxu3  ;;  %v6132_v53 = vor.u32 %v5084_v1, %v4750_v47  ;;  %v6134_v51 = vpop.f32.mrf.mxu0  ;;  %v5024_v1 = vld [vmem:[#allocation5 + $0x74] sm:$0xf] }
  0xef   :  { %1565 = vmatpush.bf16.msrb.mxu1 %v5712_v0  ;;  %9478 = vst [vmem:[#allocation135_spill] sm:$0xff] %v6128_v40  ;;  %v4702_v40 = vld [vmem:[#allocation5 + $0x208] sm:$0xf0]  ;;  %v6154_v57 = vor.u32 %v5024_v1, %v4510_v7  ;;  %v5467_v7 = vld [vmem:[%s9113_s0 + $0x38] sm:$0xff] }
  0xf0   :  { %1332 = vmatpush.bf16.msra.mxu3 %v6102_v21  ;;  %1551 = vmatpush.bf16.msrb.mxu0 %v5710_v62  ;;  %9479 = vst [vmem:[#allocation136_spill] sm:$0xff] %v6132_v53  ;;  %v4726_v62 = vld [vmem:[#allocation5 + $0x238] sm:$0xf0] }
  0xf1   :  { %9480 = vst [vmem:[#allocation137_spill] sm:$0xff] %v6134_v51  ;;  %v6144_v47 = vor.u32 %v5078_v55, %v4726_v62  ;;  %v5072_v51 = vld [vmem:[#allocation5 + $0x1f4] sm:$0xf]  ;;  %v5018_v62 = vld [vmem:[#allocation5 + $0x44] sm:$0xf] }
  0xf2   :  { %1319 = vmatpush.bf16.msra.mxu2 %v6114_v36  ;;  %v6136_v46 = vpop.f32.mrf.mxu1  ;;  %9485 = vst [vmem:[#allocation142_spill] sm:$0xff] %v6154_v57  ;;  %v6156_v55 = vor.u32 %v5072_v51, %v4702_v40  ;;  %v5012_v51 = vld [vmem:[#allocation5 + $0x14] sm:$0xf] }
  0xf3   :  { %9481 = vst [vmem:[#allocation138_spill] sm:$0xff] %v6136_v46  ;;  %1566 = vmatpush.bf16.msrb.mxu1 %v5731_v9  ;;  %v4486_v9 = vld [vmem:[#allocation5 + $0x58] sm:$0xf0] }
  0xf4   :  { %1333 = vmatpush.bf16.msra.mxu3 %v6116_v14  ;;  %1552 = vmatpush.bf16.msrb.mxu0 %v5729_v5  ;;  %9482 = vst [vmem:[#allocation139_spill] sm:$0xff] %v6144_v47  ;;  %v6147_v34 = vpop.f32.mrf.mxu2  ;;  %v5066_v5 = vld [vmem:[#allocation5 + $0x1c4] sm:$0xf]  ;;  %v6166_v1 = vor.u32 %v5018_v62, %v4486_v9 }
  0xf5   :  { %9483 = vst [vmem:[#allocation140_spill] sm:$0xff] %v6147_v34 }
  0xf6   :  { %1320 = vmatpush.bf16.msra.mxu2 %v6130_v45  ;;  %v6152_v46 = vpop.f32.mrf.mxu3  ;;  %9486 = vst [vmem:[#allocation143_spill] sm:$0xff] %v6156_v55  ;;  %v6158_v63 = vpop.f32.mrf.mxu0 }
  0xf7   :  { %1567 = vmatpush.bf16.msrb.mxu1 %v5737_v13  ;;  %9484 = vst [vmem:[#allocation141_spill] sm:$0xff] %v6152_v46  ;;  %v4654_v46 = vld [vmem:[#allocation5 + $0x1a8] sm:$0xf0] }
  0xf8   :  { %1334 = vmatpush.bf16.msra.mxu3 %v6132_v53  ;;  %1553 = vmatpush.bf16.msrb.mxu0 %v5734_v12  ;;  %9487 = vst [vmem:[#allocation144_spill] sm:$0xff] %v6158_v63  ;;  %v4678_v12 = vld [vmem:[#allocation5 + $0x1d8] sm:$0xf0]  ;;  %v5060_v63 = vld [vmem:[#allocation5 + $0x194] sm:$0xf] }
  0xf9   :  { %9489 = vst [vmem:[#allocation146_spill] sm:$0xff] %v6166_v1  ;;  %v6168_v40 = vor.u32 %v5066_v5, %v4678_v12  ;;  %4433 = vmatmul.msk.bf16.gmra.mxu0 %vm220_vm0, %v5467_v7  ;;  %v6185_v12 = vor.u32 %v5060_v63, %v4654_v46 }
  0xfa   :  { %1321 = vmatpush.bf16.msra.mxu2 %v6142_v20  ;;  %v6160_v0 = vpop.f32.mrf.mxu1  ;;  %4441 = vmatmul.msk.bf16.gmra.mxu1 %vm220_vm0, %v5467_v7 }
  0xfb   :  { %9488 = vst [vmem:[#allocation145_spill] sm:$0xff] %v6160_v0  ;;  %1568 = vmatpush.bf16.msrb.mxu1 %v5743_v19  ;;  %v4462_v0 = vld [vmem:[#allocation5 + $0x28] sm:$0xf0] }
  0xfc   :  { %1335 = vmatpush.bf16.msra.mxu3 %v6144_v47  ;;  %1554 = vmatpush.bf16.msrb.mxu0 %v5740_v18  ;;  %9490 = vst [vmem:[#allocation147_spill] sm:$0xff] %v6168_v40  ;;  %v6176_v34 = vpop.f32.mrf.mxu2  ;;  %v6183_v9 = vor.u32 %v5012_v51, %v4462_v0 }
  0xfd   :  { %9491 = vst [vmem:[#allocation148_spill] sm:$0xff] %v6176_v34  ;;  %v539_v34 = vld [vmem:[%s9114_s1] sm:$0xff] }
  0xfe   :  { %1322 = vmatpush.bf16.msra.mxu2 %v6154_v57  ;;  %v6181_v5 = vpop.f32.mrf.mxu3  ;;  %9493 = vst [vmem:[#allocation150_spill] sm:$0xff] %v6183_v9  ;;  %v6187_v62 = vpop.f32.mrf.mxu0  ;;  %646 = vperm.xlu0 %5137, %v539_v34   ;;  %v540_v34 = vld [vmem:[%s9114_s1 + $0x8] sm:$0xff] }
  0xff   :  { %1569 = vmatpush.bf16.msrb.mxu1 %v5767_v35  ;;  %9492 = vst [vmem:[#allocation149_spill] sm:$0xff] %v6181_v5  ;;  %v9507_v5 = vld [vmem:[#allocation80_spill] sm:$0xff] }
 0x100   :  { %1336 = vmatpush.bf16.msra.mxu3 %v6156_v55  ;;  %1555 = vmatpush.bf16.msrb.mxu0 %v5760_v29  ;;  %9494 = vst [vmem:[#allocation151_spill] sm:$0xff] %v6185_v12  ;;  %v9544_v35 = vld [vmem:[#allocation56_spill] sm:$0xff] }
 0x101   :  { %9495 = vst [vmem:[#allocation152_spill] sm:$0xff] %v6187_v62 }
 0x102   :  { %1323 = vmatpush.bf16.msra.mxu2 %v6166_v1  ;;  %v6189_v7 = vpop.f32.mrf.mxu1 }
 0x103   :  { %9496 = vst [vmem:[#allocation153_spill] sm:$0xff] %v6189_v7 }
 0x104   :  { %1337 = vmatpush.bf16.msra.mxu3 %v6168_v40  ;;  %v6200_v46 = vpop.f32.mrf.mxu2 }
 0x105   :  { %9497 = vst [vmem:[#allocation154_spill] sm:$0xff] %v6200_v46 }
 0x106   :  { %1324 = vmatpush.bf16.msra.mxu2 %v6183_v9  ;;  %v6202_v0 = vpop.f32.mrf.mxu3  ;;  %v6204_v63 = vpop.f32.mrf.mxu0  ;;  %649 = vperm.xlu0 %5137, %v540_v34  }
 0x107   :  { %9498 = vst [vmem:[#allocation155_spill] sm:$0xff] %v6202_v0 }
 0x108   :  { %1338 = vmatpush.bf16.msra.mxu3 %v6185_v12 }
 0x109   :  { %1325 = vmatmul.bf16.vlgmr.msra.gmra.mxu2 %v9406_v59  ;;  %1297 = vmatmul.bf16.vlgmr.msra.gmra.mxu0 %v9406_v59 }
 0x10a   :  { %1576 = vmatpush.bf16.msrb.mxu2 %v5770_v43  ;;  %v6207_v51 = vpop.f32.mrf.mxu1  ;;  %1311 = vmatmul.bf16.vlgmr.msra.gmra.mxu1 %v9406_v59 }
 0x10b   :  { %1339 = vmatmul.bf16.vlgmr.msra.gmra.mxu3 %v9406_v59  ;;  %1618 = vmatpush.bf16.msra.mxu1 %v5890_v32 }
 0x10c   :  { %1590 = vmatpush.bf16.msrb.mxu3 %v5772_v44  ;;  %v6216_v7 = vpop.f32.mrf.mxu2  ;;  %1604 = vmatpush.bf16.msra.mxu0 %v5888_v31 }
 0x10d   :  { %9499 = vst [vmem:[#allocation156_spill] sm:$0xff] %v6216_v7 }
 0x10e   :  { %1577 = vmatpush.bf16.msrb.mxu2 %v5778_v50  ;;  %v6220_v62 = vpop.f32.mrf.mxu3  ;;  %v6223_v0 = vpop.f32.mrf.mxu0 }
 0x10f   :  { %9500 = vst [vmem:[#allocation157_spill] sm:$0xff] %v6220_v62  ;;  %1619 = vmatpush.bf16.msra.mxu1 %v5902_v2 }
 0x110   :  { %1591 = vmatpush.bf16.msrb.mxu3 %v5780_v52  ;;  %1605 = vmatpush.bf16.msra.mxu0 %v5900_v38  ;;  %v9521_v38 = vld [vmem:[#allocation105_spill] sm:$0xff] }
 0x112   :  { %1578 = vmatpush.bf16.msrb.mxu2 %v5784_v60  ;;  %v6225_v46 = vpop.f32.mrf.mxu1 }
 0x113   :  { %1620 = vmatpush.bf16.msra.mxu1 %v5921_v33  ;;  %v9510_v33 = vld [vmem:[#allocation47_spill] sm:$0xff] }
 0x114   :  { %1592 = vmatpush.bf16.msrb.mxu3 %v5786_v61  ;;  %v6232_v59 = vpop.f32.mrf.mxu2  ;;  %1606 = vmatpush.bf16.msra.mxu0 %v5919_v48  ;;  %v9519_v48 = vld [vmem:[#allocation90_spill] sm:$0xff] }
 0x115   :  { %9501 = vst [vmem:[#allocation158_spill] sm:$0xff] %v6232_v59 }
 0x116   :  { %1579 = vmatpush.bf16.msrb.mxu2 %v5795_v4  ;;  %v6236_v34 = vpop.f32.mrf.mxu3  ;;  %v6239_v62 = vpop.f32.mrf.mxu0 }
 0x117   :  { %9502 = vst [vmem:[#allocation159_spill] sm:$0xff] %v6236_v34  ;;  %1621 = vmatpush.bf16.msra.mxu1 %v5928_v17  ;;  %v9511_v17 = vld [vmem:[#allocation46_spill] sm:$0xff] }
 0x118   :  { %1593 = vmatpush.bf16.msrb.mxu3 %v5797_v8  ;;  %9503 = vst [vmem:[#allocation160_spill] sm:$0xff] %v6239_v62  ;;  %1607 = vmatpush.bf16.msra.mxu0 %v5926_v16  ;;  %v9513_v16 = vld [vmem:[#allocation82_spill] sm:$0xff] }
 0x11a   :  { %1580 = vmatpush.bf16.msrb.mxu2 %v5813_v25  ;;  %v6241_v7 = vpop.f32.mrf.mxu1  ;;  %v637_v25 = vld [vmem:[%s9118_s5] sm:$0x3] }
 0x11b   :  { %9504 = vst [vmem:[#allocation161_spill] sm:$0xff] %v6241_v7  ;;  %1622 = vmatpush.bf16.msra.mxu1 %v5942_v30  ;;  %v9515_v30 = vld [vmem:[#allocation100_spill] sm:$0xff] }
 0x11c   :  { %1594 = vmatpush.bf16.msrb.mxu3 %v5816_v28  ;;  %v6248_v59 = vpop.f32.mrf.mxu2  ;;  %1608 = vmatpush.bf16.msra.mxu0 %v9507_v5 }
 0x11d   :  { %9505 = vst [vmem:[#allocation162_spill] sm:$0xff] %v6248_v59  ;;  %v9512_v59 = vld [vmem:[#allocation83_spill] sm:$0xff] }
 0x11e   :  { %1581 = vmatpush.bf16.msrb.mxu2 %v5821_v39  ;;  %v6252_v34 = vpop.f32.mrf.mxu3  ;;  %v6255_v7 = vpop.f32.mrf.mxu0 }
 0x11f   :  { %9506 = vst [vmem:[#allocation163_spill] sm:$0xff] %v6252_v34  ;;  %1623 = vmatpush.bf16.msra.mxu1 %v9512_v59  ;;  %v9522_v59 = vld [vmem:[#allocation104_spill] sm:$0xff] }
 0x120   :  { %1595 = vmatpush.bf16.msrb.mxu3 %v5823_v41  ;;  %9508 = vst [vmem:[#allocation164_spill] sm:$0xff] %v6255_v7  ;;  %1609 = vmatpush.bf16.msra.mxu0 %v9513_v16  ;;  %v9516_v7 = vld [vmem:[#allocation91_spill] sm:$0xff]  ;;  %v9523_v16 = vld [vmem:[#allocation93_spill] sm:$0xff] }
 0x122   :  { %1582 = vmatpush.bf16.msrb.mxu2 %v5827_v49  ;;  %v6257_v62 = vpop.f32.mrf.mxu1 }
 0x123   :  { %9509 = vst [vmem:[#allocation165_spill] sm:$0xff] %v6257_v62  ;;  %1624 = vmatpush.bf16.msra.mxu1 %v9516_v7 }
 0x124   :  { %1596 = vmatpush.bf16.msrb.mxu3 %v5829_v54  ;;  %v6266_v34 = vpop.f32.mrf.mxu2  ;;  %1610 = vmatpush.bf16.msra.mxu0 %v9519_v48 }
 0x125   :  { %9514 = vst [vmem:[#allocation166_spill] sm:$0xff] %v6266_v34  ;;  %v9525_v34 = vld [vmem:[#allocation111_spill] sm:$0xff] }
 0x126   :  { %1583 = vmatpush.bf16.msrb.mxu2 %v9511_v17  ;;  %v6270_v62 = vpop.f32.mrf.mxu3  ;;  %v6272_v5 = vpop.f32.mrf.mxu0  ;;  %v9545_v17 = vld [vmem:[#allocation51_spill] sm:$0xff] }
 0x127   :  { %9517 = vst [vmem:[#allocation167_spill] sm:$0xff] %v6270_v62  ;;  %1625 = vmatpush.bf16.msra.mxu1 %v9523_v16 }
 0x128   :  { %1597 = vmatpush.bf16.msrb.mxu3 %v9510_v33  ;;  %9518 = vst [vmem:[#allocation168_spill] sm:$0xff] %v6272_v5 }
 0x12a   :  { %1632 = vmatpush.bf16.msra.mxu2 %v5984_v27  ;;  %v6275_v2 = vpop.f32.mrf.mxu1 }
 0x12b   :  { %9520 = vst [vmem:[#allocation169_spill] sm:$0xff] %v6275_v2  ;;  %v9530_v2 = vld [vmem:[#allocation113_spill] sm:$0xff] }
 0x12c   :  { %1646 = vmatpush.bf16.msra.mxu3 %v5986_v23  ;;  %v1186_v62 = vpop.f32.mrf.mxu2  ;;  %v9529_v23 = vld [vmem:[#allocation114_spill] sm:$0xff] }
 0x12e   :  { %1633 = vmatpush.bf16.msra.mxu2 %v9515_v30  ;;  %v9526_v30 = vld [vmem:[#allocation110_spill] sm:$0xff]  ;;  %v6283_v7 = vpop.f32.mrf.mxu0  ;;  %v1200_v48 = vpop.f32.mrf.mxu3 }
 0x12f   :  { %9527 = vst [vmem:[#allocation170_spill] sm:$0xff] %v6283_v7 }
 0x130   :  { %1647 = vmatpush.bf16.msra.mxu3 %v6000_v22  ;;  %v9524_v22 = vld [vmem:[#allocation92_spill] sm:$0xff] }
 0x131   :  { %1611 = vmatpush.bf16.msra.mxu0 %v9524_v22 }
 0x132   :  { %1634 = vmatpush.bf16.msra.mxu2 %v9522_v59  ;;  %v6285_v5 = vpop.f32.mrf.mxu1  ;;  %v9532_v59 = vld [vmem:[#allocation118_spill] sm:$0xff] }
 0x133   :  { %9528 = vst [vmem:[#allocation171_spill] sm:$0xff] %v6285_v5 }
 0x134   :  { %1648 = vmatpush.bf16.msra.mxu3 %v9521_v38  ;;  %v9531_v38 = vld [vmem:[#allocation119_spill] sm:$0xff] }
 0x136   :  { %1635 = vmatpush.bf16.msra.mxu2 %v9526_v30  ;;  %v6291_v16 = vpop.f32.mrf.mxu0  ;;  %v1202_v7 = vpop.f32.mrf.mxu3 }
 0x137   :  { %9533 = vst [vmem:[#allocation172_spill] sm:$0xff] %v6291_v16 }
 0x138   :  { %1649 = vmatpush.bf16.msra.mxu3 %v9525_v34  ;;  %v1188_v34 = vpop.f32.mrf.mxu2 }
 0x139   :  { %v1203_v32 = vadd.f32 %v1202_v7, %v1188_v34 }
 0x13a   :  { %1636 = vmatpush.bf16.msra.mxu2 %v9530_v2  ;;  %v6293_v22 = vpop.f32.mrf.mxu1 }
 0x13b   :  { %9534 = vst [vmem:[#allocation173_spill] sm:$0xff] %v6293_v22  ;;  %v6310_v22 = vld [vmem:[%s9116_s3] sm:$0x3f] }
 0x13c   :  { %1650 = vmatpush.bf16.msra.mxu3 %v9529_v23  ;;  %v6320_v30 = vperm.slane %v6310_v22, 1 }
 0x13e   :  { %1637 = vmatpush.bf16.msra.mxu2 %v9532_v59  ;;  %v6299_v5 = vpop.f32.mrf.mxu0  ;;  %v1228_v59 = vpop.f32.mrf.mxu3  ;;  %9542 = vst [vmem:[#allocation181_spill] sm:$0xff] %v6320_v30  ;;  %v304_v29 = vadd.f32 %v9545_v17, %v6320_v30 }
 0x13f   :  { %9535 = vst [vmem:[#allocation174_spill] sm:$0xff] %v6299_v5 }
 0x140   :  { %1651 = vmatpush.bf16.msra.mxu3 %v9531_v38  ;;  %v1214_v38 = vpop.f32.mrf.mxu2 }
 0x141   :  { %v1229_v33 = vadd.f32 %v1228_v59, %v1214_v38 }
 0x142   :  { %1638 = vmatpush.bf16.msra.mxu2 %v6064_v56  ;;  %v6301_v23 = vpop.f32.mrf.mxu1 }
 0x143   :  { %9536 = vst [vmem:[#allocation175_spill] sm:$0xff] %v6301_v23  ;;  %v1201_v23 = vadd.f32 %v1200_v48, %v1186_v62 }
 0x144   :  { %1652 = vmatpush.bf16.msra.mxu3 %v6066_v15 }
 0x146   :  { %1639 = vmatpush.bf16.msra.mxu2 %v6082_v26  ;;  %v6303_v2 = vpop.f32.mrf.mxu0  ;;  %v1230_v26 = vpop.f32.mrf.mxu3 }
 0x147   :  { %9537 = vst [vmem:[#allocation176_spill] sm:$0xff] %v6303_v2 }
 0x148   :  { %1653 = vmatpush.bf16.msra.mxu3 %v6084_v24  ;;  %v1216_v15 = vpop.f32.mrf.mxu2  ;;  %v6313_v24 = vperm.slane %v6310_v22, 0 }
 0x149   :  { %v1231_v59 = vadd.f32 %v1230_v26, %v1216_v15 }
 0x14a   :  { %v6305_v16 = vpop.f32.mrf.mxu1  ;;  %9539 = vst [vmem:[#allocation178_spill] sm:$0xff] %v6313_v24  ;;  %v257_v27 = vadd.f32 %v9544_v35, %v6313_v24 }
 0x14b   :  { %9538 = vst [vmem:[#allocation177_spill] sm:$0xff] %v6305_v16  ;;  %v9543_v16 = vld [vmem:[#allocation50_spill] sm:$0xff] }
 0x14c   :  { %v255_v2 = vadd.f32 %v9543_v16, %v6313_v24  ;;  %v1349_v54 = vadd.f32 %v1203_v32, %v257_v27  ;;  %v6333_v16 = vperm.slane %v6310_v22, 2  ;;  %v9550_v32 = vld [vmem:[#allocation66_spill] sm:$0xff] }
 0x14e   :  { %v6315_v56 = vpop.f32.mrf.mxu0  ;;  %v1345_v31 = vadd.f32 %v1201_v23, %v255_v2  ;;  %v1256_v49 = vpop.f32.mrf.mxu3  ;;  %9548 = vst [vmem:[#allocation51_spill] sm:$0xff] %v6333_v16  ;;  %v4830_v38 = vmul.f32 -1.442695, %v1349_v54  ;;  %v9549_v2 = vld [vmem:[#allocation57_spill] sm:$0xff]  ;;  %v353_v27 = vadd.f32 %v9550_v32, %v6333_v16  ;;  %v6346_v32 = vperm.slane %v6310_v22, 3 }
 0x14f   :  { %9540 = vst [vmem:[#allocation179_spill] sm:$0xff] %v6315_v56  ;;  %v306_v17 = vadd.f32 %v9549_v2, %v6320_v30 }
 0x150   :  { %v4826_v62 = vmul.f32 -1.442695, %v1345_v31  ;;  %v1242_v19 = vpop.f32.mrf.mxu2  ;;  %9553 = vst [vmem:[#allocation182_spill] sm:$0xff] %v6346_v32 }
 0x151   :  { %v1257_v35 = vadd.f32 %v1256_v49, %v1242_v19  ;;  %v1350_v31 = vadd.f32 %v1231_v59, %v306_v17 }
 0x152   :  { %v6317_v5 = vpop.f32.mrf.mxu1  ;;  %5139 = vpow2.f32 %v4826_v62 }
 0x153   :  { %9541 = vst [vmem:[#allocation180_spill] sm:$0xff] %v6317_v5  ;;  %v1346_v5 = vadd.f32 %v1229_v33, %v304_v29  ;;  %5141 = vpow2.f32 %v4830_v38  ;;  %v1347_v23 = vadd.f32 %v1257_v35, %v353_v27  ;;  %v4831_v15 = vmul.f32 -1.442695, %v1350_v31  ;;  %v9556_v35 = vld [vmem:[#allocation76_spill] sm:$0xff] }
 0x154   :  { %v355_v17 = vadd.f32 %v9556_v35, %v6333_v16 }
 0x155   :  { %v4827_v7 = vmul.f32 -1.442695, %v1346_v5  ;;  %v4828_v19 = vmul.f32 -1.442695, %v1347_v23 }
 0x156   :  { %v6328_v56 = vpop.f32.mrf.mxu0  ;;  %v1258_v5 = vpop.f32.mrf.mxu3 }
 0x157   :  { %9546 = vst [vmem:[#allocation50_spill] sm:$0xff] %v6328_v56  ;;  %5143 = vpow2.f32 %v4827_v7 }
 0x158   :  { %v5140_v34 = vpop.eup %5139  ;;  %v1244_v54 = vpop.f32.mrf.mxu2  ;;  %5145 = vpow2.f32 %v4831_v15 }
 0x159   :  { %v5142_v26 = vpop.eup %5141  ;;  %v6343_v62 = vadd.f32 1.0, %v5140_v34  ;;  %v1259_v2 = vadd.f32 %v1258_v5, %v1244_v54  ;;  %5147 = vpow2.f32 %v4828_v19  ;;  %v9557_v54 = vld [vmem:[#allocation68_spill] sm:$0xff] }
 0x15a   :  { %v6330_v48 = vpop.f32.mrf.mxu1  ;;  %v6348_v38 = vadd.f32 1.0, %v5142_v26  ;;  %v402_v5 = vadd.f32 %v9557_v54, %v6346_v32 }
 0x15b   :  { %9547 = vst [vmem:[#allocation56_spill] sm:$0xff] %v6330_v48  ;;  %5149 = vrcp.f32 %v6343_v62  ;;  %v1351_v31 = vadd.f32 %v1259_v2, %v355_v17  ;;  %v6388_v48 = vperm.slane %v6310_v22, 4  ;;  %vm1390_vm1 = vweird.f32 %v6343_v62 }
 0x15c   :  { %5151 = vrcp.f32 %v6348_v38  ;;  %vm1450_vm3 = vweird.f32 %v6348_v38 }
 0x15d   :  { %v5144_v49 = vpop.eup %5143  ;;  %v4832_v35 = vmul.f32 -1.442695, %v1351_v31 }
 0x15e   :  { %v6339_v29 = vpop.f32.mrf.mxu0  ;;  %v6356_v27 = vadd.f32 1.0, %v5144_v49  ;;  %v5146_v26 = vpop.eup %5145 }
 0x15f   :  { %9551 = vst [vmem:[#allocation57_spill] sm:$0xff] %v6339_v29  ;;  %v6369_v17 = vadd.f32 1.0, %v5146_v26 }
 0x160   :  { %5153 = vrcp.f32 %v6356_v27  ;;  %v1409_v18 = vand.u32 2147483647, %v6356_v27  ;;  %v1411_v13 = vand.u32 2147483648, %v6356_v27  ;;  %vm1405_vm7 = vweird.f32 %v6356_v27 }
 0x161   :  { %vm1465_vm13 = vweird.f32 %v6369_v17 }
 0x162   :  { %v6341_v33 = vpop.f32.mrf.mxu1  ;;  %vm6495_vm12 = vcmp.eq.f32.partialorder %v1409_v18, 8.507059e+37  ;;  %v1471_v18 = vand.u32 2147483648, %v6369_v17 }
 0x163   :  { %9552 = vst [vmem:[#allocation66_spill] sm:$0xff] %v6341_v33 }
 0x166   :  { %v6350_v7 = vpop.f32.mrf.mxu0 }
 0x167   :  { %9554 = vst [vmem:[#allocation183_spill] sm:$0xff] %v6350_v7  ;;  %v5148_v7 = vpop.eup %5147 }
 0x168   :  { %v6363_v49 = vpop.eup %5149  ;;  %v6373_v54 = vadd.f32 1.0, %v5148_v7 }
 0x169   :  { %v6371_v29 = vpop.eup %5151  ;;  %v1386_v31 = vmul.f32 %v6363_v49, %v6343_v62  ;;  %vm1391_vm2 = vweird.f32 %v6363_v49 }
 0x16a   :  { %v6352_v59 = vpop.f32.mrf.mxu1  ;;  %v1446_v26 = vmul.f32 %v6371_v29, %v6348_v38  ;;  %vm1451_vm4 = vweird.f32 %v6371_v29  ;;  %vm6458_vm6 = vmor %vm1390_vm1, %vm1391_vm2  ;;  %vm1420_vm2 = vweird.f32 %v6373_v54 }
 0x16b   :  { %9555 = vst [vmem:[#allocation184_spill] sm:$0xff] %v6352_v59  ;;  %vm6474_vm9 = vmor %vm1450_vm3, %vm1451_vm4 }
 0x16c   :  { %v1270_v23 = vpop.f32.mrf.mxu2 }
 0x16e   :  { %v1284_v34 = vpop.f32.mrf.mxu3  ;;  %v6365_v33 = vpop.f32.mrf.mxu0 }
 0x16f   :  { %v1285_v15 = vadd.f32 %v1284_v34, %v1270_v23  ;;  %9558 = vst [vmem:[#allocation76_spill] sm:$0xff] %v6365_v33  ;;  %v6375_v23 = vpop.eup %5153 }
 0x170   :  { %vm1406_vm5 = vweird.f32 %v6375_v23 }
 0x171   :  { %v1348_v59 = vadd.f32 %v1285_v15, %v402_v5  ;;  %vm6478_vm10 = vmor %vm1405_vm7, %vm1406_vm5 }
 0x172   :  { %v6367_v2 = vpop.f32.mrf.mxu1 }
 0x173   :  { %v4829_v19 = vmul.f32 -1.442695, %v1348_v59  ;;  %9559 = vst [vmem:[#allocation68_spill] sm:$0xff] %v6367_v2  ;;  %v9560_v59 = vld [vmem:[#allocation77_spill] sm:$0xff] }
 0x174   :  { %v1272_v34 = vpop.f32.mrf.mxu2  ;;  %v404_v15 = vadd.f32 %v9560_v59, %v6346_v32  ;;  %9561 = vst [vmem:[#allocation77_spill] sm:$0xff] %v6388_v48  ;;  %v6395_v59 = vperm.slane %v6310_v22, 5 }
 0x175   :  { %5155 = vpow2.f32 %v4829_v19  ;;  %v1387_v19 = vsub.f32 1.0, %v1386_v31 }
 0x176   :  { %5157 = vpow2.f32 %v4832_v35  ;;  %v1286_v5 = vpop.f32.mrf.mxu3  ;;  %v1401_v35 = vmul.f32 %v6375_v23, %v6356_v27  ;;  %v6390_v16 = vpop.f32.mrf.mxu0  ;;  %9564 = vst [vmem:[#allocation187_spill] sm:$0xff] %v6395_v59  ;;  %v6413_v22 = vadd.f32 %v6207_v51, %v6395_v59 }
 0x177   :  { %v1287_v33 = vadd.f32 %v1286_v5, %v1272_v34  ;;  %5159 = vrcp.f32 %v6369_v17  ;;  %9562 = vst [vmem:[#allocation185_spill] sm:$0xff] %v6390_v16  ;;  %v1388_v31 = vmul.f32 %v6363_v49, %v1387_v19  ;;  %v1396_v19 = vand.u32 2147483648, %v6343_v62 }
 0x178   :  { %5161 = vrcp.f32 %v6373_v54 }
 0x179   :  { %v1352_v7 = vadd.f32 %v1287_v33, %v404_v15  ;;  %v1447_v33 = vsub.f32 1.0, %v1446_v26  ;;  %v1402_v15 = vsub.f32 1.0, %v1401_v35 }
 0x17a   :  { %v6392_v34 = vpop.f32.mrf.mxu1 }
 0x17b   :  { %v5156_v2 = vpop.eup %5155  ;;  %v4833_v56 = vmul.f32 -1.442695, %v1352_v7  ;;  %9563 = vst [vmem:[#allocation186_spill] sm:$0xff] %v6392_v34  ;;  %v6407_v34 = vadd.f32 %v6204_v63, %v6388_v48  ;;  %v1448_v26 = vmul.f32 %v6371_v29, %v1447_v33  ;;  %v1403_v35 = vmul.f32 %v6375_v23, %v1402_v15 }
 0x17c   :  { %v5158_v5 = vpop.eup %5157  ;;  %v6397_v32 = vadd.f32 1.0, %v5156_v2  ;;  %v6421_v2 = vadd.f32 %v6225_v46, %v6395_v59  ;;  %v1394_v63 = vand.u32 2147483647, %v6343_v62  ;;  %v1454_v59 = vand.u32 2147483647, %v6348_v38 }
 0x17d   :  { %5163 = vpow2.f32 %v4833_v56  ;;  %v6399_v30 = vpop.eup %5159  ;;  %v6409_v16 = vadd.f32 1.0, %v5158_v5  ;;  %v6417_v56 = vadd.f32 %v6223_v0, %v6388_v48  ;;  %v1389_v0 = vadd.f32 %v6363_v49, %v1388_v31 }
 0x17e   :  { %5165 = vrcp.f32 %v6397_v32  ;;  %v6403_v7 = vpop.eup %5161  ;;  %v1461_v46 = vmul.f32 %v6399_v30, %v6369_v17  ;;  %v6435_v33 = vpop.f32.mrf.mxu0  ;;  %v1456_v48 = vand.u32 2147483648, %v6348_v38  ;;  %v1449_v41 = vadd.f32 %v6371_v29, %v1448_v26 }
 0x17f   :  { %v1416_v51 = vmul.f32 %v6403_v7, %v6373_v54  ;;  %5167 = vrcp.f32 %v6409_v16  ;;  %9565 = vst [vmem:[#allocation188_spill] sm:$0xff] %v6435_v33  ;;  %v1393_v39 = vsel %vm6458_vm6, %v6363_v49, %v1389_v0  ;;  %vm1395_vm8 = vcmp.eq.f32.partialorder %v1394_v63, 8.507059e+37 }
 0x180   :  { %v1397_v62 = vor.u32 1.1754944e-38, %v1396_v19  ;;  %v1469_v0 = vand.u32 2147483647, %v6369_v17  ;;  %v1453_v27 = vsel %vm6474_vm9, %v6371_v29, %v1449_v41  ;;  %vm6486_vm11 = vcmp.eq.f32.partialorder %v1454_v59, 8.507059e+37 }
 0x181   :  { %v1417_v26 = vsub.f32 1.0, %v1416_v51  ;;  %v1457_v19 = vor.u32 1.1754944e-38, %v1456_v48  ;;  %v6500_v41 = vperm.slane %v637_v25, 1  ;;  %v6505_v49 = vperm.slane %v637_v25, 0 }
 0x182   :  { %v6437_v15 = vpop.f32.mrf.mxu1  ;;  %v1398_v8 = vsel %vm1395_vm8, %v1397_v62, %v1393_v39  ;;  %vm1466_vm14 = vweird.f32 %v6399_v30  ;;  %vm6519_vm15 = vcmp.eq.f32.partialorder %v1469_v0, 8.507059e+37  ;;  %v1424_v62 = vand.u32 2147483647, %v6373_v54 }
 0x183   :  { %v5164_v5 = vpop.eup %5163  ;;  %9566 = vst [vmem:[#allocation189_spill] sm:$0xff] %v6437_v15  ;;  %v1404_v15 = vadd.f32 %v6375_v23, %v1403_v35  ;;  %v1462_v35 = vsub.f32 1.0, %v1461_v46  ;;  %v1418_v51 = vmul.f32 %v6403_v7, %v1417_v26  ;;  %vm1421_vm0 = vweird.f32 %v6403_v7  ;;  %vm6540_vm3 = vmor %vm1465_vm13, %vm1466_vm14 }
 0x184   :  { %v6442_v24 = vpop.eup %5165  ;;  %v6444_v31 = vadd.f32 1.0, %v5164_v5  ;;  %v1412_v5 = vor.u32 1.1754944e-38, %v1411_v13  ;;  %v6510_v13 = vsel %vm6486_vm11, %v1457_v19, %v1453_v27  ;;  %v1426_v27 = vand.u32 2147483648, %v6373_v54  ;;  %vm6544_vm4 = vmor %vm1420_vm2, %vm1421_vm0 }
 0x185   :  { %v1431_v33 = vmul.f32 %v6442_v24, %v6397_v32  ;;  %v6490_v38 = vpop.eup %5167  ;;  %v1408_v46 = vsel %vm6478_vm10, %v6375_v23, %v1404_v15  ;;  %v1463_v29 = vmul.f32 %v6399_v30, %v1462_v35  ;;  %vm1436_vm1 = vweird.f32 %v6442_v24 }
 0x186   :  { %5169 = vrcp.f32 %v6444_v31  ;;  %v1476_v23 = vmul.f32 %v6490_v38, %v6409_v16  ;;  %v1413_v26 = vsel %vm6495_vm12, %v1412_v5, %v1408_v46  ;;  %vm1435_vm5 = vweird.f32 %v6397_v32 }
 0x187   :  { %v1432_v28 = vsub.f32 1.0, %v1431_v33  ;;  %v1464_v33 = vadd.f32 %v6399_v30, %v1463_v29  ;;  %v1439_v54 = vand.u32 2147483647, %v6397_v32  ;;  %vm6550_vm6 = vcmp.eq.f32.partialorder %v1424_v62, 8.507059e+37  ;;  %vm6556_vm7 = vmor %vm1435_vm5, %vm1436_vm1 }
 0x188   :  { %v1477_v61 = vsub.f32 1.0, %v1476_v23  ;;  %v1472_v23 = vor.u32 1.1754944e-38, %v1471_v18  ;;  %vm1480_vm9 = vweird.f32 %v6409_v16  ;;  %vm1481_vm11 = vweird.f32 %v6490_v38 }
 0x189   :  { %v1433_v48 = vmul.f32 %v6442_v24, %v1432_v28  ;;  %v1298_v28 = vpop.f32.mrf.mxu0  ;;  %vm1440_vm8 = vcmp.eq.f32.partialorder %v1439_v54, 8.507059e+37  ;;  %v6586_v54 = vpop.permute.xlu0 %646  ;;  %vm1495_vm12 = vweird.f32 %v6444_v31  ;;  %vm6601_vm14 = vmor %vm1480_vm9, %vm1481_vm11 }
 0x18a   :  { %v1312_v35 = vpop.f32.mrf.mxu1  ;;  %vm9323_vm2 = vcmp.gt.s32.totalorder %v6586_v54, 0 }
 0x18b   :  { %v1313_v19 = vadd.f32 %v1312_v35, %v1298_v28  ;;  %v1434_v0 = vadd.f32 %v6442_v24, %v1433_v48  ;;  %v1441_v28 = vand.u32 2147483648, %v6397_v32 }
 0x18c   :  { %v1326_v59 = vpop.f32.mrf.mxu2  ;;  %v6512_v39 = vpop.eup %5169 }
 0x18d   :  { %v1491_v63 = vmul.f32 %v6512_v39, %v6444_v31  ;;  %v1438_v32 = vsel %vm6556_vm7, %v6442_v24, %v1434_v0  ;;  %vm1496_vm10 = vweird.f32 %v6512_v39 }
 0x18e   :  { %v1340_v4 = vpop.f32.mrf.mxu3  ;;  %vm6592_vm13 = vmor %vm1495_vm12, %vm1496_vm10 }
 0x18f   :  { %v1341_v15 = vadd.f32 %v1340_v4, %v1326_v59  ;;  %v1419_v4 = vadd.f32 %v6403_v7, %v1418_v51  ;;  %v1492_v5 = vsub.f32 1.0, %v1491_v63  ;;  %v1510_v59 = vadd.f32 %v6505_v49, %v1313_v19 }
 0x190   :  { %v1468_v19 = vsel %vm6540_vm3, %v6399_v30, %v1464_v33  ;;  %v1501_v51 = vand.u32 2147483648, %v6444_v31 }
 0x191   :  { %v1511_v46 = vadd.f32 %v6500_v41, %v1341_v15  ;;  %v1514_v48 = vmul.f32 %v1510_v59, %v1398_v8  ;;  %v1493_v8 = vmul.f32 %v6512_v39, %v1492_v5  ;;  %v1423_v18 = vsel %vm6544_vm4, %v6403_v7, %v1419_v4  ;;  %v1300_v30 = vpop.f32.mrf.mxu0 }
 0x192   :  { %v1442_v59 = vor.u32 1.1754944e-38, %v1441_v28  ;;  %v1314_v33 = vpop.f32.mrf.mxu1  ;;  %v1473_v24 = vsel %vm6519_vm15, %v1472_v23, %v1468_v19  ;;  %v1486_v7 = vand.u32 2147483648, %v6409_v16  ;;  %vm9325_vm4 = vcmp.gt.s32.totalorder %v6586_v54, 7 }
 0x193   :  { %v1515_v35 = vmul.f32 %v1511_v46, %v1413_v26  ;;  %v1427_v26 = vor.u32 1.1754944e-38, %v1426_v27  ;;  %v1518_v62 = vadd.f32 %v1514_v48, %v6407_v34  ;;  %v1315_v0 = vadd.f32 %v1314_v33, %v1300_v30 }
 0x194   :  { %v1328_v27 = vpop.f32.mrf.mxu2  ;;  %v1443_v34 = vsel %vm1440_vm8, %v1442_v59, %v1438_v32  ;;  %v1499_v48 = vand.u32 2147483647, %v6444_v31  ;;  %v9603_v31 = vld [vmem:[#allocation69_spill] sm:$0xff] }
 0x195   :  { %v1519_v63 = vadd.f32 %v1515_v35, %v6413_v22  ;;  %v1478_v22 = vmul.f32 %v6490_v38, %v1477_v61  ;;  %v1494_v61 = vadd.f32 %v6512_v39, %v1493_v8  ;;  %v1428_v5 = vsel %vm6550_vm6, %v1427_v26, %v1423_v18 }
 0x196   :  { %v1342_v46 = vpop.f32.mrf.mxu3  ;;  %v1512_v28 = vadd.f32 %v6505_v49, %v1315_v0  ;;  %v1527_v23 = vsub.f32 1.0, %v1443_v34  ;;  %v1484_v26 = vand.u32 2147483647, %v6409_v16  ;;  %v1526_v19 = vsub.f32 1.0, %v1428_v5 }
 0x197   :  { %5171 = vtanh.f32 %v1519_v63  ;;  %v1343_v35 = vadd.f32 %v1342_v46, %v1328_v27  ;;  %v1479_v25 = vadd.f32 %v6490_v38, %v1478_v22  ;;  %v1534_v32 = vmul.f32 0.0, %v1428_v5  ;;  %v9598_v63 = vld [vmem:[#allocation38_spill] sm:$0xff] }
 0x198   :  { %5173 = vtanh.f32 %v1518_v62  ;;  %v1516_v17 = vmul.f32 %v1512_v28, %v6510_v13  ;;  %v1498_v62 = vsel %vm6592_vm13, %v6512_v39, %v1494_v61  ;;  %v1535_v46 = vmul.f32 0.0, %v1443_v34  ;;  %v6616_v34 = vpop.permute.xlu0 %649 }
 0x199   :  { %v1513_v4 = vadd.f32 %v6500_v41, %v1343_v35  ;;  %v1502_v22 = vor.u32 1.1754944e-38, %v1501_v51  ;;  %v1483_v59 = vsel %vm6601_vm14, %v6490_v38, %v1479_v25  ;;  %v1487_v16 = vor.u32 1.1754944e-38, %v1486_v7 }
 0x19a   :  { %v1520_v27 = vadd.f32 %v1516_v17, %v6417_v56  ;;  %vm1500_vm15 = vcmp.eq.f32.partialorder %v1499_v48, 8.507059e+37  ;;  %vm1485_vm0 = vcmp.eq.f32.partialorder %v1484_v26, 8.507059e+37  ;;  %vm9324_vm1 = vcmp.gt.s32.totalorder %v6616_v34, 7  ;;  %v9595_v17 = vld [vmem:[#allocation28_spill] sm:$0xff]  ;;  %v9597_v26 = vld [vmem:[#allocation39_spill] sm:$0xff] }
 0x19b   :  { %v1517_v29 = vmul.f32 %v1513_v4, %v1473_v24  ;;  %v1503_v30 = vsel %vm1500_vm15, %v1502_v22, %v1498_v62  ;;  %v1488_v39 = vsel %vm1485_vm0, %v1487_v16, %v1483_v59  ;;  %vm9322_vm3 = vcmp.gt.s32.totalorder %v6616_v34, 0  ;;  %vm6632_vm5 = vmpackc.low %vm9324_vm1, %vm9325_vm4  ;;  %v9605_v62 = vld [vmem:[#allocation86_spill] sm:$0xff]  ;;  %v9610_v59 = vld [vmem:[#allocation15_spill] sm:$0xff] }
 0x19c   :  { %v1529_v24 = vsub.f32 1.0, %v1503_v30  ;;  %v1528_v0 = vsub.f32 1.0, %v1488_v39  ;;  %v1537_v5 = vmul.f32 0.0, %v1503_v30  ;;  %v1536_v38 = vmul.f32 0.0, %v1488_v39  ;;  %vm6646_vm6 = vmpackc.low %vm9322_vm3, %vm9323_vm2  ;;  %v9608_v22 = vld [vmem:[#allocation102_spill] sm:$0xff]  ;;  %v9611_v16 = vld [vmem:[#allocation16_spill] sm:$0xff] }
 0x19d   :  { %v5172_v15 = vpop.eup %5171  ;;  %v1521_v8 = vadd.f32 %v1517_v29, %v6421_v2  ;;  %v9612_v30 = vld [vmem:[#allocation17_spill] sm:$0xff]  ;;  %v9613_v39 = vld [vmem:[#allocation35_spill] sm:$0xff]  ;;  %v9623_v29 = vld [vmem:[#allocation42_spill] sm:$0xff] }
 0x19e   :  { %v5174_v18 = vpop.eup %5173  ;;  %v1531_v13 = vmul.f32 %v5172_v15, %v1527_v23  ;;  %v9596_v15 = vld [vmem:[#allocation27_spill] sm:$0xff] }
 0x19f   :  { %v1530_v2 = vmul.f32 %v5174_v18, %v1526_v19  ;;  %5175 = vtanh.f32 %v1521_v8  ;;  %v9599_v19 = vld [vmem:[#allocation49_spill] sm:$0xff]  ;;  %v9600_v8 = vld [vmem:[#allocation48_spill] sm:$0xff]  ;;  %v9625_v23 = vld [vmem:[#allocation43_spill] sm:$0xff] }
 0x1a0   :  { %5177 = vtanh.f32 %v1520_v27  ;;  %v6612_v35 = vadd.f32 %v1535_v46, %v1531_v13  ;;  %v9602_v18 = vld [vmem:[#allocation53_spill] sm:$0xff]  ;;  %v9604_v13 = vld [vmem:[#allocation67_spill] sm:$0xff]  ;;  %v9606_v27 = vld [vmem:[#allocation84_spill] sm:$0xff] }
 0x1a1   :  { %v6614_v33 = vadd.f32 %v1534_v32, %v1530_v2  ;;  %v9601_v32 = vld [vmem:[#allocation55_spill] sm:$0xff]  ;;  %v9607_v46 = vld [vmem:[#allocation106_spill] sm:$0xff]  ;;  %v9609_v2 = vld [vmem:[#allocation12_spill] sm:$0xff] }
 0x1a5   :  { %v5176_v56 = vpop.eup %5175 }
 0x1a6   :  { %v5178_v4 = vpop.eup %5177  ;;  %v1533_v61 = vmul.f32 %v5176_v56, %v1529_v24  ;;  %v9614_v24 = vld [vmem:[#allocation18_spill] sm:$0xff]  ;;  %v9615_v56 = vld [vmem:[#allocation36_spill] sm:$0xff] }
 0x1a7   :  { %v1532_v28 = vmul.f32 %v5178_v4, %v1528_v0  ;;  %v9616_v0 = vld [vmem:[#allocation19_spill] sm:$0xff]  ;;  %v9617_v4 = vld [vmem:[#allocation37_spill] sm:$0xff] }
 0x1a8   :  { %v6619_v7 = vadd.f32 %v1537_v5, %v1533_v61  ;;  %v9618_v61 = vld [vmem:[#allocation20_spill] sm:$0xff] }
 0x1a9   :  { %v6623_v25 = vadd.f32 %v1536_v38, %v1532_v28  ;;  %v9619_v5 = vld [vmem:[#allocation40_spill] sm:$0xff]  ;;  %v9620_v28 = vld [vmem:[#allocation21_spill] sm:$0xff] }
 0x1aa   :  { %v4838_v51 = vpack.c.bf16 %v6619_v7, %v6612_v35  ;;  %v9621_v38 = vld [vmem:[#allocation41_spill] sm:$0xff] }
 0x1ab   :  { %v4835_v48 = vpack.c.bf16 %v6623_v25, %v6614_v33 }
 0x1ac   :  { %4839 = vmatmul.msk.bf16.vlgmr.msrb.gmra.mxu1 %vm6632_vm5, %v4838_v51  ;;  %4845 = vmatmul.msk.bf16.vlgmr.msrb.gmra.mxu3 %vm6632_vm5, %v4838_v51 }
 0x1ad   :  { %4836 = vmatmul.msk.bf16.vlgmr.msrb.gmra.mxu0 %vm6646_vm6, %v4835_v48  ;;  %4842 = vmatmul.msk.bf16.vlgmr.msrb.gmra.mxu2 %vm6646_vm6, %v4835_v48 }
 0x1ae   :  { %1674 = vmatpush.bf16.msrb.mxu1 %v9595_v17  ;;  %1702 = vmatpush.bf16.msrb.mxu3 %v6088_v10 }
 0x1af   :  { %1660 = vmatpush.bf16.msrb.mxu0 %v9596_v15  ;;  %1688 = vmatpush.bf16.msrb.mxu2 %v6086_v6 }
 0x1b2   :  { %1675 = vmatpush.bf16.msrb.mxu1 %v9597_v26  ;;  %1703 = vmatpush.bf16.msrb.mxu3 %v6102_v21 }
 0x1b3   :  { %1661 = vmatpush.bf16.msrb.mxu0 %v9598_v63  ;;  %1689 = vmatpush.bf16.msrb.mxu2 %v6100_v3 }
 0x1b6   :  { %1676 = vmatpush.bf16.msrb.mxu1 %v9599_v19  ;;  %1704 = vmatpush.bf16.msrb.mxu3 %v6116_v14 }
 0x1b7   :  { %1662 = vmatpush.bf16.msrb.mxu0 %v9600_v8  ;;  %1690 = vmatpush.bf16.msrb.mxu2 %v6114_v36 }
 0x1ba   :  { %1677 = vmatpush.bf16.msrb.mxu1 %v9601_v32  ;;  %1705 = vmatpush.bf16.msrb.mxu3 %v6132_v53 }
 0x1bb   :  { %1663 = vmatpush.bf16.msrb.mxu0 %v9602_v18  ;;  %1691 = vmatpush.bf16.msrb.mxu2 %v6130_v45 }
 0x1bc   :  { %4851 = vmatmul.msk.bf16.vlgmr.msra.gmra.mxu1 %vm6632_vm5, %v4838_v51  ;;  %4857 = vmatmul.msk.bf16.vlgmr.msra.gmra.mxu3 %vm6632_vm5, %v4838_v51 }
 0x1bd   :  { %4848 = vmatmul.msk.bf16.vlgmr.msra.gmra.mxu0 %vm6646_vm6, %v4835_v48  ;;  %4854 = vmatmul.msk.bf16.vlgmr.msra.gmra.mxu2 %vm6646_vm6, %v4835_v48 }
 0x1be   :  { %1678 = vmatpush.bf16.msrb.mxu1 %v9603_v31  ;;  %1706 = vmatpush.bf16.msrb.mxu3 %v6144_v47 }
 0x1bf   :  { %1664 = vmatpush.bf16.msrb.mxu0 %v9604_v13  ;;  %1692 = vmatpush.bf16.msrb.mxu2 %v6142_v20 }
 0x1c2   :  { %1679 = vmatpush.bf16.msrb.mxu1 %v9605_v62  ;;  %1707 = vmatpush.bf16.msrb.mxu3 %v6156_v55 }
 0x1c3   :  { %1665 = vmatpush.bf16.msrb.mxu0 %v9606_v27  ;;  %1693 = vmatpush.bf16.msrb.mxu2 %v6154_v57 }
 0x1c6   :  { %1680 = vmatpush.bf16.msrb.mxu1 %v9607_v46  ;;  %1708 = vmatpush.bf16.msrb.mxu3 %v6168_v40  ;;  %v9682_v40 = vld [vmem:[#allocation164_spill] sm:$0xff] }
 0x1c7   :  { %1666 = vmatpush.bf16.msrb.mxu0 %v9608_v22  ;;  %1694 = vmatpush.bf16.msrb.mxu2 %v6166_v1 }
 0x1ca   :  { %1681 = vmatpush.bf16.msrb.mxu1 %v6068_v58  ;;  %1709 = vmatpush.bf16.msrb.mxu3 %v6185_v12 }
 0x1cb   :  { %1667 = vmatpush.bf16.msrb.mxu0 %v6058_v11  ;;  %1695 = vmatpush.bf16.msrb.mxu2 %v6183_v9 }
 0x1cd   :  { %4863 = vmatmul.msk.bf16.vlgmr.msrb.gmra.mxu1 %vm6632_vm5, %v4838_v51  ;;  %4869 = vmatmul.msk.bf16.vlgmr.msrb.gmra.mxu3 %vm6632_vm5, %v4838_v51  ;;  %v9622_v51 = vld [vmem:[#allocation22_spill] sm:$0xff] }
 0x1ce   :  { %4860 = vmatmul.msk.bf16.vlgmr.msrb.gmra.mxu0 %vm6646_vm6, %v4835_v48  ;;  %4866 = vmatmul.msk.bf16.vlgmr.msrb.gmra.mxu2 %vm6646_vm6, %v4835_v48  ;;  %v9624_v48 = vld [vmem:[#allocation23_spill] sm:$0xff] }
 0x1cf   :  { %1914 = vmatpush.bf16.msra.mxu0 %v9609_v2  ;;  %1942 = vmatpush.bf16.msra.mxu2 %v5770_v43 }
 0x1d0   :  { %1928 = vmatpush.bf16.msra.mxu1 %v5655_v37  ;;  %1956 = vmatpush.bf16.msra.mxu3 %v5772_v44 }
 0x1d3   :  { %1915 = vmatpush.bf16.msra.mxu0 %v5672_v42  ;;  %1943 = vmatpush.bf16.msra.mxu2 %v5778_v50  ;;  %v9678_v50 = vld [vmem:[#allocation77_spill] sm:$0xff] }
 0x1d4   :  { %1929 = vmatpush.bf16.msra.mxu1 %v9610_v59  ;;  %1957 = vmatpush.bf16.msra.mxu3 %v5780_v52  ;;  %v9668_v59 = vld [vmem:[#allocation181_spill] sm:$0xff] }
 0x1d7   :  { %1916 = vmatpush.bf16.msra.mxu0 %v9611_v16  ;;  %1944 = vmatpush.bf16.msra.mxu2 %v5784_v60 }
 0x1d8   :  { %1930 = vmatpush.bf16.msra.mxu1 %v9612_v30  ;;  %1958 = vmatpush.bf16.msra.mxu3 %v9613_v39  ;;  %v9626_v39 = vld [vmem:[#allocation24_spill] sm:$0xff]  ;;  %v9666_v30 = vld [vmem:[#allocation178_spill] sm:$0xff] }
 0x1db   :  { %1917 = vmatpush.bf16.msra.mxu0 %v9614_v24  ;;  %1945 = vmatpush.bf16.msra.mxu2 %v9615_v56 }
 0x1dc   :  { %1931 = vmatpush.bf16.msra.mxu1 %v9616_v0  ;;  %1959 = vmatpush.bf16.msra.mxu3 %v9617_v4  ;;  %v9627_v0 = vld [vmem:[#allocation44_spill] sm:$0xff]  ;;  %v9628_v4 = vld [vmem:[#allocation25_spill] sm:$0xff] }
 0x1df   :  { %1918 = vmatpush.bf16.msra.mxu0 %v9618_v61  ;;  %1946 = vmatpush.bf16.msra.mxu2 %v9619_v5  ;;  %v9629_v61 = vld [vmem:[#allocation45_spill] sm:$0xff]  ;;  %v9630_v5 = vld [vmem:[#allocation26_spill] sm:$0xff] }
 0x1e0   :  { %1932 = vmatpush.bf16.msra.mxu1 %v9620_v28  ;;  %1960 = vmatpush.bf16.msra.mxu3 %v9621_v38  ;;  %v9631_v28 = vld [vmem:[#allocation46_spill] sm:$0xff] }
 0x1e1   :  { %v9632_v38 = vld [vmem:[#allocation62_spill] sm:$0xff] }
 0x1e3   :  { %1919 = vmatpush.bf16.msra.mxu0 %v9622_v51  ;;  %1947 = vmatpush.bf16.msra.mxu2 %v9623_v29  ;;  %v9633_v51 = vld [vmem:[#allocation95_spill] sm:$0xff]  ;;  %v9634_v29 = vld [vmem:[#allocation29_spill] sm:$0xff] }
 0x1e4   :  { %1933 = vmatpush.bf16.msra.mxu1 %v9624_v48  ;;  %1961 = vmatpush.bf16.msra.mxu3 %v9625_v23  ;;  %v9635_v48 = vld [vmem:[#allocation47_spill] sm:$0xff] }
 0x1e5   :  { %v9636_v23 = vld [vmem:[#allocation63_spill] sm:$0xff] }
 0x1e7   :  { %1920 = vmatpush.bf16.msra.mxu0 %v9626_v39  ;;  %1948 = vmatpush.bf16.msra.mxu2 %v9627_v0  ;;  %v9637_v39 = vld [vmem:[#allocation96_spill] sm:$0xff] }
 0x1e8   :  { %1934 = vmatpush.bf16.msra.mxu1 %v9628_v4  ;;  %1962 = vmatpush.bf16.msra.mxu3 %v9629_v61  ;;  %v9638_v0 = vld [vmem:[#allocation64_spill] sm:$0xff]  ;;  %v9640_v61 = vld [vmem:[#allocation65_spill] sm:$0xff] }
 0x1e9   :  { %v9639_v4 = vld [vmem:[#allocation100_spill] sm:$0xff] }
 0x1eb   :  { %1921 = vmatpush.bf16.msra.mxu0 %v9630_v5  ;;  %1949 = vmatpush.bf16.msra.mxu2 %v9631_v28  ;;  %v9641_v5 = vld [vmem:[#allocation101_spill] sm:$0xff]  ;;  %v9642_v28 = vld [vmem:[#allocation72_spill] sm:$0xff] }
 0x1ec   :  { %1935 = vmatpush.bf16.msra.mxu1 %v9634_v29  ;;  %1963 = vmatpush.bf16.msra.mxu3 %v9635_v48  ;;  %v9645_v29 = vld [vmem:[#allocation105_spill] sm:$0xff]  ;;  %v9646_v48 = vld [vmem:[#allocation74_spill] sm:$0xff] }
 0x1ef   :  { %1970 = vmatpush.bf16.msrb.mxu0 %v9632_v38  ;;  %1998 = vmatpush.bf16.msrb.mxu2 %v9633_v51  ;;  %v9643_v38 = vld [vmem:[#allocation104_spill] sm:$0xff]  ;;  %v9644_v51 = vld [vmem:[#allocation73_spill] sm:$0xff] }
 0x1f0   :  { %1984 = vmatpush.bf16.msrb.mxu1 %v9636_v23  ;;  %2012 = vmatpush.bf16.msrb.mxu3 %v9637_v39  ;;  %v9647_v23 = vld [vmem:[#allocation110_spill] sm:$0xff]  ;;  %v9648_v39 = vld [vmem:[#allocation75_spill] sm:$0xff] }
 0x1f3   :  { %1971 = vmatpush.bf16.msrb.mxu0 %v9638_v0  ;;  %1999 = vmatpush.bf16.msrb.mxu2 %v9639_v4  ;;  %v9649_v0 = vld [vmem:[#allocation111_spill] sm:$0xff]  ;;  %v9650_v4 = vld [vmem:[#allocation80_spill] sm:$0xff] }
 0x1f4   :  { %1985 = vmatpush.bf16.msrb.mxu1 %v9640_v61  ;;  %2013 = vmatpush.bf16.msrb.mxu3 %v9641_v5  ;;  %v9651_v61 = vld [vmem:[#allocation113_spill] sm:$0xff] }
 0x1f5   :  { %v9652_v5 = vld [vmem:[#allocation81_spill] sm:$0xff] }
 0x1f7   :  { %1972 = vmatpush.bf16.msrb.mxu0 %v9642_v28  ;;  %2000 = vmatpush.bf16.msrb.mxu2 %v9643_v38  ;;  %v9653_v28 = vld [vmem:[#allocation114_spill] sm:$0xff] }
 0x1f8   :  { %1986 = vmatpush.bf16.msrb.mxu1 %v9644_v51  ;;  %2014 = vmatpush.bf16.msrb.mxu3 %v9645_v29  ;;  %v9654_v38 = vld [vmem:[#allocation82_spill] sm:$0xff]  ;;  %v9656_v29 = vld [vmem:[#allocation83_spill] sm:$0xff] }
 0x1f9   :  { %v9655_v51 = vld [vmem:[#allocation118_spill] sm:$0xff] }
 0x1fb   :  { %1973 = vmatpush.bf16.msrb.mxu0 %v9646_v48  ;;  %2001 = vmatpush.bf16.msrb.mxu2 %v9647_v23  ;;  %v9657_v48 = vld [vmem:[#allocation119_spill] sm:$0xff]  ;;  %v9658_v23 = vld [vmem:[#allocation90_spill] sm:$0xff] }
 0x1fc   :  { %1987 = vmatpush.bf16.msrb.mxu1 %v9648_v39  ;;  %2015 = vmatpush.bf16.msrb.mxu3 %v9649_v0  ;;  %v9659_v39 = vld [vmem:[#allocation122_spill] sm:$0xff]  ;;  %v9660_v0 = vld [vmem:[#allocation91_spill] sm:$0xff] }
 0x1ff   :  { %1974 = vmatpush.bf16.msrb.mxu0 %v9650_v4  ;;  %2002 = vmatpush.bf16.msrb.mxu2 %v9651_v61  ;;  %v9661_v4 = vld [vmem:[#allocation123_spill] sm:$0xff]  ;;  %v9662_v61 = vld [vmem:[#allocation92_spill] sm:$0xff] }
 0x200   :  { %1988 = vmatpush.bf16.msrb.mxu1 %v9652_v5  ;;  %2016 = vmatpush.bf16.msrb.mxu3 %v9653_v28  ;;  %v9663_v5 = vld [vmem:[#allocation128_spill] sm:$0xff]  ;;  %v9664_v28 = vld [vmem:[#allocation93_spill] sm:$0xff] }
 0x203   :  { %1975 = vmatpush.bf16.msrb.mxu0 %v9654_v38  ;;  %2003 = vmatpush.bf16.msrb.mxu2 %v9655_v51  ;;  %v9665_v38 = vld [vmem:[#allocation129_spill] sm:$0xff] }
 0x204   :  { %1989 = vmatpush.bf16.msrb.mxu1 %v9656_v29  ;;  %2017 = vmatpush.bf16.msrb.mxu3 %v9657_v48  ;;  %v9667_v48 = vld [vmem:[#allocation60_spill] sm:$0xff] }
 0x205   :  { %v260_v56 = vadd.f32 %v9667_v48, %v9666_v30 }
 0x207   :  { %1976 = vmatpush.bf16.msrb.mxu0 %v9658_v23  ;;  %2004 = vmatpush.bf16.msrb.mxu2 %v9659_v39 }
 0x208   :  { %1990 = vmatpush.bf16.msrb.mxu1 %v9660_v0  ;;  %2018 = vmatpush.bf16.msrb.mxu3 %v9661_v4  ;;  %v9669_v4 = vld [vmem:[#allocation61_spill] sm:$0xff] }
 0x209   :  { %v309_v60 = vadd.f32 %v9669_v4, %v9668_v59  ;;  %v9671_v4 = vld [vmem:[#allocation71_spill] sm:$0xff] }
 0x20b   :  { %1977 = vmatpush.bf16.msrb.mxu0 %v9662_v61  ;;  %2005 = vmatpush.bf16.msrb.mxu2 %v9663_v5 }
 0x20c   :  { %1991 = vmatpush.bf16.msrb.mxu1 %v9664_v28  ;;  %2019 = vmatpush.bf16.msrb.mxu3 %v9665_v38  ;;  %v9670_v28 = vld [vmem:[#allocation70_spill] sm:$0xff] }
 0x20d   :  { %v262_v38 = vadd.f32 %v9670_v28, %v9666_v30 }
 0x229   :  { %v1571_v51 = vpop.f32.mrf.mxu1 }
 0x22a   :  { %v1557_v29 = vpop.f32.mrf.mxu0 }
 0x22b   :  { %v1572_v23 = vadd.f32 %v1571_v51, %v1557_v29 }
 0x22d   :  { %v1716_v24 = vadd.f32 %v1572_v23, %v260_v56 }
 0x22f   :  { %v4870_v39 = vmul.f32 -1.442695, %v1716_v24  ;;  %v1599_v52 = vpop.f32.mrf.mxu3 }
 0x230   :  { %v1585_v0 = vpop.f32.mrf.mxu2 }
 0x231   :  { %5179 = vpow2.f32 %v4870_v39  ;;  %v1600_v61 = vadd.f32 %v1599_v52, %v1585_v0  ;;  %v1573_v5 = vpop.f32.mrf.mxu1  ;;  %v311_v39 = vadd.f32 %v9671_v4, %v9668_v59  ;;  %v9674_v59 = vld [vmem:[#allocation182_spill] sm:$0xff] }
 0x232   :  { %v1559_v16 = vpop.f32.mrf.mxu0 }
 0x233   :  { %v1717_v44 = vadd.f32 %v1600_v61, %v309_v60  ;;  %v1574_v37 = vadd.f32 %v1573_v5, %v1559_v16  ;;  %v9672_v60 = vld [vmem:[#allocation51_spill] sm:$0xff]  ;;  %v9673_v16 = vld [vmem:[#allocation85_spill] sm:$0xff] }
 0x235   :  { %v4871_v12 = vmul.f32 -1.442695, %v1717_v44  ;;  %v1720_v58 = vadd.f32 %v1574_v37, %v262_v38  ;;  %v358_v44 = vadd.f32 %v9673_v16, %v9672_v60  ;;  %v9675_v16 = vld [vmem:[#allocation87_spill] sm:$0xff] }
 0x237   :  { %v5180_v48 = vpop.eup %5179  ;;  %5181 = vpow2.f32 %v4871_v12  ;;  %v4874_v56 = vmul.f32 -1.442695, %v1720_v58  ;;  %v1601_v24 = vpop.f32.mrf.mxu3 }
 0x238   :  { %v6772_v51 = vadd.f32 1.0, %v5180_v48  ;;  %v1587_v29 = vpop.f32.mrf.mxu2 }
 0x239   :  { %5183 = vpow2.f32 %v4874_v56  ;;  %v1602_v52 = vadd.f32 %v1601_v24, %v1587_v29  ;;  %v1627_v0 = vpop.f32.mrf.mxu1 }
 0x23a   :  { %5185 = vrcp.f32 %v6772_v51  ;;  %v1613_v28 = vpop.f32.mrf.mxu0  ;;  %vm1761_vm7 = vweird.f32 %v6772_v51 }
 0x23b   :  { %v1721_v37 = vadd.f32 %v1602_v52, %v311_v39  ;;  %v1628_v61 = vadd.f32 %v1627_v0, %v1613_v28  ;;  %v407_v39 = vadd.f32 %v9675_v16, %v9674_v59  ;;  %v9679_v16 = vld [vmem:[#allocation160_spill] sm:$0xff] }
 0x23d   :  { %v5182_v12 = vpop.eup %5181  ;;  %v4875_v58 = vmul.f32 -1.442695, %v1721_v37  ;;  %v1718_v5 = vadd.f32 %v1628_v61, %v358_v44  ;;  %v9676_v44 = vld [vmem:[#allocation94_spill] sm:$0xff] }
 0x23e   :  { %v6779_v38 = vadd.f32 1.0, %v5182_v12  ;;  %v360_v37 = vadd.f32 %v9676_v44, %v9672_v60  ;;  %v9677_v12 = vld [vmem:[#allocation97_spill] sm:$0xff]  ;;  %v6805_v44 = vadd.f32 %v9682_v40, %v9678_v50  ;;  %v6810_v60 = vsel %vm9325_vm4, %v6612_v35, 0.0 }
 0x23f   :  { %v5184_v23 = vpop.eup %5183  ;;  %5187 = vpow2.f32 %v4875_v58  ;;  %v4872_v48 = vmul.f32 -1.442695, %v1718_v5  ;;  %v1655_v4 = vpop.f32.mrf.mxu3  ;;  %v409_v58 = vadd.f32 %v9677_v12, %v9674_v59  ;;  %v1765_v40 = vand.u32 2147483647, %v6772_v51 }
 0x240   :  { %v6781_v56 = vpop.eup %5185  ;;  %5189 = vrcp.f32 %v6779_v38  ;;  %v6784_v24 = vadd.f32 1.0, %v5184_v23  ;;  %v1641_v29 = vpop.f32.mrf.mxu2  ;;  %v1767_v35 = vand.u32 2147483648, %v6772_v51  ;;  %v1782_v46 = vand.u32 2147483648, %v6779_v38 }
 0x241   :  { %5191 = vpow2.f32 %v4872_v48  ;;  %v1656_v52 = vadd.f32 %v1655_v4, %v1641_v29  ;;  %v1629_v0 = vpop.f32.mrf.mxu1  ;;  %v1757_v28 = vmul.f32 %v6781_v56, %v6772_v51  ;;  %v6797_v48 = vadd.f32 %v9679_v16, %v9678_v50  ;;  %v9680_v4 = vld [vmem:[#allocation187_spill] sm:$0xff]  ;;  %v9681_v29 = vld [vmem:[#allocation161_spill] sm:$0xff] }
 0x242   :  { %5193 = vrcp.f32 %v6784_v24  ;;  %v1615_v61 = vpop.f32.mrf.mxu0  ;;  %v6801_v42 = vadd.f32 %v9681_v29, %v9680_v4  ;;  %vm1762_vm8 = vweird.f32 %v6781_v56  ;;  %vm6837_vm9 = vcmp.eq.f32.partialorder %v1765_v40, 8.507059e+37 }
 0x243   :  { %v1719_v5 = vadd.f32 %v1656_v52, %v407_v39  ;;  %v1630_v23 = vadd.f32 %v1629_v0, %v1615_v61  ;;  %v1758_v30 = vsub.f32 1.0, %v1757_v28  ;;  %v6815_v52 = vsel %vm9323_vm2, %v6614_v33, 0.0  ;;  %vm6844_vm11 = vmor %vm1761_vm7, %vm1762_vm8 }
 0x244   :  { %v1768_v9 = vor.u32 1.1754944e-38, %v1767_v35  ;;  %vm1776_vm10 = vweird.f32 %v6779_v38  ;;  %v1827_v40 = vand.u32 2147483648, %v6784_v24  ;;  %v1783_v55 = vor.u32 1.1754944e-38, %v1782_v46 }
 0x245   :  { %v5188_v39 = vpop.eup %5187  ;;  %v4873_v0 = vmul.f32 -1.442695, %v1719_v5  ;;  %v1722_v28 = vadd.f32 %v1630_v23, %v360_v37  ;;  %v1759_v61 = vmul.f32 %v6781_v56, %v1758_v30  ;;  %v1780_v37 = vand.u32 2147483647, %v6779_v38 }
 0x246   :  { %v6818_v12 = vpop.eup %5189  ;;  %v6820_v16 = vadd.f32 1.0, %v5188_v39  ;;  %vm1821_vm14 = vweird.f32 %v6784_v24 }
 0x247   :  { %v5192_v29 = vpop.eup %5191  ;;  %5195 = vpow2.f32 %v4873_v0  ;;  %v4876_v50 = vmul.f32 -1.442695, %v1722_v28  ;;  %v1657_v59 = vpop.f32.mrf.mxu3  ;;  %v1772_v33 = vmul.f32 %v6818_v12, %v6779_v38  ;;  %v1760_v39 = vadd.f32 %v6781_v56, %v1759_v61 }
 0x248   :  { %v6828_v30 = vpop.eup %5193  ;;  %5197 = vrcp.f32 %v6820_v16  ;;  %v6831_v5 = vadd.f32 1.0, %v5192_v29  ;;  %v1643_v23 = vpop.f32.mrf.mxu2  ;;  %vm6856_vm12 = vcmp.eq.f32.partialorder %v1780_v37, 8.507059e+37  ;;  %vm1777_vm13 = vweird.f32 %v6818_v12 }
 0x249   :  { %5199 = vpow2.f32 %v4876_v50  ;;  %v1658_v0 = vadd.f32 %v1657_v59, %v1643_v23  ;;  %v1773_v28 = vsub.f32 1.0, %v1772_v33  ;;  %v1817_v61 = vmul.f32 %v6828_v30, %v6784_v24  ;;  %vm6891_vm5 = vmor %vm1776_vm10, %vm1777_vm13 }
 0x24a   :  { %5201 = vrcp.f32 %v6831_v5  ;;  %v1683_v43 = vpop.f32.mrf.mxu1  ;;  %v1797_v33 = vand.u32 2147483648, %v6831_v5  ;;  %v1825_v23 = vand.u32 2147483647, %v6784_v24  ;;  %vm1791_vm15 = vweird.f32 %v6831_v5 }
 0x24b   :  { %v1723_v29 = vadd.f32 %v1658_v0, %v409_v58  ;;  %v1669_v11 = vpop.f32.mrf.mxu0  ;;  %v1774_v59 = vmul.f32 %v6818_v12, %v1773_v28  ;;  %v1764_v58 = vsel %vm6844_vm11, %v6781_v56, %v1760_v39  ;;  %v1818_v62 = vsub.f32 1.0, %v1817_v61 }
 0x24c   :  { %v1684_v35 = vadd.f32 %v1683_v43, %v1669_v11  ;;  %v1795_v43 = vand.u32 2147483647, %v6831_v5  ;;  %v1769_v46 = vsel %vm6837_vm9, %v1768_v9, %v1764_v58  ;;  %v6877_v61 = vor.u32 1.1754944e-38, %v1797_v33 }
 0x24d   :  { %v5196_v0 = vpop.eup %5195  ;;  %v4877_v28 = vmul.f32 -1.442695, %v1723_v29  ;;  %v1775_v37 = vadd.f32 %v6818_v12, %v1774_v59  ;;  %v6873_v29 = vor.u32 1.1754944e-38, %v1827_v40  ;;  %vm1822_vm0 = vweird.f32 %v6828_v30 }
 0x24e   :  { %v6863_v1 = vpop.eup %5197  ;;  %v6866_v11 = vadd.f32 1.0, %v5196_v0  ;;  %v1876_v56 = vadd.f32 %v1684_v35, %v6505_v49  ;;  %v1819_v35 = vmul.f32 %v6828_v30, %v1818_v62  ;;  %vm6895_vm6 = vcmp.eq.f32.partialorder %v1825_v23, 8.507059e+37  ;;  %vm6928_vm10 = vmor %vm1821_vm14, %vm1822_vm0 }
 0x24f   :  { %v5200_v39 = vpop.eup %5199  ;;  %5203 = vpow2.f32 %v4877_v28  ;;  %vm6899_vm7 = vcmp.eq.f32.partialorder %v1795_v43, 8.507059e+37  ;;  %v1832_v43 = vmul.f32 %v6863_v1, %v6820_v16  ;;  %vm1836_vm0 = vweird.f32 %v6820_v16 }
 0x250   :  { %v6875_v50 = vpop.eup %5201  ;;  %5205 = vrcp.f32 %v6866_v11  ;;  %v1711_v0 = vpop.f32.mrf.mxu3  ;;  %v1812_v28 = vand.u32 2147483648, %v6866_v11  ;;  %v6885_v2 = vadd.f32 1.0, %v5200_v39  ;;  %v1880_v9 = vmul.f32 %v1876_v56, %v1769_v46 }
 0x251   :  { %v1787_v59 = vmul.f32 %v6875_v50, %v6831_v5  ;;  %v1697_v40 = vpop.f32.mrf.mxu2  ;;  %v1779_v56 = vsel %vm6891_vm5, %v6818_v12, %v1775_v37  ;;  %v1810_v47 = vand.u32 2147483647, %v6866_v11  ;;  %vm1792_vm8 = vweird.f32 %v6875_v50 }
 0x252   :  { %v1712_v39 = vadd.f32 %v1711_v0, %v1697_v40  ;;  %5207 = vrcp.f32 %v6885_v2  ;;  %v1685_v23 = vpop.f32.mrf.mxu1  ;;  %v1857_v0 = vand.u32 2147483648, %v6885_v2  ;;  %v1884_v12 = vadd.f32 %v1880_v9, %v6797_v48  ;;  %vm6946_vm13 = vmor %vm1791_vm15, %vm1792_vm8 }
 0x253   :  { %v1788_v22 = vsub.f32 1.0, %v1787_v59  ;;  %v1671_v31 = vpop.f32.mrf.mxu0  ;;  %vm1806_vm9 = vweird.f32 %v6866_v11  ;;  %v1813_v33 = vor.u32 1.1754944e-38, %v1812_v28  ;;  %v1784_v38 = vsel %vm6856_vm12, %v1783_v55, %v1779_v56 }
 0x254   :  { %v1877_v37 = vadd.f32 %v1712_v39, %v6500_v41  ;;  %v1820_v46 = vadd.f32 %v6828_v30, %v1819_v35  ;;  %v1855_v27 = vand.u32 2147483647, %v6885_v2  ;;  %v1686_v48 = vadd.f32 %v1685_v23, %v1671_v31 }
 0x255   :  { %v5204_v40 = vpop.eup %5203  ;;  %v1789_v59 = vmul.f32 %v6875_v50, %v1788_v22  ;;  %vm6934_vm11 = vcmp.eq.f32.partialorder %v1810_v47, 8.507059e+37  ;;  %vm1851_vm12 = vweird.f32 %v6885_v2  ;;  %5209 = vtanh.f32 %v1884_v12 }
 0x256   :  { %v5206_v57 = vpop.eup %5205  ;;  %v6922_v53 = vadd.f32 1.0, %v5204_v40  ;;  %v1881_v32 = vmul.f32 %v1877_v37, %v1784_v38  ;;  %v1824_v31 = vsel %vm6928_vm10, %v6828_v30, %v1820_v46  ;;  %v1858_v47 = vor.u32 1.1754944e-38, %v1857_v0 }
 0x257   :  { %v1790_v51 = vadd.f32 %v6875_v50, %v1789_v59  ;;  %v1802_v55 = vmul.f32 %v5206_v57, %v6866_v11  ;;  %vm1807_vm14 = vweird.f32 %v5206_v57  ;;  %v1833_v28 = vsub.f32 1.0, %v1832_v43  ;;  %v9711_v11 = vld [vmem:[#allocation136_spill] sm:$0xff] }
 0x258   :  { %5211 = vrcp.f32 %v6922_v53  ;;  %v5208_v9 = vpop.eup %5207  ;;  %vm9332_vm5 = vcmp.gt.s32.totalorder %v6586_v54, 1  ;;  %v1870_v30 = vand.u32 2147483647, %v6922_v53  ;;  %v1885_v56 = vadd.f32 %v1881_v32, %v6801_v42  ;;  %v1713_v46 = vpop.f32.mrf.mxu3 }
 0x259   :  { %v1803_v39 = vsub.f32 1.0, %v1802_v55  ;;  %v1794_v5 = vsel %vm6946_vm13, %v6875_v50, %v1790_v51  ;;  %v1699_v38 = vpop.f32.mrf.mxu2  ;;  %v1847_v23 = vmul.f32 %v5208_v9, %v6885_v2  ;;  %vm1852_vm15 = vweird.f32 %v5208_v9 }
 0x25a   :  { %vm6959_vm8 = vcmp.eq.f32.partialorder %v1855_v27, 8.507059e+37  ;;  %v1872_v0 = vand.u32 2147483648, %v6922_v53  ;;  %v1829_v12 = vsel %vm6895_vm6, %v6873_v29, %v1824_v31  ;;  %v1799_v42 = vsel %vm6899_vm7, %v6877_v61, %v1794_v5  ;;  %vm1808_vm7 = vmor %vm1806_vm9, %vm1807_vm14 }
 0x25b   :  { %v1804_v37 = vmul.f32 %v5206_v57, %v1803_v39  ;;  %5213 = vtanh.f32 %v1885_v56  ;;  %v1878_v32 = vadd.f32 %v1686_v48, %v6505_v49  ;;  %v1848_v50 = vsub.f32 1.0, %v1847_v23  ;;  %v5210_v22 = vpop.eup %5209  ;;  %vm6990_vm9 = vmor %vm1851_vm12, %vm1852_vm15 }
 0x25c   :  { %v1892_v40 = vsub.f32 1.0, %v1799_v42  ;;  %v1900_v27 = vmul.f32 %v1799_v42, %v6815_v52  ;;  %v1714_v59 = vadd.f32 %v1713_v46, %v1699_v38  ;;  %v1834_v24 = vmul.f32 %v6863_v1, %v1833_v28 }
 0x25d   :  { %v1805_v51 = vadd.f32 %v5206_v57, %v1804_v37  ;;  %v1882_v55 = vmul.f32 %v1878_v32, %v1829_v12  ;;  %vm1837_vm6 = vweird.f32 %v6863_v1  ;;  %v1849_v61 = vmul.f32 %v5208_v9, %v1848_v50 }
 0x25e   :  { %v5212_v29 = vpop.eup %5211  ;;  %v1896_v62 = vmul.f32 %v5210_v22, %v1892_v40  ;;  %v9703_v58 = vand.u32 2147483647, %v6820_v16  ;;  %v9706_v31 = vand.u32 2147483648, %v6820_v16  ;;  %v1835_v12 = vadd.f32 %v6863_v1, %v1834_v24  ;;  %vm1838_vm12 = vmor %vm1836_vm0, %vm1837_vm6  ;;  %v9709_v22 = vld [vmem:[#allocation165_spill] sm:$0xff] }
 0x25f   :  { %v1862_v28 = vmul.f32 %v5212_v29, %v6922_v53  ;;  %vm1867_vm13 = vweird.f32 %v5212_v29  ;;  %v1809_v5 = vsel %vm1808_vm7, %v5206_v57, %v1805_v51  ;;  %v1886_v56 = vadd.f32 %v1882_v55, %v6805_v44 }
 0x260   :  { %vm6979_vm10 = vcmp.eq.f32.partialorder %v9703_v58, 8.507059e+37  ;;  %v1843_v39 = vor.u32 1.1754944e-38, %v9706_v31  ;;  %v1850_v46 = vadd.f32 %v5208_v9, %v1849_v61  ;;  %v1904_v38 = vadd.f32 %v1900_v27, %v1896_v62 }
 0x261   :  { %v1814_v23 = vsel %vm6934_vm11, %v1813_v33, %v1809_v5  ;;  %v5214_v37 = vpop.eup %5213  ;;  %v1863_v42 = vsub.f32 1.0, %v1862_v28  ;;  %5215 = vtanh.f32 %v1886_v56  ;;  %v1839_v2 = vsel %vm1838_vm12, %v6863_v1, %v1835_v12  ;;  %v9714_v12 = vld [vmem:[#allocation69_spill] sm:$0xff] }
 0x262   :  { %v1893_v32 = vsub.f32 1.0, %v1814_v23  ;;  %v1901_v57 = vmul.f32 %v1814_v23, %v6810_v60  ;;  %v1854_v44 = vsel %vm6990_vm9, %v5208_v9, %v1850_v46  ;;  %v1879_v33 = vadd.f32 %v1714_v59, %v6500_v41  ;;  %v9710_v46 = vld [vmem:[#allocation55_spill] sm:$0xff]  ;;  %v9713_v23 = vld [vmem:[#allocation142_spill] sm:$0xff] }
 0x263   :  { %v7009_v35 = vsel %vm9332_vm5, %v1904_v38, %v6815_v52  ;;  %v1864_v50 = vmul.f32 %v5212_v29, %v1863_v42  ;;  %v1859_v27 = vsel %vm6959_vm8, %v1858_v47, %v1854_v44  ;;  %v1844_v16 = vsel %vm6979_vm10, %v1843_v39, %v1839_v2  ;;  %v9712_v38 = vld [vmem:[#allocation84_spill] sm:$0xff]  ;;  %v9716_v42 = vld [vmem:[#allocation102_spill] sm:$0xff]  ;;  %v9719_v44 = vld [vmem:[#allocation143_spill] sm:$0xff] }
 0x264   :  { %v1897_v40 = vmul.f32 %v5214_v37, %v1893_v32  ;;  %v507_v9 = vadd.f32 %v9709_v22, %v9680_v4  ;;  %v1894_v51 = vsub.f32 1.0, %v1859_v27  ;;  %v1883_v1 = vmul.f32 %v1879_v33, %v1844_v16  ;;  %v9715_v37 = vld [vmem:[#allocation139_spill] sm:$0xff]  ;;  %v9717_v32 = vld [vmem:[#allocation146_spill] sm:$0xff]  ;;  %v9720_v2 = vld [vmem:[#allocation120_spill] sm:$0xff] }
 0x265   :  { %v1865_v55 = vadd.f32 %v5212_v29, %v1864_v50  ;;  %vm1866_vm11 = vweird.f32 %v6922_v53  ;;  %vm9334_vm14 = vcmp.gt.s32.totalorder %v6586_v54, 6  ;;  %v1873_v52 = vor.u32 1.1754944e-38, %v1872_v0  ;;  %v9721_v33 = vld [vmem:[#allocation150_spill] sm:$0xff]  ;;  %v9722_v50 = vld [vmem:[#allocation12_spill] sm:$0xff]  ;;  %v9725_v16 = vld [vmem:[#allocation147_spill] sm:$0xff] }
 0x266   :  { %v1905_v59 = vadd.f32 %v1901_v57, %v1897_v40  ;;  %vm1868_vm0 = vmor %vm1866_vm11, %vm1867_vm13  ;;  %v1887_v24 = vadd.f32 %v1883_v1, %v507_v9  ;;  %v1544_v47 = vsel %vm9322_vm3, %v6623_v25, 0.0  ;;  %vm1871_vm15 = vcmp.eq.f32.partialorder %v1870_v30, 8.507059e+37  ;;  %v9718_v57 = vld [vmem:[#allocation86_spill] sm:$0xff]  ;;  %v9727_v9 = vld [vmem:[#allocation32_spill] sm:$0xff] }
 0x267   :  { %v5216_v43 = vpop.eup %5215  ;;  %v1869_v61 = vsel %vm1868_vm0, %v5212_v29, %v1865_v55  ;;  %v1902_v48 = vmul.f32 %v1859_v27, %v1544_v47  ;;  %vm9331_vm8 = vcmp.gt.s32.totalorder %v6616_v34, 1  ;;  %vm9333_vm6 = vcmp.gt.s32.totalorder %v6616_v34, 6  ;;  %v9723_v40 = vld [vmem:[#allocation30_spill] sm:$0xff]  ;;  %v9729_v1 = vld [vmem:[#allocation151_spill] sm:$0xff]  ;;  %v9730_v55 = vld [vmem:[#allocation13_spill] sm:$0xff] }
 0x268   :  { %v7028_v62 = vsel %vm9334_vm14, %v1905_v59, %v6810_v60  ;;  %v1898_v58 = vmul.f32 %v5216_v43, %v1894_v51  ;;  %v1874_v31 = vsel %vm1871_vm15, %v1873_v52, %v1869_v61  ;;  %5217 = vtanh.f32 %v1887_v24  ;;  %v9724_v27 = vld [vmem:[#allocation106_spill] sm:$0xff]  ;;  %v9728_v51 = vld [vmem:[#allocation124_spill] sm:$0xff]  ;;  %v9731_v59 = vld [vmem:[#allocation31_spill] sm:$0xff] }
 0x269   :  { %v1895_v39 = vsub.f32 1.0, %v1874_v31  ;;  %v1545_v60 = vsel %vm9324_vm1, %v6619_v7, 0.0  ;;  %v9726_v22 = vld [vmem:[#allocation14_spill] sm:$0xff]  ;;  %v9732_v52 = vld [vmem:[#allocation16_spill] sm:$0xff]  ;;  %v9734_v43 = vld [vmem:[#allocation15_spill] sm:$0xff] }
 0x26a   :  { %v1906_v0 = vadd.f32 %v1902_v48, %v1898_v58  ;;  %v1903_v28 = vmul.f32 %v1874_v31, %v1545_v60  ;;  %v9733_v24 = vld [vmem:[#allocation34_spill] sm:$0xff]  ;;  %v9737_v58 = vld [vmem:[#allocation36_spill] sm:$0xff]  ;;  %v9738_v48 = vld [vmem:[#allocation17_spill] sm:$0xff] }
 0x26b   :  { %v9736_v61 = vld [vmem:[#allocation18_spill] sm:$0xff]  ;;  %v9739_v31 = vld [vmem:[#allocation35_spill] sm:$0xff] }
 0x26c   :  { %v7033_v25 = vsel %vm9331_vm8, %v1906_v0, %v1544_v47  ;;  %v9735_v47 = vld [vmem:[#allocation33_spill] sm:$0xff]  ;;  %v9740_v0 = vld [vmem:[#allocation20_spill] sm:$0xff] }
 0x26d   :  { %v1912_v53 = vpack.c.bf16 %v7033_v25, %v7009_v35 }
 0x26e   :  { %v5218_v30 = vpop.eup %5217 }
 0x26f   :  { %v1899_v29 = vmul.f32 %v5218_v30, %v1895_v39  ;;  %1922 = vmatmul.bf16.vlgmr.msra.gmra.mxu0 %v1912_v53  ;;  %1950 = vmatmul.bf16.vlgmr.msra.gmra.mxu2 %v1912_v53  ;;  %v9741_v39 = vld [vmem:[#allocation40_spill] sm:$0xff]  ;;  %v9743_v30 = vld [vmem:[#allocation37_spill] sm:$0xff] }
 0x270   :  { %2026 = vmatpush.bf16.msra.mxu0 %v9596_v15  ;;  %2054 = vmatpush.bf16.msra.mxu2 %v6086_v6 }
 0x271   :  { %v1907_v5 = vadd.f32 %v1903_v28, %v1899_v29  ;;  %v9745_v29 = vld [vmem:[#allocation42_spill] sm:$0xff]  ;;  %v9746_v28 = vld [vmem:[#allocation21_spill] sm:$0xff] }
 0x273   :  { %v7045_v56 = vsel %vm9333_vm6, %v1907_v5, %v1545_v60  ;;  %v9744_v60 = vld [vmem:[#allocation22_spill] sm:$0xff]  ;;  %v9747_v5 = vld [vmem:[#allocation41_spill] sm:$0xff] }
 0x274   :  { %2027 = vmatpush.bf16.msra.mxu0 %v9598_v63  ;;  %2055 = vmatpush.bf16.msra.mxu2 %v6100_v3  ;;  %v1913_v7 = vpack.c.bf16 %v7045_v56, %v7028_v62 }
 0x276   :  { %1936 = vmatmul.bf16.vlgmr.msra.gmra.mxu1 %v1913_v7  ;;  %1964 = vmatmul.bf16.vlgmr.msra.gmra.mxu3 %v1913_v7 }
 0x277   :  { %2040 = vmatpush.bf16.msra.mxu1 %v9595_v17  ;;  %2068 = vmatpush.bf16.msra.mxu3 %v6088_v10 }
 0x278   :  { %2028 = vmatpush.bf16.msra.mxu0 %v9600_v8  ;;  %2056 = vmatpush.bf16.msra.mxu2 %v6114_v36 }
 0x27b   :  { %2041 = vmatpush.bf16.msra.mxu1 %v9597_v26  ;;  %2069 = vmatpush.bf16.msra.mxu3 %v6102_v21 }
 0x27c   :  { %2029 = vmatpush.bf16.msra.mxu0 %v9602_v18  ;;  %2057 = vmatpush.bf16.msra.mxu2 %v6130_v45 }
 0x27f   :  { %2042 = vmatpush.bf16.msra.mxu1 %v9599_v19  ;;  %2070 = vmatpush.bf16.msra.mxu3 %v6116_v14 }
 0x280   :  { %1978 = vmatmul.bf16.vlgmr.msrb.gmra.mxu0 %v1912_v53  ;;  %2006 = vmatmul.bf16.vlgmr.msrb.gmra.mxu2 %v1912_v53 }
 0x281   :  { %2030 = vmatpush.bf16.msra.mxu0 %v9604_v13  ;;  %2058 = vmatpush.bf16.msra.mxu2 %v6142_v20 }
 0x283   :  { %2043 = vmatpush.bf16.msra.mxu1 %v9710_v46  ;;  %2071 = vmatpush.bf16.msra.mxu3 %v9711_v11 }
 0x285   :  { %2031 = vmatpush.bf16.msra.mxu0 %v9712_v38  ;;  %2059 = vmatpush.bf16.msra.mxu2 %v9713_v23 }
 0x286   :  { %1992 = vmatmul.bf16.vlgmr.msrb.gmra.mxu1 %v1913_v7  ;;  %2020 = vmatmul.bf16.vlgmr.msrb.gmra.mxu3 %v1913_v7 }
 0x287   :  { %2044 = vmatpush.bf16.msra.mxu1 %v9714_v12  ;;  %2072 = vmatpush.bf16.msra.mxu3 %v9715_v37 }
 0x289   :  { %2032 = vmatpush.bf16.msra.mxu0 %v9716_v42  ;;  %2060 = vmatpush.bf16.msra.mxu2 %v9717_v32 }
 0x28b   :  { %2045 = vmatpush.bf16.msra.mxu1 %v9718_v57  ;;  %2073 = vmatpush.bf16.msra.mxu3 %v9719_v44 }
 0x28d   :  { %2033 = vmatpush.bf16.msra.mxu0 %v9720_v2  ;;  %2061 = vmatpush.bf16.msra.mxu2 %v9721_v33 }
 0x28f   :  { %2046 = vmatpush.bf16.msra.mxu1 %v9724_v27  ;;  %2074 = vmatpush.bf16.msra.mxu3 %v9725_v16  ;;  %v9803_v16 = vld [vmem:[#allocation168_spill] sm:$0xff] }
 0x290   :  { %2034 = vmatmul.bf16.vlgmr.msra.gmra.mxu0 %v1912_v53  ;;  %2062 = vmatmul.bf16.vlgmr.msra.gmra.mxu2 %v1912_v53  ;;  %v9742_v53 = vld [vmem:[#allocation19_spill] sm:$0xff] }
 0x291   :  { %2280 = vmatpush.bf16.msrb.mxu0 %v9722_v50  ;;  %2308 = vmatpush.bf16.msrb.mxu2 %v9723_v40 }
 0x293   :  { %2047 = vmatpush.bf16.msra.mxu1 %v9728_v51  ;;  %2075 = vmatpush.bf16.msra.mxu3 %v9729_v1 }
 0x295   :  { %2281 = vmatpush.bf16.msrb.mxu0 %v9726_v22  ;;  %2309 = vmatpush.bf16.msrb.mxu2 %v9727_v9 }
 0x296   :  { %2048 = vmatmul.bf16.vlgmr.msra.gmra.mxu1 %v1913_v7  ;;  %2076 = vmatmul.bf16.vlgmr.msra.gmra.mxu3 %v1913_v7  ;;  %v9748_v7 = vld [vmem:[#allocation24_spill] sm:$0xff] }
 0x297   :  { %2294 = vmatpush.bf16.msrb.mxu1 %v9730_v55  ;;  %2322 = vmatpush.bf16.msrb.mxu3 %v9731_v59 }
 0x299   :  { %2282 = vmatpush.bf16.msrb.mxu0 %v9732_v52  ;;  %2310 = vmatpush.bf16.msrb.mxu2 %v9733_v24  ;;  %v9793_v52 = vld [vmem:[#allocation79_spill] sm:$0xff] }
 0x29b   :  { %2295 = vmatpush.bf16.msrb.mxu1 %v9734_v43  ;;  %2323 = vmatpush.bf16.msrb.mxu3 %v9735_v47 }
 0x29d   :  { %2283 = vmatpush.bf16.msrb.mxu0 %v9736_v61  ;;  %2311 = vmatpush.bf16.msrb.mxu2 %v9737_v58  ;;  %v9791_v61 = vld [vmem:[#allocation78_spill] sm:$0xff] }
 0x29f   :  { %2296 = vmatpush.bf16.msrb.mxu1 %v9738_v48  ;;  %2324 = vmatpush.bf16.msrb.mxu3 %v9739_v31  ;;  %v9749_v48 = vld [vmem:[#allocation44_spill] sm:$0xff]  ;;  %v9750_v31 = vld [vmem:[#allocation23_spill] sm:$0xff] }
 0x2a1   :  { %2284 = vmatpush.bf16.msrb.mxu0 %v9740_v0  ;;  %2312 = vmatpush.bf16.msrb.mxu2 %v9741_v39  ;;  %v9751_v0 = vld [vmem:[#allocation43_spill] sm:$0xff]  ;;  %v9752_v39 = vld [vmem:[#allocation26_spill] sm:$0xff] }
 0x2a3   :  { %2297 = vmatpush.bf16.msrb.mxu1 %v9742_v53  ;;  %2325 = vmatpush.bf16.msrb.mxu3 %v9743_v30  ;;  %v9753_v53 = vld [vmem:[#allocation46_spill] sm:$0xff] }
 0x2a4   :  { %v9754_v30 = vld [vmem:[#allocation62_spill] sm:$0xff] }
 0x2a5   :  { %2285 = vmatpush.bf16.msrb.mxu0 %v9744_v60  ;;  %2313 = vmatpush.bf16.msrb.mxu2 %v9745_v29  ;;  %v9755_v60 = vld [vmem:[#allocation95_spill] sm:$0xff]  ;;  %v9756_v29 = vld [vmem:[#allocation25_spill] sm:$0xff] }
 0x2a7   :  { %2298 = vmatpush.bf16.msrb.mxu1 %v9746_v28  ;;  %2326 = vmatpush.bf16.msrb.mxu3 %v9747_v5  ;;  %v9757_v28 = vld [vmem:[#allocation45_spill] sm:$0xff]  ;;  %v9758_v5 = vld [vmem:[#allocation64_spill] sm:$0xff] }
 0x2a9   :  { %2286 = vmatpush.bf16.msrb.mxu0 %v9748_v7  ;;  %2314 = vmatpush.bf16.msrb.mxu2 %v9749_v48  ;;  %v9759_v7 = vld [vmem:[#allocation100_spill] sm:$0xff]  ;;  %v9760_v48 = vld [vmem:[#allocation29_spill] sm:$0xff] }
 0x2ab   :  { %2299 = vmatpush.bf16.msrb.mxu1 %v9750_v31  ;;  %2327 = vmatpush.bf16.msrb.mxu3 %v9751_v0  ;;  %v9761_v31 = vld [vmem:[#allocation47_spill] sm:$0xff] }
 0x2ac   :  { %v9762_v0 = vld [vmem:[#allocation63_spill] sm:$0xff] }
 0x2ad   :  { %2287 = vmatpush.bf16.msrb.mxu0 %v9752_v39  ;;  %2315 = vmatpush.bf16.msrb.mxu2 %v9753_v53  ;;  %v9763_v39 = vld [vmem:[#allocation96_spill] sm:$0xff] }
 0x2ae   :  { %v9764_v53 = vld [vmem:[#allocation72_spill] sm:$0xff] }
 0x2af   :  { %2300 = vmatpush.bf16.msrb.mxu1 %v9756_v29  ;;  %2328 = vmatpush.bf16.msrb.mxu3 %v9757_v28  ;;  %v9767_v29 = vld [vmem:[#allocation101_spill] sm:$0xff]  ;;  %v9768_v28 = vld [vmem:[#allocation74_spill] sm:$0xff] }
 0x2b1   :  { %2336 = vmatpush.bf16.msra.mxu0 %v9754_v30  ;;  %2364 = vmatpush.bf16.msra.mxu2 %v9755_v60  ;;  %v9765_v30 = vld [vmem:[#allocation104_spill] sm:$0xff]  ;;  %v9766_v60 = vld [vmem:[#allocation65_spill] sm:$0xff] }
 0x2b3   :  { %2301 = vmatpush.bf16.msrb.mxu1 %v9760_v48  ;;  %2329 = vmatpush.bf16.msrb.mxu3 %v9761_v31  ;;  %v9771_v48 = vld [vmem:[#allocation105_spill] sm:$0xff]  ;;  %v9772_v31 = vld [vmem:[#allocation80_spill] sm:$0xff] }
 0x2b5   :  { %2337 = vmatpush.bf16.msra.mxu0 %v9758_v5  ;;  %2365 = vmatpush.bf16.msra.mxu2 %v9759_v7  ;;  %v9769_v5 = vld [vmem:[#allocation110_spill] sm:$0xff]  ;;  %v9770_v7 = vld [vmem:[#allocation73_spill] sm:$0xff] }
 0x2b7   :  { %2350 = vmatpush.bf16.msra.mxu1 %v9762_v0  ;;  %2378 = vmatpush.bf16.msra.mxu3 %v9763_v39  ;;  %v9773_v0 = vld [vmem:[#allocation113_spill] sm:$0xff]  ;;  %v9774_v39 = vld [vmem:[#allocation75_spill] sm:$0xff] }
 0x2b9   :  { %2338 = vmatpush.bf16.msra.mxu0 %v9764_v53  ;;  %2366 = vmatpush.bf16.msra.mxu2 %v9765_v30  ;;  %v9775_v53 = vld [vmem:[#allocation111_spill] sm:$0xff]  ;;  %v9776_v30 = vld [vmem:[#allocation82_spill] sm:$0xff] }
 0x2bb   :  { %2351 = vmatpush.bf16.msra.mxu1 %v9766_v60  ;;  %2379 = vmatpush.bf16.msra.mxu3 %v9767_v29  ;;  %v9777_v60 = vld [vmem:[#allocation118_spill] sm:$0xff]  ;;  %v9778_v29 = vld [vmem:[#allocation81_spill] sm:$0xff] }
 0x2bd   :  { %2339 = vmatpush.bf16.msra.mxu0 %v9768_v28  ;;  %2367 = vmatpush.bf16.msra.mxu2 %v9769_v5  ;;  %v9779_v28 = vld [vmem:[#allocation114_spill] sm:$0xff] }
 0x2be   :  { %v9780_v5 = vld [vmem:[#allocation90_spill] sm:$0xff] }
 0x2bf   :  { %2352 = vmatpush.bf16.msra.mxu1 %v9770_v7  ;;  %2380 = vmatpush.bf16.msra.mxu3 %v9771_v48  ;;  %v9781_v7 = vld [vmem:[#allocation122_spill] sm:$0xff]  ;;  %v9782_v48 = vld [vmem:[#allocation83_spill] sm:$0xff] }
 0x2c1   :  { %2340 = vmatpush.bf16.msra.mxu0 %v9772_v31  ;;  %2368 = vmatpush.bf16.msra.mxu2 %v9773_v0  ;;  %v9783_v31 = vld [vmem:[#allocation119_spill] sm:$0xff]  ;;  %v9784_v0 = vld [vmem:[#allocation92_spill] sm:$0xff] }
 0x2c3   :  { %2353 = vmatpush.bf16.msra.mxu1 %v9774_v39  ;;  %2381 = vmatpush.bf16.msra.mxu3 %v9775_v53  ;;  %v9785_v39 = vld [vmem:[#allocation128_spill] sm:$0xff]  ;;  %v9786_v53 = vld [vmem:[#allocation91_spill] sm:$0xff] }
 0x2c5   :  { %2341 = vmatpush.bf16.msra.mxu0 %v9776_v30  ;;  %2369 = vmatpush.bf16.msra.mxu2 %v9777_v60  ;;  %v9787_v30 = vld [vmem:[#allocation123_spill] sm:$0xff]  ;;  %v9788_v60 = vld [vmem:[#allocation93_spill] sm:$0xff] }
 0x2c7   :  { %2354 = vmatpush.bf16.msra.mxu1 %v9778_v29  ;;  %2382 = vmatpush.bf16.msra.mxu3 %v9779_v28  ;;  %v9789_v29 = vld [vmem:[#allocation129_spill] sm:$0xff] }
 0x2c9   :  { %2342 = vmatpush.bf16.msra.mxu0 %v9780_v5  ;;  %2370 = vmatpush.bf16.msra.mxu2 %v9781_v7  ;;  %v9790_v7 = vld [vmem:[#allocation178_spill] sm:$0xff] }
 0x2cb   :  { %2355 = vmatpush.bf16.msra.mxu1 %v9782_v48  ;;  %2383 = vmatpush.bf16.msra.mxu3 %v9783_v31  ;;  %v265_v48 = vadd.f32 %v9791_v61, %v9790_v7 }
 0x2cd   :  { %2343 = vmatpush.bf16.msra.mxu0 %v9784_v0  ;;  %2371 = vmatpush.bf16.msra.mxu2 %v9785_v39  ;;  %v9792_v39 = vld [vmem:[#allocation181_spill] sm:$0xff] }
 0x2cf   :  { %2356 = vmatpush.bf16.msra.mxu1 %v9786_v53  ;;  %2384 = vmatpush.bf16.msra.mxu3 %v9787_v30  ;;  %v314_v53 = vadd.f32 %v9793_v52, %v9792_v39  ;;  %v9795_v52 = vld [vmem:[#allocation89_spill] sm:$0xff] }
 0x2d3   :  { %2357 = vmatpush.bf16.msra.mxu1 %v9788_v60  ;;  %2385 = vmatpush.bf16.msra.mxu3 %v9789_v29  ;;  %v9794_v60 = vld [vmem:[#allocation88_spill] sm:$0xff] }
 0x2d4   :  { %v267_v29 = vadd.f32 %v9794_v60, %v9790_v7  ;;  %v9802_v7 = vld [vmem:[#allocation77_spill] sm:$0xff] }
 0x2ec   :  { %v1923_v28 = vpop.f32.mrf.mxu0 }
 0x2f2   :  { %v1951_v5 = vpop.f32.mrf.mxu2 }
 0x2f3   :  { %v1937_v58 = vpop.f32.mrf.mxu1 }
 0x2f4   :  { %v1938_v47 = vadd.f32 %v1937_v58, %v1923_v28  ;;  %v1925_v31 = vpop.f32.mrf.mxu0 }
 0x2f6   :  { %v2082_v43 = vadd.f32 %v1938_v47, %v265_v48 }
 0x2f8   :  { %v4878_v0 = vmul.f32 -1.442695, %v2082_v43 }
 0x2f9   :  { %v1965_v24 = vpop.f32.mrf.mxu3 }
 0x2fa   :  { %5219 = vpow2.f32 %v4878_v0  ;;  %v1966_v30 = vadd.f32 %v1965_v24, %v1951_v5  ;;  %v1953_v51 = vpop.f32.mrf.mxu2  ;;  %v316_v0 = vadd.f32 %v9795_v52, %v9792_v39 }
 0x2fb   :  { %v1939_v59 = vpop.f32.mrf.mxu1 }
 0x2fc   :  { %v2083_v55 = vadd.f32 %v1966_v30, %v314_v53  ;;  %v1940_v1 = vadd.f32 %v1939_v59, %v1925_v31  ;;  %v9796_v53 = vld [vmem:[#allocation51_spill] sm:$0xff] }
 0x2fd   :  { %v1979_v61 = vpop.f32.mrf.mxu0  ;;  %v9797_v59 = vld [vmem:[#allocation103_spill] sm:$0xff] }
 0x2fe   :  { %v4879_v9 = vmul.f32 -1.442695, %v2083_v55  ;;  %v2086_v22 = vadd.f32 %v1940_v1, %v267_v29  ;;  %v363_v31 = vadd.f32 %v9797_v59, %v9796_v53  ;;  %v9798_v59 = vld [vmem:[#allocation182_spill] sm:$0xff] }
 0x300   :  { %v5220_v58 = vpop.eup %5219  ;;  %5221 = vpow2.f32 %v4879_v9  ;;  %v4882_v47 = vmul.f32 -1.442695, %v2086_v22 }
 0x301   :  { %v7149_v43 = vadd.f32 1.0, %v5220_v58  ;;  %v1967_v48 = vpop.f32.mrf.mxu3 }
 0x302   :  { %5223 = vpow2.f32 %v4882_v47  ;;  %v1968_v24 = vadd.f32 %v1967_v48, %v1953_v51 }
 0x303   :  { %5225 = vrcp.f32 %v7149_v43  ;;  %v1993_v60 = vpop.f32.mrf.mxu1  ;;  %v2007_v22 = vpop.f32.mrf.mxu2  ;;  %vm2127_vm10 = vweird.f32 %v7149_v43 }
 0x304   :  { %v2087_v55 = vadd.f32 %v1968_v24, %v316_v0  ;;  %v1994_v1 = vadd.f32 %v1993_v60, %v1979_v61  ;;  %v9799_v0 = vld [vmem:[#allocation107_spill] sm:$0xff] }
 0x305   :  { %v1981_v52 = vpop.f32.mrf.mxu0  ;;  %v412_v61 = vadd.f32 %v9799_v0, %v9798_v59  ;;  %v7174_v0 = vadd.f32 %v9803_v16, %v9802_v7  ;;  %v2133_v16 = vand.u32 2147483648, %v7149_v43 }
 0x306   :  { %v5222_v30 = vpop.eup %5221  ;;  %v4883_v29 = vmul.f32 -1.442695, %v2087_v55  ;;  %v2084_v9 = vadd.f32 %v1994_v1, %v363_v31  ;;  %v9800_v31 = vld [vmem:[#allocation112_spill] sm:$0xff] }
 0x307   :  { %v7156_v28 = vadd.f32 1.0, %v5222_v30  ;;  %v365_v55 = vadd.f32 %v9800_v31, %v9796_v53 }
 0x308   :  { %v5224_v5 = vpop.eup %5223  ;;  %5227 = vpow2.f32 %v4883_v29  ;;  %v4880_v58 = vmul.f32 -1.442695, %v2084_v9 }
 0x309   :  { %v7158_v47 = vpop.eup %5225  ;;  %5229 = vrcp.f32 %v7156_v28  ;;  %v7161_v51 = vadd.f32 1.0, %v5224_v5  ;;  %v2021_v48 = vpop.f32.mrf.mxu3  ;;  %v9801_v5 = vld [vmem:[#allocation115_spill] sm:$0xff]  ;;  %v2148_v50 = vand.u32 2147483648, %v7156_v28  ;;  %vm2142_vm12 = vweird.f32 %v7156_v28 }
 0x30a   :  { %5231 = vpow2.f32 %v4880_v58  ;;  %v2022_v24 = vadd.f32 %v2021_v48, %v2007_v22  ;;  %v2123_v60 = vmul.f32 %v7158_v47, %v7149_v43  ;;  %v414_v39 = vadd.f32 %v9801_v5, %v9798_v59  ;;  %v9804_v22 = vld [vmem:[#allocation169_spill] sm:$0xff] }
 0x30b   :  { %v1995_v1 = vpop.f32.mrf.mxu1  ;;  %5233 = vrcp.f32 %v7161_v51  ;;  %v7178_v58 = vadd.f32 %v9804_v22, %v9680_v4  ;;  %vm2128_vm7 = vweird.f32 %v7158_v47  ;;  %vm2187_vm15 = vweird.f32 %v7161_v51 }
 0x30c   :  { %v2085_v30 = vadd.f32 %v2022_v24, %v412_v61  ;;  %v1996_v29 = vadd.f32 %v1995_v1, %v1981_v52  ;;  %v2124_v9 = vsub.f32 1.0, %v2123_v60  ;;  %v2131_v61 = vand.u32 2147483647, %v7149_v43  ;;  %v9805_v24 = vld [vmem:[#allocation170_spill] sm:$0xff]  ;;  %vm7209_vm9 = vmor %vm2127_vm10, %vm2128_vm7 }
 0x30d   :  { %v7186_v60 = vadd.f32 %v9805_v24, %v9802_v7  ;;  %v2134_v43 = vor.u32 1.1754944e-38, %v2133_v16 }
 0x30e   :  { %v5228_v48 = vpop.eup %5227  ;;  %v4881_v27 = vmul.f32 -1.442695, %v2085_v30  ;;  %v2088_v31 = vadd.f32 %v1996_v29, %v365_v55  ;;  %v2125_v53 = vmul.f32 %v7158_v47, %v2124_v9  ;;  %v2009_v55 = vpop.f32.mrf.mxu2  ;;  %vm7202_vm13 = vcmp.eq.f32.partialorder %v2131_v61, 8.507059e+37 }
 0x30f   :  { %v7182_v52 = vpop.eup %5229  ;;  %v7188_v1 = vadd.f32 1.0, %v5228_v48  ;;  %v2146_v48 = vand.u32 2147483647, %v7156_v28 }
 0x310   :  { %v5232_v5 = vpop.eup %5231  ;;  %5235 = vpow2.f32 %v4881_v27  ;;  %v4884_v30 = vmul.f32 -1.442695, %v2088_v31  ;;  %v2126_v29 = vadd.f32 %v7158_v47, %v2125_v53  ;;  %v2138_v9 = vmul.f32 %v7182_v52, %v7156_v28  ;;  %v2035_v27 = vpop.f32.mrf.mxu0 }
 0x311   :  { %5237 = vrcp.f32 %v7188_v1  ;;  %v7196_v22 = vadd.f32 1.0, %v5232_v5  ;;  %v2023_v24 = vpop.f32.mrf.mxu3  ;;  %v7200_v7 = vpop.eup %5233  ;;  %vm7221_vm11 = vcmp.eq.f32.partialorder %v2146_v48, 8.507059e+37  ;;  %vm2143_vm0 = vweird.f32 %v7182_v52 }
 0x312   :  { %5239 = vpow2.f32 %v4884_v30  ;;  %v2024_v31 = vadd.f32 %v2023_v24, %v2009_v55  ;;  %v2139_v53 = vsub.f32 1.0, %v2138_v9  ;;  %v2193_v30 = vand.u32 2147483648, %v7161_v51  ;;  %vm7255_vm10 = vmor %vm2142_vm12, %vm2143_vm0 }
 0x313   :  { %5241 = vrcp.f32 %v7196_v22  ;;  %v2049_v40 = vpop.f32.mrf.mxu1  ;;  %v2130_v9 = vsel %vm7209_vm9, %v7158_v47, %v2126_v29  ;;  %v2163_v33 = vand.u32 2147483648, %v7196_v22  ;;  %v2183_v16 = vmul.f32 %v7200_v7, %v7161_v51 }
 0x314   :  { %v2089_v55 = vadd.f32 %v2024_v31, %v414_v39  ;;  %v2050_v61 = vadd.f32 %v2049_v40, %v2035_v27  ;;  %v2140_v24 = vmul.f32 %v7182_v52, %v2139_v53  ;;  %v2191_v47 = vand.u32 2147483647, %v7161_v51 }
 0x315   :  { %v2161_v27 = vand.u32 2147483647, %v7196_v22  ;;  %v2135_v48 = vsel %vm7202_vm13, %v2134_v43, %v2130_v9  ;;  %v7239_v57 = vor.u32 1.1754944e-38, %v2193_v30  ;;  %vm2157_vm7 = vweird.f32 %v7196_v22 }
 0x316   :  { %v5236_v44 = vpop.eup %5235  ;;  %v4885_v39 = vmul.f32 -1.442695, %v2089_v55  ;;  %v2242_v40 = vadd.f32 %v2050_v61, %v6505_v49  ;;  %v2141_v53 = vadd.f32 %v7182_v52, %v2140_v24  ;;  %v2149_v61 = vor.u32 1.1754944e-38, %v2148_v50  ;;  %v2063_v30 = vpop.f32.mrf.mxu2 }
 0x317   :  { %v7230_v29 = vpop.eup %5237  ;;  %v7233_v31 = vadd.f32 1.0, %v5236_v44  ;;  %v2164_v42 = vor.u32 1.1754944e-38, %v2163_v33  ;;  %v2184_v59 = vsub.f32 1.0, %v2183_v16  ;;  %vm7259_vm13 = vcmp.eq.f32.partialorder %v2161_v27, 8.507059e+37 }
 0x318   :  { %v5240_v5 = vpop.eup %5239  ;;  %5243 = vpow2.f32 %v4885_v39  ;;  %v2246_v55 = vmul.f32 %v2242_v40, %v2135_v48  ;;  %v2145_v40 = vsel %vm7255_vm10, %v7182_v52, %v2141_v53  ;;  %vm2188_vm9 = vweird.f32 %v7200_v7 }
 0x319   :  { %v7241_v32 = vpop.eup %5241  ;;  %5245 = vrcp.f32 %v7233_v31  ;;  %v2077_v44 = vpop.f32.mrf.mxu3  ;;  %v2178_v9 = vand.u32 2147483648, %v7233_v31  ;;  %v7248_v24 = vadd.f32 1.0, %v5240_v5  ;;  %vm7267_vm3 = vcmp.eq.f32.partialorder %v2191_v47, 8.507059e+37 }
 0x31a   :  { %v2153_v43 = vmul.f32 %v7241_v32, %v7196_v22  ;;  %v2250_v50 = vadd.f32 %v2246_v55, %v7174_v0  ;;  %v2078_v39 = vadd.f32 %v2077_v44, %v2063_v30  ;;  %v2176_v27 = vand.u32 2147483647, %v7233_v31  ;;  %v2037_v55 = vpop.f32.mrf.mxu0 }
 0x31b   :  { %v2051_v48 = vpop.f32.mrf.mxu1  ;;  %5247 = vrcp.f32 %v7248_v24  ;;  %vm2158_vm12 = vweird.f32 %v7241_v32  ;;  %v2198_v47 = vmul.f32 %v7230_v29, %v7188_v1  ;;  %vm2172_vm0 = vweird.f32 %v7233_v31 }
 0x31c   :  { %v2154_v5 = vsub.f32 1.0, %v2153_v43  ;;  %v2243_v52 = vadd.f32 %v2078_v39, %v6500_v41  ;;  %v2052_v53 = vadd.f32 %v2051_v48, %v2037_v55  ;;  %v2179_v43 = vor.u32 1.1754944e-38, %v2178_v9  ;;  %vm7308_vm1 = vmor %vm2157_vm7, %vm2158_vm12 }
 0x31d   :  { %v2150_v28 = vsel %vm7221_vm11, %v2149_v61, %v2145_v40  ;;  %v2185_v37 = vmul.f32 %v7200_v7, %v2184_v59  ;;  %v2221_v12 = vand.u32 2147483647, %v7248_v24  ;;  %v2223_v39 = vand.u32 2147483648, %v7248_v24  ;;  %vm7299_vm11 = vmor %vm2187_vm15, %vm2188_vm9 }
 0x31e   :  { %v5244_v30 = vpop.eup %5243  ;;  %v2155_v33 = vmul.f32 %v7241_v32, %v2154_v5  ;;  %v2247_v55 = vmul.f32 %v2243_v52, %v2150_v28  ;;  %vm7290_vm10 = vcmp.eq.f32.partialorder %v2176_v27, 8.507059e+37  ;;  %5249 = vtanh.f32 %v2250_v50 }
 0x31f   :  { %v5246_v44 = vpop.eup %5245  ;;  %v7286_v48 = vadd.f32 1.0, %v5244_v30  ;;  %v2186_v2 = vadd.f32 %v7200_v7, %v2185_v37  ;;  %vm2202_vm2 = vweird.f32 %v7188_v1  ;;  %vm2217_vm4 = vweird.f32 %v7248_v24 }
 0x320   :  { %v2156_v23 = vadd.f32 %v7241_v32, %v2155_v33  ;;  %v2168_v5 = vmul.f32 %v5246_v44, %v7233_v31  ;;  %v2244_v37 = vadd.f32 %v2052_v53, %v6505_v49  ;;  %v2199_v51 = vsub.f32 1.0, %v2198_v47 }
 0x321   :  { %5251 = vrcp.f32 %v7286_v48  ;;  %v5248_v9 = vpop.eup %5247  ;;  %v2251_v28 = vadd.f32 %v2247_v55, %v7178_v58  ;;  %v2190_v22 = vsel %vm7299_vm11, %v7200_v7, %v2186_v2  ;;  %vm2173_vm15 = vweird.f32 %v5246_v44  ;;  %v2065_v2 = vpop.f32.mrf.mxu2 }
 0x322   :  { %v2169_v50 = vsub.f32 1.0, %v2168_v5  ;;  %v2160_v40 = vsel %vm7308_vm1, %v7241_v32, %v2156_v23  ;;  %v2213_v27 = vmul.f32 %v5248_v9, %v7248_v24  ;;  %vm7323_vm7 = vcmp.eq.f32.partialorder %v2221_v12, 8.507059e+37  ;;  %v2079_v32 = vpop.f32.mrf.mxu3 }
 0x323   :  { %v2224_v53 = vor.u32 1.1754944e-38, %v2223_v39  ;;  %vm2218_vm9 = vweird.f32 %v5248_v9  ;;  %v2165_v30 = vsel %vm7259_vm13, %v2164_v42, %v2160_v40  ;;  %v2195_v23 = vsel %vm7267_vm3, %v7239_v57, %v2190_v22  ;;  %vm2174_vm13 = vmor %vm2172_vm0, %vm2173_vm15 }
 0x324   :  { %v2170_v47 = vmul.f32 %v5246_v44, %v2169_v50  ;;  %v2214_v58 = vsub.f32 1.0, %v2213_v27  ;;  %v2258_v7 = vsub.f32 1.0, %v2165_v30  ;;  %5253 = vtanh.f32 %v2251_v28  ;;  %v5250_v55 = vpop.eup %5249  ;;  %vm2219_vm12 = vmor %vm2217_vm4, %vm2218_vm9 }
 0x325   :  { %v2248_v33 = vmul.f32 %v2244_v37, %v2195_v23  ;;  %v2266_v5 = vmul.f32 %v2165_v30, %v7009_v35  ;;  %v2200_v39 = vmul.f32 %v7230_v29, %v2199_v51  ;;  %vm2203_vm1 = vweird.f32 %v7230_v29 }
 0x326   :  { %v2171_v12 = vadd.f32 %v5246_v44, %v2170_v47  ;;  %v2215_v42 = vmul.f32 %v5248_v9, %v2214_v58  ;;  %v2262_v57 = vmul.f32 %v5250_v55, %v2258_v7  ;;  %v2080_v61 = vadd.f32 %v2079_v32, %v2065_v2  ;;  %vm7348_vm3 = vmor %vm2202_vm2, %vm2203_vm1 }
 0x327   :  { %v5252_v16 = vpop.eup %5251  ;;  %v2252_v0 = vadd.f32 %v2248_v33, %v7186_v60  ;;  %v2238_v37 = vand.u32 2147483648, %v7286_v48  ;;  %v2201_v40 = vadd.f32 %v7230_v29, %v2200_v39  ;;  %v9829_v30 = vand.u32 2147483648, %v7188_v1 }
 0x328   :  { %v2228_v59 = vmul.f32 %v5252_v16, %v7286_v48  ;;  %v2175_v50 = vsel %vm2174_vm13, %v5246_v44, %v2171_v12  ;;  %v2216_v51 = vadd.f32 %v5248_v9, %v2215_v42  ;;  %v2270_v28 = vadd.f32 %v2266_v5, %v2262_v57 }
 0x329   :  { %v2180_v22 = vsel %vm7290_vm10, %v2179_v43, %v2175_v50  ;;  %5255 = vtanh.f32 %v2252_v0  ;;  %v2205_v38 = vsel %vm7348_vm3, %v7230_v29, %v2201_v40  ;;  %v9828_v43 = vand.u32 2147483647, %v7188_v1  ;;  %v9830_v29 = vld [vmem:[#allocation171_spill] sm:$0xff] }
 0x32a   :  { %v2229_v31 = vsub.f32 1.0, %v2228_v59  ;;  %v2259_v44 = vsub.f32 1.0, %v2180_v22  ;;  %v5254_v27 = vpop.eup %5253  ;;  %vm2233_vm10 = vweird.f32 %v5252_v16  ;;  %v2220_v47 = vsel %vm2219_vm12, %v5248_v9, %v2216_v51 }
 0x32b   :  { %vm2207_vm0 = vcmp.eq.f32.partialorder %v9828_v43, 8.507059e+37  ;;  %v2209_v23 = vor.u32 1.1754944e-38, %v9829_v30  ;;  %v2245_v32 = vadd.f32 %v2080_v61, %v6500_v41  ;;  %v2267_v7 = vmul.f32 %v2180_v22, %v7028_v62  ;;  %v9835_v43 = vld [vmem:[#allocation102_spill] sm:$0xff]  ;;  %v9838_v30 = vld [vmem:[#allocation143_spill] sm:$0xff] }
 0x32c   :  { %v2230_v58 = vmul.f32 %v5252_v16, %v2229_v31  ;;  %v2263_v24 = vmul.f32 %v5254_v27, %v2259_v44  ;;  %v2225_v33 = vsel %vm7323_vm7, %v2224_v53, %v2220_v47  ;;  %v512_v55 = vadd.f32 %v9830_v29, %v9680_v4  ;;  %v9833_v44 = vld [vmem:[#allocation69_spill] sm:$0xff]  ;;  %v9836_v27 = vld [vmem:[#allocation146_spill] sm:$0xff] }
 0x32d   :  { %v2236_v12 = vand.u32 2147483647, %v7286_v48  ;;  %v2260_v5 = vsub.f32 1.0, %v2225_v33  ;;  %v2210_v2 = vsel %vm2207_vm0, %v2209_v23, %v2205_v38  ;;  %vm2232_vm2 = vweird.f32 %v7286_v48  ;;  %v9834_v38 = vld [vmem:[#allocation139_spill] sm:$0xff]  ;;  %v9837_v47 = vld [vmem:[#allocation86_spill] sm:$0xff]  ;;  %v9839_v23 = vld [vmem:[#allocation120_spill] sm:$0xff] }
 0x32e   :  { %v2231_v9 = vadd.f32 %v5252_v16, %v2230_v58  ;;  %v2271_v1 = vadd.f32 %v2267_v7, %v2263_v24  ;;  %v2249_v39 = vmul.f32 %v2245_v32, %v2210_v2  ;;  %vm2234_vm4 = vmor %vm2232_vm2, %vm2233_vm10  ;;  %v2239_v57 = vor.u32 1.1754944e-38, %v2238_v37  ;;  %v9840_v32 = vld [vmem:[#allocation150_spill] sm:$0xff]  ;;  %v9841_v58 = vld [vmem:[#allocation12_spill] sm:$0xff] }
 0x32f   :  { %v5256_v42 = vpop.eup %5255  ;;  %v2268_v52 = vmul.f32 %v2225_v33, %v7033_v25  ;;  %vm2237_vm11 = vcmp.eq.f32.partialorder %v2236_v12, 8.507059e+37  ;;  %vm9341_vm15 = vcmp.gt.s32.totalorder %v6586_v54, 2  ;;  %vm9340_vm7 = vcmp.gt.s32.totalorder %v6616_v34, 2  ;;  %v9842_v24 = vld [vmem:[#allocation30_spill] sm:$0xff]  ;;  %v9844_v33 = vld [vmem:[#allocation147_spill] sm:$0xff]  ;;  %v9847_v12 = vld [vmem:[#allocation124_spill] sm:$0xff] }
 0x330   :  { %v2264_v0 = vmul.f32 %v5256_v42, %v2260_v5  ;;  %v2235_v53 = vsel %vm2234_vm4, %v5252_v16, %v2231_v9  ;;  %v2253_v61 = vadd.f32 %v2249_v39, %v512_v55  ;;  %v7377_v48 = vsel %vm9341_vm15, %v2270_v28, %v7009_v35  ;;  %v9843_v7 = vld [vmem:[#allocation106_spill] sm:$0xff]  ;;  %v9846_v55 = vld [vmem:[#allocation32_spill] sm:$0xff]  ;;  %v9848_v5 = vld [vmem:[#allocation151_spill] sm:$0xff] }
 0x331   :  { %v2240_v50 = vsel %vm2237_vm11, %v2239_v57, %v2235_v53  ;;  %vm9343_vm9 = vcmp.gt.s32.totalorder %v6586_v54, 5  ;;  %vm9342_vm1 = vcmp.gt.s32.totalorder %v6616_v34, 5  ;;  %v9845_v29 = vld [vmem:[#allocation14_spill] sm:$0xff]  ;;  %v9849_v2 = vld [vmem:[#allocation13_spill] sm:$0xff]  ;;  %v9850_v9 = vld [vmem:[#allocation31_spill] sm:$0xff] }
 0x332   :  { %v2272_v59 = vadd.f32 %v2268_v52, %v2264_v0  ;;  %5257 = vtanh.f32 %v2253_v61  ;;  %v2261_v16 = vsub.f32 1.0, %v2240_v50  ;;  %v2269_v35 = vmul.f32 %v2240_v50, %v7045_v56  ;;  %v9852_v39 = vld [vmem:[#allocation34_spill] sm:$0xff]  ;;  %v9853_v42 = vld [vmem:[#allocation15_spill] sm:$0xff]  ;;  %v9854_v57 = vld [vmem:[#allocation33_spill] sm:$0xff] }
 0x333   :  { %v9855_v0 = vld [vmem:[#allocation18_spill] sm:$0xff]  ;;  %v9856_v52 = vld [vmem:[#allocation36_spill] sm:$0xff]  ;;  %v9857_v53 = vld [vmem:[#allocation17_spill] sm:$0xff] }
 0x334   :  { %v7382_v37 = vsel %vm9340_vm7, %v2272_v59, %v7033_v25  ;;  %v7396_v25 = vsel %vm9343_vm9, %v2271_v1, %v7028_v62  ;;  %v9831_v62 = vld [vmem:[#allocation84_spill] sm:$0xff]  ;;  %v9858_v61 = vld [vmem:[#allocation35_spill] sm:$0xff] }
 0x335   :  { %v2278_v40 = vpack.c.bf16 %v7382_v37, %v7377_v48  ;;  %v9851_v1 = vld [vmem:[#allocation16_spill] sm:$0xff] }
 0x336   :  { %v9859_v59 = vld [vmem:[#allocation20_spill] sm:$0xff] }
 0x337   :  { %2288 = vmatmul.bf16.vlgmr.msrb.gmra.mxu0 %v2278_v40  ;;  %2316 = vmatmul.bf16.vlgmr.msrb.gmra.mxu2 %v2278_v40  ;;  %v9860_v50 = vld [vmem:[#allocation40_spill] sm:$0xff] }
 0x338   :  { %v5258_v51 = vpop.eup %5257  ;;  %2392 = vmatpush.bf16.msrb.mxu0 %v9596_v15  ;;  %2420 = vmatpush.bf16.msrb.mxu2 %v6086_v6 }
 0x339   :  { %v2265_v22 = vmul.f32 %v5258_v51, %v2261_v16  ;;  %v9861_v16 = vld [vmem:[#allocation19_spill] sm:$0xff]  ;;  %v9863_v51 = vld [vmem:[#allocation22_spill] sm:$0xff] }
 0x33b   :  { %v2273_v28 = vadd.f32 %v2269_v35, %v2265_v22  ;;  %v9864_v22 = vld [vmem:[#allocation42_spill] sm:$0xff]  ;;  %v9865_v35 = vld [vmem:[#allocation21_spill] sm:$0xff] }
 0x33c   :  { %2393 = vmatpush.bf16.msrb.mxu0 %v9598_v63  ;;  %2421 = vmatpush.bf16.msrb.mxu2 %v6100_v3 }
 0x33d   :  { %v7401_v60 = vsel %vm9342_vm1, %v2273_v28, %v7045_v56  ;;  %v9832_v56 = vld [vmem:[#allocation142_spill] sm:$0xff]  ;;  %v9866_v28 = vld [vmem:[#allocation41_spill] sm:$0xff] }
 0x33e   :  { %v2279_v31 = vpack.c.bf16 %v7401_v60, %v7396_v25 }
 0x340   :  { %2302 = vmatmul.bf16.vlgmr.msrb.gmra.mxu1 %v2279_v31  ;;  %2330 = vmatmul.bf16.vlgmr.msrb.gmra.mxu3 %v2279_v31 }
 0x341   :  { %2406 = vmatpush.bf16.msrb.mxu1 %v9595_v17  ;;  %2434 = vmatpush.bf16.msrb.mxu3 %v6088_v10 }
 0x342   :  { %2394 = vmatpush.bf16.msrb.mxu0 %v9600_v8  ;;  %2422 = vmatpush.bf16.msrb.mxu2 %v6114_v36 }
 0x345   :  { %2407 = vmatpush.bf16.msrb.mxu1 %v9597_v26  ;;  %2435 = vmatpush.bf16.msrb.mxu3 %v6102_v21 }
 0x346   :  { %2395 = vmatpush.bf16.msrb.mxu0 %v9602_v18  ;;  %2423 = vmatpush.bf16.msrb.mxu2 %v6130_v45 }
 0x347   :  { %2344 = vmatmul.bf16.vlgmr.msra.gmra.mxu0 %v2278_v40  ;;  %2372 = vmatmul.bf16.vlgmr.msra.gmra.mxu2 %v2278_v40 }
 0x349   :  { %2408 = vmatpush.bf16.msrb.mxu1 %v9599_v19  ;;  %2436 = vmatpush.bf16.msrb.mxu3 %v6116_v14 }
 0x34a   :  { %2396 = vmatpush.bf16.msrb.mxu0 %v9604_v13  ;;  %2424 = vmatpush.bf16.msrb.mxu2 %v6142_v20 }
 0x34d   :  { %2409 = vmatpush.bf16.msrb.mxu1 %v9710_v46  ;;  %2437 = vmatpush.bf16.msrb.mxu3 %v9711_v11 }
 0x34e   :  { %2397 = vmatpush.bf16.msrb.mxu0 %v9831_v62  ;;  %2425 = vmatpush.bf16.msrb.mxu2 %v9832_v56 }
 0x350   :  { %2358 = vmatmul.bf16.vlgmr.msra.gmra.mxu1 %v2279_v31  ;;  %2386 = vmatmul.bf16.vlgmr.msra.gmra.mxu3 %v2279_v31 }
 0x351   :  { %2410 = vmatpush.bf16.msrb.mxu1 %v9833_v44  ;;  %2438 = vmatpush.bf16.msrb.mxu3 %v9834_v38 }
 0x352   :  { %2398 = vmatpush.bf16.msrb.mxu0 %v9835_v43  ;;  %2426 = vmatpush.bf16.msrb.mxu2 %v9836_v27 }
 0x355   :  { %2411 = vmatpush.bf16.msrb.mxu1 %v9837_v47  ;;  %2439 = vmatpush.bf16.msrb.mxu3 %v9838_v30 }
 0x356   :  { %2399 = vmatpush.bf16.msrb.mxu0 %v9839_v23  ;;  %2427 = vmatpush.bf16.msrb.mxu2 %v9840_v32 }
 0x359   :  { %2412 = vmatpush.bf16.msrb.mxu1 %v9843_v7  ;;  %2440 = vmatpush.bf16.msrb.mxu3 %v9844_v33  ;;  %v9922_v33 = vld [vmem:[#allocation172_spill] sm:$0xff] }
 0x35a   :  { %2646 = vmatpush.bf16.msra.mxu0 %v9841_v58  ;;  %2674 = vmatpush.bf16.msra.mxu2 %v9842_v24 }
 0x35b   :  { %2400 = vmatmul.bf16.vlgmr.msrb.gmra.mxu0 %v2278_v40  ;;  %2428 = vmatmul.bf16.vlgmr.msrb.gmra.mxu2 %v2278_v40  ;;  %v9862_v40 = vld [vmem:[#allocation37_spill] sm:$0xff] }
 0x35d   :  { %2413 = vmatpush.bf16.msrb.mxu1 %v9847_v12  ;;  %2441 = vmatpush.bf16.msrb.mxu3 %v9848_v5 }
 0x35e   :  { %2647 = vmatpush.bf16.msra.mxu0 %v9845_v29  ;;  %2675 = vmatpush.bf16.msra.mxu2 %v9846_v55 }
 0x360   :  { %2414 = vmatmul.bf16.vlgmr.msrb.gmra.mxu1 %v2279_v31  ;;  %2442 = vmatmul.bf16.vlgmr.msrb.gmra.mxu3 %v2279_v31  ;;  %v9867_v31 = vld [vmem:[#allocation24_spill] sm:$0xff] }
 0x361   :  { %2660 = vmatpush.bf16.msra.mxu1 %v9849_v2  ;;  %2688 = vmatpush.bf16.msra.mxu3 %v9850_v9 }
 0x362   :  { %2648 = vmatpush.bf16.msra.mxu0 %v9851_v1  ;;  %2676 = vmatpush.bf16.msra.mxu2 %v9852_v39  ;;  %v9912_v1 = vld [vmem:[#allocation99_spill] sm:$0xff] }
 0x365   :  { %2661 = vmatpush.bf16.msra.mxu1 %v9853_v42  ;;  %2689 = vmatpush.bf16.msra.mxu3 %v9854_v57 }
 0x366   :  { %2649 = vmatpush.bf16.msra.mxu0 %v9855_v0  ;;  %2677 = vmatpush.bf16.msra.mxu2 %v9856_v52  ;;  %v9910_v0 = vld [vmem:[#allocation98_spill] sm:$0xff] }
 0x369   :  { %2662 = vmatpush.bf16.msra.mxu1 %v9857_v53  ;;  %2690 = vmatpush.bf16.msra.mxu3 %v9858_v61  ;;  %v9868_v53 = vld [vmem:[#allocation44_spill] sm:$0xff]  ;;  %v9869_v61 = vld [vmem:[#allocation23_spill] sm:$0xff] }
 0x36a   :  { %2650 = vmatpush.bf16.msra.mxu0 %v9859_v59  ;;  %2678 = vmatpush.bf16.msra.mxu2 %v9860_v50  ;;  %v9870_v59 = vld [vmem:[#allocation43_spill] sm:$0xff]  ;;  %v9871_v50 = vld [vmem:[#allocation26_spill] sm:$0xff] }
 0x36d   :  { %2663 = vmatpush.bf16.msra.mxu1 %v9861_v16  ;;  %2691 = vmatpush.bf16.msra.mxu3 %v9862_v40  ;;  %v9872_v16 = vld [vmem:[#allocation46_spill] sm:$0xff] }
 0x36e   :  { %2651 = vmatpush.bf16.msra.mxu0 %v9863_v51  ;;  %2679 = vmatpush.bf16.msra.mxu2 %v9864_v22  ;;  %v9873_v40 = vld [vmem:[#allocation62_spill] sm:$0xff]  ;;  %v9874_v51 = vld [vmem:[#allocation95_spill] sm:$0xff]  ;;  %v9875_v22 = vld [vmem:[#allocation25_spill] sm:$0xff] }
 0x371   :  { %2664 = vmatpush.bf16.msra.mxu1 %v9865_v35  ;;  %2692 = vmatpush.bf16.msra.mxu3 %v9866_v28  ;;  %v9876_v35 = vld [vmem:[#allocation45_spill] sm:$0xff]  ;;  %v9877_v28 = vld [vmem:[#allocation64_spill] sm:$0xff] }
 0x372   :  { %2652 = vmatpush.bf16.msra.mxu0 %v9867_v31  ;;  %2680 = vmatpush.bf16.msra.mxu2 %v9868_v53  ;;  %v9878_v31 = vld [vmem:[#allocation100_spill] sm:$0xff]  ;;  %v9879_v53 = vld [vmem:[#allocation29_spill] sm:$0xff] }
 0x375   :  { %2665 = vmatpush.bf16.msra.mxu1 %v9869_v61  ;;  %2693 = vmatpush.bf16.msra.mxu3 %v9870_v59  ;;  %v9880_v61 = vld [vmem:[#allocation47_spill] sm:$0xff] }
 0x376   :  { %2653 = vmatpush.bf16.msra.mxu0 %v9871_v50  ;;  %2681 = vmatpush.bf16.msra.mxu2 %v9872_v16  ;;  %v9881_v59 = vld [vmem:[#allocation63_spill] sm:$0xff]  ;;  %v9882_v50 = vld [vmem:[#allocation96_spill] sm:$0xff] }
 0x377   :  { %v9883_v16 = vld [vmem:[#allocation72_spill] sm:$0xff] }
 0x379   :  { %2666 = vmatpush.bf16.msra.mxu1 %v9875_v22  ;;  %2694 = vmatpush.bf16.msra.mxu3 %v9876_v35  ;;  %v9886_v22 = vld [vmem:[#allocation101_spill] sm:$0xff]  ;;  %v9887_v35 = vld [vmem:[#allocation74_spill] sm:$0xff] }
 0x37a   :  { %2702 = vmatpush.bf16.msrb.mxu0 %v9873_v40  ;;  %2730 = vmatpush.bf16.msrb.mxu2 %v9874_v51  ;;  %v9884_v40 = vld [vmem:[#allocation104_spill] sm:$0xff]  ;;  %v9885_v51 = vld [vmem:[#allocation65_spill] sm:$0xff] }
 0x37d   :  { %2667 = vmatpush.bf16.msra.mxu1 %v9879_v53  ;;  %2695 = vmatpush.bf16.msra.mxu3 %v9880_v61  ;;  %v9890_v53 = vld [vmem:[#allocation105_spill] sm:$0xff]  ;;  %v9891_v61 = vld [vmem:[#allocation80_spill] sm:$0xff] }
 0x37e   :  { %2703 = vmatpush.bf16.msrb.mxu0 %v9877_v28  ;;  %2731 = vmatpush.bf16.msrb.mxu2 %v9878_v31  ;;  %v9888_v28 = vld [vmem:[#allocation110_spill] sm:$0xff]  ;;  %v9889_v31 = vld [vmem:[#allocation73_spill] sm:$0xff] }
 0x381   :  { %2716 = vmatpush.bf16.msrb.mxu1 %v9881_v59  ;;  %2744 = vmatpush.bf16.msrb.mxu3 %v9882_v50  ;;  %v9892_v59 = vld [vmem:[#allocation113_spill] sm:$0xff]  ;;  %v9893_v50 = vld [vmem:[#allocation75_spill] sm:$0xff] }
 0x382   :  { %2704 = vmatpush.bf16.msrb.mxu0 %v9883_v16  ;;  %2732 = vmatpush.bf16.msrb.mxu2 %v9884_v40  ;;  %v9894_v16 = vld [vmem:[#allocation111_spill] sm:$0xff]  ;;  %v9895_v40 = vld [vmem:[#allocation82_spill] sm:$0xff] }
 0x385   :  { %2717 = vmatpush.bf16.msrb.mxu1 %v9885_v51  ;;  %2745 = vmatpush.bf16.msrb.mxu3 %v9886_v22  ;;  %v9896_v51 = vld [vmem:[#allocation118_spill] sm:$0xff]  ;;  %v9897_v22 = vld [vmem:[#allocation81_spill] sm:$0xff] }
 0x386   :  { %2705 = vmatpush.bf16.msrb.mxu0 %v9887_v35  ;;  %2733 = vmatpush.bf16.msrb.mxu2 %v9888_v28  ;;  %v9898_v35 = vld [vmem:[#allocation114_spill] sm:$0xff] }
 0x387   :  { %v9899_v28 = vld [vmem:[#allocation90_spill] sm:$0xff] }
 0x389   :  { %2718 = vmatpush.bf16.msrb.mxu1 %v9889_v31  ;;  %2746 = vmatpush.bf16.msrb.mxu3 %v9890_v53  ;;  %v9900_v31 = vld [vmem:[#allocation122_spill] sm:$0xff]  ;;  %v9901_v53 = vld [vmem:[#allocation83_spill] sm:$0xff] }
 0x38a   :  { %2706 = vmatpush.bf16.msrb.mxu0 %v9891_v61  ;;  %2734 = vmatpush.bf16.msrb.mxu2 %v9892_v59  ;;  %v9902_v61 = vld [vmem:[#allocation119_spill] sm:$0xff]  ;;  %v9903_v59 = vld [vmem:[#allocation92_spill] sm:$0xff] }
 0x38d   :  { %2719 = vmatpush.bf16.msrb.mxu1 %v9893_v50  ;;  %2747 = vmatpush.bf16.msrb.mxu3 %v9894_v16  ;;  %v9904_v50 = vld [vmem:[#allocation128_spill] sm:$0xff]  ;;  %v9905_v16 = vld [vmem:[#allocation91_spill] sm:$0xff] }
 0x38e   :  { %2707 = vmatpush.bf16.msrb.mxu0 %v9895_v40  ;;  %2735 = vmatpush.bf16.msrb.mxu2 %v9896_v51  ;;  %v9906_v40 = vld [vmem:[#allocation123_spill] sm:$0xff]  ;;  %v9907_v51 = vld [vmem:[#allocation93_spill] sm:$0xff] }
 0x391   :  { %2720 = vmatpush.bf16.msrb.mxu1 %v9897_v22  ;;  %2748 = vmatpush.bf16.msrb.mxu3 %v9898_v35  ;;  %v9908_v22 = vld [vmem:[#allocation129_spill] sm:$0xff] }
 0x392   :  { %2708 = vmatpush.bf16.msrb.mxu0 %v9899_v28  ;;  %2736 = vmatpush.bf16.msrb.mxu2 %v9900_v31  ;;  %v9909_v31 = vld [vmem:[#allocation178_spill] sm:$0xff] }
 0x395   :  { %2721 = vmatpush.bf16.msrb.mxu1 %v9901_v53  ;;  %2749 = vmatpush.bf16.msrb.mxu3 %v9902_v61  ;;  %v270_v53 = vadd.f32 %v9910_v0, %v9909_v31 }
 0x396   :  { %2709 = vmatpush.bf16.msrb.mxu0 %v9903_v59  ;;  %2737 = vmatpush.bf16.msrb.mxu2 %v9904_v50  ;;  %v9911_v50 = vld [vmem:[#allocation181_spill] sm:$0xff] }
 0x399   :  { %2722 = vmatpush.bf16.msrb.mxu1 %v9905_v16  ;;  %2750 = vmatpush.bf16.msrb.mxu3 %v9906_v40  ;;  %v319_v16 = vadd.f32 %v9912_v1, %v9911_v50  ;;  %v9914_v1 = vld [vmem:[#allocation109_spill] sm:$0xff] }
 0x39d   :  { %2723 = vmatpush.bf16.msrb.mxu1 %v9907_v51  ;;  %2751 = vmatpush.bf16.msrb.mxu3 %v9908_v22  ;;  %v9913_v51 = vld [vmem:[#allocation108_spill] sm:$0xff] }
 0x39e   :  { %v272_v22 = vadd.f32 %v9913_v51, %v9909_v31  ;;  %v9921_v31 = vld [vmem:[#allocation77_spill] sm:$0xff] }
 0x3b4   :  { %v2289_v35 = vpop.f32.mrf.mxu0 }
 0x3ba   :  { %v2317_v28 = vpop.f32.mrf.mxu2 }
 0x3bc   :  { %v2291_v61 = vpop.f32.mrf.mxu0 }
 0x3bd   :  { %v2303_v52 = vpop.f32.mrf.mxu1 }
 0x3be   :  { %v2304_v57 = vadd.f32 %v2303_v52, %v2289_v35 }
 0x3c0   :  { %v2448_v42 = vadd.f32 %v2304_v57, %v270_v53 }
 0x3c2   :  { %v4886_v59 = vmul.f32 -1.442695, %v2448_v42  ;;  %v2319_v12 = vpop.f32.mrf.mxu2 }
 0x3c3   :  { %v2331_v39 = vpop.f32.mrf.mxu3 }
 0x3c4   :  { %5259 = vpow2.f32 %v4886_v59  ;;  %v2332_v40 = vadd.f32 %v2331_v39, %v2317_v28  ;;  %v2345_v0 = vpop.f32.mrf.mxu0  ;;  %v321_v59 = vadd.f32 %v9914_v1, %v9911_v50 }
 0x3c5   :  { %v2305_v9 = vpop.f32.mrf.mxu1 }
 0x3c6   :  { %v2449_v2 = vadd.f32 %v2332_v40, %v319_v16  ;;  %v2306_v5 = vadd.f32 %v2305_v9, %v2291_v61  ;;  %v9915_v16 = vld [vmem:[#allocation51_spill] sm:$0xff]  ;;  %v9916_v9 = vld [vmem:[#allocation121_spill] sm:$0xff] }
 0x3c7   :  { %v368_v61 = vadd.f32 %v9916_v9, %v9915_v16  ;;  %v9917_v9 = vld [vmem:[#allocation182_spill] sm:$0xff] }
 0x3c8   :  { %v4887_v55 = vmul.f32 -1.442695, %v2449_v2  ;;  %v2452_v29 = vadd.f32 %v2306_v5, %v272_v22 }
 0x3ca   :  { %v5260_v52 = vpop.eup %5259  ;;  %5261 = vpow2.f32 %v4887_v55  ;;  %v4890_v57 = vmul.f32 -1.442695, %v2452_v29  ;;  %v2373_v29 = vpop.f32.mrf.mxu2 }
 0x3cb   :  { %v7503_v42 = vadd.f32 1.0, %v5260_v52  ;;  %v2333_v53 = vpop.f32.mrf.mxu3 }
 0x3cc   :  { %5263 = vpow2.f32 %v4890_v57  ;;  %v2334_v39 = vadd.f32 %v2333_v53, %v2319_v12  ;;  %v2347_v1 = vpop.f32.mrf.mxu0 }
 0x3cd   :  { %5265 = vrcp.f32 %v7503_v42  ;;  %v2359_v51 = vpop.f32.mrf.mxu1  ;;  %vm2493_vm3 = vweird.f32 %v7503_v42 }
 0x3ce   :  { %v2453_v2 = vadd.f32 %v2334_v39, %v321_v59  ;;  %v2360_v5 = vadd.f32 %v2359_v51, %v2345_v0  ;;  %v9918_v59 = vld [vmem:[#allocation125_spill] sm:$0xff] }
 0x3cf   :  { %v417_v0 = vadd.f32 %v9918_v59, %v9917_v9  ;;  %v7528_v59 = vadd.f32 %v9922_v33, %v9921_v31  ;;  %v2499_v33 = vand.u32 2147483648, %v7503_v42 }
 0x3d0   :  { %v5262_v40 = vpop.eup %5261  ;;  %v4891_v22 = vmul.f32 -1.442695, %v2453_v2  ;;  %v2450_v55 = vadd.f32 %v2360_v5, %v368_v61  ;;  %v9919_v61 = vld [vmem:[#allocation130_spill] sm:$0xff] }
 0x3d1   :  { %v7510_v35 = vadd.f32 1.0, %v5262_v40  ;;  %v370_v2 = vadd.f32 %v9919_v61, %v9915_v16 }
 0x3d2   :  { %v5264_v28 = vpop.eup %5263  ;;  %5267 = vpow2.f32 %v4891_v22  ;;  %v4888_v52 = vmul.f32 -1.442695, %v2450_v55 }
 0x3d3   :  { %v7512_v57 = vpop.eup %5265  ;;  %5269 = vrcp.f32 %v7510_v35  ;;  %v7515_v12 = vadd.f32 1.0, %v5264_v28  ;;  %v2387_v53 = vpop.f32.mrf.mxu3  ;;  %v9920_v28 = vld [vmem:[#allocation131_spill] sm:$0xff]  ;;  %v2514_v58 = vand.u32 2147483648, %v7510_v35  ;;  %vm2508_vm10 = vweird.f32 %v7510_v35 }
 0x3d4   :  { %5271 = vpow2.f32 %v4888_v52  ;;  %v2388_v39 = vadd.f32 %v2387_v53, %v2373_v29  ;;  %v2489_v51 = vmul.f32 %v7512_v57, %v7503_v42  ;;  %v419_v50 = vadd.f32 %v9920_v28, %v9917_v9  ;;  %v9923_v29 = vld [vmem:[#allocation173_spill] sm:$0xff] }
 0x3d5   :  { %v2361_v5 = vpop.f32.mrf.mxu1  ;;  %5273 = vrcp.f32 %v7515_v12  ;;  %v7532_v52 = vadd.f32 %v9923_v29, %v9680_v4  ;;  %vm2494_vm13 = vweird.f32 %v7512_v57  ;;  %vm2553_vm11 = vweird.f32 %v7515_v12 }
 0x3d6   :  { %v2451_v40 = vadd.f32 %v2388_v39, %v417_v0  ;;  %v2362_v22 = vadd.f32 %v2361_v5, %v2347_v1  ;;  %v2490_v55 = vsub.f32 1.0, %v2489_v51  ;;  %v2497_v0 = vand.u32 2147483647, %v7503_v42  ;;  %v9924_v39 = vld [vmem:[#allocation174_spill] sm:$0xff]  ;;  %vm7563_vm0 = vmor %vm2493_vm3, %vm2494_vm13 }
 0x3d7   :  { %v7540_v51 = vadd.f32 %v9924_v39, %v9921_v31  ;;  %v2500_v42 = vor.u32 1.1754944e-38, %v2499_v33 }
 0x3d8   :  { %v5268_v53 = vpop.eup %5267  ;;  %v4889_v7 = vmul.f32 -1.442695, %v2451_v40  ;;  %v2454_v61 = vadd.f32 %v2362_v22, %v370_v2  ;;  %v2491_v16 = vmul.f32 %v7512_v57, %v2490_v55  ;;  %v2375_v2 = vpop.f32.mrf.mxu2  ;;  %vm7556_vm12 = vcmp.eq.f32.partialorder %v2497_v0, 8.507059e+37 }
 0x3d9   :  { %v7536_v1 = vpop.eup %5269  ;;  %v7542_v5 = vadd.f32 1.0, %v5268_v53  ;;  %v2512_v53 = vand.u32 2147483647, %v7510_v35 }
 0x3da   :  { %v5272_v28 = vpop.eup %5271  ;;  %5275 = vpow2.f32 %v4889_v7  ;;  %v4892_v40 = vmul.f32 -1.442695, %v2454_v61  ;;  %v2492_v22 = vadd.f32 %v7512_v57, %v2491_v16  ;;  %v2504_v55 = vmul.f32 %v7536_v1, %v7510_v35  ;;  %v2401_v7 = vpop.f32.mrf.mxu0 }
 0x3db   :  { %5277 = vrcp.f32 %v7542_v5  ;;  %v7550_v29 = vadd.f32 1.0, %v5272_v28  ;;  %v2389_v39 = vpop.f32.mrf.mxu3  ;;  %v7554_v31 = vpop.eup %5273  ;;  %vm7575_vm2 = vcmp.eq.f32.partialorder %v2512_v53, 8.507059e+37  ;;  %vm2509_vm4 = vweird.f32 %v7536_v1 }
 0x3dc   :  { %5279 = vpow2.f32 %v4892_v40  ;;  %v2390_v61 = vadd.f32 %v2389_v39, %v2375_v2  ;;  %v2505_v16 = vsub.f32 1.0, %v2504_v55  ;;  %v2559_v40 = vand.u32 2147483648, %v7515_v12  ;;  %vm7609_vm3 = vmor %vm2508_vm10, %vm2509_vm4 }
 0x3dd   :  { %5281 = vrcp.f32 %v7550_v29  ;;  %v2415_v24 = vpop.f32.mrf.mxu1  ;;  %v2496_v55 = vsel %vm7563_vm0, %v7512_v57, %v2492_v22  ;;  %v2529_v32 = vand.u32 2147483648, %v7550_v29  ;;  %v2549_v33 = vmul.f32 %v7554_v31, %v7515_v12 }
 0x3de   :  { %v2455_v2 = vadd.f32 %v2390_v61, %v419_v50  ;;  %v2416_v0 = vadd.f32 %v2415_v24, %v2401_v7  ;;  %v2506_v39 = vmul.f32 %v7536_v1, %v2505_v16  ;;  %v2557_v57 = vand.u32 2147483647, %v7515_v12 }
 0x3df   :  { %v2527_v7 = vand.u32 2147483647, %v7550_v29  ;;  %v2501_v53 = vsel %vm7556_vm12, %v2500_v42, %v2496_v55  ;;  %v7593_v47 = vor.u32 1.1754944e-38, %v2559_v40  ;;  %vm2523_vm13 = vweird.f32 %v7550_v29 }
 0x3e0   :  { %v5276_v30 = vpop.eup %5275  ;;  %v4893_v50 = vmul.f32 -1.442695, %v2455_v2  ;;  %v2608_v24 = vadd.f32 %v2416_v0, %v6505_v49  ;;  %v2507_v16 = vadd.f32 %v7536_v1, %v2506_v39  ;;  %v2515_v0 = vor.u32 1.1754944e-38, %v2514_v58  ;;  %v2429_v40 = vpop.f32.mrf.mxu2 }
 0x3e1   :  { %v7584_v22 = vpop.eup %5277  ;;  %v7587_v61 = vadd.f32 1.0, %v5276_v30  ;;  %v2530_v43 = vor.u32 1.1754944e-38, %v2529_v32  ;;  %v2550_v9 = vsub.f32 1.0, %v2549_v33  ;;  %vm7613_vm12 = vcmp.eq.f32.partialorder %v2527_v7, 8.507059e+37 }
 0x3e2   :  { %v5280_v28 = vpop.eup %5279  ;;  %5283 = vpow2.f32 %v4893_v50  ;;  %v2612_v2 = vmul.f32 %v2608_v24, %v2501_v53  ;;  %v2511_v24 = vsel %vm7609_vm3, %v7536_v1, %v2507_v16  ;;  %vm2554_vm0 = vweird.f32 %v7554_v31 }
 0x3e3   :  { %v7595_v27 = vpop.eup %5281  ;;  %5285 = vrcp.f32 %v7587_v61  ;;  %v2443_v30 = vpop.f32.mrf.mxu3  ;;  %v2544_v55 = vand.u32 2147483648, %v7587_v61  ;;  %v7602_v39 = vadd.f32 1.0, %v5280_v28  ;;  %vm7621_vm8 = vcmp.eq.f32.partialorder %v2557_v57, 8.507059e+37 }
 0x3e4   :  { %v2519_v42 = vmul.f32 %v7595_v27, %v7550_v29  ;;  %v2616_v58 = vadd.f32 %v2612_v2, %v7528_v59  ;;  %v2444_v50 = vadd.f32 %v2443_v30, %v2429_v40  ;;  %v2542_v7 = vand.u32 2147483647, %v7587_v61  ;;  %v2403_v2 = vpop.f32.mrf.mxu0 }
 0x3e5   :  { %v2417_v53 = vpop.f32.mrf.mxu1  ;;  %5287 = vrcp.f32 %v7602_v39  ;;  %vm2524_vm10 = vweird.f32 %v7595_v27  ;;  %v2564_v57 = vmul.f32 %v7584_v22, %v7542_v5  ;;  %vm2538_vm4 = vweird.f32 %v7587_v61 }
 0x3e6   :  { %v2520_v28 = vsub.f32 1.0, %v2519_v42  ;;  %v2609_v1 = vadd.f32 %v2444_v50, %v6500_v41  ;;  %v2418_v16 = vadd.f32 %v2417_v53, %v2403_v2  ;;  %v2545_v42 = vor.u32 1.1754944e-38, %v2544_v55  ;;  %vm7662_vm6 = vmor %vm2523_vm13, %vm2524_vm10 }
 0x3e7   :  { %v2516_v35 = vsel %vm7575_vm2, %v2515_v0, %v2511_v24  ;;  %v2551_v38 = vmul.f32 %v7554_v31, %v2550_v9  ;;  %v2587_v44 = vand.u32 2147483647, %v7602_v39  ;;  %v2589_v50 = vand.u32 2147483648, %v7602_v39  ;;  %vm7653_vm2 = vmor %vm2553_vm11, %vm2554_vm0 }
 0x3e8   :  { %v5284_v40 = vpop.eup %5283  ;;  %v2521_v32 = vmul.f32 %v7595_v27, %v2520_v28  ;;  %v2613_v2 = vmul.f32 %v2609_v1, %v2516_v35  ;;  %vm7644_vm3 = vcmp.eq.f32.partialorder %v2542_v7, 8.507059e+37  ;;  %5289 = vtanh.f32 %v2616_v58 }
 0x3e9   :  { %v5286_v30 = vpop.eup %5285  ;;  %v7640_v53 = vadd.f32 1.0, %v5284_v40  ;;  %v2552_v23 = vadd.f32 %v7554_v31, %v2551_v38  ;;  %vm2568_vm5 = vweird.f32 %v7542_v5  ;;  %vm2583_vm14 = vweird.f32 %v7602_v39 }
 0x3ea   :  { %v2522_v56 = vadd.f32 %v7595_v27, %v2521_v32  ;;  %v2534_v28 = vmul.f32 %v5286_v30, %v7587_v61  ;;  %v2610_v38 = vadd.f32 %v2418_v16, %v6505_v49  ;;  %v2565_v12 = vsub.f32 1.0, %v2564_v57 }
 0x3eb   :  { %5291 = vrcp.f32 %v7640_v53  ;;  %v5288_v55 = vpop.eup %5287  ;;  %v2617_v35 = vadd.f32 %v2613_v2, %v7532_v52  ;;  %v2556_v29 = vsel %vm7653_vm2, %v7554_v31, %v2552_v23  ;;  %vm2539_vm11 = vweird.f32 %v5286_v30  ;;  %v2431_v23 = vpop.f32.mrf.mxu2 }
 0x3ec   :  { %v2535_v58 = vsub.f32 1.0, %v2534_v28  ;;  %v2526_v24 = vsel %vm7662_vm6, %v7595_v27, %v2522_v56  ;;  %v2579_v7 = vmul.f32 %v5288_v55, %v7602_v39  ;;  %vm7677_vm13 = vcmp.eq.f32.partialorder %v2587_v44, 8.507059e+37  ;;  %v2445_v27 = vpop.f32.mrf.mxu3 }
 0x3ed   :  { %v2590_v16 = vor.u32 1.1754944e-38, %v2589_v50  ;;  %vm2584_vm0 = vweird.f32 %v5288_v55  ;;  %v2531_v40 = vsel %vm7613_vm12, %v2530_v43, %v2526_v24  ;;  %v2561_v56 = vsel %vm7621_vm8, %v7593_v47, %v2556_v29  ;;  %vm2540_vm12 = vmor %vm2538_vm4, %vm2539_vm11 }
 0x3ee   :  { %v2536_v57 = vmul.f32 %v5286_v30, %v2535_v58  ;;  %v2580_v52 = vsub.f32 1.0, %v2579_v7  ;;  %v2624_v31 = vsub.f32 1.0, %v2531_v40  ;;  %5293 = vtanh.f32 %v2617_v35  ;;  %v5290_v2 = vpop.eup %5289  ;;  %vm2585_vm10 = vmor %vm2583_vm14, %vm2584_vm0 }
 0x3ef   :  { %v2614_v32 = vmul.f32 %v2610_v38, %v2561_v56  ;;  %v2632_v28 = vmul.f32 %v2531_v40, %v7377_v48  ;;  %v2566_v50 = vmul.f32 %v7584_v22, %v2565_v12  ;;  %vm2569_vm6 = vweird.f32 %v7584_v22 }
 0x3f0   :  { %v2537_v44 = vadd.f32 %v5286_v30, %v2536_v57  ;;  %v2581_v43 = vmul.f32 %v5288_v55, %v2580_v52  ;;  %v2628_v47 = vmul.f32 %v5290_v2, %v2624_v31  ;;  %v2446_v0 = vadd.f32 %v2445_v27, %v2431_v23  ;;  %vm7702_vm8 = vmor %vm2568_vm5, %vm2569_vm6 }
 0x3f1   :  { %v5292_v33 = vpop.eup %5291  ;;  %v2618_v59 = vadd.f32 %v2614_v32, %v7540_v51  ;;  %v2604_v38 = vand.u32 2147483648, %v7640_v53  ;;  %v2567_v24 = vadd.f32 %v7584_v22, %v2566_v50  ;;  %v9948_v40 = vand.u32 2147483648, %v7542_v5 }
 0x3f2   :  { %v2594_v9 = vmul.f32 %v5292_v33, %v7640_v53  ;;  %v2541_v58 = vsel %vm2540_vm12, %v5286_v30, %v2537_v44  ;;  %v2582_v12 = vadd.f32 %v5288_v55, %v2581_v43  ;;  %v2636_v35 = vadd.f32 %v2632_v28, %v2628_v47 }
 0x3f3   :  { %v2546_v29 = vsel %vm7644_vm3, %v2545_v42, %v2541_v58  ;;  %5295 = vtanh.f32 %v2618_v59  ;;  %v2571_v62 = vsel %vm7702_vm8, %v7584_v22, %v2567_v24  ;;  %v9947_v42 = vand.u32 2147483647, %v7542_v5  ;;  %v9949_v22 = vld [vmem:[#allocation175_spill] sm:$0xff] }
 0x3f4   :  { %v2595_v61 = vsub.f32 1.0, %v2594_v9  ;;  %v2625_v30 = vsub.f32 1.0, %v2546_v29  ;;  %v5294_v7 = vpop.eup %5293  ;;  %vm2599_vm3 = vweird.f32 %v5292_v33  ;;  %v2586_v57 = vsel %vm2585_vm10, %v5288_v55, %v2582_v12 }
 0x3f5   :  { %vm2573_vm4 = vcmp.eq.f32.partialorder %v9947_v42, 8.507059e+37  ;;  %v2575_v56 = vor.u32 1.1754944e-38, %v9948_v40  ;;  %v2611_v27 = vadd.f32 %v2446_v0, %v6500_v41  ;;  %v2633_v31 = vmul.f32 %v2546_v29, %v7396_v25  ;;  %v9954_v42 = vld [vmem:[#allocation102_spill] sm:$0xff]  ;;  %v9957_v40 = vld [vmem:[#allocation143_spill] sm:$0xff] }
 0x3f6   :  { %v2596_v52 = vmul.f32 %v5292_v33, %v2595_v61  ;;  %v2629_v39 = vmul.f32 %v5294_v7, %v2625_v30  ;;  %v2591_v32 = vsel %vm7677_vm13, %v2590_v16, %v2586_v57  ;;  %v517_v2 = vadd.f32 %v9949_v22, %v9680_v4  ;;  %v9952_v30 = vld [vmem:[#allocation69_spill] sm:$0xff]  ;;  %v9955_v7 = vld [vmem:[#allocation146_spill] sm:$0xff] }
 0x3f7   :  { %v2602_v44 = vand.u32 2147483647, %v7640_v53  ;;  %v2626_v28 = vsub.f32 1.0, %v2591_v32  ;;  %v2576_v23 = vsel %vm2573_vm4, %v2575_v56, %v2571_v62  ;;  %vm2598_vm5 = vweird.f32 %v7640_v53  ;;  %v9953_v62 = vld [vmem:[#allocation139_spill] sm:$0xff]  ;;  %v9956_v57 = vld [vmem:[#allocation86_spill] sm:$0xff]  ;;  %v9958_v56 = vld [vmem:[#allocation120_spill] sm:$0xff] }
 0x3f8   :  { %v2597_v55 = vadd.f32 %v5292_v33, %v2596_v52  ;;  %v2637_v5 = vadd.f32 %v2633_v31, %v2629_v39  ;;  %v2615_v50 = vmul.f32 %v2611_v27, %v2576_v23  ;;  %vm2600_vm14 = vmor %vm2598_vm5, %vm2599_vm3  ;;  %v2605_v47 = vor.u32 1.1754944e-38, %v2604_v38  ;;  %v9959_v27 = vld [vmem:[#allocation150_spill] sm:$0xff]  ;;  %v9960_v52 = vld [vmem:[#allocation12_spill] sm:$0xff] }
 0x3f9   :  { %v5296_v43 = vpop.eup %5295  ;;  %v2634_v1 = vmul.f32 %v2591_v32, %v7382_v37  ;;  %vm2603_vm2 = vcmp.eq.f32.partialorder %v2602_v44, 8.507059e+37  ;;  %vm669_vm11 = vcmp.gt.s32.totalorder %v6586_v54, 3  ;;  %vm671_vm13 = vcmp.gt.s32.totalorder %v6616_v34, 3  ;;  %v9961_v39 = vld [vmem:[#allocation30_spill] sm:$0xff]  ;;  %v9963_v32 = vld [vmem:[#allocation147_spill] sm:$0xff]  ;;  %v9966_v44 = vld [vmem:[#allocation124_spill] sm:$0xff] }
 0x3fa   :  { %v2630_v59 = vmul.f32 %v5296_v43, %v2626_v28  ;;  %v2601_v16 = vsel %vm2600_vm14, %v5292_v33, %v2597_v55  ;;  %v2619_v0 = vadd.f32 %v2615_v50, %v517_v2  ;;  %v7731_v53 = vsel %vm669_vm11, %v2636_v35, %v7377_v48  ;;  %v9962_v31 = vld [vmem:[#allocation106_spill] sm:$0xff]  ;;  %v9965_v2 = vld [vmem:[#allocation32_spill] sm:$0xff]  ;;  %v9967_v28 = vld [vmem:[#allocation151_spill] sm:$0xff] }
 0x3fb   :  { %v2606_v58 = vsel %vm2603_vm2, %v2605_v47, %v2601_v16  ;;  %vm670_vm0 = vcmp.gt.s32.totalorder %v6586_v54, 4  ;;  %vm672_vm6 = vcmp.gt.s32.totalorder %v6616_v34, 4  ;;  %v9964_v22 = vld [vmem:[#allocation14_spill] sm:$0xff]  ;;  %v9968_v23 = vld [vmem:[#allocation13_spill] sm:$0xff]  ;;  %v9969_v55 = vld [vmem:[#allocation31_spill] sm:$0xff] }
 0x3fc   :  { %v2638_v9 = vadd.f32 %v2634_v1, %v2630_v59  ;;  %5297 = vtanh.f32 %v2619_v0  ;;  %v2627_v33 = vsub.f32 1.0, %v2606_v58  ;;  %v2635_v48 = vmul.f32 %v2606_v58, %v7401_v60  ;;  %v9971_v50 = vld [vmem:[#allocation34_spill] sm:$0xff]  ;;  %v9972_v43 = vld [vmem:[#allocation15_spill] sm:$0xff]  ;;  %v9973_v47 = vld [vmem:[#allocation33_spill] sm:$0xff] }
 0x3fd   :  { %v9974_v59 = vld [vmem:[#allocation18_spill] sm:$0xff]  ;;  %v9975_v1 = vld [vmem:[#allocation36_spill] sm:$0xff]  ;;  %v9976_v16 = vld [vmem:[#allocation17_spill] sm:$0xff] }
 0x3fe   :  { %v7736_v38 = vsel %vm671_vm13, %v2638_v9, %v7382_v37  ;;  %v7750_v37 = vsel %vm670_vm0, %v2637_v5, %v7396_v25  ;;  %v9950_v25 = vld [vmem:[#allocation84_spill] sm:$0xff]  ;;  %v9977_v0 = vld [vmem:[#allocation35_spill] sm:$0xff] }
 0x3ff   :  { %v2644_v24 = vpack.c.bf16 %v7736_v38, %v7731_v53  ;;  %v9970_v5 = vld [vmem:[#allocation16_spill] sm:$0xff] }
 0x400   :  { %v9978_v9 = vld [vmem:[#allocation20_spill] sm:$0xff] }
 0x401   :  { %2654 = vmatmul.bf16.vlgmr.msra.gmra.mxu0 %v2644_v24  ;;  %2682 = vmatmul.bf16.vlgmr.msra.gmra.mxu2 %v2644_v24  ;;  %v9979_v58 = vld [vmem:[#allocation40_spill] sm:$0xff] }
 0x402   :  { %v5298_v12 = vpop.eup %5297  ;;  %2758 = vmatpush.bf16.msra.mxu0 %v9596_v15  ;;  %2786 = vmatpush.bf16.msra.mxu2 %v6086_v6 }
 0x403   :  { %v2631_v29 = vmul.f32 %v5298_v12, %v2627_v33  ;;  %v9980_v33 = vld [vmem:[#allocation19_spill] sm:$0xff]  ;;  %v9982_v12 = vld [vmem:[#allocation22_spill] sm:$0xff] }
 0x405   :  { %v2639_v35 = vadd.f32 %v2635_v48, %v2631_v29  ;;  %v9983_v29 = vld [vmem:[#allocation42_spill] sm:$0xff]  ;;  %v9984_v48 = vld [vmem:[#allocation21_spill] sm:$0xff] }
 0x406   :  { %2759 = vmatpush.bf16.msra.mxu0 %v9598_v63  ;;  %2787 = vmatpush.bf16.msra.mxu2 %v6100_v3 }
 0x407   :  { %v7755_v51 = vsel %vm672_vm6, %v2639_v35, %v7401_v60  ;;  %v9951_v60 = vld [vmem:[#allocation142_spill] sm:$0xff]  ;;  %v9985_v35 = vld [vmem:[#allocation41_spill] sm:$0xff] }
 0x408   :  { %v2645_v61 = vpack.c.bf16 %v7755_v51, %v7750_v37 }
 0x40a   :  { %2668 = vmatmul.bf16.vlgmr.msra.gmra.mxu1 %v2645_v61  ;;  %2696 = vmatmul.bf16.vlgmr.msra.gmra.mxu3 %v2645_v61 }
 0x40b   :  { %2772 = vmatpush.bf16.msra.mxu1 %v9595_v17  ;;  %2800 = vmatpush.bf16.msra.mxu3 %v6088_v10 }
 0x40c   :  { %2760 = vmatpush.bf16.msra.mxu0 %v9600_v8  ;;  %2788 = vmatpush.bf16.msra.mxu2 %v6114_v36 }
 0x40f   :  { %2773 = vmatpush.bf16.msra.mxu1 %v9597_v26  ;;  %2801 = vmatpush.bf16.msra.mxu3 %v6102_v21 }
 0x410   :  { %2761 = vmatpush.bf16.msra.mxu0 %v9602_v18  ;;  %2789 = vmatpush.bf16.msra.mxu2 %v6130_v45 }
 0x411   :  { %2710 = vmatmul.bf16.vlgmr.msrb.gmra.mxu0 %v2644_v24  ;;  %2738 = vmatmul.bf16.vlgmr.msrb.gmra.mxu2 %v2644_v24 }
 0x413   :  { %2774 = vmatpush.bf16.msra.mxu1 %v9599_v19  ;;  %2802 = vmatpush.bf16.msra.mxu3 %v6116_v14 }
 0x414   :  { %2762 = vmatpush.bf16.msra.mxu0 %v9604_v13  ;;  %2790 = vmatpush.bf16.msra.mxu2 %v6142_v20 }
 0x417   :  { %2775 = vmatpush.bf16.msra.mxu1 %v9710_v46  ;;  %2803 = vmatpush.bf16.msra.mxu3 %v9711_v11 }
 0x418   :  { %2763 = vmatpush.bf16.msra.mxu0 %v9950_v25  ;;  %2791 = vmatpush.bf16.msra.mxu2 %v9951_v60 }
 0x41a   :  { %2724 = vmatmul.bf16.vlgmr.msrb.gmra.mxu1 %v2645_v61  ;;  %2752 = vmatmul.bf16.vlgmr.msrb.gmra.mxu3 %v2645_v61 }
 0x41b   :  { %2776 = vmatpush.bf16.msra.mxu1 %v9952_v30  ;;  %2804 = vmatpush.bf16.msra.mxu3 %v9953_v62 }
 0x41c   :  { %2764 = vmatpush.bf16.msra.mxu0 %v9954_v42  ;;  %2792 = vmatpush.bf16.msra.mxu2 %v9955_v7 }
 0x41f   :  { %2777 = vmatpush.bf16.msra.mxu1 %v9956_v57  ;;  %2805 = vmatpush.bf16.msra.mxu3 %v9957_v40 }
 0x420   :  { %2765 = vmatpush.bf16.msra.mxu0 %v9958_v56  ;;  %2793 = vmatpush.bf16.msra.mxu2 %v9959_v27 }
 0x423   :  { %2778 = vmatpush.bf16.msra.mxu1 %v9962_v31  ;;  %2806 = vmatpush.bf16.msra.mxu3 %v9963_v32  ;;  %v10041_v32 = vld [vmem:[#allocation176_spill] sm:$0xff] }
 0x424   :  { %3012 = vmatpush.bf16.msrb.mxu0 %v9960_v52  ;;  %3040 = vmatpush.bf16.msrb.mxu2 %v9961_v39 }
 0x425   :  { %2766 = vmatmul.bf16.vlgmr.msra.gmra.mxu0 %v2644_v24  ;;  %2794 = vmatmul.bf16.vlgmr.msra.gmra.mxu2 %v2644_v24  ;;  %v9981_v24 = vld [vmem:[#allocation37_spill] sm:$0xff] }
 0x427   :  { %2779 = vmatpush.bf16.msra.mxu1 %v9966_v44  ;;  %2807 = vmatpush.bf16.msra.mxu3 %v9967_v28 }
 0x428   :  { %3013 = vmatpush.bf16.msrb.mxu0 %v9964_v22  ;;  %3041 = vmatpush.bf16.msrb.mxu2 %v9965_v2 }
 0x42a   :  { %2780 = vmatmul.bf16.vlgmr.msra.gmra.mxu1 %v2645_v61  ;;  %2808 = vmatmul.bf16.vlgmr.msra.gmra.mxu3 %v2645_v61  ;;  %v9986_v61 = vld [vmem:[#allocation24_spill] sm:$0xff] }
 0x42b   :  { %3026 = vmatpush.bf16.msrb.mxu1 %v9968_v23  ;;  %3054 = vmatpush.bf16.msrb.mxu3 %v9969_v55 }
 0x42c   :  { %3014 = vmatpush.bf16.msrb.mxu0 %v9970_v5  ;;  %3042 = vmatpush.bf16.msrb.mxu2 %v9971_v50  ;;  %v10031_v5 = vld [vmem:[#allocation117_spill] sm:$0xff] }
 0x42f   :  { %3027 = vmatpush.bf16.msrb.mxu1 %v9972_v43  ;;  %3055 = vmatpush.bf16.msrb.mxu3 %v9973_v47 }
 0x430   :  { %3015 = vmatpush.bf16.msrb.mxu0 %v9974_v59  ;;  %3043 = vmatpush.bf16.msrb.mxu2 %v9975_v1  ;;  %v10029_v59 = vld [vmem:[#allocation116_spill] sm:$0xff] }
 0x433   :  { %3028 = vmatpush.bf16.msrb.mxu1 %v9976_v16  ;;  %3056 = vmatpush.bf16.msrb.mxu3 %v9977_v0  ;;  %v9987_v16 = vld [vmem:[#allocation44_spill] sm:$0xff]  ;;  %v9988_v0 = vld [vmem:[#allocation23_spill] sm:$0xff] }
 0x434   :  { %3016 = vmatpush.bf16.msrb.mxu0 %v9978_v9  ;;  %3044 = vmatpush.bf16.msrb.mxu2 %v9979_v58  ;;  %v9989_v9 = vld [vmem:[#allocation43_spill] sm:$0xff]  ;;  %v9990_v58 = vld [vmem:[#allocation26_spill] sm:$0xff] }
 0x437   :  { %3029 = vmatpush.bf16.msrb.mxu1 %v9980_v33  ;;  %3057 = vmatpush.bf16.msrb.mxu3 %v9981_v24  ;;  %v9991_v33 = vld [vmem:[#allocation46_spill] sm:$0xff] }
 0x438   :  { %3017 = vmatpush.bf16.msrb.mxu0 %v9982_v12  ;;  %3045 = vmatpush.bf16.msrb.mxu2 %v9983_v29  ;;  %v9992_v24 = vld [vmem:[#allocation62_spill] sm:$0xff]  ;;  %v9993_v12 = vld [vmem:[#allocation95_spill] sm:$0xff]  ;;  %v9994_v29 = vld [vmem:[#allocation25_spill] sm:$0xff] }
 0x43b   :  { %3030 = vmatpush.bf16.msrb.mxu1 %v9984_v48  ;;  %3058 = vmatpush.bf16.msrb.mxu3 %v9985_v35  ;;  %v9995_v48 = vld [vmem:[#allocation45_spill] sm:$0xff]  ;;  %v9996_v35 = vld [vmem:[#allocation64_spill] sm:$0xff] }
 0x43c   :  { %3018 = vmatpush.bf16.msrb.mxu0 %v9986_v61  ;;  %3046 = vmatpush.bf16.msrb.mxu2 %v9987_v16  ;;  %v9997_v61 = vld [vmem:[#allocation100_spill] sm:$0xff]  ;;  %v9998_v16 = vld [vmem:[#allocation29_spill] sm:$0xff] }
 0x43f   :  { %3031 = vmatpush.bf16.msrb.mxu1 %v9988_v0  ;;  %3059 = vmatpush.bf16.msrb.mxu3 %v9989_v9  ;;  %v9999_v0 = vld [vmem:[#allocation47_spill] sm:$0xff] }
 0x440   :  { %3019 = vmatpush.bf16.msrb.mxu0 %v9990_v58  ;;  %3047 = vmatpush.bf16.msrb.mxu2 %v9991_v33  ;;  %v10000_v9 = vld [vmem:[#allocation63_spill] sm:$0xff]  ;;  %v10001_v58 = vld [vmem:[#allocation96_spill] sm:$0xff] }
 0x441   :  { %v10002_v33 = vld [vmem:[#allocation72_spill] sm:$0xff] }
 0x443   :  { %3032 = vmatpush.bf16.msrb.mxu1 %v9994_v29  ;;  %3060 = vmatpush.bf16.msrb.mxu3 %v9995_v48  ;;  %v10005_v29 = vld [vmem:[#allocation101_spill] sm:$0xff]  ;;  %v10006_v48 = vld [vmem:[#allocation74_spill] sm:$0xff] }
 0x444   :  { %3068 = vmatpush.bf16.msra.mxu0 %v9992_v24  ;;  %3096 = vmatpush.bf16.msra.mxu2 %v9993_v12  ;;  %v10003_v24 = vld [vmem:[#allocation104_spill] sm:$0xff]  ;;  %v10004_v12 = vld [vmem:[#allocation65_spill] sm:$0xff] }
 0x447   :  { %3033 = vmatpush.bf16.msrb.mxu1 %v9998_v16  ;;  %3061 = vmatpush.bf16.msrb.mxu3 %v9999_v0  ;;  %v10009_v16 = vld [vmem:[#allocation105_spill] sm:$0xff]  ;;  %v10010_v0 = vld [vmem:[#allocation80_spill] sm:$0xff] }
 0x448   :  { %3069 = vmatpush.bf16.msra.mxu0 %v9996_v35  ;;  %3097 = vmatpush.bf16.msra.mxu2 %v9997_v61  ;;  %v10007_v35 = vld [vmem:[#allocation110_spill] sm:$0xff]  ;;  %v10008_v61 = vld [vmem:[#allocation73_spill] sm:$0xff] }
 0x44b   :  { %3082 = vmatpush.bf16.msra.mxu1 %v10000_v9  ;;  %3110 = vmatpush.bf16.msra.mxu3 %v10001_v58  ;;  %v10011_v9 = vld [vmem:[#allocation113_spill] sm:$0xff]  ;;  %v10012_v58 = vld [vmem:[#allocation75_spill] sm:$0xff] }
 0x44c   :  { %3070 = vmatpush.bf16.msra.mxu0 %v10002_v33  ;;  %3098 = vmatpush.bf16.msra.mxu2 %v10003_v24  ;;  %v10013_v33 = vld [vmem:[#allocation111_spill] sm:$0xff]  ;;  %v10014_v24 = vld [vmem:[#allocation82_spill] sm:$0xff] }
 0x44f   :  { %3083 = vmatpush.bf16.msra.mxu1 %v10004_v12  ;;  %3111 = vmatpush.bf16.msra.mxu3 %v10005_v29  ;;  %v10015_v12 = vld [vmem:[#allocation118_spill] sm:$0xff]  ;;  %v10016_v29 = vld [vmem:[#allocation81_spill] sm:$0xff] }
 0x450   :  { %3071 = vmatpush.bf16.msra.mxu0 %v10006_v48  ;;  %3099 = vmatpush.bf16.msra.mxu2 %v10007_v35  ;;  %v10017_v48 = vld [vmem:[#allocation114_spill] sm:$0xff] }
 0x451   :  { %v10018_v35 = vld [vmem:[#allocation90_spill] sm:$0xff] }
 0x453   :  { %3084 = vmatpush.bf16.msra.mxu1 %v10008_v61  ;;  %3112 = vmatpush.bf16.msra.mxu3 %v10009_v16  ;;  %v10019_v61 = vld [vmem:[#allocation122_spill] sm:$0xff]  ;;  %v10020_v16 = vld [vmem:[#allocation83_spill] sm:$0xff] }
 0x454   :  { %3072 = vmatpush.bf16.msra.mxu0 %v10010_v0  ;;  %3100 = vmatpush.bf16.msra.mxu2 %v10011_v9  ;;  %v10021_v0 = vld [vmem:[#allocation119_spill] sm:$0xff]  ;;  %v10022_v9 = vld [vmem:[#allocation92_spill] sm:$0xff] }
 0x457   :  { %3085 = vmatpush.bf16.msra.mxu1 %v10012_v58  ;;  %3113 = vmatpush.bf16.msra.mxu3 %v10013_v33  ;;  %v10023_v58 = vld [vmem:[#allocation128_spill] sm:$0xff]  ;;  %v10024_v33 = vld [vmem:[#allocation91_spill] sm:$0xff] }
 0x458   :  { %3073 = vmatpush.bf16.msra.mxu0 %v10014_v24  ;;  %3101 = vmatpush.bf16.msra.mxu2 %v10015_v12  ;;  %v10025_v24 = vld [vmem:[#allocation123_spill] sm:$0xff]  ;;  %v10026_v12 = vld [vmem:[#allocation93_spill] sm:$0xff] }
 0x45b   :  { %3086 = vmatpush.bf16.msra.mxu1 %v10016_v29  ;;  %3114 = vmatpush.bf16.msra.mxu3 %v10017_v48  ;;  %v10027_v29 = vld [vmem:[#allocation129_spill] sm:$0xff] }
 0x45c   :  { %3074 = vmatpush.bf16.msra.mxu0 %v10018_v35  ;;  %3102 = vmatpush.bf16.msra.mxu2 %v10019_v61  ;;  %v10028_v61 = vld [vmem:[#allocation178_spill] sm:$0xff] }
 0x45f   :  { %3087 = vmatpush.bf16.msra.mxu1 %v10020_v16  ;;  %3115 = vmatpush.bf16.msra.mxu3 %v10021_v0  ;;  %v275_v16 = vadd.f32 %v10029_v59, %v10028_v61 }
 0x460   :  { %3075 = vmatpush.bf16.msra.mxu0 %v10022_v9  ;;  %3103 = vmatpush.bf16.msra.mxu2 %v10023_v58  ;;  %v10030_v58 = vld [vmem:[#allocation181_spill] sm:$0xff] }
 0x463   :  { %3088 = vmatpush.bf16.msra.mxu1 %v10024_v33  ;;  %3116 = vmatpush.bf16.msra.mxu3 %v10025_v24  ;;  %v324_v33 = vadd.f32 %v10031_v5, %v10030_v58  ;;  %v10033_v5 = vld [vmem:[#allocation127_spill] sm:$0xff] }
 0x467   :  { %3089 = vmatpush.bf16.msra.mxu1 %v10026_v12  ;;  %3117 = vmatpush.bf16.msra.mxu3 %v10027_v29  ;;  %v10032_v12 = vld [vmem:[#allocation126_spill] sm:$0xff] }
 0x468   :  { %v277_v29 = vadd.f32 %v10032_v12, %v10028_v61  ;;  %v10040_v61 = vld [vmem:[#allocation77_spill] sm:$0xff] }
 0x47e   :  { %v2655_v48 = vpop.f32.mrf.mxu0 }
 0x484   :  { %v2683_v35 = vpop.f32.mrf.mxu2 }
 0x486   :  { %v2657_v0 = vpop.f32.mrf.mxu0 }
 0x487   :  { %v2669_v1 = vpop.f32.mrf.mxu1 }
 0x488   :  { %v2670_v47 = vadd.f32 %v2669_v1, %v2655_v48 }
 0x48a   :  { %v2814_v43 = vadd.f32 %v2670_v47, %v275_v16 }
 0x48c   :  { %v4894_v9 = vmul.f32 -1.442695, %v2814_v43  ;;  %v2685_v44 = vpop.f32.mrf.mxu2 }
 0x48d   :  { %v2697_v50 = vpop.f32.mrf.mxu3 }
 0x48e   :  { %5299 = vpow2.f32 %v4894_v9  ;;  %v2698_v24 = vadd.f32 %v2697_v50, %v2683_v35  ;;  %v2711_v59 = vpop.f32.mrf.mxu0  ;;  %v326_v9 = vadd.f32 %v10033_v5, %v10030_v58 }
 0x48f   :  { %v2671_v55 = vpop.f32.mrf.mxu1 }
 0x490   :  { %v2815_v23 = vadd.f32 %v2698_v24, %v324_v33  ;;  %v2672_v28 = vadd.f32 %v2671_v55, %v2657_v0  ;;  %v10034_v33 = vld [vmem:[#allocation51_spill] sm:$0xff]  ;;  %v10035_v55 = vld [vmem:[#allocation134_spill] sm:$0xff] }
 0x491   :  { %v373_v0 = vadd.f32 %v10035_v55, %v10034_v33  ;;  %v10036_v55 = vld [vmem:[#allocation182_spill] sm:$0xff] }
 0x492   :  { %v4895_v2 = vmul.f32 -1.442695, %v2815_v23  ;;  %v2818_v22 = vadd.f32 %v2672_v28, %v277_v29 }
 0x494   :  { %v5300_v1 = vpop.eup %5299  ;;  %5301 = vpow2.f32 %v4895_v2  ;;  %v4898_v47 = vmul.f32 -1.442695, %v2818_v22  ;;  %v2739_v22 = vpop.f32.mrf.mxu2 }
 0x495   :  { %v7857_v43 = vadd.f32 1.0, %v5300_v1  ;;  %v2699_v16 = vpop.f32.mrf.mxu3 }
 0x496   :  { %5303 = vpow2.f32 %v4898_v47  ;;  %v2700_v50 = vadd.f32 %v2699_v16, %v2685_v44  ;;  %v2713_v5 = vpop.f32.mrf.mxu0 }
 0x497   :  { %5305 = vrcp.f32 %v7857_v43  ;;  %v2725_v12 = vpop.f32.mrf.mxu1  ;;  %vm2859_vm8 = vweird.f32 %v7857_v43 }
 0x498   :  { %v2819_v23 = vadd.f32 %v2700_v50, %v326_v9  ;;  %v2726_v28 = vadd.f32 %v2725_v12, %v2711_v59  ;;  %v10037_v9 = vld [vmem:[#allocation135_spill] sm:$0xff] }
 0x499   :  { %v422_v59 = vadd.f32 %v10037_v9, %v10036_v55  ;;  %v7882_v9 = vadd.f32 %v10041_v32, %v10040_v61  ;;  %v2865_v32 = vand.u32 2147483648, %v7857_v43 }
 0x49a   :  { %v5302_v24 = vpop.eup %5301  ;;  %v4899_v29 = vmul.f32 -1.442695, %v2819_v23  ;;  %v2816_v2 = vadd.f32 %v2726_v28, %v373_v0  ;;  %v10038_v0 = vld [vmem:[#allocation140_spill] sm:$0xff] }
 0x49b   :  { %v7864_v48 = vadd.f32 1.0, %v5302_v24  ;;  %v375_v23 = vadd.f32 %v10038_v0, %v10034_v33 }
 0x49c   :  { %v5304_v35 = vpop.eup %5303  ;;  %5307 = vpow2.f32 %v4899_v29  ;;  %v4896_v1 = vmul.f32 -1.442695, %v2816_v2 }
 0x49d   :  { %v7866_v47 = vpop.eup %5305  ;;  %5309 = vrcp.f32 %v7864_v48  ;;  %v7869_v44 = vadd.f32 1.0, %v5304_v35  ;;  %v2753_v16 = vpop.f32.mrf.mxu3  ;;  %v10039_v35 = vld [vmem:[#allocation141_spill] sm:$0xff]  ;;  %v2880_v52 = vand.u32 2147483648, %v7864_v48  ;;  %vm2874_vm3 = vweird.f32 %v7864_v48 }
 0x49e   :  { %5311 = vpow2.f32 %v4896_v1  ;;  %v2754_v50 = vadd.f32 %v2753_v16, %v2739_v22  ;;  %v2855_v12 = vmul.f32 %v7866_v47, %v7857_v43  ;;  %v424_v58 = vadd.f32 %v10039_v35, %v10036_v55  ;;  %v10042_v22 = vld [vmem:[#allocation177_spill] sm:$0xff] }
 0x49f   :  { %v2727_v28 = vpop.f32.mrf.mxu1  ;;  %5313 = vrcp.f32 %v7869_v44  ;;  %v7886_v1 = vadd.f32 %v10042_v22, %v9680_v4  ;;  %vm2860_vm12 = vweird.f32 %v7866_v47  ;;  %vm2919_vm2 = vweird.f32 %v7869_v44 }
 0x4a0   :  { %v2817_v24 = vadd.f32 %v2754_v50, %v422_v59  ;;  %v2728_v29 = vadd.f32 %v2727_v28, %v2713_v5  ;;  %v2856_v2 = vsub.f32 1.0, %v2855_v12  ;;  %v2863_v59 = vand.u32 2147483647, %v7857_v43  ;;  %v10043_v50 = vld [vmem:[#allocation179_spill] sm:$0xff]  ;;  %vm7917_vm4 = vmor %vm2859_vm8, %vm2860_vm12 }
 0x4a1   :  { %v7894_v12 = vadd.f32 %v10043_v50, %v10040_v61  ;;  %v2866_v43 = vor.u32 1.1754944e-38, %v2865_v32 }
 0x4a2   :  { %v5308_v16 = vpop.eup %5307  ;;  %v4897_v31 = vmul.f32 -1.442695, %v2817_v24  ;;  %v2820_v0 = vadd.f32 %v2728_v29, %v375_v23  ;;  %v2857_v33 = vmul.f32 %v7866_v47, %v2856_v2  ;;  %v2741_v23 = vpop.f32.mrf.mxu2  ;;  %vm7910_vm10 = vcmp.eq.f32.partialorder %v2863_v59, 8.507059e+37 }
 0x4a3   :  { %v7890_v5 = vpop.eup %5309  ;;  %v7896_v28 = vadd.f32 1.0, %v5308_v16  ;;  %v2878_v16 = vand.u32 2147483647, %v7864_v48 }
 0x4a4   :  { %v5312_v35 = vpop.eup %5311  ;;  %5315 = vpow2.f32 %v4897_v31  ;;  %v4900_v24 = vmul.f32 -1.442695, %v2820_v0  ;;  %v2858_v29 = vadd.f32 %v7866_v47, %v2857_v33  ;;  %v2870_v2 = vmul.f32 %v7890_v5, %v7864_v48  ;;  %v2767_v31 = vpop.f32.mrf.mxu0 }
 0x4a5   :  { %5317 = vrcp.f32 %v7896_v28  ;;  %v7904_v22 = vadd.f32 1.0, %v5312_v35  ;;  %v2755_v50 = vpop.f32.mrf.mxu3  ;;  %v7908_v61 = vpop.eup %5313  ;;  %vm7929_vm5 = vcmp.eq.f32.partialorder %v2878_v16, 8.507059e+37  ;;  %vm2875_vm14 = vweird.f32 %v7890_v5 }
 0x4a6   :  { %5319 = vpow2.f32 %v4900_v24  ;;  %v2756_v0 = vadd.f32 %v2755_v50, %v2741_v23  ;;  %v2871_v33 = vsub.f32 1.0, %v2870_v2  ;;  %v2925_v24 = vand.u32 2147483648, %v7869_v44  ;;  %vm7963_vm8 = vmor %vm2874_vm3, %vm2875_vm14 }
 0x4a7   :  { %5321 = vrcp.f32 %v7904_v22  ;;  %v2781_v39 = vpop.f32.mrf.mxu1  ;;  %v2862_v2 = vsel %vm7917_vm4, %v7866_v47, %v2858_v29  ;;  %v2895_v27 = vand.u32 2147483648, %v7904_v22  ;;  %v2915_v32 = vmul.f32 %v7908_v61, %v7869_v44 }
 0x4a8   :  { %v2821_v23 = vadd.f32 %v2756_v0, %v424_v58  ;;  %v2782_v59 = vadd.f32 %v2781_v39, %v2767_v31  ;;  %v2872_v50 = vmul.f32 %v7890_v5, %v2871_v33  ;;  %v2923_v47 = vand.u32 2147483647, %v7869_v44 }
 0x4a9   :  { %v2893_v31 = vand.u32 2147483647, %v7904_v22  ;;  %v2867_v16 = vsel %vm7910_vm10, %v2866_v43, %v2862_v2  ;;  %v7947_v57 = vor.u32 1.1754944e-38, %v2925_v24  ;;  %vm2889_vm12 = vweird.f32 %v7904_v22 }
 0x4aa   :  { %v5316_v40 = vpop.eup %5315  ;;  %v4901_v58 = vmul.f32 -1.442695, %v2821_v23  ;;  %v2974_v39 = vadd.f32 %v2782_v59, %v6505_v49  ;;  %v2873_v33 = vadd.f32 %v7890_v5, %v2872_v50  ;;  %v2881_v59 = vor.u32 1.1754944e-38, %v2880_v52  ;;  %v2795_v24 = vpop.f32.mrf.mxu2 }
 0x4ab   :  { %v7938_v29 = vpop.eup %5317  ;;  %v7941_v0 = vadd.f32 1.0, %v5316_v40  ;;  %v2896_v42 = vor.u32 1.1754944e-38, %v2895_v27  ;;  %v2916_v55 = vsub.f32 1.0, %v2915_v32  ;;  %vm7967_vm10 = vcmp.eq.f32.partialorder %v2893_v31, 8.507059e+37 }
 0x4ac   :  { %v5320_v35 = vpop.eup %5319  ;;  %5323 = vpow2.f32 %v4901_v58  ;;  %v2978_v23 = vmul.f32 %v2974_v39, %v2867_v16  ;;  %v2877_v39 = vsel %vm7963_vm8, %v7890_v5, %v2873_v33  ;;  %vm2920_vm4 = vweird.f32 %v7908_v61 }
 0x4ad   :  { %v7949_v7 = vpop.eup %5321  ;;  %5325 = vrcp.f32 %v7941_v0  ;;  %v2809_v40 = vpop.f32.mrf.mxu3  ;;  %v2910_v2 = vand.u32 2147483648, %v7941_v0  ;;  %v7956_v50 = vadd.f32 1.0, %v5320_v35  ;;  %vm7975_vm7 = vcmp.eq.f32.partialorder %v2923_v47, 8.507059e+37 }
 0x4ae   :  { %v2885_v43 = vmul.f32 %v7949_v7, %v7904_v22  ;;  %v2982_v52 = vadd.f32 %v2978_v23, %v7882_v9  ;;  %v2810_v58 = vadd.f32 %v2809_v40, %v2795_v24  ;;  %v2908_v31 = vand.u32 2147483647, %v7941_v0  ;;  %v2769_v23 = vpop.f32.mrf.mxu0 }
 0x4af   :  { %v2783_v16 = vpop.f32.mrf.mxu1  ;;  %5327 = vrcp.f32 %v7956_v50  ;;  %vm2890_vm3 = vweird.f32 %v7949_v7  ;;  %v2930_v47 = vmul.f32 %v7938_v29, %v7896_v28  ;;  %vm2904_vm14 = vweird.f32 %v7941_v0 }
 0x4b0   :  { %v2886_v35 = vsub.f32 1.0, %v2885_v43  ;;  %v2975_v5 = vadd.f32 %v2810_v58, %v6500_v41  ;;  %v2784_v33 = vadd.f32 %v2783_v16, %v2769_v23  ;;  %v2911_v43 = vor.u32 1.1754944e-38, %v2910_v2  ;;  %vm8016_vm1 = vmor %vm2889_vm12, %vm2890_vm3 }
 0x4b1   :  { %v2882_v48 = vsel %vm7929_vm5, %v2881_v59, %v2877_v39  ;;  %v2917_v62 = vmul.f32 %v7908_v61, %v2916_v55  ;;  %v2953_v30 = vand.u32 2147483647, %v7956_v50  ;;  %v2955_v58 = vand.u32 2147483648, %v7956_v50  ;;  %vm8007_vm5 = vmor %vm2919_vm2, %vm2920_vm4 }
 0x4b2   :  { %v5324_v24 = vpop.eup %5323  ;;  %v2887_v27 = vmul.f32 %v7949_v7, %v2886_v35  ;;  %v2979_v23 = vmul.f32 %v2975_v5, %v2882_v48  ;;  %vm7998_vm8 = vcmp.eq.f32.partialorder %v2908_v31, 8.507059e+37  ;;  %5329 = vtanh.f32 %v2982_v52 }
 0x4b3   :  { %v5326_v40 = vpop.eup %5325  ;;  %v7994_v16 = vadd.f32 1.0, %v5324_v24  ;;  %v2918_v56 = vadd.f32 %v7908_v61, %v2917_v62  ;;  %vm2934_vm15 = vweird.f32 %v7896_v28  ;;  %vm2949_vm9 = vweird.f32 %v7956_v50 }
 0x4b4   :  { %v2888_v60 = vadd.f32 %v7949_v7, %v2887_v27  ;;  %v2900_v35 = vmul.f32 %v5326_v40, %v7941_v0  ;;  %v2976_v62 = vadd.f32 %v2784_v33, %v6505_v49  ;;  %v2931_v44 = vsub.f32 1.0, %v2930_v47 }
 0x4b5   :  { %5331 = vrcp.f32 %v7994_v16  ;;  %v5328_v2 = vpop.eup %5327  ;;  %v2983_v48 = vadd.f32 %v2979_v23, %v7886_v1  ;;  %v2922_v22 = vsel %vm8007_vm5, %v7908_v61, %v2918_v56  ;;  %vm2905_vm2 = vweird.f32 %v5326_v40  ;;  %v2797_v56 = vpop.f32.mrf.mxu2 }
 0x4b6   :  { %v2901_v52 = vsub.f32 1.0, %v2900_v35  ;;  %v2892_v39 = vsel %vm8016_vm1, %v7949_v7, %v2888_v60  ;;  %v2945_v31 = vmul.f32 %v5328_v2, %v7956_v50  ;;  %vm8031_vm12 = vcmp.eq.f32.partialorder %v2953_v30, 8.507059e+37  ;;  %v2811_v7 = vpop.f32.mrf.mxu3 }
 0x4b7   :  { %v2956_v33 = vor.u32 1.1754944e-38, %v2955_v58  ;;  %vm2950_vm4 = vweird.f32 %v5328_v2  ;;  %v2897_v24 = vsel %vm7967_vm10, %v2896_v42, %v2892_v39  ;;  %v2927_v60 = vsel %vm7975_vm7, %v7947_v57, %v2922_v22  ;;  %vm2906_vm10 = vmor %vm2904_vm14, %vm2905_vm2 }
 0x4b8   :  { %v2902_v47 = vmul.f32 %v5326_v40, %v2901_v52  ;;  %v2946_v1 = vsub.f32 1.0, %v2945_v31  ;;  %v2990_v61 = vsub.f32 1.0, %v2897_v24  ;;  %5333 = vtanh.f32 %v2983_v48  ;;  %v5330_v23 = vpop.eup %5329  ;;  %vm2951_vm3 = vmor %vm2949_vm9, %vm2950_vm4 }
 0x4b9   :  { %v2980_v27 = vmul.f32 %v2976_v62, %v2927_v60  ;;  %v2998_v35 = vmul.f32 %v2897_v24, %v7731_v53  ;;  %v2932_v58 = vmul.f32 %v7938_v29, %v2931_v44  ;;  %vm2935_vm1 = vweird.f32 %v7938_v29 }
 0x4ba   :  { %v2903_v30 = vadd.f32 %v5326_v40, %v2902_v47  ;;  %v2947_v42 = vmul.f32 %v5328_v2, %v2946_v1  ;;  %v2994_v57 = vmul.f32 %v5330_v23, %v2990_v61  ;;  %v2812_v59 = vadd.f32 %v2811_v7, %v2797_v56  ;;  %vm8056_vm7 = vmor %vm2934_vm15, %vm2935_vm1 }
 0x4bb   :  { %v5332_v32 = vpop.eup %5331  ;;  %v2984_v9 = vadd.f32 %v2980_v27, %v7894_v12  ;;  %v2970_v62 = vand.u32 2147483648, %v7994_v16  ;;  %v2933_v39 = vadd.f32 %v7938_v29, %v2932_v58  ;;  %v10067_v24 = vand.u32 2147483648, %v7896_v28 }
 0x4bc   :  { %v2960_v55 = vmul.f32 %v5332_v32, %v7994_v16  ;;  %v2907_v52 = vsel %vm2906_vm10, %v5326_v40, %v2903_v30  ;;  %v2948_v44 = vadd.f32 %v5328_v2, %v2947_v42  ;;  %v3002_v48 = vadd.f32 %v2998_v35, %v2994_v57 }
 0x4bd   :  { %v2912_v22 = vsel %vm7998_vm8, %v2911_v43, %v2907_v52  ;;  %5335 = vtanh.f32 %v2984_v9  ;;  %v2937_v25 = vsel %vm8056_vm7, %v7938_v29, %v2933_v39  ;;  %v10066_v43 = vand.u32 2147483647, %v7896_v28  ;;  %v10068_v29 = vld [vmem:[#allocation180_spill] sm:$0xff] }
 0x4be   :  { %v2961_v0 = vsub.f32 1.0, %v2960_v55  ;;  %v2991_v40 = vsub.f32 1.0, %v2912_v22  ;;  %v5334_v31 = vpop.eup %5333  ;;  %vm2965_vm8 = vweird.f32 %v5332_v32  ;;  %v2952_v47 = vsel %vm2951_vm3, %v5328_v2, %v2948_v44 }
 0x4bf   :  { %vm2939_vm14 = vcmp.eq.f32.partialorder %v10066_v43, 8.507059e+37  ;;  %v2941_v60 = vor.u32 1.1754944e-38, %v10067_v24  ;;  %v2977_v7 = vadd.f32 %v2812_v59, %v6500_v41  ;;  %v2999_v61 = vmul.f32 %v2912_v22, %v7750_v37  ;;  %v10073_v43 = vld [vmem:[#allocation102_spill] sm:$0xff]  ;;  %v10076_v24 = vld [vmem:[#allocation143_spill] sm:$0xff] }
 0x4c0   :  { %v2962_v1 = vmul.f32 %v5332_v32, %v2961_v0  ;;  %v2995_v50 = vmul.f32 %v5334_v31, %v2991_v40  ;;  %v2957_v27 = vsel %vm8031_vm12, %v2956_v33, %v2952_v47  ;;  %v522_v23 = vadd.f32 %v10068_v29, %v9680_v4  ;;  %v10071_v40 = vld [vmem:[#allocation69_spill] sm:$0xff]  ;;  %v10074_v31 = vld [vmem:[#allocation146_spill] sm:$0xff] }
 0x4c1   :  { %v2968_v30 = vand.u32 2147483647, %v7994_v16  ;;  %v2992_v35 = vsub.f32 1.0, %v2957_v27  ;;  %v2942_v56 = vsel %vm2939_vm14, %v2941_v60, %v2937_v25  ;;  %vm2964_vm15 = vweird.f32 %v7994_v16  ;;  %v10072_v25 = vld [vmem:[#allocation139_spill] sm:$0xff]  ;;  %v10075_v47 = vld [vmem:[#allocation86_spill] sm:$0xff]  ;;  %v10077_v60 = vld [vmem:[#allocation120_spill] sm:$0xff] }
 0x4c2   :  { %v2963_v2 = vadd.f32 %v5332_v32, %v2962_v1  ;;  %v3003_v28 = vadd.f32 %v2999_v61, %v2995_v50  ;;  %v2981_v58 = vmul.f32 %v2977_v7, %v2942_v56  ;;  %vm2966_vm9 = vmor %vm2964_vm15, %vm2965_vm8  ;;  %v2971_v57 = vor.u32 1.1754944e-38, %v2970_v62  ;;  %v10078_v7 = vld [vmem:[#allocation150_spill] sm:$0xff]  ;;  %v10079_v1 = vld [vmem:[#allocation12_spill] sm:$0xff] }
 0x4c3   :  { %v5336_v42 = vpop.eup %5335  ;;  %v3000_v5 = vmul.f32 %v2957_v27, %v7736_v38  ;;  %vm2969_vm5 = vcmp.eq.f32.partialorder %v2968_v30, 8.507059e+37  ;;  %v8083_v39 = vsel %vm670_vm0, %v3002_v48, %v7731_v53  ;;  %v10080_v50 = vld [vmem:[#allocation30_spill] sm:$0xff]  ;;  %v10082_v27 = vld [vmem:[#allocation147_spill] sm:$0xff]  ;;  %v10085_v30 = vld [vmem:[#allocation124_spill] sm:$0xff] }
 0x4c4   :  { %v2996_v9 = vmul.f32 %v5336_v42, %v2992_v35  ;;  %v2967_v33 = vsel %vm2966_vm9, %v5332_v32, %v2963_v2  ;;  %v2985_v59 = vadd.f32 %v2981_v58, %v522_v23  ;;  %v10081_v61 = vld [vmem:[#allocation106_spill] sm:$0xff]  ;;  %v10084_v23 = vld [vmem:[#allocation32_spill] sm:$0xff]  ;;  %v10086_v35 = vld [vmem:[#allocation151_spill] sm:$0xff] }
 0x4c5   :  { %v2972_v52 = vsel %vm2969_vm5, %v2971_v57, %v2967_v33  ;;  %v10083_v29 = vld [vmem:[#allocation14_spill] sm:$0xff]  ;;  %v10087_v56 = vld [vmem:[#allocation13_spill] sm:$0xff]  ;;  %v10088_v2 = vld [vmem:[#allocation31_spill] sm:$0xff] }
 0x4c6   :  { %v3004_v55 = vadd.f32 %v3000_v5, %v2996_v9  ;;  %5337 = vtanh.f32 %v2985_v59  ;;  %v2993_v62 = vsub.f32 1.0, %v2972_v52  ;;  %v3001_v53 = vmul.f32 %v2972_v52, %v7755_v51  ;;  %v10090_v58 = vld [vmem:[#allocation34_spill] sm:$0xff]  ;;  %v10091_v42 = vld [vmem:[#allocation15_spill] sm:$0xff]  ;;  %v10092_v57 = vld [vmem:[#allocation33_spill] sm:$0xff] }
 0x4c7   :  { %v10093_v9 = vld [vmem:[#allocation18_spill] sm:$0xff]  ;;  %v10094_v5 = vld [vmem:[#allocation36_spill] sm:$0xff]  ;;  %v10095_v33 = vld [vmem:[#allocation17_spill] sm:$0xff] }
 0x4c8   :  { %v8088_v16 = vsel %vm672_vm6, %v3004_v55, %v7736_v38  ;;  %v8100_v38 = vsel %vm669_vm11, %v3003_v28, %v7750_v37  ;;  %v10069_v37 = vld [vmem:[#allocation84_spill] sm:$0xff]  ;;  %v10096_v59 = vld [vmem:[#allocation35_spill] sm:$0xff] }
 0x4c9   :  { %v3010_v44 = vpack.c.bf16 %v8088_v16, %v8083_v39  ;;  %v10089_v28 = vld [vmem:[#allocation16_spill] sm:$0xff] }
 0x4ca   :  { %v10097_v55 = vld [vmem:[#allocation20_spill] sm:$0xff] }
 0x4cb   :  { %3020 = vmatmul.bf16.vlgmr.msrb.gmra.mxu0 %v3010_v44  ;;  %3048 = vmatmul.bf16.vlgmr.msrb.gmra.mxu2 %v3010_v44  ;;  %v10098_v52 = vld [vmem:[#allocation40_spill] sm:$0xff] }
 0x4cc   :  { %v5338_v32 = vpop.eup %5337  ;;  %3124 = vmatpush.bf16.msrb.mxu0 %v9596_v15  ;;  %3152 = vmatpush.bf16.msrb.mxu2 %v6086_v6 }
 0x4cd   :  { %v2997_v22 = vmul.f32 %v5338_v32, %v2993_v62  ;;  %v10099_v62 = vld [vmem:[#allocation19_spill] sm:$0xff]  ;;  %v10101_v32 = vld [vmem:[#allocation22_spill] sm:$0xff] }
 0x4cf   :  { %v3005_v48 = vadd.f32 %v3001_v53, %v2997_v22  ;;  %v10102_v22 = vld [vmem:[#allocation42_spill] sm:$0xff]  ;;  %v10103_v53 = vld [vmem:[#allocation21_spill] sm:$0xff] }
 0x4d0   :  { %3125 = vmatpush.bf16.msrb.mxu0 %v9598_v63  ;;  %3153 = vmatpush.bf16.msrb.mxu2 %v6100_v3 }
 0x4d1   :  { %v8105_v12 = vsel %vm671_vm13, %v3005_v48, %v7755_v51  ;;  %v10070_v51 = vld [vmem:[#allocation142_spill] sm:$0xff]  ;;  %v10104_v48 = vld [vmem:[#allocation41_spill] sm:$0xff] }
 0x4d2   :  { %v3011_v0 = vpack.c.bf16 %v8105_v12, %v8100_v38 }
 0x4d4   :  { %3034 = vmatmul.bf16.vlgmr.msrb.gmra.mxu1 %v3011_v0  ;;  %3062 = vmatmul.bf16.vlgmr.msrb.gmra.mxu3 %v3011_v0 }
 0x4d5   :  { %3138 = vmatpush.bf16.msrb.mxu1 %v9595_v17  ;;  %3166 = vmatpush.bf16.msrb.mxu3 %v6088_v10 }
 0x4d6   :  { %3126 = vmatpush.bf16.msrb.mxu0 %v9600_v8  ;;  %3154 = vmatpush.bf16.msrb.mxu2 %v6114_v36 }
 0x4d9   :  { %3139 = vmatpush.bf16.msrb.mxu1 %v9597_v26  ;;  %3167 = vmatpush.bf16.msrb.mxu3 %v6102_v21 }
 0x4da   :  { %3127 = vmatpush.bf16.msrb.mxu0 %v9602_v18  ;;  %3155 = vmatpush.bf16.msrb.mxu2 %v6130_v45 }
 0x4db   :  { %3076 = vmatmul.bf16.vlgmr.msra.gmra.mxu0 %v3010_v44  ;;  %3104 = vmatmul.bf16.vlgmr.msra.gmra.mxu2 %v3010_v44 }
 0x4dd   :  { %3140 = vmatpush.bf16.msrb.mxu1 %v9599_v19  ;;  %3168 = vmatpush.bf16.msrb.mxu3 %v6116_v14 }
 0x4de   :  { %3128 = vmatpush.bf16.msrb.mxu0 %v9604_v13  ;;  %3156 = vmatpush.bf16.msrb.mxu2 %v6142_v20 }
 0x4e1   :  { %3141 = vmatpush.bf16.msrb.mxu1 %v9710_v46  ;;  %3169 = vmatpush.bf16.msrb.mxu3 %v9711_v11 }
 0x4e2   :  { %3129 = vmatpush.bf16.msrb.mxu0 %v10069_v37  ;;  %3157 = vmatpush.bf16.msrb.mxu2 %v10070_v51 }
 0x4e4   :  { %3090 = vmatmul.bf16.vlgmr.msra.gmra.mxu1 %v3011_v0  ;;  %3118 = vmatmul.bf16.vlgmr.msra.gmra.mxu3 %v3011_v0 }
 0x4e5   :  { %3142 = vmatpush.bf16.msrb.mxu1 %v10071_v40  ;;  %3170 = vmatpush.bf16.msrb.mxu3 %v10072_v25 }
 0x4e6   :  { %3130 = vmatpush.bf16.msrb.mxu0 %v10073_v43  ;;  %3158 = vmatpush.bf16.msrb.mxu2 %v10074_v31 }
 0x4e9   :  { %3143 = vmatpush.bf16.msrb.mxu1 %v10075_v47  ;;  %3171 = vmatpush.bf16.msrb.mxu3 %v10076_v24 }
 0x4ea   :  { %3131 = vmatpush.bf16.msrb.mxu0 %v10077_v60  ;;  %3159 = vmatpush.bf16.msrb.mxu2 %v10078_v7 }
 0x4ed   :  { %3144 = vmatpush.bf16.msrb.mxu1 %v10081_v61  ;;  %3172 = vmatpush.bf16.msrb.mxu3 %v10082_v27  ;;  %v10160_v27 = vld [vmem:[#allocation50_spill] sm:$0xff] }
 0x4ee   :  { %3378 = vmatpush.bf16.msra.mxu0 %v10079_v1  ;;  %3406 = vmatpush.bf16.msra.mxu2 %v10080_v50 }
 0x4ef   :  { %3132 = vmatmul.bf16.vlgmr.msrb.gmra.mxu0 %v3010_v44  ;;  %3160 = vmatmul.bf16.vlgmr.msrb.gmra.mxu2 %v3010_v44  ;;  %v10100_v44 = vld [vmem:[#allocation37_spill] sm:$0xff] }
 0x4f1   :  { %3145 = vmatpush.bf16.msrb.mxu1 %v10085_v30  ;;  %3173 = vmatpush.bf16.msrb.mxu3 %v10086_v35 }
 0x4f2   :  { %3379 = vmatpush.bf16.msra.mxu0 %v10083_v29  ;;  %3407 = vmatpush.bf16.msra.mxu2 %v10084_v23 }
 0x4f4   :  { %3146 = vmatmul.bf16.vlgmr.msrb.gmra.mxu1 %v3011_v0  ;;  %3174 = vmatmul.bf16.vlgmr.msrb.gmra.mxu3 %v3011_v0  ;;  %v10105_v0 = vld [vmem:[#allocation24_spill] sm:$0xff] }
 0x4f5   :  { %3392 = vmatpush.bf16.msra.mxu1 %v10087_v56  ;;  %3420 = vmatpush.bf16.msra.mxu3 %v10088_v2 }
 0x4f6   :  { %3380 = vmatpush.bf16.msra.mxu0 %v10089_v28  ;;  %3408 = vmatpush.bf16.msra.mxu2 %v10090_v58  ;;  %v10150_v28 = vld [vmem:[#allocation133_spill] sm:$0xff] }
 0x4f9   :  { %3393 = vmatpush.bf16.msra.mxu1 %v10091_v42  ;;  %3421 = vmatpush.bf16.msra.mxu3 %v10092_v57 }
 0x4fa   :  { %3381 = vmatpush.bf16.msra.mxu0 %v10093_v9  ;;  %3409 = vmatpush.bf16.msra.mxu2 %v10094_v5  ;;  %v10148_v9 = vld [vmem:[#allocation132_spill] sm:$0xff] }
 0x4fd   :  { %3394 = vmatpush.bf16.msra.mxu1 %v10095_v33  ;;  %3422 = vmatpush.bf16.msra.mxu3 %v10096_v59  ;;  %v10106_v33 = vld [vmem:[#allocation44_spill] sm:$0xff]  ;;  %v10107_v59 = vld [vmem:[#allocation23_spill] sm:$0xff] }
 0x4fe   :  { %3382 = vmatpush.bf16.msra.mxu0 %v10097_v55  ;;  %3410 = vmatpush.bf16.msra.mxu2 %v10098_v52  ;;  %v10108_v55 = vld [vmem:[#allocation43_spill] sm:$0xff]  ;;  %v10109_v52 = vld [vmem:[#allocation26_spill] sm:$0xff] }
 0x501   :  { %3395 = vmatpush.bf16.msra.mxu1 %v10099_v62  ;;  %3423 = vmatpush.bf16.msra.mxu3 %v10100_v44  ;;  %v10110_v62 = vld [vmem:[#allocation46_spill] sm:$0xff] }
 0x502   :  { %3383 = vmatpush.bf16.msra.mxu0 %v10101_v32  ;;  %3411 = vmatpush.bf16.msra.mxu2 %v10102_v22  ;;  %v10111_v44 = vld [vmem:[#allocation62_spill] sm:$0xff]  ;;  %v10112_v32 = vld [vmem:[#allocation95_spill] sm:$0xff]  ;;  %v10113_v22 = vld [vmem:[#allocation25_spill] sm:$0xff] }
 0x505   :  { %3396 = vmatpush.bf16.msra.mxu1 %v10103_v53  ;;  %3424 = vmatpush.bf16.msra.mxu3 %v10104_v48  ;;  %v10114_v53 = vld [vmem:[#allocation45_spill] sm:$0xff]  ;;  %v10115_v48 = vld [vmem:[#allocation64_spill] sm:$0xff] }
 0x506   :  { %3384 = vmatpush.bf16.msra.mxu0 %v10105_v0  ;;  %3412 = vmatpush.bf16.msra.mxu2 %v10106_v33  ;;  %v10116_v0 = vld [vmem:[#allocation100_spill] sm:$0xff]  ;;  %v10117_v33 = vld [vmem:[#allocation29_spill] sm:$0xff] }
 0x509   :  { %3397 = vmatpush.bf16.msra.mxu1 %v10107_v59  ;;  %3425 = vmatpush.bf16.msra.mxu3 %v10108_v55  ;;  %v10118_v59 = vld [vmem:[#allocation47_spill] sm:$0xff] }
 0x50a   :  { %3385 = vmatpush.bf16.msra.mxu0 %v10109_v52  ;;  %3413 = vmatpush.bf16.msra.mxu2 %v10110_v62  ;;  %v10119_v55 = vld [vmem:[#allocation63_spill] sm:$0xff]  ;;  %v10120_v52 = vld [vmem:[#allocation96_spill] sm:$0xff] }
 0x50b   :  { %v10121_v62 = vld [vmem:[#allocation72_spill] sm:$0xff] }
 0x50d   :  { %3398 = vmatpush.bf16.msra.mxu1 %v10113_v22  ;;  %3426 = vmatpush.bf16.msra.mxu3 %v10114_v53  ;;  %v10124_v22 = vld [vmem:[#allocation101_spill] sm:$0xff]  ;;  %v10125_v53 = vld [vmem:[#allocation74_spill] sm:$0xff] }
 0x50e   :  { %3434 = vmatpush.bf16.msrb.mxu0 %v10111_v44  ;;  %3462 = vmatpush.bf16.msrb.mxu2 %v10112_v32  ;;  %v10122_v44 = vld [vmem:[#allocation104_spill] sm:$0xff]  ;;  %v10123_v32 = vld [vmem:[#allocation65_spill] sm:$0xff] }
 0x511   :  { %3399 = vmatpush.bf16.msra.mxu1 %v10117_v33  ;;  %3427 = vmatpush.bf16.msra.mxu3 %v10118_v59  ;;  %v10128_v33 = vld [vmem:[#allocation105_spill] sm:$0xff]  ;;  %v10129_v59 = vld [vmem:[#allocation80_spill] sm:$0xff] }
 0x512   :  { %3435 = vmatpush.bf16.msrb.mxu0 %v10115_v48  ;;  %3463 = vmatpush.bf16.msrb.mxu2 %v10116_v0  ;;  %v10126_v48 = vld [vmem:[#allocation110_spill] sm:$0xff]  ;;  %v10127_v0 = vld [vmem:[#allocation73_spill] sm:$0xff] }
 0x515   :  { %3448 = vmatpush.bf16.msrb.mxu1 %v10119_v55  ;;  %3476 = vmatpush.bf16.msrb.mxu3 %v10120_v52  ;;  %v10130_v55 = vld [vmem:[#allocation113_spill] sm:$0xff]  ;;  %v10131_v52 = vld [vmem:[#allocation75_spill] sm:$0xff] }
 0x516   :  { %3436 = vmatpush.bf16.msrb.mxu0 %v10121_v62  ;;  %3464 = vmatpush.bf16.msrb.mxu2 %v10122_v44  ;;  %v10132_v62 = vld [vmem:[#allocation111_spill] sm:$0xff]  ;;  %v10133_v44 = vld [vmem:[#allocation82_spill] sm:$0xff] }
 0x519   :  { %3449 = vmatpush.bf16.msrb.mxu1 %v10123_v32  ;;  %3477 = vmatpush.bf16.msrb.mxu3 %v10124_v22  ;;  %v10134_v32 = vld [vmem:[#allocation118_spill] sm:$0xff]  ;;  %v10135_v22 = vld [vmem:[#allocation81_spill] sm:$0xff] }
 0x51a   :  { %3437 = vmatpush.bf16.msrb.mxu0 %v10125_v53  ;;  %3465 = vmatpush.bf16.msrb.mxu2 %v10126_v48  ;;  %v10136_v53 = vld [vmem:[#allocation114_spill] sm:$0xff] }
 0x51b   :  { %v10137_v48 = vld [vmem:[#allocation90_spill] sm:$0xff] }
 0x51d   :  { %3450 = vmatpush.bf16.msrb.mxu1 %v10127_v0  ;;  %3478 = vmatpush.bf16.msrb.mxu3 %v10128_v33  ;;  %v10138_v0 = vld [vmem:[#allocation122_spill] sm:$0xff]  ;;  %v10139_v33 = vld [vmem:[#allocation83_spill] sm:$0xff] }
 0x51e   :  { %3438 = vmatpush.bf16.msrb.mxu0 %v10129_v59  ;;  %3466 = vmatpush.bf16.msrb.mxu2 %v10130_v55  ;;  %v10140_v59 = vld [vmem:[#allocation119_spill] sm:$0xff]  ;;  %v10141_v55 = vld [vmem:[#allocation92_spill] sm:$0xff] }
 0x521   :  { %3451 = vmatpush.bf16.msrb.mxu1 %v10131_v52  ;;  %3479 = vmatpush.bf16.msrb.mxu3 %v10132_v62  ;;  %v10142_v52 = vld [vmem:[#allocation128_spill] sm:$0xff]  ;;  %v10143_v62 = vld [vmem:[#allocation91_spill] sm:$0xff] }
 0x522   :  { %3439 = vmatpush.bf16.msrb.mxu0 %v10133_v44  ;;  %3467 = vmatpush.bf16.msrb.mxu2 %v10134_v32  ;;  %v10144_v44 = vld [vmem:[#allocation123_spill] sm:$0xff]  ;;  %v10145_v32 = vld [vmem:[#allocation93_spill] sm:$0xff] }
 0x525   :  { %3452 = vmatpush.bf16.msrb.mxu1 %v10135_v22  ;;  %3480 = vmatpush.bf16.msrb.mxu3 %v10136_v53  ;;  %v10146_v22 = vld [vmem:[#allocation129_spill] sm:$0xff] }
 0x526   :  { %3440 = vmatpush.bf16.msrb.mxu0 %v10137_v48  ;;  %3468 = vmatpush.bf16.msrb.mxu2 %v10138_v0  ;;  %v10147_v0 = vld [vmem:[#allocation178_spill] sm:$0xff] }
 0x529   :  { %3453 = vmatpush.bf16.msrb.mxu1 %v10139_v33  ;;  %3481 = vmatpush.bf16.msrb.mxu3 %v10140_v59  ;;  %v280_v33 = vadd.f32 %v10148_v9, %v10147_v0 }
 0x52a   :  { %3441 = vmatpush.bf16.msrb.mxu0 %v10141_v55  ;;  %3469 = vmatpush.bf16.msrb.mxu2 %v10142_v52  ;;  %v10149_v52 = vld [vmem:[#allocation181_spill] sm:$0xff] }
 0x52d   :  { %3454 = vmatpush.bf16.msrb.mxu1 %v10143_v62  ;;  %3482 = vmatpush.bf16.msrb.mxu3 %v10144_v44  ;;  %v329_v62 = vadd.f32 %v10150_v28, %v10149_v52  ;;  %v10152_v28 = vld [vmem:[#allocation138_spill] sm:$0xff] }
 0x531   :  { %3455 = vmatpush.bf16.msrb.mxu1 %v10145_v32  ;;  %3483 = vmatpush.bf16.msrb.mxu3 %v10146_v22  ;;  %v10151_v32 = vld [vmem:[#allocation137_spill] sm:$0xff] }
 0x532   :  { %v282_v22 = vadd.f32 %v10151_v32, %v10147_v0  ;;  %v10159_v0 = vld [vmem:[#allocation77_spill] sm:$0xff] }
 0x548   :  { %v3021_v53 = vpop.f32.mrf.mxu0 }
 0x54e   :  { %v3049_v48 = vpop.f32.mrf.mxu2 }
 0x550   :  { %v3023_v59 = vpop.f32.mrf.mxu0 }
 0x551   :  { %v3035_v5 = vpop.f32.mrf.mxu1 }
 0x552   :  { %v3036_v57 = vadd.f32 %v3035_v5, %v3021_v53 }
 0x554   :  { %v3180_v42 = vadd.f32 %v3036_v57, %v280_v33 }
 0x556   :  { %v4902_v55 = vmul.f32 -1.442695, %v3180_v42  ;;  %v3051_v30 = vpop.f32.mrf.mxu2 }
 0x557   :  { %v3063_v58 = vpop.f32.mrf.mxu3 }
 0x558   :  { %5339 = vpow2.f32 %v4902_v55  ;;  %v3064_v44 = vadd.f32 %v3063_v58, %v3049_v48  ;;  %v3077_v9 = vpop.f32.mrf.mxu0  ;;  %v331_v55 = vadd.f32 %v10152_v28, %v10149_v52 }
 0x559   :  { %v3037_v2 = vpop.f32.mrf.mxu1 }
 0x55a   :  { %v3181_v56 = vadd.f32 %v3064_v44, %v329_v62  ;;  %v3038_v35 = vadd.f32 %v3037_v2, %v3023_v59  ;;  %v10153_v62 = vld [vmem:[#allocation51_spill] sm:$0xff]  ;;  %v10154_v2 = vld [vmem:[#allocation148_spill] sm:$0xff] }
 0x55b   :  { %v378_v59 = vadd.f32 %v10154_v2, %v10153_v62  ;;  %v10155_v2 = vld [vmem:[#allocation182_spill] sm:$0xff] }
 0x55c   :  { %v4903_v23 = vmul.f32 -1.442695, %v3181_v56  ;;  %v3184_v29 = vadd.f32 %v3038_v35, %v282_v22 }
 0x55e   :  { %v5340_v5 = vpop.eup %5339  ;;  %5341 = vpow2.f32 %v4903_v23  ;;  %v4906_v57 = vmul.f32 -1.442695, %v3184_v29  ;;  %v3105_v29 = vpop.f32.mrf.mxu2 }
 0x55f   :  { %v8207_v42 = vadd.f32 1.0, %v5340_v5  ;;  %v3065_v33 = vpop.f32.mrf.mxu3 }
 0x560   :  { %5343 = vpow2.f32 %v4906_v57  ;;  %v3066_v58 = vadd.f32 %v3065_v33, %v3051_v30  ;;  %v3079_v28 = vpop.f32.mrf.mxu0 }
 0x561   :  { %5345 = vrcp.f32 %v8207_v42  ;;  %v3091_v32 = vpop.f32.mrf.mxu1  ;;  %vm3225_vm13 = vweird.f32 %v8207_v42 }
 0x562   :  { %v3185_v56 = vadd.f32 %v3066_v58, %v331_v55  ;;  %v3092_v35 = vadd.f32 %v3091_v32, %v3077_v9  ;;  %v10156_v55 = vld [vmem:[#allocation149_spill] sm:$0xff] }
 0x563   :  { %v427_v9 = vadd.f32 %v10156_v55, %v10155_v2  ;;  %v8232_v55 = vadd.f32 %v10160_v27, %v10159_v0  ;;  %v3231_v27 = vand.u32 2147483648, %v8207_v42 }
 0x564   :  { %v5342_v44 = vpop.eup %5341  ;;  %v4907_v22 = vmul.f32 -1.442695, %v3185_v56  ;;  %v3182_v23 = vadd.f32 %v3092_v35, %v378_v59  ;;  %v10157_v59 = vld [vmem:[#allocation154_spill] sm:$0xff] }
 0x565   :  { %v8214_v53 = vadd.f32 1.0, %v5342_v44  ;;  %v380_v56 = vadd.f32 %v10157_v59, %v10153_v62 }
 0x566   :  { %v5344_v48 = vpop.eup %5343  ;;  %5347 = vpow2.f32 %v4907_v22  ;;  %v4904_v5 = vmul.f32 -1.442695, %v3182_v23 }
 0x567   :  { %v8216_v57 = vpop.eup %5345  ;;  %5349 = vrcp.f32 %v8214_v53  ;;  %v8219_v30 = vadd.f32 1.0, %v5344_v48  ;;  %v3119_v33 = vpop.f32.mrf.mxu3  ;;  %v10158_v48 = vld [vmem:[#allocation155_spill] sm:$0xff]  ;;  %v3246_v1 = vand.u32 2147483648, %v8214_v53  ;;  %vm3240_vm2 = vweird.f32 %v8214_v53 }
 0x568   :  { %5351 = vpow2.f32 %v4904_v5  ;;  %v3120_v58 = vadd.f32 %v3119_v33, %v3105_v29  ;;  %v3221_v32 = vmul.f32 %v8216_v57, %v8207_v42  ;;  %v429_v52 = vadd.f32 %v10158_v48, %v10155_v2  ;;  %v10161_v29 = vld [vmem:[#allocation56_spill] sm:$0xff] }
 0x569   :  { %v3093_v35 = vpop.f32.mrf.mxu1  ;;  %5353 = vrcp.f32 %v8219_v30  ;;  %v8236_v5 = vadd.f32 %v10161_v29, %v9680_v4  ;;  %vm3226_vm11 = vweird.f32 %v8216_v57  ;;  %vm3285_vm1 = vweird.f32 %v8219_v30 }
 0x56a   :  { %v3183_v44 = vadd.f32 %v3120_v58, %v427_v9  ;;  %v3094_v22 = vadd.f32 %v3093_v35, %v3079_v28  ;;  %v3222_v23 = vsub.f32 1.0, %v3221_v32  ;;  %v3229_v9 = vand.u32 2147483647, %v8207_v42  ;;  %v10162_v58 = vld [vmem:[#allocation57_spill] sm:$0xff]  ;;  %vm8267_vm6 = vmor %vm3225_vm13, %vm3226_vm11 }
 0x56b   :  { %v8244_v32 = vadd.f32 %v10162_v58, %v10159_v0  ;;  %v3232_v42 = vor.u32 1.1754944e-38, %v3231_v27 }
 0x56c   :  { %v5348_v33 = vpop.eup %5347  ;;  %v4905_v61 = vmul.f32 -1.442695, %v3183_v44  ;;  %v3186_v59 = vadd.f32 %v3094_v22, %v380_v56  ;;  %v3223_v62 = vmul.f32 %v8216_v57, %v3222_v23  ;;  %v3107_v56 = vpop.f32.mrf.mxu2  ;;  %vm8260_vm0 = vcmp.eq.f32.partialorder %v3229_v9, 8.507059e+37 }
 0x56d   :  { %v8240_v28 = vpop.eup %5349  ;;  %v8246_v35 = vadd.f32 1.0, %v5348_v33  ;;  %v3244_v33 = vand.u32 2147483647, %v8214_v53 }
 0x56e   :  { %v5352_v48 = vpop.eup %5351  ;;  %5355 = vpow2.f32 %v4905_v61  ;;  %v4908_v44 = vmul.f32 -1.442695, %v3186_v59  ;;  %v3224_v22 = vadd.f32 %v8216_v57, %v3223_v62  ;;  %v3236_v23 = vmul.f32 %v8240_v28, %v8214_v53  ;;  %v3133_v61 = vpop.f32.mrf.mxu0 }
 0x56f   :  { %5357 = vrcp.f32 %v8246_v35  ;;  %v8254_v29 = vadd.f32 1.0, %v5352_v48  ;;  %v3121_v58 = vpop.f32.mrf.mxu3  ;;  %v8258_v0 = vpop.eup %5353  ;;  %vm8279_vm12 = vcmp.eq.f32.partialorder %v3244_v33, 8.507059e+37  ;;  %vm3241_vm4 = vweird.f32 %v8240_v28 }
 0x570   :  { %5359 = vpow2.f32 %v4908_v44  ;;  %v3122_v59 = vadd.f32 %v3121_v58, %v3107_v56  ;;  %v3237_v62 = vsub.f32 1.0, %v3236_v23  ;;  %v3291_v44 = vand.u32 2147483648, %v8219_v30  ;;  %vm8313_vm7 = vmor %vm3240_vm2, %vm3241_vm4 }
 0x571   :  { %5361 = vrcp.f32 %v8254_v29  ;;  %v3147_v50 = vpop.f32.mrf.mxu1  ;;  %v3228_v23 = vsel %vm8267_vm6, %v8216_v57, %v3224_v22  ;;  %v3261_v7 = vand.u32 2147483648, %v8254_v29  ;;  %v3281_v27 = vmul.f32 %v8258_v0, %v8219_v30 }
 0x572   :  { %v3187_v56 = vadd.f32 %v3122_v59, %v429_v52  ;;  %v3148_v9 = vadd.f32 %v3147_v50, %v3133_v61  ;;  %v3238_v58 = vmul.f32 %v8240_v28, %v3237_v62  ;;  %v3289_v57 = vand.u32 2147483647, %v8219_v30 }
 0x573   :  { %v3259_v61 = vand.u32 2147483647, %v8254_v29  ;;  %v3233_v33 = vsel %vm8260_vm0, %v3232_v42, %v3228_v23  ;;  %v8297_v47 = vor.u32 1.1754944e-38, %v3291_v44  ;;  %vm3255_vm10 = vweird.f32 %v8254_v29 }
 0x574   :  { %v5356_v24 = vpop.eup %5355  ;;  %v4909_v52 = vmul.f32 -1.442695, %v3187_v56  ;;  %v3340_v50 = vadd.f32 %v3148_v9, %v6505_v49  ;;  %v3239_v62 = vadd.f32 %v8240_v28, %v3238_v58  ;;  %v3247_v9 = vor.u32 1.1754944e-38, %v3246_v1  ;;  %v3161_v44 = vpop.f32.mrf.mxu2 }
 0x575   :  { %v8288_v22 = vpop.eup %5357  ;;  %v8291_v59 = vadd.f32 1.0, %v5356_v24  ;;  %v3262_v43 = vor.u32 1.1754944e-38, %v3261_v7  ;;  %v3282_v2 = vsub.f32 1.0, %v3281_v27  ;;  %vm8317_vm3 = vcmp.eq.f32.partialorder %v3259_v61, 8.507059e+37 }
 0x576   :  { %v5360_v48 = vpop.eup %5359  ;;  %5363 = vpow2.f32 %v4909_v52  ;;  %v3344_v56 = vmul.f32 %v3340_v50, %v3233_v33  ;;  %v3243_v50 = vsel %vm8313_vm7, %v8240_v28, %v3239_v62  ;;  %vm3286_vm14 = vweird.f32 %v8258_v0 }
 0x577   :  { %v8299_v31 = vpop.eup %5361  ;;  %5365 = vrcp.f32 %v8291_v59  ;;  %v3175_v24 = vpop.f32.mrf.mxu3  ;;  %v3276_v23 = vand.u32 2147483648, %v8291_v59  ;;  %v8306_v58 = vadd.f32 1.0, %v5360_v48  ;;  %vm8325_vm8 = vcmp.eq.f32.partialorder %v3289_v57, 8.507059e+37  ;;  %vm8357_vm11 = vmor %vm3285_vm1, %vm3286_vm14 }
 0x578   :  { %v3251_v42 = vmul.f32 %v8299_v31, %v8254_v29  ;;  %v3348_v1 = vadd.f32 %v3344_v56, %v8232_v55  ;;  %v3176_v52 = vadd.f32 %v3175_v24, %v3161_v44  ;;  %v3274_v61 = vand.u32 2147483647, %v8291_v59  ;;  %v3135_v56 = vpop.f32.mrf.mxu0 }
 0x579   :  { %v3149_v33 = vpop.f32.mrf.mxu1  ;;  %5367 = vrcp.f32 %v8306_v58  ;;  %vm3256_vm15 = vweird.f32 %v8299_v31  ;;  %v3296_v57 = vmul.f32 %v8288_v22, %v8246_v35  ;;  %vm3270_vm9 = vweird.f32 %v8291_v59 }
 0x57a   :  { %v3252_v48 = vsub.f32 1.0, %v3251_v42  ;;  %v3341_v28 = vadd.f32 %v3176_v52, %v6500_v41  ;;  %v3150_v62 = vadd.f32 %v3149_v33, %v3135_v56  ;;  %v3277_v42 = vor.u32 1.1754944e-38, %v3276_v23  ;;  %vm8366_vm0 = vmor %vm3255_vm10, %vm3256_vm15 }
 0x57b   :  { %v3248_v53 = vsel %vm8279_vm12, %v3247_v9, %v3243_v50  ;;  %v3283_v25 = vmul.f32 %v8258_v0, %v3282_v2  ;;  %v3319_v40 = vand.u32 2147483647, %v8306_v58  ;;  %v3321_v52 = vand.u32 2147483648, %v8306_v58 }
 0x57c   :  { %v5364_v44 = vpop.eup %5363  ;;  %v3253_v7 = vmul.f32 %v8299_v31, %v3252_v48  ;;  %v3345_v56 = vmul.f32 %v3341_v28, %v3248_v53  ;;  %vm8348_vm5 = vcmp.eq.f32.partialorder %v3274_v61, 8.507059e+37  ;;  %5369 = vtanh.f32 %v3348_v1 }
 0x57d   :  { %v5366_v24 = vpop.eup %5365  ;;  %v8344_v33 = vadd.f32 1.0, %v5364_v44  ;;  %v3284_v60 = vadd.f32 %v8258_v0, %v3283_v25  ;;  %vm3300_vm13 = vweird.f32 %v8246_v35  ;;  %vm3315_vm6 = vweird.f32 %v8306_v58 }
 0x57e   :  { %v3254_v51 = vadd.f32 %v8299_v31, %v3253_v7  ;;  %v3266_v48 = vmul.f32 %v5366_v24, %v8291_v59  ;;  %v3342_v25 = vadd.f32 %v3150_v62, %v6505_v49  ;;  %v3297_v30 = vsub.f32 1.0, %v3296_v57 }
 0x57f   :  { %5371 = vrcp.f32 %v8344_v33  ;;  %v5368_v23 = vpop.eup %5367  ;;  %v3349_v53 = vadd.f32 %v3345_v56, %v8236_v5  ;;  %v3288_v29 = vsel %vm8357_vm11, %v8258_v0, %v3284_v60  ;;  %vm3271_vm2 = vweird.f32 %v5366_v24  ;;  %v3163_v60 = vpop.f32.mrf.mxu2 }
 0x580   :  { %v3267_v1 = vsub.f32 1.0, %v3266_v48  ;;  %v3258_v50 = vsel %vm8366_vm0, %v8299_v31, %v3254_v51  ;;  %v3311_v61 = vmul.f32 %v5368_v23, %v8306_v58  ;;  %vm8381_vm12 = vcmp.eq.f32.partialorder %v3319_v40, 8.507059e+37  ;;  %v3177_v31 = vpop.f32.mrf.mxu3  ;;  %vm3272_vm10 = vmor %vm3270_vm9, %vm3271_vm2 }
 0x581   :  { %v3322_v62 = vor.u32 1.1754944e-38, %v3321_v52  ;;  %vm3316_vm4 = vweird.f32 %v5368_v23  ;;  %v3263_v44 = vsel %vm8317_vm3, %v3262_v43, %v3258_v50  ;;  %v3293_v51 = vsel %vm8325_vm8, %v8297_v47, %v3288_v29 }
 0x582   :  { %v3268_v57 = vmul.f32 %v5366_v24, %v3267_v1  ;;  %v3312_v5 = vsub.f32 1.0, %v3311_v61  ;;  %v3356_v0 = vsub.f32 1.0, %v3263_v44  ;;  %5373 = vtanh.f32 %v3349_v53  ;;  %v5370_v56 = vpop.eup %5369  ;;  %vm3317_vm3 = vmor %vm3315_vm6, %vm3316_vm4 }
 0x583   :  { %v3346_v7 = vmul.f32 %v3342_v25, %v3293_v51  ;;  %v3364_v48 = vmul.f32 %v3263_v44, %v8083_v39  ;;  %v3298_v52 = vmul.f32 %v8288_v22, %v3297_v30  ;;  %vm3301_vm1 = vweird.f32 %v8288_v22 }
 0x584   :  { %v3269_v40 = vadd.f32 %v5366_v24, %v3268_v57  ;;  %v3313_v43 = vmul.f32 %v5368_v23, %v3312_v5  ;;  %v3360_v47 = vmul.f32 %v5370_v56, %v3356_v0  ;;  %v3178_v9 = vadd.f32 %v3177_v31, %v3163_v60  ;;  %vm8406_vm7 = vmor %vm3300_vm13, %vm3301_vm1 }
 0x585   :  { %v5372_v27 = vpop.eup %5371  ;;  %v3350_v55 = vadd.f32 %v3346_v7, %v8244_v32  ;;  %v3336_v25 = vand.u32 2147483648, %v8344_v33  ;;  %v3299_v50 = vadd.f32 %v8288_v22, %v3298_v52  ;;  %v10186_v44 = vand.u32 2147483648, %v8246_v35 }
 0x586   :  { %v3326_v2 = vmul.f32 %v5372_v27, %v8344_v33  ;;  %v3273_v1 = vsel %vm3272_vm10, %v5366_v24, %v3269_v40  ;;  %v3314_v30 = vadd.f32 %v5368_v23, %v3313_v43  ;;  %v3368_v53 = vadd.f32 %v3364_v48, %v3360_v47 }
 0x587   :  { %v3278_v29 = vsel %vm8348_vm5, %v3277_v42, %v3273_v1  ;;  %5375 = vtanh.f32 %v3350_v55  ;;  %v3303_v37 = vsel %vm8406_vm7, %v8288_v22, %v3299_v50  ;;  %v10185_v42 = vand.u32 2147483647, %v8246_v35  ;;  %v10187_v22 = vld [vmem:[#allocation66_spill] sm:$0xff] }
 0x588   :  { %v3327_v59 = vsub.f32 1.0, %v3326_v2  ;;  %v3357_v24 = vsub.f32 1.0, %v3278_v29  ;;  %v5374_v61 = vpop.eup %5373  ;;  %vm3331_vm8 = vweird.f32 %v5372_v27  ;;  %v3318_v57 = vsel %vm3317_vm3, %v5368_v23, %v3314_v30 }
 0x589   :  { %vm3305_vm14 = vcmp.eq.f32.partialorder %v10185_v42, 8.507059e+37  ;;  %v3307_v51 = vor.u32 1.1754944e-38, %v10186_v44  ;;  %v3343_v31 = vadd.f32 %v3178_v9, %v6500_v41  ;;  %v3365_v0 = vmul.f32 %v3278_v29, %v8100_v38  ;;  %v10196_v42 = vld [vmem:[#allocation102_spill] sm:$0xff]  ;;  %v10199_v44 = vld [vmem:[#allocation143_spill] sm:$0xff] }
 0x58a   :  { %v3328_v5 = vmul.f32 %v5372_v27, %v3327_v59  ;;  %v3361_v58 = vmul.f32 %v5374_v61, %v3357_v24  ;;  %v3323_v7 = vsel %vm8381_vm12, %v3322_v62, %v3318_v57  ;;  %v527_v56 = vadd.f32 %v10187_v22, %v9680_v4  ;;  %v10194_v24 = vld [vmem:[#allocation69_spill] sm:$0xff]  ;;  %v10197_v61 = vld [vmem:[#allocation146_spill] sm:$0xff] }
 0x58b   :  { %v3334_v40 = vand.u32 2147483647, %v8344_v33  ;;  %v3358_v48 = vsub.f32 1.0, %v3323_v7  ;;  %v3308_v60 = vsel %vm3305_vm14, %v3307_v51, %v3303_v37  ;;  %vm3330_vm15 = vweird.f32 %v8344_v33  ;;  %v10195_v37 = vld [vmem:[#allocation139_spill] sm:$0xff]  ;;  %v10198_v57 = vld [vmem:[#allocation86_spill] sm:$0xff]  ;;  %v10200_v51 = vld [vmem:[#allocation120_spill] sm:$0xff] }
 0x58c   :  { %v3329_v23 = vadd.f32 %v5372_v27, %v3328_v5  ;;  %v3369_v35 = vadd.f32 %v3365_v0, %v3361_v58  ;;  %v3347_v52 = vmul.f32 %v3343_v31, %v3308_v60  ;;  %vm3332_vm9 = vmor %vm3330_vm15, %vm3331_vm8  ;;  %v3337_v47 = vor.u32 1.1754944e-38, %v3336_v25  ;;  %v10201_v31 = vld [vmem:[#allocation150_spill] sm:$0xff]  ;;  %v10202_v5 = vld [vmem:[#allocation12_spill] sm:$0xff] }
 0x58d   :  { %v5376_v43 = vpop.eup %5375  ;;  %v3366_v28 = vmul.f32 %v3323_v7, %v8088_v16  ;;  %vm3335_vm5 = vcmp.eq.f32.partialorder %v3334_v40, 8.507059e+37  ;;  %vm10188_vm11 = vcmp.gt.s32.totalorder %v6586_v54, 5  ;;  %vm10189_vm13 = vcmp.gt.s32.totalorder %v6616_v34, 5  ;;  %v10203_v58 = vld [vmem:[#allocation30_spill] sm:$0xff]  ;;  %v10205_v7 = vld [vmem:[#allocation147_spill] sm:$0xff]  ;;  %v10208_v40 = vld [vmem:[#allocation124_spill] sm:$0xff] }
 0x58e   :  { %v3362_v55 = vmul.f32 %v5376_v43, %v3358_v48  ;;  %v3333_v62 = vsel %vm3332_vm9, %v5372_v27, %v3329_v23  ;;  %v3351_v9 = vadd.f32 %v3347_v52, %v527_v56  ;;  %v8433_v50 = vsel %vm10188_vm11, %v3368_v53, %v8083_v39  ;;  %v10204_v0 = vld [vmem:[#allocation106_spill] sm:$0xff]  ;;  %v10207_v56 = vld [vmem:[#allocation32_spill] sm:$0xff]  ;;  %v10209_v48 = vld [vmem:[#allocation151_spill] sm:$0xff] }
 0x58f   :  { %v3338_v1 = vsel %vm3335_vm5, %v3337_v47, %v3333_v62  ;;  %vm10190_vm0 = vcmp.gt.s32.totalorder %v6586_v54, 2  ;;  %vm10191_vm6 = vcmp.gt.s32.totalorder %v6616_v34, 2  ;;  %v10206_v22 = vld [vmem:[#allocation14_spill] sm:$0xff]  ;;  %v10210_v60 = vld [vmem:[#allocation13_spill] sm:$0xff]  ;;  %v10211_v23 = vld [vmem:[#allocation31_spill] sm:$0xff] }
 0x590   :  { %v3370_v2 = vadd.f32 %v3366_v28, %v3362_v55  ;;  %5377 = vtanh.f32 %v3351_v9  ;;  %v3359_v25 = vsub.f32 1.0, %v3338_v1  ;;  %v3367_v39 = vmul.f32 %v3338_v1, %v8105_v12  ;;  %v10213_v52 = vld [vmem:[#allocation34_spill] sm:$0xff]  ;;  %v10214_v43 = vld [vmem:[#allocation15_spill] sm:$0xff]  ;;  %v10215_v47 = vld [vmem:[#allocation33_spill] sm:$0xff] }
 0x591   :  { %v10216_v55 = vld [vmem:[#allocation18_spill] sm:$0xff]  ;;  %v10217_v28 = vld [vmem:[#allocation36_spill] sm:$0xff]  ;;  %v10218_v62 = vld [vmem:[#allocation17_spill] sm:$0xff] }
 0x592   :  { %v8438_v33 = vsel %vm10189_vm13, %v3370_v2, %v8088_v16  ;;  %v8450_v16 = vsel %vm10190_vm0, %v3369_v35, %v8100_v38  ;;  %v10192_v38 = vld [vmem:[#allocation84_spill] sm:$0xff]  ;;  %v10219_v9 = vld [vmem:[#allocation35_spill] sm:$0xff] }
 0x593   :  { %v3376_v30 = vpack.c.bf16 %v8438_v33, %v8433_v50  ;;  %v10212_v35 = vld [vmem:[#allocation16_spill] sm:$0xff] }
 0x594   :  { %v10220_v2 = vld [vmem:[#allocation20_spill] sm:$0xff] }
 0x595   :  { %3386 = vmatmul.bf16.vlgmr.msra.gmra.mxu0 %v3376_v30  ;;  %3414 = vmatmul.bf16.vlgmr.msra.gmra.mxu2 %v3376_v30  ;;  %v10221_v1 = vld [vmem:[#allocation40_spill] sm:$0xff] }
 0x596   :  { %v5378_v27 = vpop.eup %5377  ;;  %3490 = vmatpush.bf16.msra.mxu0 %v9596_v15  ;;  %3518 = vmatpush.bf16.msra.mxu2 %v6086_v6 }
 0x597   :  { %v3363_v29 = vmul.f32 %v5378_v27, %v3359_v25  ;;  %v10222_v25 = vld [vmem:[#allocation19_spill] sm:$0xff]  ;;  %v10224_v27 = vld [vmem:[#allocation22_spill] sm:$0xff] }
 0x599   :  { %v3371_v53 = vadd.f32 %v3367_v39, %v3363_v29  ;;  %v10225_v29 = vld [vmem:[#allocation42_spill] sm:$0xff]  ;;  %v10226_v39 = vld [vmem:[#allocation21_spill] sm:$0xff] }
 0x59a   :  { %3491 = vmatpush.bf16.msra.mxu0 %v9598_v63  ;;  %3519 = vmatpush.bf16.msra.mxu2 %v6100_v3 }
 0x59b   :  { %v8455_v32 = vsel %vm10191_vm6, %v3371_v53, %v8105_v12  ;;  %v10193_v12 = vld [vmem:[#allocation142_spill] sm:$0xff]  ;;  %v10227_v53 = vld [vmem:[#allocation41_spill] sm:$0xff] }
 0x59c   :  { %v3377_v59 = vpack.c.bf16 %v8455_v32, %v8450_v16 }
 0x59e   :  { %3400 = vmatmul.bf16.vlgmr.msra.gmra.mxu1 %v3377_v59  ;;  %3428 = vmatmul.bf16.vlgmr.msra.gmra.mxu3 %v3377_v59 }
 0x59f   :  { %3504 = vmatpush.bf16.msra.mxu1 %v9595_v17  ;;  %3532 = vmatpush.bf16.msra.mxu3 %v6088_v10 }
 0x5a0   :  { %3492 = vmatpush.bf16.msra.mxu0 %v9600_v8  ;;  %3520 = vmatpush.bf16.msra.mxu2 %v6114_v36 }
 0x5a3   :  { %3505 = vmatpush.bf16.msra.mxu1 %v9597_v26  ;;  %3533 = vmatpush.bf16.msra.mxu3 %v6102_v21 }
 0x5a4   :  { %3493 = vmatpush.bf16.msra.mxu0 %v9602_v18  ;;  %3521 = vmatpush.bf16.msra.mxu2 %v6130_v45 }
 0x5a5   :  { %3442 = vmatmul.bf16.vlgmr.msrb.gmra.mxu0 %v3376_v30  ;;  %3470 = vmatmul.bf16.vlgmr.msrb.gmra.mxu2 %v3376_v30 }
 0x5a7   :  { %3506 = vmatpush.bf16.msra.mxu1 %v9599_v19  ;;  %3534 = vmatpush.bf16.msra.mxu3 %v6116_v14 }
 0x5a8   :  { %3494 = vmatpush.bf16.msra.mxu0 %v9604_v13  ;;  %3522 = vmatpush.bf16.msra.mxu2 %v6142_v20 }
 0x5ab   :  { %3507 = vmatpush.bf16.msra.mxu1 %v9710_v46  ;;  %3535 = vmatpush.bf16.msra.mxu3 %v9711_v11 }
 0x5ac   :  { %3495 = vmatpush.bf16.msra.mxu0 %v10192_v38  ;;  %3523 = vmatpush.bf16.msra.mxu2 %v10193_v12 }
 0x5ae   :  { %3456 = vmatmul.bf16.vlgmr.msrb.gmra.mxu1 %v3377_v59  ;;  %3484 = vmatmul.bf16.vlgmr.msrb.gmra.mxu3 %v3377_v59 }
 0x5af   :  { %3508 = vmatpush.bf16.msra.mxu1 %v10194_v24  ;;  %3536 = vmatpush.bf16.msra.mxu3 %v10195_v37 }
 0x5b0   :  { %3496 = vmatpush.bf16.msra.mxu0 %v10196_v42  ;;  %3524 = vmatpush.bf16.msra.mxu2 %v10197_v61 }
 0x5b3   :  { %3509 = vmatpush.bf16.msra.mxu1 %v10198_v57  ;;  %3537 = vmatpush.bf16.msra.mxu3 %v10199_v44 }
 0x5b4   :  { %3497 = vmatpush.bf16.msra.mxu0 %v10200_v51  ;;  %3525 = vmatpush.bf16.msra.mxu2 %v10201_v31 }
 0x5b7   :  { %3510 = vmatpush.bf16.msra.mxu1 %v10204_v0  ;;  %3538 = vmatpush.bf16.msra.mxu3 %v10205_v7 }
 0x5b8   :  { %3744 = vmatpush.bf16.msrb.mxu0 %v10202_v5  ;;  %3772 = vmatpush.bf16.msrb.mxu2 %v10203_v58  ;;  %v10229_v5 = vld [vmem:[#allocation44_spill] sm:$0xff]  ;;  %v10230_v58 = vld [vmem:[#allocation23_spill] sm:$0xff] }
 0x5b9   :  { %3498 = vmatmul.bf16.vlgmr.msra.gmra.mxu0 %v3376_v30  ;;  %3526 = vmatmul.bf16.vlgmr.msra.gmra.mxu2 %v3376_v30  ;;  %v10223_v30 = vld [vmem:[#allocation37_spill] sm:$0xff] }
 0x5bb   :  { %3511 = vmatpush.bf16.msra.mxu1 %v10208_v40  ;;  %3539 = vmatpush.bf16.msra.mxu3 %v10209_v48  ;;  %v10283_v48 = vld [vmem:[#allocation183_spill] sm:$0xff] }
 0x5bc   :  { %3745 = vmatpush.bf16.msrb.mxu0 %v10206_v22  ;;  %3773 = vmatpush.bf16.msrb.mxu2 %v10207_v56  ;;  %v10231_v22 = vld [vmem:[#allocation43_spill] sm:$0xff]  ;;  %v10232_v56 = vld [vmem:[#allocation26_spill] sm:$0xff] }
 0x5be   :  { %3512 = vmatmul.bf16.vlgmr.msra.gmra.mxu1 %v3377_v59  ;;  %3540 = vmatmul.bf16.vlgmr.msra.gmra.mxu3 %v3377_v59  ;;  %v10228_v59 = vld [vmem:[#allocation24_spill] sm:$0xff] }
 0x5bf   :  { %3758 = vmatpush.bf16.msrb.mxu1 %v10210_v60  ;;  %3786 = vmatpush.bf16.msrb.mxu3 %v10211_v23  ;;  %v10233_v60 = vld [vmem:[#allocation46_spill] sm:$0xff] }
 0x5c0   :  { %3746 = vmatpush.bf16.msrb.mxu0 %v10212_v35  ;;  %3774 = vmatpush.bf16.msrb.mxu2 %v10213_v52  ;;  %v10234_v23 = vld [vmem:[#allocation62_spill] sm:$0xff]  ;;  %v10235_v35 = vld [vmem:[#allocation95_spill] sm:$0xff]  ;;  %v10236_v52 = vld [vmem:[#allocation25_spill] sm:$0xff] }
 0x5c3   :  { %3759 = vmatpush.bf16.msrb.mxu1 %v10214_v43  ;;  %3787 = vmatpush.bf16.msrb.mxu3 %v10215_v47  ;;  %v10237_v43 = vld [vmem:[#allocation45_spill] sm:$0xff]  ;;  %v10238_v47 = vld [vmem:[#allocation64_spill] sm:$0xff] }
 0x5c4   :  { %3747 = vmatpush.bf16.msrb.mxu0 %v10216_v55  ;;  %3775 = vmatpush.bf16.msrb.mxu2 %v10217_v28  ;;  %v10239_v55 = vld [vmem:[#allocation100_spill] sm:$0xff]  ;;  %v10240_v28 = vld [vmem:[#allocation29_spill] sm:$0xff] }
 0x5c7   :  { %3760 = vmatpush.bf16.msrb.mxu1 %v10218_v62  ;;  %3788 = vmatpush.bf16.msrb.mxu3 %v10219_v9  ;;  %v10241_v62 = vld [vmem:[#allocation47_spill] sm:$0xff] }
 0x5c8   :  { %3748 = vmatpush.bf16.msrb.mxu0 %v10220_v2  ;;  %3776 = vmatpush.bf16.msrb.mxu2 %v10221_v1  ;;  %v10242_v9 = vld [vmem:[#allocation63_spill] sm:$0xff]  ;;  %v10243_v2 = vld [vmem:[#allocation96_spill] sm:$0xff] }
 0x5c9   :  { %v10244_v1 = vld [vmem:[#allocation72_spill] sm:$0xff] }
 0x5cb   :  { %3761 = vmatpush.bf16.msrb.mxu1 %v10222_v25  ;;  %3789 = vmatpush.bf16.msrb.mxu3 %v10223_v30  ;;  %v10245_v25 = vld [vmem:[#allocation104_spill] sm:$0xff]  ;;  %v10246_v30 = vld [vmem:[#allocation65_spill] sm:$0xff] }
 0x5cc   :  { %3749 = vmatpush.bf16.msrb.mxu0 %v10224_v27  ;;  %3777 = vmatpush.bf16.msrb.mxu2 %v10225_v29  ;;  %v10247_v27 = vld [vmem:[#allocation101_spill] sm:$0xff]  ;;  %v10248_v29 = vld [vmem:[#allocation74_spill] sm:$0xff] }
 0x5cf   :  { %3762 = vmatpush.bf16.msrb.mxu1 %v10226_v39  ;;  %3790 = vmatpush.bf16.msrb.mxu3 %v10227_v53  ;;  %v10249_v39 = vld [vmem:[#allocation110_spill] sm:$0xff]  ;;  %v10250_v53 = vld [vmem:[#allocation73_spill] sm:$0xff] }
 0x5d0   :  { %3750 = vmatpush.bf16.msrb.mxu0 %v10228_v59  ;;  %3778 = vmatpush.bf16.msrb.mxu2 %v10229_v5  ;;  %v10251_v59 = vld [vmem:[#allocation105_spill] sm:$0xff]  ;;  %v10252_v5 = vld [vmem:[#allocation80_spill] sm:$0xff] }
 0x5d3   :  { %3763 = vmatpush.bf16.msrb.mxu1 %v10230_v58  ;;  %3791 = vmatpush.bf16.msrb.mxu3 %v10231_v22  ;;  %v10253_v58 = vld [vmem:[#allocation113_spill] sm:$0xff]  ;;  %v10254_v22 = vld [vmem:[#allocation75_spill] sm:$0xff] }
 0x5d4   :  { %3751 = vmatpush.bf16.msrb.mxu0 %v10232_v56  ;;  %3779 = vmatpush.bf16.msrb.mxu2 %v10233_v60  ;;  %v10255_v56 = vld [vmem:[#allocation111_spill] sm:$0xff]  ;;  %v10256_v60 = vld [vmem:[#allocation82_spill] sm:$0xff] }
 0x5d7   :  { %3764 = vmatpush.bf16.msrb.mxu1 %v10236_v52  ;;  %3792 = vmatpush.bf16.msrb.mxu3 %v10237_v43  ;;  %v10259_v52 = vld [vmem:[#allocation114_spill] sm:$0xff] }
 0x5d8   :  { %3800 = vmatpush.bf16.msra.mxu0 %v10234_v23  ;;  %3828 = vmatpush.bf16.msra.mxu2 %v10235_v35  ;;  %v10257_v23 = vld [vmem:[#allocation118_spill] sm:$0xff]  ;;  %v10258_v35 = vld [vmem:[#allocation81_spill] sm:$0xff] }
 0x5d9   :  { %v10260_v43 = vld [vmem:[#allocation90_spill] sm:$0xff] }
 0x5db   :  { %3765 = vmatpush.bf16.msrb.mxu1 %v10240_v28  ;;  %3793 = vmatpush.bf16.msrb.mxu3 %v10241_v62  ;;  %v10263_v28 = vld [vmem:[#allocation119_spill] sm:$0xff]  ;;  %v10264_v62 = vld [vmem:[#allocation92_spill] sm:$0xff] }
 0x5dc   :  { %3801 = vmatpush.bf16.msra.mxu0 %v10238_v47  ;;  %3829 = vmatpush.bf16.msra.mxu2 %v10239_v55  ;;  %v10261_v47 = vld [vmem:[#allocation122_spill] sm:$0xff]  ;;  %v10262_v55 = vld [vmem:[#allocation83_spill] sm:$0xff] }
 0x5df   :  { %3814 = vmatpush.bf16.msra.mxu1 %v10242_v9  ;;  %3842 = vmatpush.bf16.msra.mxu3 %v10243_v2  ;;  %v10265_v9 = vld [vmem:[#allocation128_spill] sm:$0xff]  ;;  %v10266_v2 = vld [vmem:[#allocation91_spill] sm:$0xff] }
 0x5e0   :  { %3802 = vmatpush.bf16.msra.mxu0 %v10244_v1  ;;  %3830 = vmatpush.bf16.msra.mxu2 %v10245_v25  ;;  %v10267_v1 = vld [vmem:[#allocation123_spill] sm:$0xff]  ;;  %v10268_v25 = vld [vmem:[#allocation93_spill] sm:$0xff] }
 0x5e3   :  { %3815 = vmatpush.bf16.msra.mxu1 %v10246_v30  ;;  %3843 = vmatpush.bf16.msra.mxu3 %v10247_v27  ;;  %v10269_v30 = vld [vmem:[#allocation129_spill] sm:$0xff] }
 0x5e4   :  { %3803 = vmatpush.bf16.msra.mxu0 %v10248_v29  ;;  %3831 = vmatpush.bf16.msra.mxu2 %v10249_v39 }
 0x5e7   :  { %3816 = vmatpush.bf16.msra.mxu1 %v10250_v53  ;;  %3844 = vmatpush.bf16.msra.mxu3 %v10251_v59  ;;  %v10270_v53 = vld [vmem:[#allocation178_spill] sm:$0xff]  ;;  %v10271_v59 = vld [vmem:[#allocation144_spill] sm:$0xff] }
 0x5e8   :  { %3804 = vmatpush.bf16.msra.mxu0 %v10252_v5  ;;  %3832 = vmatpush.bf16.msra.mxu2 %v10253_v58  ;;  %v285_v5 = vadd.f32 %v10271_v59, %v10270_v53 }
 0x5eb   :  { %3817 = vmatpush.bf16.msra.mxu1 %v10254_v22  ;;  %3845 = vmatpush.bf16.msra.mxu3 %v10255_v56 }
 0x5ec   :  { %3805 = vmatpush.bf16.msra.mxu0 %v10256_v60  ;;  %3833 = vmatpush.bf16.msra.mxu2 %v10257_v23 }
 0x5ef   :  { %3818 = vmatpush.bf16.msra.mxu1 %v10258_v35  ;;  %3846 = vmatpush.bf16.msra.mxu3 %v10259_v52  ;;  %v10272_v35 = vld [vmem:[#allocation181_spill] sm:$0xff] }
 0x5f0   :  { %3806 = vmatpush.bf16.msra.mxu0 %v10260_v43  ;;  %3834 = vmatpush.bf16.msra.mxu2 %v10261_v47  ;;  %v10273_v52 = vld [vmem:[#allocation145_spill] sm:$0xff] }
 0x5f1   :  { %v334_v43 = vadd.f32 %v10273_v52, %v10272_v35  ;;  %v10276_v52 = vld [vmem:[#allocation51_spill] sm:$0xff] }
 0x5f3   :  { %3819 = vmatpush.bf16.msra.mxu1 %v10262_v55  ;;  %3847 = vmatpush.bf16.msra.mxu3 %v10263_v28  ;;  %v10274_v28 = vld [vmem:[#allocation152_spill] sm:$0xff] }
 0x5f4   :  { %3807 = vmatpush.bf16.msra.mxu0 %v10264_v62  ;;  %3835 = vmatpush.bf16.msra.mxu2 %v10265_v9  ;;  %v287_v62 = vadd.f32 %v10274_v28, %v10270_v53  ;;  %v10282_v53 = vld [vmem:[#allocation77_spill] sm:$0xff] }
 0x5f7   :  { %3820 = vmatpush.bf16.msra.mxu1 %v10266_v2  ;;  %3848 = vmatpush.bf16.msra.mxu3 %v10267_v1 }
 0x5fb   :  { %3821 = vmatpush.bf16.msra.mxu1 %v10268_v25  ;;  %3849 = vmatpush.bf16.msra.mxu3 %v10269_v30 }
 0x612   :  { %v3387_v27 = vpop.f32.mrf.mxu0 }
 0x618   :  { %v3415_v29 = vpop.f32.mrf.mxu2 }
 0x61a   :  { %v3389_v22 = vpop.f32.mrf.mxu0 }
 0x61b   :  { %v3401_v39 = vpop.f32.mrf.mxu1 }
 0x61c   :  { %v3402_v58 = vadd.f32 %v3401_v39, %v3387_v27 }
 0x61e   :  { %v3546_v56 = vadd.f32 %v3402_v58, %v285_v5 }
 0x620   :  { %v4910_v60 = vmul.f32 -1.442695, %v3546_v56  ;;  %v3417_v1 = vpop.f32.mrf.mxu2  ;;  %v10275_v56 = vld [vmem:[#allocation153_spill] sm:$0xff] }
 0x621   :  { %v3429_v23 = vpop.f32.mrf.mxu3 }
 0x622   :  { %5379 = vpow2.f32 %v4910_v60  ;;  %v3430_v47 = vadd.f32 %v3429_v23, %v3415_v29  ;;  %v3443_v59 = vpop.f32.mrf.mxu0  ;;  %v336_v60 = vadd.f32 %v10275_v56, %v10272_v35 }
 0x623   :  { %v3403_v55 = vpop.f32.mrf.mxu1 }
 0x624   :  { %v3547_v9 = vadd.f32 %v3430_v47, %v334_v43  ;;  %v3404_v2 = vadd.f32 %v3403_v55, %v3389_v22  ;;  %v10277_v22 = vld [vmem:[#allocation156_spill] sm:$0xff] }
 0x625   :  { %v383_v43 = vadd.f32 %v10277_v22, %v10276_v52  ;;  %v10278_v22 = vld [vmem:[#allocation182_spill] sm:$0xff] }
 0x626   :  { %v4911_v25 = vmul.f32 -1.442695, %v3547_v9  ;;  %v3550_v30 = vadd.f32 %v3404_v2, %v287_v62 }
 0x628   :  { %v5380_v27 = vpop.eup %5379  ;;  %5381 = vpow2.f32 %v4911_v25  ;;  %v4914_v39 = vmul.f32 -1.442695, %v3550_v30  ;;  %v3471_v2 = vpop.f32.mrf.mxu2 }
 0x629   :  { %v8557_v5 = vadd.f32 1.0, %v5380_v27  ;;  %v3431_v58 = vpop.f32.mrf.mxu3 }
 0x62a   :  { %5383 = vpow2.f32 %v4914_v39  ;;  %v3432_v29 = vadd.f32 %v3431_v58, %v3417_v1  ;;  %v3445_v56 = vpop.f32.mrf.mxu0 }
 0x62b   :  { %5385 = vrcp.f32 %v8557_v5  ;;  %v3457_v23 = vpop.f32.mrf.mxu1  ;;  %vm3591_vm12 = vweird.f32 %v8557_v5 }
 0x62c   :  { %v3551_v47 = vadd.f32 %v3432_v29, %v336_v60  ;;  %v3458_v55 = vadd.f32 %v3457_v23, %v3443_v59  ;;  %v10279_v60 = vld [vmem:[#allocation157_spill] sm:$0xff] }
 0x62d   :  { %v432_v59 = vadd.f32 %v10279_v60, %v10278_v22  ;;  %v8582_v60 = vadd.f32 %v10283_v48, %v10282_v53  ;;  %v3597_v48 = vand.u32 2147483648, %v8557_v5 }
 0x62e   :  { %v5382_v28 = vpop.eup %5381  ;;  %v4915_v62 = vmul.f32 -1.442695, %v3551_v47  ;;  %v3548_v9 = vadd.f32 %v3458_v55, %v383_v43  ;;  %v10280_v43 = vld [vmem:[#allocation158_spill] sm:$0xff] }
 0x62f   :  { %v8564_v25 = vadd.f32 1.0, %v5382_v28  ;;  %v385_v47 = vadd.f32 %v10280_v43, %v10276_v52 }
 0x630   :  { %v5384_v30 = vpop.eup %5383  ;;  %5387 = vpow2.f32 %v4915_v62  ;;  %v4912_v27 = vmul.f32 -1.442695, %v3548_v9 }
 0x631   :  { %v8566_v39 = vpop.eup %5385  ;;  %5389 = vrcp.f32 %v8564_v25  ;;  %v8569_v1 = vadd.f32 1.0, %v5384_v30  ;;  %v3485_v58 = vpop.f32.mrf.mxu3  ;;  %v10281_v30 = vld [vmem:[#allocation159_spill] sm:$0xff]  ;;  %v3612_v0 = vand.u32 2147483648, %v8564_v25  ;;  %vm3606_vm10 = vweird.f32 %v8564_v25 }
 0x632   :  { %5391 = vpow2.f32 %v4912_v27  ;;  %v3486_v29 = vadd.f32 %v3485_v58, %v3471_v2  ;;  %v3587_v23 = vmul.f32 %v8566_v39, %v8557_v5  ;;  %v434_v35 = vadd.f32 %v10281_v30, %v10278_v22  ;;  %v10284_v2 = vld [vmem:[#allocation184_spill] sm:$0xff] }
 0x633   :  { %v3459_v55 = vpop.f32.mrf.mxu1  ;;  %5393 = vrcp.f32 %v8569_v1  ;;  %v8586_v27 = vadd.f32 %v10284_v2, %v9680_v4  ;;  %vm3592_vm2 = vweird.f32 %v8566_v39  ;;  %vm3651_vm14 = vweird.f32 %v8569_v1 }
 0x634   :  { %v3549_v28 = vadd.f32 %v3486_v29, %v432_v59  ;;  %v3460_v62 = vadd.f32 %v3459_v55, %v3445_v56  ;;  %v3588_v9 = vsub.f32 1.0, %v3587_v23  ;;  %v3595_v59 = vand.u32 2147483647, %v8557_v5  ;;  %v10285_v29 = vld [vmem:[#allocation76_spill] sm:$0xff]  ;;  %vm8617_vm1 = vmor %vm3591_vm12, %vm3592_vm2 }
 0x635   :  { %v8594_v23 = vadd.f32 %v10285_v29, %v10282_v53  ;;  %v3598_v5 = vor.u32 1.1754944e-38, %v3597_v48 }
 0x636   :  { %v5388_v58 = vpop.eup %5387  ;;  %v4913_v40 = vmul.f32 -1.442695, %v3549_v28  ;;  %v3552_v43 = vadd.f32 %v3460_v62, %v385_v47  ;;  %v3589_v52 = vmul.f32 %v8566_v39, %v3588_v9  ;;  %v3473_v47 = vpop.f32.mrf.mxu2  ;;  %vm8610_vm4 = vcmp.eq.f32.partialorder %v3595_v59, 8.507059e+37 }
 0x637   :  { %v8590_v56 = vpop.eup %5389  ;;  %v8596_v55 = vadd.f32 1.0, %v5388_v58  ;;  %v3610_v58 = vand.u32 2147483647, %v8564_v25 }
 0x638   :  { %v5392_v30 = vpop.eup %5391  ;;  %5395 = vpow2.f32 %v4913_v40  ;;  %v4916_v28 = vmul.f32 -1.442695, %v3552_v43  ;;  %v3590_v62 = vadd.f32 %v8566_v39, %v3589_v52  ;;  %v3602_v9 = vmul.f32 %v8590_v56, %v8564_v25  ;;  %v3499_v40 = vpop.f32.mrf.mxu0 }
 0x639   :  { %5397 = vrcp.f32 %v8596_v55  ;;  %v8604_v2 = vadd.f32 1.0, %v5392_v30  ;;  %v3487_v29 = vpop.f32.mrf.mxu3  ;;  %v8608_v53 = vpop.eup %5393  ;;  %vm8629_vm7 = vcmp.eq.f32.partialorder %v3610_v58, 8.507059e+37  ;;  %vm3607_vm3 = vweird.f32 %v8590_v56 }
 0x63a   :  { %5399 = vpow2.f32 %v4916_v28  ;;  %v3488_v43 = vadd.f32 %v3487_v29, %v3473_v47  ;;  %v3603_v52 = vsub.f32 1.0, %v3602_v9  ;;  %v3657_v28 = vand.u32 2147483648, %v8569_v1  ;;  %vm8663_vm15 = vmor %vm3606_vm10, %vm3607_vm3 }
 0x63b   :  { %5401 = vrcp.f32 %v8604_v2  ;;  %v3513_v7 = vpop.f32.mrf.mxu1  ;;  %v3594_v9 = vsel %vm8617_vm1, %v8566_v39, %v3590_v62  ;;  %v3627_v31 = vand.u32 2147483648, %v8604_v2  ;;  %v3647_v48 = vmul.f32 %v8608_v53, %v8569_v1 }
 0x63c   :  { %v3553_v47 = vadd.f32 %v3488_v43, %v434_v35  ;;  %v3514_v59 = vadd.f32 %v3513_v7, %v3499_v40  ;;  %v3604_v29 = vmul.f32 %v8590_v56, %v3603_v52  ;;  %v3655_v39 = vand.u32 2147483647, %v8569_v1 }
 0x63d   :  { %v3625_v40 = vand.u32 2147483647, %v8604_v2  ;;  %v3599_v58 = vsel %vm8610_vm4, %v3598_v5, %v3594_v9  ;;  %v8647_v57 = vor.u32 1.1754944e-38, %v3657_v28  ;;  %vm3621_vm8 = vweird.f32 %v8604_v2 }
 0x63e   :  { %v5396_v44 = vpop.eup %5395  ;;  %v4917_v35 = vmul.f32 -1.442695, %v3553_v47  ;;  %v3706_v7 = vadd.f32 %v3514_v59, %v6505_v49  ;;  %v3605_v52 = vadd.f32 %v8590_v56, %v3604_v29  ;;  %v3613_v59 = vor.u32 1.1754944e-38, %v3612_v0  ;;  %v3527_v28 = vpop.f32.mrf.mxu2 }
 0x63f   :  { %v8638_v62 = vpop.eup %5397  ;;  %v8641_v43 = vadd.f32 1.0, %v5396_v44  ;;  %v3628_v42 = vor.u32 1.1754944e-38, %v3627_v31  ;;  %v3648_v22 = vsub.f32 1.0, %v3647_v48  ;;  %vm8667_vm9 = vcmp.eq.f32.partialorder %v3625_v40, 8.507059e+37 }
 0x640   :  { %v5400_v30 = vpop.eup %5399  ;;  %5403 = vpow2.f32 %v4917_v35  ;;  %v3710_v47 = vmul.f32 %v3706_v7, %v3599_v58  ;;  %v3609_v7 = vsel %vm8663_vm15, %v8590_v56, %v3605_v52  ;;  %vm3652_vm5 = vweird.f32 %v8608_v53 }
 0x641   :  { %v8649_v61 = vpop.eup %5401  ;;  %5405 = vrcp.f32 %v8641_v43  ;;  %v3541_v44 = vpop.f32.mrf.mxu3  ;;  %v3642_v9 = vand.u32 2147483648, %v8641_v43  ;;  %v8656_v29 = vadd.f32 1.0, %v5400_v30  ;;  %vm8675_vm11 = vcmp.eq.f32.partialorder %v3655_v39, 8.507059e+37  ;;  %vm8707_vm2 = vmor %vm3651_vm14, %vm3652_vm5 }
 0x642   :  { %v3617_v5 = vmul.f32 %v8649_v61, %v8604_v2  ;;  %v3714_v0 = vadd.f32 %v3710_v47, %v8582_v60  ;;  %v3542_v35 = vadd.f32 %v3541_v44, %v3527_v28  ;;  %v3640_v40 = vand.u32 2147483647, %v8641_v43  ;;  %v3501_v47 = vpop.f32.mrf.mxu0 }
 0x643   :  { %v3515_v58 = vpop.f32.mrf.mxu1  ;;  %5407 = vrcp.f32 %v8656_v29  ;;  %vm3622_vm13 = vweird.f32 %v8649_v61  ;;  %v3662_v39 = vmul.f32 %v8638_v62, %v8596_v55  ;;  %vm3636_vm0 = vweird.f32 %v8641_v43 }
 0x644   :  { %v3618_v30 = vsub.f32 1.0, %v3617_v5  ;;  %v3707_v56 = vadd.f32 %v3542_v35, %v6500_v41  ;;  %v3516_v52 = vadd.f32 %v3515_v58, %v3501_v47  ;;  %v3643_v5 = vor.u32 1.1754944e-38, %v3642_v9  ;;  %vm8716_vm4 = vmor %vm3621_vm8, %vm3622_vm13 }
 0x645   :  { %v3614_v25 = vsel %vm8629_vm7, %v3613_v59, %v3609_v7  ;;  %v3649_v37 = vmul.f32 %v8608_v53, %v3648_v22  ;;  %v3685_v24 = vand.u32 2147483647, %v8656_v29  ;;  %v3687_v35 = vand.u32 2147483648, %v8656_v29 }
 0x646   :  { %v5404_v28 = vpop.eup %5403  ;;  %v3619_v31 = vmul.f32 %v8649_v61, %v3618_v30  ;;  %v3711_v47 = vmul.f32 %v3707_v56, %v3614_v25  ;;  %vm8698_vm6 = vcmp.eq.f32.partialorder %v3640_v40, 8.507059e+37  ;;  %5409 = vtanh.f32 %v3714_v0 }
 0x647   :  { %v5406_v44 = vpop.eup %5405  ;;  %v8694_v58 = vadd.f32 1.0, %v5404_v28  ;;  %v3650_v51 = vadd.f32 %v8608_v53, %v3649_v37  ;;  %vm3666_vm12 = vweird.f32 %v8596_v55  ;;  %vm3681_vm1 = vweird.f32 %v8656_v29 }
 0x648   :  { %v3620_v12 = vadd.f32 %v8649_v61, %v3619_v31  ;;  %v3632_v30 = vmul.f32 %v5406_v44, %v8641_v43  ;;  %v3708_v37 = vadd.f32 %v3516_v52, %v6505_v49  ;;  %v3663_v1 = vsub.f32 1.0, %v3662_v39 }
 0x649   :  { %5411 = vrcp.f32 %v8694_v58  ;;  %v5408_v9 = vpop.eup %5407  ;;  %v3715_v25 = vadd.f32 %v3711_v47, %v8586_v27  ;;  %v3654_v2 = vsel %vm8707_vm2, %v8608_v53, %v3650_v51  ;;  %vm3637_vm10 = vweird.f32 %v5406_v44  ;;  %v3529_v51 = vpop.f32.mrf.mxu2 }
 0x64a   :  { %v3633_v0 = vsub.f32 1.0, %v3632_v30  ;;  %v3624_v7 = vsel %vm8716_vm4, %v8649_v61, %v3620_v12  ;;  %v3677_v40 = vmul.f32 %v5408_v9, %v8656_v29  ;;  %vm8731_vm7 = vcmp.eq.f32.partialorder %v3685_v24, 8.507059e+37  ;;  %v3543_v61 = vpop.f32.mrf.mxu3  ;;  %vm3638_vm8 = vmor %vm3636_vm0, %vm3637_vm10 }
 0x64b   :  { %v3688_v52 = vor.u32 1.1754944e-38, %v3687_v35  ;;  %vm3682_vm3 = vweird.f32 %v5408_v9  ;;  %v3629_v28 = vsel %vm8667_vm9, %v3628_v42, %v3624_v7  ;;  %v3659_v12 = vsel %vm8675_vm11, %v8647_v57, %v3654_v2 }
 0x64c   :  { %v3634_v39 = vmul.f32 %v5406_v44, %v3633_v0  ;;  %v3678_v27 = vsub.f32 1.0, %v3677_v40  ;;  %v3722_v53 = vsub.f32 1.0, %v3629_v28  ;;  %5413 = vtanh.f32 %v3715_v25  ;;  %v5410_v47 = vpop.eup %5409  ;;  %vm3683_vm9 = vmor %vm3681_vm1, %vm3682_vm3 }
 0x64d   :  { %v3712_v31 = vmul.f32 %v3708_v37, %v3659_v12  ;;  %v3730_v30 = vmul.f32 %v3629_v28, %v8433_v50  ;;  %v3664_v35 = vmul.f32 %v8638_v62, %v3663_v1  ;;  %vm3667_vm14 = vweird.f32 %v8638_v62 }
 0x64e   :  { %v3635_v24 = vadd.f32 %v5406_v44, %v3634_v39  ;;  %v3679_v42 = vmul.f32 %v5408_v9, %v3678_v27  ;;  %v3726_v57 = vmul.f32 %v5410_v47, %v3722_v53  ;;  %v3544_v59 = vadd.f32 %v3543_v61, %v3529_v51  ;;  %vm8756_vm15 = vmor %vm3666_vm12, %vm3667_vm14 }
 0x64f   :  { %v5412_v48 = vpop.eup %5411  ;;  %v3716_v60 = vadd.f32 %v3712_v31, %v8594_v23  ;;  %v3702_v37 = vand.u32 2147483648, %v8694_v58  ;;  %v3665_v7 = vadd.f32 %v8638_v62, %v3664_v35  ;;  %v10309_v28 = vand.u32 2147483648, %v8596_v55 }
 0x650   :  { %v3692_v22 = vmul.f32 %v5412_v48, %v8694_v58  ;;  %v3639_v0 = vsel %vm3638_vm8, %v5406_v44, %v3635_v24  ;;  %v3680_v1 = vadd.f32 %v5408_v9, %v3679_v42  ;;  %v3734_v25 = vadd.f32 %v3730_v30, %v3726_v57 }
 0x651   :  { %v3644_v2 = vsel %vm8698_vm6, %v3643_v5, %v3639_v0  ;;  %5415 = vtanh.f32 %v3716_v60  ;;  %v3669_v38 = vsel %vm8756_vm15, %v8638_v62, %v3665_v7  ;;  %v10308_v5 = vand.u32 2147483647, %v8596_v55  ;;  %v10310_v62 = vld [vmem:[#allocation68_spill] sm:$0xff] }
 0x652   :  { %v3693_v43 = vsub.f32 1.0, %v3692_v22  ;;  %v3723_v44 = vsub.f32 1.0, %v3644_v2  ;;  %v5414_v40 = vpop.eup %5413  ;;  %vm3697_vm11 = vweird.f32 %v5412_v48  ;;  %v3684_v39 = vsel %vm3683_vm9, %v5408_v9, %v3680_v1 }
 0x653   :  { %vm3671_vm5 = vcmp.eq.f32.partialorder %v10308_v5, 8.507059e+37  ;;  %v3673_v12 = vor.u32 1.1754944e-38, %v10309_v28  ;;  %v3709_v61 = vadd.f32 %v3544_v59, %v6500_v41  ;;  %v3731_v53 = vmul.f32 %v3644_v2, %v8450_v16  ;;  %v10331_v28 = vld [vmem:[#allocation181_spill] sm:$0xff] }
 0x654   :  { %v3694_v27 = vmul.f32 %v5412_v48, %v3693_v43  ;;  %v3727_v29 = vmul.f32 %v5414_v40, %v3723_v44  ;;  %v3689_v31 = vsel %vm8731_vm7, %v3688_v52, %v3684_v39  ;;  %v532_v47 = vadd.f32 %v10310_v62, %v9680_v4 }
 0x655   :  { %v3700_v24 = vand.u32 2147483647, %v8694_v58  ;;  %v3724_v30 = vsub.f32 1.0, %v3689_v31  ;;  %v3674_v51 = vsel %vm3671_vm5, %v3673_v12, %v3669_v38  ;;  %vm3696_vm13 = vweird.f32 %v8694_v58  ;;  %v10332_v12 = vld [vmem:[#allocation54_spill] sm:$0xff] }
 0x656   :  { %v3695_v9 = vadd.f32 %v5412_v48, %v3694_v27  ;;  %v3735_v55 = vadd.f32 %v3731_v53, %v3727_v29  ;;  %v3713_v35 = vmul.f32 %v3709_v61, %v3674_v51  ;;  %vm3698_vm0 = vmor %vm3696_vm13, %vm3697_vm11  ;;  %v3703_v57 = vor.u32 1.1754944e-38, %v3702_v37  ;;  %v10333_v53 = vld [vmem:[#allocation58_spill] sm:$0xff] }
 0x657   :  { %v5416_v42 = vpop.eup %5415  ;;  %v3732_v56 = vmul.f32 %v3689_v31, %v8438_v33  ;;  %vm3701_vm6 = vcmp.eq.f32.partialorder %v3700_v24, 8.507059e+37  ;;  %vm10311_vm2 = vcmp.gt.s32.totalorder %v6586_v54, 6  ;;  %vm10312_vm12 = vcmp.gt.s32.totalorder %v6616_v34, 6 }
 0x658   :  { %v3728_v60 = vmul.f32 %v5416_v42, %v3724_v30  ;;  %v3699_v52 = vsel %vm3698_vm0, %v5412_v48, %v3695_v9  ;;  %v3717_v59 = vadd.f32 %v3713_v35, %v532_v47  ;;  %v8783_v7 = vsel %vm10311_vm2, %v3734_v25, %v8433_v50 }
 0x659   :  { %v3704_v0 = vsel %vm3701_vm6, %v3703_v57, %v3699_v52  ;;  %vm10313_vm4 = vcmp.gt.s32.totalorder %v6586_v54, 1  ;;  %vm10314_vm1 = vcmp.gt.s32.totalorder %v6616_v34, 1  ;;  %v339_v61 = vadd.f32 %v10332_v12, %v10331_v28 }
 0x65a   :  { %v3736_v22 = vadd.f32 %v3732_v56, %v3728_v60  ;;  %5417 = vtanh.f32 %v3717_v59  ;;  %v3725_v37 = vsub.f32 1.0, %v3704_v0  ;;  %v3733_v50 = vmul.f32 %v3704_v0, %v8455_v32  ;;  %v10334_v60 = vld [vmem:[#allocation59_spill] sm:$0xff]  ;;  %v10336_v0 = vld [vmem:[#allocation162_spill] sm:$0xff] }
 0x65b   :  { %v341_v56 = vadd.f32 %v10334_v60, %v10331_v28  ;;  %v10343_v28 = vld [vmem:[#allocation186_spill] sm:$0xff] }
 0x65c   :  { %v8788_v58 = vsel %vm10312_vm12, %v3736_v22, %v8438_v33  ;;  %v8800_v33 = vsel %vm10313_vm4, %v3735_v55, %v8450_v16  ;;  %v10329_v16 = vld [vmem:[#allocation178_spill] sm:$0xff]  ;;  %v10335_v22 = vld [vmem:[#allocation51_spill] sm:$0xff]  ;;  %v8872_v12 = vadd.f32 %v10343_v28, %v9680_v4 }
 0x65d   :  { %v3742_v1 = vpack.c.bf16 %v8788_v58, %v8783_v7  ;;  %v292_v31 = vadd.f32 %v10333_v53, %v10329_v16 }
 0x65f   :  { %3752 = vmatmul.bf16.vlgmr.msrb.gmra.mxu0 %v3742_v1  ;;  %3780 = vmatmul.bf16.vlgmr.msrb.gmra.mxu2 %v3742_v1 }
 0x660   :  { %v5418_v48 = vpop.eup %5417  ;;  %3856 = vmatpush.bf16.msrb.mxu0 %v9596_v15  ;;  %3884 = vmatpush.bf16.msrb.mxu2 %v6086_v6  ;;  %v10323_v15 = vld [vmem:[#allocation120_spill] sm:$0xff] }
 0x661   :  { %v3729_v2 = vmul.f32 %v5418_v48, %v3725_v37  ;;  %v388_v37 = vadd.f32 %v10336_v0, %v10335_v22 }
 0x663   :  { %v3737_v25 = vadd.f32 %v3733_v50, %v3729_v2 }
 0x664   :  { %3857 = vmatpush.bf16.msrb.mxu0 %v9598_v63  ;;  %3885 = vmatpush.bf16.msrb.mxu2 %v6100_v3  ;;  %v10316_v3 = vld [vmem:[#allocation142_spill] sm:$0xff] }
 0x665   :  { %v8805_v23 = vsel %vm10314_vm1, %v3737_v25, %v8455_v32  ;;  %v10325_v63 = vld [vmem:[#allocation106_spill] sm:$0xff]  ;;  %v10330_v32 = vld [vmem:[#allocation52_spill] sm:$0xff] }
 0x666   :  { %v3743_v6 = vpack.c.bf16 %v8805_v23, %v8800_v33  ;;  %v290_v43 = vadd.f32 %v10330_v32, %v10329_v16 }
 0x668   :  { %3766 = vmatmul.bf16.vlgmr.msrb.gmra.mxu1 %v3743_v6  ;;  %3794 = vmatmul.bf16.vlgmr.msrb.gmra.mxu3 %v3743_v6 }
 0x669   :  { %3870 = vmatpush.bf16.msrb.mxu1 %v9595_v17  ;;  %3898 = vmatpush.bf16.msrb.mxu3 %v6088_v10  ;;  %v10315_v10 = vld [vmem:[#allocation84_spill] sm:$0xff]  ;;  %v10321_v17 = vld [vmem:[#allocation86_spill] sm:$0xff] }
 0x66a   :  { %3858 = vmatpush.bf16.msrb.mxu0 %v9600_v8  ;;  %3886 = vmatpush.bf16.msrb.mxu2 %v6114_v36  ;;  %v10318_v36 = vld [vmem:[#allocation139_spill] sm:$0xff]  ;;  %v10327_v8 = vld [vmem:[#allocation124_spill] sm:$0xff] }
 0x66d   :  { %3871 = vmatpush.bf16.msrb.mxu1 %v9597_v26  ;;  %3899 = vmatpush.bf16.msrb.mxu3 %v6102_v21  ;;  %v10317_v21 = vld [vmem:[#allocation69_spill] sm:$0xff]  ;;  %v10324_v26 = vld [vmem:[#allocation150_spill] sm:$0xff] }
 0x66e   :  { %3859 = vmatpush.bf16.msrb.mxu0 %v9602_v18  ;;  %3887 = vmatpush.bf16.msrb.mxu2 %v6130_v45  ;;  %v10319_v45 = vld [vmem:[#allocation102_spill] sm:$0xff]  ;;  %v10328_v18 = vld [vmem:[#allocation151_spill] sm:$0xff] }
 0x66f   :  { %3808 = vmatmul.bf16.vlgmr.msra.gmra.mxu0 %v3742_v1  ;;  %3836 = vmatmul.bf16.vlgmr.msra.gmra.mxu2 %v3742_v1 }
 0x671   :  { %3872 = vmatpush.bf16.msrb.mxu1 %v9599_v19  ;;  %3900 = vmatpush.bf16.msrb.mxu3 %v6116_v14  ;;  %v10320_v14 = vld [vmem:[#allocation146_spill] sm:$0xff]  ;;  %v10326_v19 = vld [vmem:[#allocation147_spill] sm:$0xff] }
 0x672   :  { %3860 = vmatpush.bf16.msrb.mxu0 %v9604_v13  ;;  %3888 = vmatpush.bf16.msrb.mxu2 %v6142_v20  ;;  %v10322_v20 = vld [vmem:[#allocation143_spill] sm:$0xff] }
 0x675   :  { %3873 = vmatpush.bf16.msrb.mxu1 %v9710_v46  ;;  %3901 = vmatpush.bf16.msrb.mxu3 %v9711_v11 }
 0x676   :  { %3861 = vmatpush.bf16.msrb.mxu0 %v10315_v10  ;;  %3889 = vmatpush.bf16.msrb.mxu2 %v10316_v3  ;;  %v5113_v3 = vld [vmem:[#allocation7 + $0x38] sm:$0xff] }
 0x678   :  { %3822 = vmatmul.bf16.vlgmr.msra.gmra.mxu1 %v3743_v6  ;;  %3850 = vmatmul.bf16.vlgmr.msra.gmra.mxu3 %v3743_v6 }
 0x679   :  { %3874 = vmatpush.bf16.msrb.mxu1 %v10317_v21  ;;  %3902 = vmatpush.bf16.msrb.mxu3 %v10318_v36 }
 0x67a   :  { %3862 = vmatpush.bf16.msrb.mxu0 %v10319_v45  ;;  %3890 = vmatpush.bf16.msrb.mxu2 %v10320_v14 }
 0x67d   :  { %3875 = vmatpush.bf16.msrb.mxu1 %v10321_v17  ;;  %3903 = vmatpush.bf16.msrb.mxu3 %v10322_v20 }
 0x67e   :  { %3863 = vmatpush.bf16.msrb.mxu0 %v10323_v15  ;;  %3891 = vmatpush.bf16.msrb.mxu2 %v10324_v26  ;;  %v10337_v15 = vld [vmem:[#allocation182_spill] sm:$0xff]  ;;  %v10338_v26 = vld [vmem:[#allocation163_spill] sm:$0xff] }
 0x681   :  { %3876 = vmatpush.bf16.msrb.mxu1 %v10325_v63  ;;  %3904 = vmatpush.bf16.msrb.mxu3 %v10326_v19  ;;  %v437_v63 = vadd.f32 %v10338_v26, %v10337_v15 }
 0x682   :  { %3864 = vmatmul.bf16.vlgmr.msrb.gmra.mxu0 %v3742_v1  ;;  %3892 = vmatmul.bf16.vlgmr.msrb.gmra.mxu2 %v3742_v1 }
 0x683   :  { %4242 = vmatpush.bf16.msra.mxu0 %v5113_v3 }
 0x685   :  { %3877 = vmatpush.bf16.msrb.mxu1 %v10327_v8  ;;  %3905 = vmatpush.bf16.msrb.mxu3 %v10328_v18  ;;  %v10339_v18 = vld [vmem:[#allocation166_spill] sm:$0xff] }
 0x688   :  { %3878 = vmatmul.bf16.vlgmr.msrb.gmra.mxu1 %v3743_v6  ;;  %3906 = vmatmul.bf16.vlgmr.msrb.gmra.mxu3 %v3743_v6 }
 0x6dc   :  { %v3753_v13 = vpop.f32.mrf.mxu0 }
 0x6e2   :  { %v3781_v46 = vpop.f32.mrf.mxu2 }
 0x6e4   :  { %v3755_v38 = vpop.f32.mrf.mxu0 }
 0x6e5   :  { %v3767_v11 = vpop.f32.mrf.mxu1 }
 0x6e6   :  { %v3768_v44 = vadd.f32 %v3767_v11, %v3753_v13  ;;  %v390_v13 = vadd.f32 %v10339_v18, %v10335_v22  ;;  %v5112_v11 = vld [vmem:[#allocation7 + $0x30] sm:$0xff] }
 0x6e7   :  { %4243 = vmatpush.bf16.msra.mxu0 %v5112_v11 }
 0x6e8   :  { %v3912_v5 = vadd.f32 %v3768_v44, %v290_v43  ;;  %v10340_v44 = vld [vmem:[#allocation167_spill] sm:$0xff] }
 0x6ea   :  { %v4918_v40 = vmul.f32 -1.442695, %v3912_v5  ;;  %v3783_v24 = vpop.f32.mrf.mxu2  ;;  %v10341_v5 = vld [vmem:[#allocation77_spill] sm:$0xff] }
 0x6eb   :  { %v3795_v39 = vpop.f32.mrf.mxu3 }
 0x6ec   :  { %5419 = vpow2.f32 %v4918_v40  ;;  %v3796_v27 = vadd.f32 %v3795_v39, %v3781_v46  ;;  %v3809_v9 = vpop.f32.mrf.mxu0  ;;  %v10342_v40 = vld [vmem:[#allocation185_spill] sm:$0xff] }
 0x6ed   :  { %v3769_v29 = vpop.f32.mrf.mxu1  ;;  %v8868_v39 = vadd.f32 %v10342_v40, %v10341_v5 }
 0x6ee   :  { %v3913_v62 = vadd.f32 %v3796_v27, %v339_v61  ;;  %v3770_v47 = vadd.f32 %v3769_v29, %v3755_v38  ;;  %v439_v38 = vadd.f32 %v10340_v44, %v10337_v15  ;;  %v5121_v61 = vld [vmem:[#allocation7 + $0x78] sm:$0xff] }
 0x6ef   :  { %4256 = vmatpush.bf16.msra.mxu1 %v5121_v61  ;;  %v5110_v61 = vld [vmem:[#allocation7 + $0x20] sm:$0xff] }
 0x6f0   :  { %v4919_v30 = vmul.f32 -1.442695, %v3913_v62  ;;  %v3916_v51 = vadd.f32 %v3770_v47, %v292_v31 }
 0x6f2   :  { %v5420_v55 = vpop.eup %5419  ;;  %5421 = vpow2.f32 %v4919_v30  ;;  %v4922_v35 = vmul.f32 -1.442695, %v3916_v51  ;;  %v3837_v6 = vpop.f32.mrf.mxu2 }
 0x6f3   :  { %v8843_v42 = vadd.f32 1.0, %v5420_v55  ;;  %v3797_v57 = vpop.f32.mrf.mxu3  ;;  %v5111_v55 = vld [vmem:[#allocation7 + $0x28] sm:$0xff] }
 0x6f4   :  { %5423 = vpow2.f32 %v4922_v35  ;;  %v3798_v52 = vadd.f32 %v3797_v57, %v3783_v24  ;;  %v3811_v45 = vpop.f32.mrf.mxu0  ;;  %v10344_v24 = vld [vmem:[#allocation188_spill] sm:$0xff]  ;;  %4244 = vmatpush.bf16.msra.mxu0 %v5111_v55 }
 0x6f5   :  { %5425 = vrcp.f32 %v8843_v42  ;;  %v3823_v59 = vpop.f32.mrf.mxu1  ;;  %v3961_v62 = vand.u32 2147483647, %v8843_v42  ;;  %v8880_v30 = vadd.f32 %v10344_v24, %v10341_v5  ;;  %vm3957_vm7 = vweird.f32 %v8843_v42 }
 0x6f6   :  { %v3917_v1 = vadd.f32 %v3798_v52, %v341_v56  ;;  %v3824_v48 = vadd.f32 %v3823_v59, %v3809_v9  ;;  %v3963_v9 = vand.u32 2147483648, %v8843_v42 }
 0x6f7   :  { %vm8896_vm3 = vcmp.eq.f32.partialorder %v3961_v62, 8.507059e+37 }
 0x6f8   :  { %v5422_v2 = vpop.eup %5421  ;;  %v4923_v50 = vmul.f32 -1.442695, %v3917_v1  ;;  %v3914_v25 = vadd.f32 %v3824_v48, %v388_v37  ;;  %v5120_v37 = vld [vmem:[#allocation7 + $0x70] sm:$0xff]  ;;  %v3964_v3 = vor.u32 1.1754944e-38, %v3963_v9  ;;  %4245 = vmatpush.bf16.msra.mxu0 %v5110_v61 }
 0x6f9   :  { %v8850_v10 = vadd.f32 1.0, %v5422_v2  ;;  %4257 = vmatpush.bf16.msra.mxu1 %v5120_v37  ;;  %v5109_v37 = vld [vmem:[#allocation7 + $0x18] sm:$0xff] }
 0x6fa   :  { %v5424_v21 = vpop.eup %5423  ;;  %5427 = vpow2.f32 %v4923_v50  ;;  %v4920_v36 = vmul.f32 -1.442695, %v3914_v25  ;;  %v3839_v60 = vpop.f32.mrf.mxu2 }
 0x6fb   :  { %v8852_v14 = vpop.eup %5425  ;;  %5429 = vrcp.f32 %v8850_v10  ;;  %v8855_v17 = vadd.f32 1.0, %v5424_v21  ;;  %v3851_v20 = vpop.f32.mrf.mxu3  ;;  %v3976_v0 = vand.u32 2147483647, %v8850_v10  ;;  %v3978_v21 = vand.u32 2147483648, %v8850_v10 }
 0x6fc   :  { %5431 = vpow2.f32 %v4920_v36  ;;  %v3852_v19 = vadd.f32 %v3851_v20, %v3837_v6  ;;  %v3953_v8 = vmul.f32 %v8852_v14, %v8843_v42  ;;  %vm3958_vm10 = vweird.f32 %v8852_v14  ;;  %4246 = vmatpush.bf16.msra.mxu0 %v5109_v37 }
 0x6fd   :  { %v3825_v46 = vpop.f32.mrf.mxu1  ;;  %5433 = vrcp.f32 %v8855_v17  ;;  %vm8903_vm14 = vmor %vm3957_vm7, %vm3958_vm10  ;;  %v4023_v36 = vand.u32 2147483648, %v8855_v17  ;;  %vm3972_vm8 = vweird.f32 %v8850_v10  ;;  %vm8915_vm15 = vcmp.eq.f32.partialorder %v3976_v0, 8.507059e+37 }
 0x6fe   :  { %v3915_v16 = vadd.f32 %v3852_v19, %v437_v63  ;;  %v3826_v32 = vadd.f32 %v3825_v46, %v3811_v45  ;;  %v3954_v43 = vsub.f32 1.0, %v3953_v8  ;;  %vm4017_vm5 = vweird.f32 %v8855_v17 }
 0x6ff   :  { %v3865_v48 = vpop.f32.mrf.mxu0  ;;  %v3979_v40 = vor.u32 1.1754944e-38, %v3978_v21  ;;  %v8933_v28 = vor.u32 1.1754944e-38, %v4023_v36 }
 0x700   :  { %v5428_v27 = vpop.eup %5427  ;;  %v4921_v29 = vmul.f32 -1.442695, %v3915_v16  ;;  %v3918_v53 = vadd.f32 %v3826_v32, %v390_v13  ;;  %v3955_v31 = vmul.f32 %v8852_v14, %v3954_v43 }
 0x701   :  { %v8876_v47 = vpop.eup %5429  ;;  %v8882_v51 = vadd.f32 1.0, %v5428_v27 }
 0x702   :  { %v5432_v35 = vpop.eup %5431  ;;  %5435 = vpow2.f32 %v4921_v29  ;;  %v4924_v57 = vmul.f32 -1.442695, %v3918_v53  ;;  %v3956_v56 = vadd.f32 %v8852_v14, %v3955_v31  ;;  %v3968_v52 = vmul.f32 %v8876_v47, %v8850_v10 }
 0x703   :  { %5437 = vrcp.f32 %v8882_v51  ;;  %v8890_v59 = vadd.f32 1.0, %v5432_v35  ;;  %v3853_v22 = vpop.f32.mrf.mxu3  ;;  %v8894_v1 = vpop.eup %5433  ;;  %vm3973_vm9 = vweird.f32 %v8876_v47  ;;  %v4036_v0 = vand.u32 2147483647, %v8882_v51 }
 0x704   :  { %5439 = vpow2.f32 %v4924_v57  ;;  %v3854_v2 = vadd.f32 %v3853_v22, %v3839_v60  ;;  %v3969_v25 = vsub.f32 1.0, %v3968_v52  ;;  %v3960_v15 = vsel %vm8903_vm14, %v8852_v14, %v3956_v56  ;;  %vm8951_vm13 = vmor %vm3972_vm8, %vm3973_vm9  ;;  %v5119_v60 = vld [vmem:[#allocation7 + $0x68] sm:$0xff] }
 0x705   :  { %5441 = vrcp.f32 %v8890_v59  ;;  %v3879_v6 = vpop.f32.mrf.mxu1  ;;  %v3993_v63 = vand.u32 2147483648, %v8890_v59  ;;  %v4013_v8 = vmul.f32 %v8894_v1, %v8855_v17  ;;  %v4021_v14 = vand.u32 2147483647, %v8855_v17  ;;  %v3893_v35 = vpop.f32.mrf.mxu2  ;;  %4258 = vmatpush.bf16.msra.mxu1 %v5119_v60  ;;  %v5116_v60 = vld [vmem:[#allocation7 + $0x50] sm:$0xff] }
 0x706   :  { %v3919_v45 = vadd.f32 %v3854_v2, %v439_v38  ;;  %v3880_v20 = vadd.f32 %v3879_v6, %v3865_v48  ;;  %v3970_v26 = vmul.f32 %v8876_v47, %v3969_v25  ;;  %v3991_v16 = vand.u32 2147483647, %v8890_v59 }
 0x707   :  { %v3965_v43 = vsel %vm8896_vm3, %v3964_v3, %v3960_v15  ;;  %vm3987_vm11 = vweird.f32 %v8890_v59  ;;  %v8938_v29 = vor.u32 1.1754944e-38, %v3993_v63  ;;  %v4014_v31 = vsub.f32 1.0, %v4013_v8  ;;  %v3867_v50 = vpop.f32.mrf.mxu0 }
 0x708   :  { %v5436_v18 = vpop.eup %5435  ;;  %v4925_v13 = vmul.f32 -1.442695, %v3919_v45  ;;  %v4072_v46 = vadd.f32 %v3880_v20, %v6505_v49  ;;  %v3971_v44 = vadd.f32 %v8876_v47, %v3970_v26  ;;  %vm8955_vm0 = vcmp.eq.f32.partialorder %v3991_v16, 8.507059e+37  ;;  %v5108_v26 = vld [vmem:[#allocation7 + $0x10] sm:$0xff] }
 0x709   :  { %v8924_v11 = vpop.eup %5437  ;;  %v8927_v32 = vadd.f32 1.0, %v5436_v18  ;;  %vm4018_vm6 = vweird.f32 %v8894_v1  ;;  %vm8963_vm2 = vcmp.eq.f32.partialorder %v4021_v14, 8.507059e+37  ;;  %v4038_v25 = vand.u32 2147483648, %v8882_v51  ;;  %4247 = vmatpush.bf16.msra.mxu0 %v5108_v26 }
 0x70a   :  { %v5440_v38 = vpop.eup %5439  ;;  %5443 = vpow2.f32 %v4925_v13  ;;  %v4076_v5 = vmul.f32 %v4072_v46, %v3965_v43  ;;  %v4028_v3 = vmul.f32 %v8924_v11, %v8882_v51  ;;  %v4015_v15 = vmul.f32 %v8894_v1, %v4014_v31  ;;  %vm9000_vm10 = vmor %vm4017_vm5, %vm4018_vm6 }
 0x70b   :  { %v8935_v27 = vpop.eup %5441  ;;  %5445 = vrcp.f32 %v8927_v32  ;;  %v3907_v53 = vpop.f32.mrf.mxu3  ;;  %v4008_v24 = vand.u32 2147483648, %v8927_v32  ;;  %v8944_v9 = vadd.f32 1.0, %v5440_v38  ;;  %v4006_v2 = vand.u32 2147483647, %v8927_v32  ;;  %v5117_v38 = vld [vmem:[#allocation7 + $0x58] sm:$0xff] }
 0x70c   :  { %v3983_v62 = vmul.f32 %v8935_v27, %v8890_v59  ;;  %v4080_v55 = vadd.f32 %v4076_v5, %v8868_v39  ;;  %v3908_v52 = vadd.f32 %v3907_v53, %v3893_v35  ;;  %v3975_v39 = vsel %vm8951_vm13, %v8876_v47, %v3971_v44  ;;  %v5118_v47 = vld [vmem:[#allocation7 + $0x60] sm:$0xff]  ;;  %v10369_v5 = vld [vmem:[#allocation189_spill] sm:$0xff] }
 0x70d   :  { %v3881_v22 = vpop.f32.mrf.mxu1  ;;  %5447 = vrcp.f32 %v8944_v9  ;;  %vm3988_vm12 = vweird.f32 %v8935_v27  ;;  %vm4002_vm4 = vweird.f32 %v8927_v32  ;;  %v8977_v45 = vor.u32 1.1754944e-38, %v4008_v24  ;;  %4259 = vmatpush.bf16.msra.mxu1 %v5118_v47  ;;  %v5107_v24 = vld [vmem:[#allocation7 + $0x8] sm:$0xff] }
 0x70e   :  { %v3984_v48 = vsub.f32 1.0, %v3983_v62  ;;  %v4073_v6 = vadd.f32 %v3908_v52, %v6500_v41  ;;  %v3882_v42 = vadd.f32 %v3881_v22, %v3867_v50  ;;  %v3980_v20 = vsel %vm8915_vm15, %v3979_v40, %v3975_v39  ;;  %vm9009_vm3 = vmor %vm3987_vm11, %vm3988_vm12  ;;  %v3895_v50 = vpop.f32.mrf.mxu2  ;;  %4248 = vmatpush.bf16.msra.mxu0 %v5107_v24 }
 0x70f   :  { %v4051_v8 = vand.u32 2147483647, %v8944_v9  ;;  %v4053_v18 = vand.u32 2147483648, %v8944_v9  ;;  %vm8991_vm1 = vcmp.eq.f32.partialorder %v4006_v2, 8.507059e+37  ;;  %5449 = vtanh.f32 %v4080_v55 }
 0x710   :  { %v5444_v21 = vpop.eup %5443  ;;  %v3985_v36 = vmul.f32 %v8935_v27, %v3984_v48  ;;  %v4077_v46 = vmul.f32 %v4073_v6, %v3980_v20  ;;  %v4016_v43 = vadd.f32 %v8894_v1, %v4015_v15  ;;  %vm4032_vm7 = vweird.f32 %v8882_v51  ;;  %v5115_v15 = vld [vmem:[#allocation7 + $0x48] sm:$0xff] }
 0x711   :  { %v8982_v63 = vpop.eup %5445  ;;  %v8986_v13 = vadd.f32 1.0, %v5444_v21  ;;  %vm4047_vm14 = vweird.f32 %v8944_v9  ;;  %v4074_v17 = vadd.f32 %v3882_v42, %v6505_v49  ;;  %v4029_v40 = vsub.f32 1.0, %v4028_v3  ;;  %4260 = vmatpush.bf16.msra.mxu1 %v5117_v38  ;;  %v5114_v38 = vld [vmem:[#allocation7 + $0x40] sm:$0xff] }
 0x712   :  { %v3986_v14 = vadd.f32 %v8935_v27, %v3985_v36  ;;  %v3998_v16 = vmul.f32 %v8982_v63, %v8927_v32  ;;  %v4081_v59 = vadd.f32 %v4077_v46, %v8872_v12  ;;  %v4020_v62 = vsel %vm9000_vm10, %v8894_v1, %v4016_v43 }
 0x713   :  { %5451 = vrcp.f32 %v8986_v13  ;;  %v9016_v61 = vpop.eup %5447  ;;  %vm4003_vm8 = vweird.f32 %v8982_v63  ;;  %vm9028_vm15 = vcmp.eq.f32.partialorder %v4051_v8, 8.507059e+37  ;;  %v4054_v35 = vor.u32 1.1754944e-38, %v4053_v18  ;;  %v3909_v57 = vpop.f32.mrf.mxu3 }
 0x714   :  { %v3999_v53 = vsub.f32 1.0, %v3998_v16  ;;  %v3990_v31 = vsel %vm9009_vm3, %v8935_v27, %v3986_v14  ;;  %v4043_v49 = vmul.f32 %v9016_v61, %v8944_v9  ;;  %vm4048_vm9 = vweird.f32 %v9016_v61  ;;  %vm4004_vm11 = vmor %vm4002_vm4, %vm4003_vm8 }
 0x715   :  { %v3995_v12 = vsel %vm8955_vm0, %v8938_v29, %v3990_v31  ;;  %v4025_v1 = vsel %vm8963_vm2, %v8933_v28, %v4020_v62  ;;  %5453 = vtanh.f32 %v4081_v59  ;;  %v5450_v37 = vpop.eup %5449  ;;  %v4030_v56 = vmul.f32 %v8924_v11, %v4029_v40  ;;  %v5106_v29 = vld [vmem:[#allocation7] sm:$0xff]  ;;  %4261 = vmatpush.bf16.msra.mxu1 %v5116_v60  ;;  %vm4049_vm0 = vmor %vm4047_vm14, %vm4048_vm9 }
 0x716   :  { %v4000_v27 = vmul.f32 %v8982_v63, %v3999_v53  ;;  %v4044_v52 = vsub.f32 1.0, %v4043_v49  ;;  %v4088_v39 = vsub.f32 1.0, %v3995_v12  ;;  %v4078_v22 = vmul.f32 %v4074_v17, %v4025_v1  ;;  %4249 = vmatpush.bf16.msra.mxu0 %v5106_v29 }
 0x717   :  { %v4096_v2 = vmul.f32 %v3995_v12, %v8783_v7  ;;  %vm4033_vm5 = vweird.f32 %v8924_v11  ;;  %v3910_v42 = vadd.f32 %v3909_v57, %v3895_v50  ;;  %v4068_v21 = vand.u32 2147483648, %v8986_v13 }
 0x718   :  { %v4001_v48 = vadd.f32 %v8982_v63, %v4000_v27  ;;  %v4045_v10 = vmul.f32 %v9016_v61, %v4044_v52  ;;  %v4092_v47 = vmul.f32 %v5450_v37, %v4088_v39  ;;  %v4082_v6 = vadd.f32 %v4078_v22, %v8880_v30  ;;  %vm9062_vm13 = vmor %vm4032_vm7, %vm4033_vm5 }
 0x719   :  { %v5452_v28 = vpop.eup %5451  ;;  %v4031_v20 = vadd.f32 %v8924_v11, %v4030_v56  ;;  %vm9075_vm6 = vcmp.eq.f32.partialorder %v4036_v0, 8.507059e+37  ;;  %v4039_v9 = vor.u32 1.1754944e-38, %v4038_v25  ;;  %v4075_v19 = vadd.f32 %v3910_v42, %v6500_v41  ;;  %4262 = vmatpush.bf16.msra.mxu1 %v5115_v15 }
 0x71a   :  { %v4058_v3 = vmul.f32 %v5452_v28, %v8986_v13  ;;  %v4005_v36 = vsel %vm4004_vm11, %v8982_v63, %v4001_v48  ;;  %v4046_v26 = vadd.f32 %v9016_v61, %v4045_v10  ;;  %v4100_v32 = vadd.f32 %v4096_v2, %v4092_v47 }
 0x71b   :  { %v4010_v8 = vsel %vm8991_vm1, %v8977_v45, %v4005_v36  ;;  %5455 = vtanh.f32 %v4082_v6  ;;  %v4035_v45 = vsel %vm9062_vm13, %v8924_v11, %v4031_v20  ;;  %v5454_v14 = vpop.eup %5453  ;;  %vm4063_vm2 = vweird.f32 %v5452_v28 }
 0x71c   :  { %v4059_v63 = vsub.f32 1.0, %v4058_v3  ;;  %v4089_v18 = vsub.f32 1.0, %v4010_v8  ;;  %v4050_v16 = vsel %vm4049_vm0, %v9016_v61, %v4046_v26  ;;  %v4097_v11 = vmul.f32 %v4010_v8, %v8800_v33 }
 0x71d   :  { %v4055_v0 = vsel %vm9028_vm15, %v4054_v35, %v4050_v16  ;;  %v537_v17 = vadd.f32 %v10369_v5, %v9680_v4  ;;  %v4066_v40 = vand.u32 2147483647, %v8986_v13  ;;  %v4040_v51 = vsel %vm9075_vm6, %v4039_v9, %v4035_v45  ;;  %4263 = vmatpush.bf16.msra.mxu1 %v5114_v38 }
 0x71e   :  { %v4060_v43 = vmul.f32 %v5452_v28, %v4059_v63  ;;  %v4093_v44 = vmul.f32 %v5454_v14, %v4089_v18  ;;  %v4090_v61 = vsub.f32 1.0, %v4055_v0  ;;  %vm4062_vm12 = vweird.f32 %v8986_v13 }
 0x71f   :  { %v4079_v53 = vmul.f32 %v4075_v19, %v4040_v51  ;;  %vm4064_vm4 = vmor %vm4062_vm12, %vm4063_vm2  ;;  %v4069_v59 = vor.u32 1.1754944e-38, %v4068_v21  ;;  %v4098_v24 = vmul.f32 %v4055_v0, %v8788_v58  ;;  %vm4067_vm1 = vcmp.eq.f32.partialorder %v4066_v40, 8.507059e+37 }
 0x720   :  { %v4061_v25 = vadd.f32 %v5452_v28, %v4060_v43  ;;  %v4101_v41 = vadd.f32 %v4097_v11, %v4093_v44  ;;  %vm10370_vm10 = vcmp.gt.s32.totalorder %v6586_v54, 7  ;;  %vm10371_vm7 = vcmp.gt.s32.totalorder %v6616_v34, 7 }
 0x721   :  { %v5456_v31 = vpop.eup %5455  ;;  %v4083_v4 = vadd.f32 %v4079_v53, %v537_v17  ;;  %v4104_v13 = vsel %vm10370_vm10, %v4100_v32, %v8783_v7  ;;  %vm10372_vm3 = vcmp.gt.s32.totalorder %v6586_v54, 0  ;;  %vm10373_vm14 = vcmp.gt.s32.totalorder %v6616_v34, 0 }
 0x722   :  { %v4094_v62 = vmul.f32 %v5456_v31, %v4090_v61  ;;  %v4065_v49 = vsel %vm4064_vm4, %v5452_v28, %v4061_v25  ;;  %v4105_v22 = vsel %vm10372_vm3, %v4101_v41, %v8800_v33 }
 0x723   :  { %v4070_v35 = vsel %vm4067_vm1, %v4069_v59, %v4065_v49  ;;  %5457 = vtanh.f32 %v4083_v4 }
 0x724   :  { %v4102_v55 = vadd.f32 %v4098_v24, %v4094_v62  ;;  %v4091_v12 = vsub.f32 1.0, %v4070_v35  ;;  %v4099_v52 = vmul.f32 %v4070_v35, %v8805_v23 }
 0x726   :  { %v4106_v27 = vsel %vm10371_vm7, %v4102_v55, %v8788_v58  ;;  %v5138_v58 = vld [vmem:[%s9120_s7] ss:$0 sm:$0xff]  ;;  %s5578_s7 = smov [#allocation8]  }
 0x727   :  { %v4108_v1 = vpack.c.bf16 %v4106_v27, %v4104_v13  ;;  %s4298_s22 = sshll.u32 %s5578_s7, 4  ;;  %s4299_s22 = int_to_ptr.vmem [resolvable:$true] %s4298_s22 }
 0x729   :  { %4250 = vmatmul.bf16.vlgmr.msra.gmra.mxu0 %v4108_v1  ;;  %v5458_v57 = vpop.eup %5457 }
 0x72a   :  { %v4095_v60 = vmul.f32 %v5458_v57, %v4091_v12 }
 0x72c   :  { %v4103_v39 = vadd.f32 %v4099_v52, %v4095_v60 }
 0x72e   :  { %v4107_v7 = vsel %vm10373_vm14, %v4103_v39, %v8805_v23 }
 0x72f   :  { %v4109_v37 = vpack.c.bf16 %v4107_v7, %v4105_v22 }
 0x731   :  { %4264 = vmatmul.bf16.vlgmr.msra.gmra.mxu1 %v4109_v37 }
 0x7a6   :  { %v4251_v48 = vpop.f32.mrf.mxu0 }
 0x7a7   :  { %v4252_v2 = vadd.f32 %v5138_v58, %v4251_v48 }
 0x7ae   :  { %v4265_v50 = vpop.f32.mrf.mxu1  ;;  %v4253_v29 = vpop.f32.mrf.mxu0 }
 0x7af   :  { %v4266_v56 = vadd.f32 %v4265_v50, %v4252_v2  ;;  %v4254_v28 = vadd.f32 %v5138_v58, %v4253_v29 }
 0x7b1   :  { %4270 = vmax.xlane.f32.xlu1 %v4266_v56 }
 0x7b6   :  { %v4267_v10 = vpop.f32.mrf.mxu1 }
 0x7b7   :  { %v4268_v54 = vadd.f32 %v4267_v10, %v4254_v28 }
 0x7b9   :  { %4272 = vmax.xlane.f32.xlu1 %v4268_v54 }
 0x824   :  { %v4271_v33 = vpop.xlane.xlu1 %4270 }
 0x825   :  { %v4274_v47 = vsub.f32 %v4266_v56, %v4271_v33 }
 0x827   :  { %v4276_v34 = vmul.f32 1.442695, %v4274_v47 }
 0x829   :  { %5459 = vpow2.f32 %v4276_v34 }
 0x82c   :  { %v4273_v23 = vpop.xlane.xlu1 %4272 }
 0x82d   :  { %v4275_v6 = vsub.f32 %v4268_v54, %v4273_v23 }
 0x82f   :  { %v5460_v42 = vpop.eup %5459  ;;  %v4278_v3 = vmul.f32 1.442695, %v4275_v6 }
 0x830   :  { %4280 = vadd.xlane.f32.xlu2 %v5460_v42 }
 0x831   :  { %5461 = vpow2.f32 %v4278_v3 }
 0x837   :  { %v5462_v21 = vpop.eup %5461 }
 0x838   :  { %4282 = vadd.xlane.f32.xlu2 %v5462_v21 }
 0x8a3   :  { %v4281_v36 = vpop.xlane.xlu2 %4280 }
 0x8a4   :  { %5463 = vlog2.f32 %v4281_v36 }
 0x8aa   :  { %v5464_v20 = vpop.eup %5463 }
 0x8ab   :  { %v4285_v15 = vmul.f32 0.6931472, %v5464_v20  ;;  %v4283_v26 = vpop.xlane.xlu2 %4282 }
 0x8ac   :  { %5465 = vlog2.f32 %v4283_v26 }
 0x8ad   :  { %v4288_v32 = vadd.f32 %v4285_v15, %v4271_v33 }
 0x8af   :  { %v4290_v8 = vsub.f32 %v4266_v56, %v4288_v32 }
 0x8b1   :  { %4292 = vst [vmem:[#allocation8] sm:$0xff] %v4290_v8 }
 0x8b2   :  { %v5466_v30 = vpop.eup %5465 }
 0x8b3   :  { %v4287_v63 = vmul.f32 0.6931472, %v5466_v30 }
 0x8b5   :  { %v4289_v18 = vadd.f32 %v4287_v63, %v4273_v23 }
 0x8b7   :  { %v4291_v45 = vsub.f32 %v4268_v54, %v4289_v18 }
 0x8b9   :  { %4293 = vst [vmem:[#allocation8 + $0x8] sm:$0xff] %v4291_v45 }
 0x8ba   :  { %4306 = dma.vmem_to_hbm [thread:$0]  %s4299_s22, 256, %s4301_s23, [#allocation4], %s5579_s24, %s5579_s24, %s5580_s25  }
 0x8bb   :  { %5568 = dma.done.wait [#allocation4], 256  }
 0x8bc   :  { %5569 = vsyncadd [#allocation4], 4294967040 }
 0x8bd   :  { %4311 = vsyncpa [#allocation3], 1 }
 0x8be   :  { %4312 = vsyncpa [#allocation6], 1 }
 0x8bf   :  { %4313 = vsyncpa [#allocation4], 1 }

</bundles_post_ra>
